<compile_context>
chip_gen: v6e
topology: v6e:2x2x1
jax: 0.10.0
libtpu: 0.0.40
codegen_flags: <defaults>
</compile_context>

<pallas_src>
import functools

import jax
import jax.numpy as jnp
import numpy as np
from jax.experimental import pallas as pl
from jax.experimental.pallas import tpu as pltpu

CODE_SIZE = 100
BN_EPS = 1e-5
NEG_INF = float("-inf")
VMEM_LIMIT = 32 * 1024 * 1024  # explicit scoped-VMEM cap (v5e default is only 16 MiB)


# --------------------------------------------------------------------------
# small helpers
# --------------------------------------------------------------------------
def _const_spec(shape):
    """Full-array block, identical for every (b, t) grid step -> stays VMEM-resident."""
    zeros = (0,) * len(shape)
    return pl.BlockSpec(shape, lambda b, t: zeros)


def _mm(h, w_ref):
    """MXU matmul, f32 accumulation; activation cast to the weight dtype (bf16/f32)."""
    return jnp.dot(h.astype(w_ref.dtype), w_ref[...],
                   preferred_element_type=jnp.float32)


# --------------------------------------------------------------------------
# Pallas kernels
# --------------------------------------------------------------------------
def _stn_kernel(x_ref,
                c1w, c1s, c1t, c2w, c2s, c2t, c3w, c3s, c3t,
                f1w, f1s, f1t, f2w, f2s, f2t, f3w, f3b,
                out_ref, gmax_ref, *, n_points, tn):
    """Fused STN3d: conv chain + running max over point tiles + fc tail -> (1,1,9)."""
    t = pl.program_id(1)

    @pl.when(t == 0)
    def _init():
        gmax_ref[...] = jnp.full_like(gmax_ref, NEG_INF)

    h = _mm(x_ref[0], c1w)                                   # (tn, 64)
    h = jnp.maximum(h * c1s[...] + c1t[...], 0.0)
    h = _mm(h, c2w)                                          # (tn, 128)
    h = jnp.maximum(h * c2s[...] + c2t[...], 0.0)
    h = _mm(h, c3w)                                          # (tn, 1024)
    h = jnp.maximum(h * c3s[...] + c3t[...], 0.0)

    # Mask rows past num_points (non-divisible point tiling) before the running max.
    row = t * tn + jax.lax.broadcasted_iota(jnp.int32, (tn, 1), 0)
    h = jnp.where(row < n_points, h, NEG_INF)
    gmax_ref[...] = jnp.maximum(gmax_ref[...], jnp.max(h, axis=0, keepdims=True))

    @pl.when(t == pl.num_programs(1) - 1)
    def _finish():
        g = gmax_ref[...]                                    # (1, 1024)
        g = _mm(g, f1w)
        g = jnp.maximum(g * f1s[...] + f1t[...], 0.0)
        g = _mm(g, f2w)
        g = jnp.maximum(g * f2s[...] + f2t[...], 0.0)
        g = _mm(g, f3w) + f3b[...]                           # (1, 9)
        out_ref[...] = g[None].astype(out_ref.dtype)


def _enc_kernel(x_ref, w1_ref,
                e1s, e1t, e2w, e2s, e2t, e3w, e3s, e3t,
                f1w, f1b, f2w, f2b, d1w, d1b, d2w, d2b,
                out_ref, gmax_ref, *, n_points, tn):
    """Fused encoder trunk (STN transform folded into the per-batch first-layer
    weight), global max, fc1/fc2 bottleneck and decoder fc1/fc2 -> (1,1,1024)."""
    t = pl.program_id(1)

    @pl.when(t == 0)
    def _init():
        gmax_ref[...] = jnp.full_like(gmax_ref, NEG_INF)

    w1 = w1_ref[0]                                           # (3, 64), per batch
    h = jnp.dot(x_ref[0].astype(w1.dtype), w1, preferred_element_type=jnp.float32)
    h = jnp.maximum(h * e1s[...] + e1t[...], 0.0)
    h = _mm(h, e2w)
    h = jnp.maximum(h * e2s[...] + e2t[...], 0.0)
    h = _mm(h, e3w)
    h = h * e3s[...] + e3t[...]                              # BN only, no ReLU

    row = t * tn + jax.lax.broadcasted_iota(jnp.int32, (tn, 1), 0)
    h = jnp.where(row < n_points, h, NEG_INF)
    gmax_ref[...] = jnp.maximum(gmax_ref[...], jnp.max(h, axis=0, keepdims=True))

    @pl.when(t == pl.num_programs(1) - 1)
    def _finish():
        g = gmax_ref[...]                                    # (1, 1024) global feature
        g = jnp.maximum(_mm(g, f1w) + f1b[...], 0.0)         # fc1 + ReLU
        g = _mm(g, f2w) + f2b[...]                           # fc2 -> code (1, 100)
        g = jnp.maximum(_mm(g, d1w) + d1b[...], 0.0)         # decoder fc1 + ReLU
        g = jnp.maximum(_mm(g, d2w) + d2b[...], 0.0)         # decoder fc2 + ReLU
        out_ref[...] = g[None].astype(out_ref.dtype)


def _dec_out_kernel(h_ref, w_ref, b_ref, o_ref):
    """Decoder output layer: (B,1024) @ (1024, tcol) + bias, column-tiled."""
    o_ref[...] = (_mm(h_ref[...], w_ref) + b_ref[...]).astype(o_ref.dtype)


# --------------------------------------------------------------------------
# pallas_call wrappers
# --------------------------------------------------------------------------
def _stn3d(p, x, *, tn):
    """x: (B, N, 3) -> trans: (B, 3, 3)."""
    B, N, _ = x.shape
    nt = pl.cdiv(N, tn)
    c1w, c1s, c1t = p["stn_c1"]
    c2w, c2s, c2t = p["stn_c2"]
    c3w, c3s, c3t = p["stn_c3"]
    f1w, f1s, f1t = p["stn_f1"]
    f2w, f2s, f2t = p["stn_f2"]
    f3w, f3b = p["stn_f3"]
    consts = [c1w, c1s, c1t, c2w, c2s, c2t, c3w, c3s, c3t,
              f1w, f1s, f1t, f2w, f2s, f2t, f3w, f3b]
    out = pl.pallas_call(
        functools.partial(_stn_kernel, n_points=N, tn=tn),
        out_shape=jax.ShapeDtypeStruct((B, 1, 9), jnp.float32),
        grid=(B, nt),
        in_specs=[pl.BlockSpec((1, tn, 3), lambda b, t: (b, t, 0))]
                 + [_const_spec(a.shape) for a in consts],
        out_specs=pl.BlockSpec((1, 1, 9), lambda b, t: (b, 0, 0)),
        scratch_shapes=[pltpu.VMEM((1, 1024), jnp.float32)],
        compiler_params=pltpu.CompilerParams(
            dimension_semantics=("parallel", "arbitrary"),
            vmem_limit_bytes=VMEM_LIMIT),
    )(x, *consts)
    return out.reshape(B, 3, 3) + jnp.eye(3, dtype=jnp.float32)[None]


def _encoder_decoder_hidden(p, x, w1eff, *, tn):
    """x: (B, N, 3), w1eff: (B, 3, 64) -> decoder hidden after dec_f2: (B, 1024)."""
    B, N, _ = x.shape
    nt = pl.cdiv(N, tn)
    _, e1s, e1t = p["enc_c1"]
    e2w, e2s, e2t = p["enc_c2"]
    e3w, e3s, e3t = p["enc_c3"]
    f1w, f1b = p["fc1"]
    f2w, f2b = p["fc2"]
    d1w, d1b = p["dec_f1"]
    d2w, d2b = p["dec_f2"]
    consts = [e1s, e1t, e2w, e2s, e2t, e3w, e3s, e3t,
              f1w, f1b, f2w, f2b, d1w, d1b, d2w, d2b]
    out = pl.pallas_call(
        functools.partial(_enc_kernel, n_points=N, tn=tn),
        out_shape=jax.ShapeDtypeStruct((B, 1, 1024), jnp.float32),
        grid=(B, nt),
        in_specs=[pl.BlockSpec((1, tn, 3), lambda b, t: (b, t, 0)),
                  pl.BlockSpec((1, 3, 64), lambda b, t: (b, 0, 0))]
                 + [_const_spec(a.shape) for a in consts],
        out_specs=pl.BlockSpec((1, 1, 1024), lambda b, t: (b, 0, 0)),
        scratch_shapes=[pltpu.VMEM((1, 1024), jnp.float32)],
        compiler_params=pltpu.CompilerParams(
            dimension_semantics=("parallel", "arbitrary"),
            vmem_limit_bytes=VMEM_LIMIT),
    )(x, w1eff, *consts)
    return out.reshape(B, 1024)


def _decoder_output(hid, w, b, *, tcol):
    """hid: (B, 1024), w: (1024, OUT), b: (1, OUT) -> (B, OUT), column-tiled."""
    B, K = hid.shape
    OUT = w.shape[1]
    grid = (pl.cdiv(OUT, tcol),)
    return pl.pallas_call(
        _dec_out_kernel,
        out_shape=jax.ShapeDtypeStruct((B, OUT), jnp.float32),
        grid=grid,
        in_specs=[
            pl.BlockSpec((B, K), lambda j: (0, 0)),
            pl.BlockSpec((K, tcol), lambda j: (0, j)),
            pl.BlockSpec((1, tcol), lambda j: (0, j)),
        ],
        out_specs=pl.BlockSpec((B, tcol), lambda j: (0, j)),
        compiler_params=pltpu.CompilerParams(
            dimension_semantics=("parallel",),
            vmem_limit_bytes=VMEM_LIMIT),
    )(hid, w, b)


# --------------------------------------------------------------------------
# Parameter construction (deterministic, PyTorch-default-style init)
# --------------------------------------------------------------------------
def _init_linear(key, fan_in, fan_out):
    kw, kb = jax.random.split(key)
    bound = 1.0 / np.sqrt(fan_in)
    w = jax.random.uniform(kw, (fan_in, fan_out), jnp.float32, -bound, bound)
    b = jax.random.uniform(kb, (fan_out,), jnp.float32, -bound, bound)
    return w, b


def _layer_bn(key, cin, cout, dtype=jnp.float32):
    """Conv1d/Linear bias + eval-mode BatchNorm folded into (w, scale, shift)."""
    w, b = _init_linear(key, cin, cout)
    gamma = jnp.ones((cout,), jnp.float32)
    beta = jnp.zeros((cout,), jnp.float32)
    mean = jnp.zeros((cout,), jnp.float32)
    var = jnp.ones((cout,), jnp.float32)
    s = gamma / jnp.sqrt(var + BN_EPS)
    t = (b - mean) * s + beta
    return w.astype(dtype), s.reshape(1, cout), t.reshape(1, cout)


def _layer_plain(key, cin, cout, dtype=jnp.float32):
    w, b = _init_linear(key, cin, cout)
    return w.astype(dtype), b.reshape(1, cout)


def make_params(key, num_points, code_size=CODE_SIZE):
    keys = iter(jax.random.split(key, 20))
    bf16 = jnp.bfloat16
    p = {}
    # --- STN3d (input transform) ---
    p["stn_c1"] = _layer_bn(next(keys), 3, 64, bf16)
    p["stn_c2"] = _layer_bn(next(keys), 64, 128, bf16)
    p["stn_c3"] = _layer_bn(next(keys), 128, 1024, bf16)
    p["stn_f1"] = _layer_bn(next(keys), 1024, 512)       # tiny-M fc layers kept f32
    p["stn_f2"] = _layer_bn(next(keys), 512, 256)
    p["stn_f3"] = _layer_plain(next(keys), 256, 9)
    # --- PointNetfeat trunk ---
    p["enc_c1"] = _layer_bn(next(keys), 3, 64, bf16)
    p["enc_c2"] = _layer_bn(next(keys), 64, 128, bf16)
    p["enc_c3"] = _layer_bn(next(keys), 128, 1024, bf16)
    # --- bottleneck fc1/fc2 ---
    hid = int(code_size * 2 / 3)                         # 66
    p["fc1"] = _layer_plain(next(keys), 1024, hid)
    p["fc2"] = _layer_plain(next(keys), hid, code_size)
    # --- Decoder ---
    p["dec_f1"] = _layer_plain(next(keys), code_size, 512)
    p["dec_f2"] = _layer_plain(next(keys), 512, 1024)
    # dec_f3: columns pre-permuted so the (B, N*3) kernel output reshapes directly
    # to (B, N, 3) -- equivalent to view(B, 3, N).permute(0, 2, 1) in PyTorch.
    w3, b3 = _init_linear(next(keys), 1024, num_points * 3)
    w3 = w3.reshape(1024, 3, num_points).transpose(0, 2, 1).reshape(1024, num_points * 3)
    b3 = jnp.transpose(b3.reshape(3, num_points)).reshape(num_points * 3)
    p["dec_f3"] = (w3.astype(bf16), b3.reshape(1, num_points * 3))
    return p


# --------------------------------------------------------------------------
# Forward pass
# --------------------------------------------------------------------------
def pointnet_autoencoder_forward(params, x, *, point_tile=512):
    """x: (B, num_points, 3) -> (decoded (B, num_points, 3), trans (B, 3, 3))."""
    B, N, dim = x.shape
    assert dim == 3, "Fail: expecting 3 (x-y-z) as last tensor dimension!"
    tn = min(point_tile, N)

    # ---- STN3d input transform (one fused kernel) ----
    trans = _stn3d(params, x, tn=tn)                           # (B, 3, 3)

    # Fold torch.bmm(x, trans) into the first encoder conv:
    #   (x @ trans) @ W1 == x @ (trans @ W1)   -> per-batch (3, 64) effective weight.
    w1, _, _ = params["enc_c1"]
    w1eff = jnp.einsum("bij,jk->bik", trans,
                       w1.astype(jnp.float32)).astype(w1.dtype)

    # ---- fused encoder trunk + max + bottleneck + decoder fc1/fc2 ----
    hid = _encoder_decoder_hidden(params, x, w1eff, tn=tn)     # (B, 1024)

    # ---- decoder output layer (column-tiled; no transpose needed) ----
    w3, b3 = params["dec_f3"]
    out_cols = w3.shape[1]
    tcol = out_cols if out_cols <= 1536 else 1536
    d = _decoder_output(hid, w3, b3, tcol=tcol)                # (B, N*3)
    decoded = d.reshape(B, N, 3)
    return decoded, trans


# --------------------------------------------------------------------------
if __name__ == "__main__":
    key = jax.random.PRNGKey(0)
    k_params, k_x = jax.random.split(key)

    B, N = 2, 128  # small shapes: batch=2, num_points=128, xyz=3
    params = make_params(k_params, num_points=N)
    x = jax.random.normal(k_x, (B, N, 3), dtype=jnp.float32)

    fwd = jax.jit(pointnet_autoencoder_forward)
    decoded, trans = fwd(params, x)
    jax.block_until_ready((decoded, trans))

    assert decoded.shape == (B, N, 3), decoded.shape
    assert trans.shape == (B, 3, 3), trans.shape
    assert decoded.dtype == jnp.float32 and trans.dtype == jnp.float32
    assert bool(jnp.all(jnp.isfinite(decoded))) and bool(jnp.all(jnp.isfinite(trans)))

    print("KERNEL_OK")
</pallas_src>

<mosaic_0001>
module attributes {stable_mosaic.version = 11 : i64} {
  func.func @_stn_kernel(%arg0: i32, %arg1: i32, %arg2: memref<1x128x3xf32, #tpu.memory_space<vmem>>, %arg3: memref<3x64xbf16, #tpu.memory_space<vmem>>, %arg4: memref<1x64xf32, #tpu.memory_space<vmem>>, %arg5: memref<1x64xf32, #tpu.memory_space<vmem>>, %arg6: memref<64x128xbf16, #tpu.memory_space<vmem>>, %arg7: memref<1x128xf32, #tpu.memory_space<vmem>>, %arg8: memref<1x128xf32, #tpu.memory_space<vmem>>, %arg9: memref<128x1024xbf16, #tpu.memory_space<vmem>>, %arg10: memref<1x1024xf32, #tpu.memory_space<vmem>>, %arg11: memref<1x1024xf32, #tpu.memory_space<vmem>>, %arg12: memref<1024x512xf32, #tpu.memory_space<vmem>>, %arg13: memref<1x512xf32, #tpu.memory_space<vmem>>, %arg14: memref<1x512xf32, #tpu.memory_space<vmem>>, %arg15: memref<512x256xf32, #tpu.memory_space<vmem>>, %arg16: memref<1x256xf32, #tpu.memory_space<vmem>>, %arg17: memref<1x256xf32, #tpu.memory_space<vmem>>, %arg18: memref<256x9xf32, #tpu.memory_space<vmem>>, %arg19: memref<1x9xf32, #tpu.memory_space<vmem>>, %arg20: memref<1x1x9xf32, #tpu.memory_space<vmem>>, %arg21: memref<1x1024xf32, #tpu.memory_space<vmem>>) attributes {dimension_semantics = [#tpu.dimension_semantics<parallel>, #tpu.dimension_semantics<arbitrary>], iteration_bounds = array<i64: 2, 1>, scalar_prefetch = 0 : i64, scratch_operands = 1 : i64, tpu.core_type = #tpu.core_type<tc>, window_params = [{transform_indices = @transform_0, window_bounds = array<i64: 1, 128, 3>}, {pipeline_mode = #tpu.pipeline_mode<synchronous>, transform_indices = @transform_1, window_bounds = array<i64: 3, 64>}, {pipeline_mode = #tpu.pipeline_mode<synchronous>, transform_indices = @transform_2, window_bounds = array<i64: 1, 64>}, {pipeline_mode = #tpu.pipeline_mode<synchronous>, transform_indices = @transform_3, window_bounds = array<i64: 1, 64>}, {pipeline_mode = #tpu.pipeline_mode<synchronous>, transform_indices = @transform_4, window_bounds = array<i64: 64, 128>}, {pipeline_mode = #tpu.pipeline_mode<synchronous>, transform_indices = @transform_5, window_bounds = array<i64: 1, 128>}, {pipeline_mode = #tpu.pipeline_mode<synchronous>, transform_indices = @transform_6, window_bounds = array<i64: 1, 128>}, {pipeline_mode = #tpu.pipeline_mode<synchronous>, transform_indices = @transform_7, window_bounds = array<i64: 128, 1024>}, {pipeline_mode = #tpu.pipeline_mode<synchronous>, transform_indices = @transform_8, window_bounds = array<i64: 1, 1024>}, {pipeline_mode = #tpu.pipeline_mode<synchronous>, transform_indices = @transform_9, window_bounds = array<i64: 1, 1024>}, {pipeline_mode = #tpu.pipeline_mode<synchronous>, transform_indices = @transform_10, window_bounds = array<i64: 1024, 512>}, {pipeline_mode = #tpu.pipeline_mode<synchronous>, transform_indices = @transform_11, window_bounds = array<i64: 1, 512>}, {pipeline_mode = #tpu.pipeline_mode<synchronous>, transform_indices = @transform_12, window_bounds = array<i64: 1, 512>}, {pipeline_mode = #tpu.pipeline_mode<synchronous>, transform_indices = @transform_13, window_bounds = array<i64: 512, 256>}, {pipeline_mode = #tpu.pipeline_mode<synchronous>, transform_indices = @transform_14, window_bounds = array<i64: 1, 256>}, {pipeline_mode = #tpu.pipeline_mode<synchronous>, transform_indices = @transform_15, window_bounds = array<i64: 1, 256>}, {pipeline_mode = #tpu.pipeline_mode<synchronous>, transform_indices = @transform_16, window_bounds = array<i64: 256, 9>}, {pipeline_mode = #tpu.pipeline_mode<synchronous>, transform_indices = @transform_17, window_bounds = array<i64: 1, 9>}, {transform_indices = @transform_18, window_bounds = array<i64: 1, 1, 9>}]} {
    %c0_i32 = arith.constant 0 : i32
    %0 = arith.cmpi eq, %arg1, %c0_i32 : i32
    %1 = arith.extui %0 : i1 to i32
    %c0_i32_0 = arith.constant 0 : i32
    %2 = arith.cmpi ne, %1, %c0_i32_0 : i32
    scf.if %2 {
      %cst_35 = arith.constant 0xFF800000 : f32
      %56 = vector.broadcast %cst_35 : f32 to vector<1x1024xf32>
      %c0_36 = arith.constant 0 : index
      %c0_37 = arith.constant 0 : index
      %57 = vector.load %arg21[%c0_36, %c0_37] : memref<1x1024xf32, #tpu.memory_space<vmem>>, vector<1x1024xf32>
      tpu.vector_store %arg21[%c0_36, %c0_37], %56 {strides = array<i32>} : memref<1x1024xf32, #tpu.memory_space<vmem>>, vector<1x1024xf32>,
    } else {
    }
    %c0 = arith.constant 0 : index
    %c0_1 = arith.constant 0 : index
    %c0_2 = arith.constant 0 : index
    %3 = vector.load %arg2[%c0, %c0_1, %c0_2] : memref<1x128x3xf32, #tpu.memory_space<vmem>>, vector<1x128x3xf32>
    %4 = vector.shape_cast %3 : vector<1x128x3xf32> to vector<128x3xf32>
    %5 = arith.truncf %4 : vector<128x3xf32> to vector<128x3xbf16>
    %c0_3 = arith.constant 0 : index
    %c0_4 = arith.constant 0 : index
    %6 = vector.load %arg3[%c0_3, %c0_4] : memref<3x64xbf16, #tpu.memory_space<vmem>>, vector<3x64xbf16>
    %cst = arith.constant dense<0.000000e+00> : vector<128x64xf32>
    %7 = tpu.matmul %5, %6, %cst {dimension_numbers = #tpu.dot_dimension_numbers<[1], [0], [0], [1], [0, 0, 1, 1], [], []>} : vector<128x3xbf16>, vector<3x64xbf16>, vector<128x64xf32> -> vector<128x64xf32>
    %c0_5 = arith.constant 0 : index
    %c0_6 = arith.constant 0 : index
    %8 = vector.load %arg4[%c0_5, %c0_6] : memref<1x64xf32, #tpu.memory_space<vmem>>, vector<1x64xf32>
    %9 = vector.broadcast %8 : vector<1x64xf32> to vector<128x64xf32>
    %10 = arith.mulf %7, %9 : vector<128x64xf32>
    %c0_7 = arith.constant 0 : index
    %c0_8 = arith.constant 0 : index
    %11 = vector.load %arg5[%c0_7, %c0_8] : memref<1x64xf32, #tpu.memory_space<vmem>>, vector<1x64xf32>
    %12 = vector.broadcast %11 : vector<1x64xf32> to vector<128x64xf32>
    %13 = arith.addf %10, %12 : vector<128x64xf32>
    %cst_9 = arith.constant 0.000000e+00 : f32
    %14 = vector.broadcast %cst_9 : f32 to vector<128x64xf32>
    %15 = arith.maximumf %13, %14 : vector<128x64xf32>
    %16 = arith.truncf %15 : vector<128x64xf32> to vector<128x64xbf16>
    %c0_10 = arith.constant 0 : index
    %c0_11 = arith.constant 0 : index
    %17 = vector.load %arg6[%c0_10, %c0_11] : memref<64x128xbf16, #tpu.memory_space<vmem>>, vector<64x128xbf16>
    %cst_12 = arith.constant dense<0.000000e+00> : vector<128x128xf32>
    %18 = tpu.matmul %16, %17, %cst_12 {dimension_numbers = #tpu.dot_dimension_numbers<[1], [0], [0], [1], [0, 0, 1, 1], [], []>} : vector<128x64xbf16>, vector<64x128xbf16>, vector<128x128xf32> -> vector<128x128xf32>
    %c0_13 = arith.constant 0 : index
    %c0_14 = arith.constant 0 : index
    %19 = vector.load %arg7[%c0_13, %c0_14] : memref<1x128xf32, #tpu.memory_space<vmem>>, vector<1x128xf32>
    %20 = vector.broadcast %19 : vector<1x128xf32> to vector<128x128xf32>
    %21 = arith.mulf %18, %20 : vector<128x128xf32>
    %c0_15 = arith.constant 0 : index
    %c0_16 = arith.constant 0 : index
    %22 = vector.load %arg8[%c0_15, %c0_16] : memref<1x128xf32, #tpu.memory_space<vmem>>, vector<1x128xf32>
    %23 = vector.broadcast %22 : vector<1x128xf32> to vector<128x128xf32>
    %24 = arith.addf %21, %23 : vector<128x128xf32>
    %cst_17 = arith.constant 0.000000e+00 : f32
    %25 = vector.broadcast %cst_17 : f32 to vector<128x128xf32>
    %26 = arith.maximumf %24, %25 : vector<128x128xf32>
    %27 = arith.truncf %26 : vector<128x128xf32> to vector<128x128xbf16>
    %c0_18 = arith.constant 0 : index
    %c0_19 = arith.constant 0 : index
    %28 = vector.load %arg9[%c0_18, %c0_19] : memref<128x1024xbf16, #tpu.memory_space<vmem>>, vector<128x1024xbf16>
    %cst_20 = arith.constant dense<0.000000e+00> : vector<128x1024xf32>
    %29 = tpu.matmul %27, %28, %cst_20 {dimension_numbers = #tpu.dot_dimension_numbers<[1], [0], [0], [1], [0, 0, 1, 1], [], []>} : vector<128x128xbf16>, vector<128x1024xbf16>, vector<128x1024xf32> -> vector<128x1024xf32>
    %c0_21 = arith.constant 0 : index
    %c0_22 = arith.constant 0 : index
    %30 = vector.load %arg10[%c0_21, %c0_22] : memref<1x1024xf32, #tpu.memory_space<vmem>>, vector<1x1024xf32>
    %31 = vector.broadcast %30 : vector<1x1024xf32> to vector<128x1024xf32>
    %32 = arith.mulf %29, %31 : vector<128x1024xf32>
    %c0_23 = arith.constant 0 : index
    %c0_24 = arith.constant 0 : index
    %33 = vector.load %arg11[%c0_23, %c0_24] : memref<1x1024xf32, #tpu.memory_space<vmem>>, vector<1x1024xf32>
    %34 = vector.broadcast %33 : vector<1x1024xf32> to vector<128x1024xf32>
    %35 = arith.addf %32, %34 : vector<128x1024xf32>
    %cst_25 = arith.constant 0.000000e+00 : f32
    %36 = vector.broadcast %cst_25 : f32 to vector<128x1024xf32>
    %37 = arith.maximumf %35, %36 : vector<128x1024xf32>
    %c128_i32 = arith.constant 128 : i32
    %38 = arith.muli %arg1, %c128_i32 : i32
    %39 = tpu.iota {dimensions = array<i32: 0>} : vector<128x1xi32>
    %40 = vector.broadcast %38 : i32 to vector<128x1xi32>
    %41 = arith.addi %40, %39 : vector<128x1xi32>
    %c128_i32_26 = arith.constant 128 : i32
    %42 = vector.broadcast %c128_i32_26 : i32 to vector<128x1xi32>
    %43 = arith.cmpi slt, %41, %42 : vector<128x1xi32>
    %cst_27 = arith.constant 0xFF800000 : f32
    %44 = vector.shape_cast %43 : vector<128x1xi1> to vector<128x1xi1>
    %45 = vector.broadcast %44 : vector<128x1xi1> to vector<128x1024xi1>
    %46 = vector.broadcast %cst_27 : f32 to vector<128x1024xf32>
    %47 = arith.select %45, %37, %46 : vector<128x1024xi1>, vector<128x1024xf32>
    %c0_28 = arith.constant 0 : index
    %c0_29 = arith.constant 0 : index
    %48 = vector.load %arg21[%c0_28, %c0_29] : memref<1x1024xf32, #tpu.memory_space<vmem>>, vector<1x1024xf32>
    %cst_30 = arith.constant dense<0xFF800000> : vector<1024xf32>
    %49 = vector.multi_reduction <maximumf>, %47, %cst_30 [0] : vector<128x1024xf32> to vector<1024xf32>
    %50 = vector.shape_cast %49 : vector<1024xf32> to vector<1x1024xf32>
    %51 = arith.maximumf %48, %50 : vector<1x1024xf32>
    %c0_31 = arith.constant 0 : index
    %c0_32 = arith.constant 0 : index
    %52 = vector.load %arg21[%c0_31, %c0_32] : memref<1x1024xf32, #tpu.memory_space<vmem>>, vector<1x1024xf32>
    tpu.vector_store %arg21[%c0_31, %c0_32], %51 {strides = array<i32>} : memref<1x1024xf32, #tpu.memory_space<vmem>>, vector<1x1024xf32>,
    %c0_i32_33 = arith.constant 0 : i32
    %53 = arith.cmpi eq, %arg1, %c0_i32_33 : i32
    %54 = arith.extui %53 : i1 to i32
    %c0_i32_34 = arith.constant 0 : i32
    %55 = arith.cmpi ne, %54, %c0_i32_34 : i32
    scf.if %55 {
      %c0_35 = arith.constant 0 : index
      %c0_36 = arith.constant 0 : index
      %56 = vector.load %arg21[%c0_35, %c0_36] : memref<1x1024xf32, #tpu.memory_space<vmem>>, vector<1x1024xf32>
      %c0_37 = arith.constant 0 : index
      %c0_38 = arith.constant 0 : index
      %57 = vector.load %arg12[%c0_37, %c0_38] : memref<1024x512xf32, #tpu.memory_space<vmem>>, vector<1024x512xf32>
      %cst_39 = arith.constant dense<0.000000e+00> : vector<1x512xf32>
      %58 = tpu.matmul %56, %57, %cst_39 {dimension_numbers = #tpu.dot_dimension_numbers<[1], [0], [0], [1], [0, 0, 1, 1], [], []>} : vector<1x1024xf32>, vector<1024x512xf32>, vector<1x512xf32> -> vector<1x512xf32>
      %c0_40 = arith.constant 0 : index
      %c0_41 = arith.constant 0 : index
      %59 = vector.load %arg13[%c0_40, %c0_41] : memref<1x512xf32, #tpu.memory_space<vmem>>, vector<1x512xf32>
      %60 = arith.mulf %58, %59 : vector<1x512xf32>
      %c0_42 = arith.constant 0 : index
      %c0_43 = arith.constant 0 : index
      %61 = vector.load %arg14[%c0_42, %c0_43] : memref<1x512xf32, #tpu.memory_space<vmem>>, vector<1x512xf32>
      %62 = arith.addf %60, %61 : vector<1x512xf32>
      %cst_44 = arith.constant 0.000000e+00 : f32
      %63 = vector.broadcast %cst_44 : f32 to vector<1x512xf32>
      %64 = arith.maximumf %62, %63 : vector<1x512xf32>
      %c0_45 = arith.constant 0 : index
      %c0_46 = arith.constant 0 : index
      %65 = vector.load %arg15[%c0_45, %c0_46] : memref<512x256xf32, #tpu.memory_space<vmem>>, vector<512x256xf32>
      %cst_47 = arith.constant dense<0.000000e+00> : vector<1x256xf32>
      %66 = tpu.matmul %64, %65, %cst_47 {dimension_numbers = #tpu.dot_dimension_numbers<[1], [0], [0], [1], [0, 0, 1, 1], [], []>} : vector<1x512xf32>, vector<512x256xf32>, vector<1x256xf32> -> vector<1x256xf32>
      %c0_48 = arith.constant 0 : index
      %c0_49 = arith.constant 0 : index
      %67 = vector.load %arg16[%c0_48, %c0_49] : memref<1x256xf32, #tpu.memory_space<vmem>>, vector<1x256xf32>
      %68 = arith.mulf %66, %67 : vector<1x256xf32>
      %c0_50 = arith.constant 0 : index
      %c0_51 = arith.constant 0 : index
      %69 = vector.load %arg17[%c0_50, %c0_51] : memref<1x256xf32, #tpu.memory_space<vmem>>, vector<1x256xf32>
      %70 = arith.addf %68, %69 : vector<1x256xf32>
      %cst_52 = arith.constant 0.000000e+00 : f32
      %71 = vector.broadcast %cst_52 : f32 to vector<1x256xf32>
      %72 = arith.maximumf %70, %71 : vector<1x256xf32>
      %c0_53 = arith.constant 0 : index
      %c0_54 = arith.constant 0 : index
      %73 = vector.load %arg18[%c0_53, %c0_54] : memref<256x9xf32, #tpu.memory_space<vmem>>, vector<256x9xf32>
      %cst_55 = arith.constant dense<0.000000e+00> : vector<1x9xf32>
      %74 = tpu.matmul %72, %73, %cst_55 {dimension_numbers = #tpu.dot_dimension_numbers<[1], [0], [0], [1], [0, 0, 1, 1], [], []>} : vector<1x256xf32>, vector<256x9xf32>, vector<1x9xf32> -> vector<1x9xf32>
      %c0_56 = arith.constant 0 : index
      %c0_57 = arith.constant 0 : index
      %75 = vector.load %arg19[%c0_56, %c0_57] : memref<1x9xf32, #tpu.memory_space<vmem>>, vector<1x9xf32>
      %76 = arith.addf %74, %75 : vector<1x9xf32>
      %77 = vector.shape_cast %76 : vector<1x9xf32> to vector<1x1x9xf32>
      %c0_58 = arith.constant 0 : index
      %c0_59 = arith.constant 0 : index
      %c0_60 = arith.constant 0 : index
      %78 = vector.load %arg20[%c0_58, %c0_59, %c0_60] : memref<1x1x9xf32, #tpu.memory_space<vmem>>, vector<1x1x9xf32>
      tpu.vector_store %arg20[%c0_58, %c0_59, %c0_60], %77 {strides = array<i32>} : memref<1x1x9xf32, #tpu.memory_space<vmem>>, vector<1x1x9xf32>,
    } else {
    }
    return
  }
  func.func @transform_0(%arg0: i32, %arg1: i32) -> (i32, i32, i32) {
    %c0_i32 = arith.constant 0 : i32
    %c0_i32_0 = arith.constant 0 : i32
    return %arg0, %arg1, %c0_i32 : i32, i32, i32
  }
  func.func @transform_1(%arg0: i32, %arg1: i32) -> (i32, i32) {
    %c0_i32 = arith.constant 0 : i32
    %c0_i32_0 = arith.constant 0 : i32
    %c0_i32_1 = arith.constant 0 : i32
    return %c0_i32, %c0_i32_0 : i32, i32
  }
  func.func @transform_2(%arg0: i32, %arg1: i32) -> (i32, i32) {
    %c0_i32 = arith.constant 0 : i32
    %c0_i32_0 = arith.constant 0 : i32
    %c0_i32_1 = arith.constant 0 : i32
    return %c0_i32, %c0_i32_0 : i32, i32
  }
  func.func @transform_3(%arg0: i32, %arg1: i32) -> (i32, i32) {
    %c0_i32 = arith.constant 0 : i32
    %c0_i32_0 = arith.constant 0 : i32
    %c0_i32_1 = arith.constant 0 : i32
    return %c0_i32, %c0_i32_0 : i32, i32
  }
  func.func @transform_4(%arg0: i32, %arg1: i32) -> (i32, i32) {
    %c0_i32 = arith.constant 0 : i32
    %c0_i32_0 = arith.constant 0 : i32
    %c0_i32_1 = arith.constant 0 : i32
    return %c0_i32, %c0_i32_0 : i32, i32
  }
  func.func @transform_5(%arg0: i32, %arg1: i32) -> (i32, i32) {
    %c0_i32 = arith.constant 0 : i32
    %c0_i32_0 = arith.constant 0 : i32
    %c0_i32_1 = arith.constant 0 : i32
    return %c0_i32, %c0_i32_0 : i32, i32
  }
  func.func @transform_6(%arg0: i32, %arg1: i32) -> (i32, i32) {
    %c0_i32 = arith.constant 0 : i32
    %c0_i32_0 = arith.constant 0 : i32
    %c0_i32_1 = arith.constant 0 : i32
    return %c0_i32, %c0_i32_0 : i32, i32
  }
  func.func @transform_7(%arg0: i32, %arg1: i32) -> (i32, i32) {
    %c0_i32 = arith.constant 0 : i32
    %c0_i32_0 = arith.constant 0 : i32
    %c0_i32_1 = arith.constant 0 : i32
    return %c0_i32, %c0_i32_0 : i32, i32
  }
  func.func @transform_8(%arg0: i32, %arg1: i32) -> (i32, i32) {
    %c0_i32 = arith.constant 0 : i32
    %c0_i32_0 = arith.constant 0 : i32
    %c0_i32_1 = arith.constant 0 : i32
    return %c0_i32, %c0_i32_0 : i32, i32
  }
  func.func @transform_9(%arg0: i32, %arg1: i32) -> (i32, i32) {
    %c0_i32 = arith.constant 0 : i32
    %c0_i32_0 = arith.constant 0 : i32
    %c0_i32_1 = arith.constant 0 : i32
    return %c0_i32, %c0_i32_0 : i32, i32
  }
  func.func @transform_10(%arg0: i32, %arg1: i32) -> (i32, i32) {
    %c0_i32 = arith.constant 0 : i32
    %c0_i32_0 = arith.constant 0 : i32
    %c0_i32_1 = arith.constant 0 : i32
    return %c0_i32, %c0_i32_0 : i32, i32
  }
  func.func @transform_11(%arg0: i32, %arg1: i32) -> (i32, i32) {
    %c0_i32 = arith.constant 0 : i32
    %c0_i32_0 = arith.constant 0 : i32
    %c0_i32_1 = arith.constant 0 : i32
    return %c0_i32, %c0_i32_0 : i32, i32
  }
  func.func @transform_12(%arg0: i32, %arg1: i32) -> (i32, i32) {
    %c0_i32 = arith.constant 0 : i32
    %c0_i32_0 = arith.constant 0 : i32
    %c0_i32_1 = arith.constant 0 : i32
    return %c0_i32, %c0_i32_0 : i32, i32
  }
  func.func @transform_13(%arg0: i32, %arg1: i32) -> (i32, i32) {
    %c0_i32 = arith.constant 0 : i32
    %c0_i32_0 = arith.constant 0 : i32
    %c0_i32_1 = arith.constant 0 : i32
    return %c0_i32, %c0_i32_0 : i32, i32
  }
  func.func @transform_14(%arg0: i32, %arg1: i32) -> (i32, i32) {
    %c0_i32 = arith.constant 0 : i32
    %c0_i32_0 = arith.constant 0 : i32
    %c0_i32_1 = arith.constant 0 : i32
    return %c0_i32, %c0_i32_0 : i32, i32
  }
  func.func @transform_15(%arg0: i32, %arg1: i32) -> (i32, i32) {
    %c0_i32 = arith.constant 0 : i32
    %c0_i32_0 = arith.constant 0 : i32
    %c0_i32_1 = arith.constant 0 : i32
    return %c0_i32, %c0_i32_0 : i32, i32
  }
  func.func @transform_16(%arg0: i32, %arg1: i32) -> (i32, i32) {
    %c0_i32 = arith.constant 0 : i32
    %c0_i32_0 = arith.constant 0 : i32
    %c0_i32_1 = arith.constant 0 : i32
    return %c0_i32, %c0_i32_0 : i32, i32
  }
  func.func @transform_17(%arg0: i32, %arg1: i32) -> (i32, i32) {
    %c0_i32 = arith.constant 0 : i32
    %c0_i32_0 = arith.constant 0 : i32
    %c0_i32_1 = arith.constant 0 : i32
    return %c0_i32, %c0_i32_0 : i32, i32
  }
  func.func @transform_18(%arg0: i32, %arg1: i32) -> (i32, i32, i32) {
    %c0_i32 = arith.constant 0 : i32
    %c0_i32_0 = arith.constant 0 : i32
    %c0_i32_1 = arith.constant 0 : i32
    return %arg0, %c0_i32, %c0_i32_0 : i32, i32, i32
  }
}

module attributes {stable_mosaic.version = 11 : i64} {
  func.func @_enc_kernel(%arg0: i32, %arg1: i32, %arg2: memref<1x128x3xf32, #tpu.memory_space<vmem>>, %arg3: memref<1x3x64xbf16, #tpu.memory_space<vmem>>, %arg4: memref<1x64xf32, #tpu.memory_space<vmem>>, %arg5: memref<1x64xf32, #tpu.memory_space<vmem>>, %arg6: memref<64x128xbf16, #tpu.memory_space<vmem>>, %arg7: memref<1x128xf32, #tpu.memory_space<vmem>>, %arg8: memref<1x128xf32, #tpu.memory_space<vmem>>, %arg9: memref<128x1024xbf16, #tpu.memory_space<vmem>>, %arg10: memref<1x1024xf32, #tpu.memory_space<vmem>>, %arg11: memref<1x1024xf32, #tpu.memory_space<vmem>>, %arg12: memref<1024x66xf32, #tpu.memory_space<vmem>>, %arg13: memref<1x66xf32, #tpu.memory_space<vmem>>, %arg14: memref<66x100xf32, #tpu.memory_space<vmem>>, %arg15: memref<1x100xf32, #tpu.memory_space<vmem>>, %arg16: memref<100x512xf32, #tpu.memory_space<vmem>>, %arg17: memref<1x512xf32, #tpu.memory_space<vmem>>, %arg18: memref<512x1024xf32, #tpu.memory_space<vmem>>, %arg19: memref<1x1024xf32, #tpu.memory_space<vmem>>, %arg20: memref<1x1x1024xf32, #tpu.memory_space<vmem>>, %arg21: memref<1x1024xf32, #tpu.memory_space<vmem>>) attributes {dimension_semantics = [#tpu.dimension_semantics<parallel>, #tpu.dimension_semantics<arbitrary>], iteration_bounds = array<i64: 2, 1>, scalar_prefetch = 0 : i64, scratch_operands = 1 : i64, tpu.core_type = #tpu.core_type<tc>, window_params = [{transform_indices = @transform_0, window_bounds = array<i64: 1, 128, 3>}, {transform_indices = @transform_1, window_bounds = array<i64: 1, 3, 64>}, {pipeline_mode = #tpu.pipeline_mode<synchronous>, transform_indices = @transform_2, window_bounds = array<i64: 1, 64>}, {pipeline_mode = #tpu.pipeline_mode<synchronous>, transform_indices = @transform_3, window_bounds = array<i64: 1, 64>}, {pipeline_mode = #tpu.pipeline_mode<synchronous>, transform_indices = @transform_4, window_bounds = array<i64: 64, 128>}, {pipeline_mode = #tpu.pipeline_mode<synchronous>, transform_indices = @transform_5, window_bounds = array<i64: 1, 128>}, {pipeline_mode = #tpu.pipeline_mode<synchronous>, transform_indices = @transform_6, window_bounds = array<i64: 1, 128>}, {pipeline_mode = #tpu.pipeline_mode<synchronous>, transform_indices = @transform_7, window_bounds = array<i64: 128, 1024>}, {pipeline_mode = #tpu.pipeline_mode<synchronous>, transform_indices = @transform_8, window_bounds = array<i64: 1, 1024>}, {pipeline_mode = #tpu.pipeline_mode<synchronous>, transform_indices = @transform_9, window_bounds = array<i64: 1, 1024>}, {pipeline_mode = #tpu.pipeline_mode<synchronous>, transform_indices = @transform_10, window_bounds = array<i64: 1024, 66>}, {pipeline_mode = #tpu.pipeline_mode<synchronous>, transform_indices = @transform_11, window_bounds = array<i64: 1, 66>}, {pipeline_mode = #tpu.pipeline_mode<synchronous>, transform_indices = @transform_12, window_bounds = array<i64: 66, 100>}, {pipeline_mode = #tpu.pipeline_mode<synchronous>, transform_indices = @transform_13, window_bounds = array<i64: 1, 100>}, {pipeline_mode = #tpu.pipeline_mode<synchronous>, transform_indices = @transform_14, window_bounds = array<i64: 100, 512>}, {pipeline_mode = #tpu.pipeline_mode<synchronous>, transform_indices = @transform_15, window_bounds = array<i64: 1, 512>}, {pipeline_mode = #tpu.pipeline_mode<synchronous>, transform_indices = @transform_16, window_bounds = array<i64: 512, 1024>}, {pipeline_mode = #tpu.pipeline_mode<synchronous>, transform_indices = @transform_17, window_bounds = array<i64: 1, 1024>}, {transform_indices = @transform_18, window_bounds = array<i64: 1, 1, 1024>}]} {
    %c0_i32 = arith.constant 0 : i32
    %0 = arith.cmpi eq, %arg1, %c0_i32 : i32
    %1 = arith.extui %0 : i1 to i32
    %c0_i32_0 = arith.constant 0 : i32
    %2 = arith.cmpi ne, %1, %c0_i32_0 : i32
    scf.if %2 {
      %cst_35 = arith.constant 0xFF800000 : f32
      %55 = vector.broadcast %cst_35 : f32 to vector<1x1024xf32>
      %c0_36 = arith.constant 0 : index
      %c0_37 = arith.constant 0 : index
      %56 = vector.load %arg21[%c0_36, %c0_37] : memref<1x1024xf32, #tpu.memory_space<vmem>>, vector<1x1024xf32>
      tpu.vector_store %arg21[%c0_36, %c0_37], %55 {strides = array<i32>} : memref<1x1024xf32, #tpu.memory_space<vmem>>, vector<1x1024xf32>,
    } else {
    }
    %c0 = arith.constant 0 : index
    %c0_1 = arith.constant 0 : index
    %c0_2 = arith.constant 0 : index
    %3 = vector.load %arg3[%c0, %c0_1, %c0_2] : memref<1x3x64xbf16, #tpu.memory_space<vmem>>, vector<1x3x64xbf16>
    %4 = vector.shape_cast %3 : vector<1x3x64xbf16> to vector<3x64xbf16>
    %c0_3 = arith.constant 0 : index
    %c0_4 = arith.constant 0 : index
    %c0_5 = arith.constant 0 : index
    %5 = vector.load %arg2[%c0_3, %c0_4, %c0_5] : memref<1x128x3xf32, #tpu.memory_space<vmem>>, vector<1x128x3xf32>
    %6 = vector.shape_cast %5 : vector<1x128x3xf32> to vector<128x3xf32>
    %7 = arith.truncf %6 : vector<128x3xf32> to vector<128x3xbf16>
    %cst = arith.constant dense<0.000000e+00> : vector<128x64xf32>
    %8 = tpu.matmul %7, %4, %cst {dimension_numbers = #tpu.dot_dimension_numbers<[1], [0], [0], [1], [0, 0, 1, 1], [], []>} : vector<128x3xbf16>, vector<3x64xbf16>, vector<128x64xf32> -> vector<128x64xf32>
    %c0_6 = arith.constant 0 : index
    %c0_7 = arith.constant 0 : index
    %9 = vector.load %arg4[%c0_6, %c0_7] : memref<1x64xf32, #tpu.memory_space<vmem>>, vector<1x64xf32>
    %10 = vector.broadcast %9 : vector<1x64xf32> to vector<128x64xf32>
    %11 = arith.mulf %8, %10 : vector<128x64xf32>
    %c0_8 = arith.constant 0 : index
    %c0_9 = arith.constant 0 : index
    %12 = vector.load %arg5[%c0_8, %c0_9] : memref<1x64xf32, #tpu.memory_space<vmem>>, vector<1x64xf32>
    %13 = vector.broadcast %12 : vector<1x64xf32> to vector<128x64xf32>
    %14 = arith.addf %11, %13 : vector<128x64xf32>
    %cst_10 = arith.constant 0.000000e+00 : f32
    %15 = vector.broadcast %cst_10 : f32 to vector<128x64xf32>
    %16 = arith.maximumf %14, %15 : vector<128x64xf32>
    %17 = arith.truncf %16 : vector<128x64xf32> to vector<128x64xbf16>
    %c0_11 = arith.constant 0 : index
    %c0_12 = arith.constant 0 : index
    %18 = vector.load %arg6[%c0_11, %c0_12] : memref<64x128xbf16, #tpu.memory_space<vmem>>, vector<64x128xbf16>
    %cst_13 = arith.constant dense<0.000000e+00> : vector<128x128xf32>
    %19 = tpu.matmul %17, %18, %cst_13 {dimension_numbers = #tpu.dot_dimension_numbers<[1], [0], [0], [1], [0, 0, 1, 1], [], []>} : vector<128x64xbf16>, vector<64x128xbf16>, vector<128x128xf32> -> vector<128x128xf32>
    %c0_14 = arith.constant 0 : index
    %c0_15 = arith.constant 0 : index
    %20 = vector.load %arg7[%c0_14, %c0_15] : memref<1x128xf32, #tpu.memory_space<vmem>>, vector<1x128xf32>
    %21 = vector.broadcast %20 : vector<1x128xf32> to vector<128x128xf32>
    %22 = arith.mulf %19, %21 : vector<128x128xf32>
    %c0_16 = arith.constant 0 : index
    %c0_17 = arith.constant 0 : index
    %23 = vector.load %arg8[%c0_16, %c0_17] : memref<1x128xf32, #tpu.memory_space<vmem>>, vector<1x128xf32>
    %24 = vector.broadcast %23 : vector<1x128xf32> to vector<128x128xf32>
    %25 = arith.addf %22, %24 : vector<128x128xf32>
    %cst_18 = arith.constant 0.000000e+00 : f32
    %26 = vector.broadcast %cst_18 : f32 to vector<128x128xf32>
    %27 = arith.maximumf %25, %26 : vector<128x128xf32>
    %28 = arith.truncf %27 : vector<128x128xf32> to vector<128x128xbf16>
    %c0_19 = arith.constant 0 : index
    %c0_20 = arith.constant 0 : index
    %29 = vector.load %arg9[%c0_19, %c0_20] : memref<128x1024xbf16, #tpu.memory_space<vmem>>, vector<128x1024xbf16>
    %cst_21 = arith.constant dense<0.000000e+00> : vector<128x1024xf32>
    %30 = tpu.matmul %28, %29, %cst_21 {dimension_numbers = #tpu.dot_dimension_numbers<[1], [0], [0], [1], [0, 0, 1, 1], [], []>} : vector<128x128xbf16>, vector<128x1024xbf16>, vector<128x1024xf32> -> vector<128x1024xf32>
    %c0_22 = arith.constant 0 : index
    %c0_23 = arith.constant 0 : index
    %31 = vector.load %arg10[%c0_22, %c0_23] : memref<1x1024xf32, #tpu.memory_space<vmem>>, vector<1x1024xf32>
    %32 = vector.broadcast %31 : vector<1x1024xf32> to vector<128x1024xf32>
    %33 = arith.mulf %30, %32 : vector<128x1024xf32>
    %c0_24 = arith.constant 0 : index
    %c0_25 = arith.constant 0 : index
    %34 = vector.load %arg11[%c0_24, %c0_25] : memref<1x1024xf32, #tpu.memory_space<vmem>>, vector<1x1024xf32>
    %35 = vector.broadcast %34 : vector<1x1024xf32> to vector<128x1024xf32>
    %36 = arith.addf %33, %35 : vector<128x1024xf32>
    %c128_i32 = arith.constant 128 : i32
    %37 = arith.muli %arg1, %c128_i32 : i32
    %38 = tpu.iota {dimensions = array<i32: 0>} : vector<128x1xi32>
    %39 = vector.broadcast %37 : i32 to vector<128x1xi32>
    %40 = arith.addi %39, %38 : vector<128x1xi32>
    %c128_i32_26 = arith.constant 128 : i32
    %41 = vector.broadcast %c128_i32_26 : i32 to vector<128x1xi32>
    %42 = arith.cmpi slt, %40, %41 : vector<128x1xi32>
    %cst_27 = arith.constant 0xFF800000 : f32
    %43 = vector.shape_cast %42 : vector<128x1xi1> to vector<128x1xi1>
    %44 = vector.broadcast %43 : vector<128x1xi1> to vector<128x1024xi1>
    %45 = vector.broadcast %cst_27 : f32 to vector<128x1024xf32>
    %46 = arith.select %44, %36, %45 : vector<128x1024xi1>, vector<128x1024xf32>
    %c0_28 = arith.constant 0 : index
    %c0_29 = arith.constant 0 : index
    %47 = vector.load %arg21[%c0_28, %c0_29] : memref<1x1024xf32, #tpu.memory_space<vmem>>, vector<1x1024xf32>
    %cst_30 = arith.constant dense<0xFF800000> : vector<1024xf32>
    %48 = vector.multi_reduction <maximumf>, %46, %cst_30 [0] : vector<128x1024xf32> to vector<1024xf32>
    %49 = vector.shape_cast %48 : vector<1024xf32> to vector<1x1024xf32>
    %50 = arith.maximumf %47, %49 : vector<1x1024xf32>
    %c0_31 = arith.constant 0 : index
    %c0_32 = arith.constant 0 : index
    %51 = vector.load %arg21[%c0_31, %c0_32] : memref<1x1024xf32, #tpu.memory_space<vmem>>, vector<1x1024xf32>
    tpu.vector_store %arg21[%c0_31, %c0_32], %50 {strides = array<i32>} : memref<1x1024xf32, #tpu.memory_space<vmem>>, vector<1x1024xf32>,
    %c0_i32_33 = arith.constant 0 : i32
    %52 = arith.cmpi eq, %arg1, %c0_i32_33 : i32
    %53 = arith.extui %52 : i1 to i32
    %c0_i32_34 = arith.constant 0 : i32
    %54 = arith.cmpi ne, %53, %c0_i32_34 : i32
    scf.if %54 {
      %c0_35 = arith.constant 0 : index
      %c0_36 = arith.constant 0 : index
      %55 = vector.load %arg21[%c0_35, %c0_36] : memref<1x1024xf32, #tpu.memory_space<vmem>>, vector<1x1024xf32>
      %c0_37 = arith.constant 0 : index
      %c0_38 = arith.constant 0 : index
      %56 = vector.load %arg12[%c0_37, %c0_38] : memref<1024x66xf32, #tpu.memory_space<vmem>>, vector<1024x66xf32>
      %cst_39 = arith.constant dense<0.000000e+00> : vector<1x66xf32>
      %57 = tpu.matmul %55, %56, %cst_39 {dimension_numbers = #tpu.dot_dimension_numbers<[1], [0], [0], [1], [0, 0, 1, 1], [], []>} : vector<1x1024xf32>, vector<1024x66xf32>, vector<1x66xf32> -> vector<1x66xf32>
      %c0_40 = arith.constant 0 : index
      %c0_41 = arith.constant 0 : index
      %58 = vector.load %arg13[%c0_40, %c0_41] : memref<1x66xf32, #tpu.memory_space<vmem>>, vector<1x66xf32>
      %59 = arith.addf %57, %58 : vector<1x66xf32>
      %cst_42 = arith.constant 0.000000e+00 : f32
      %60 = vector.broadcast %cst_42 : f32 to vector<1x66xf32>
      %61 = arith.maximumf %59, %60 : vector<1x66xf32>
      %c0_43 = arith.constant 0 : index
      %c0_44 = arith.constant 0 : index
      %62 = vector.load %arg14[%c0_43, %c0_44] : memref<66x100xf32, #tpu.memory_space<vmem>>, vector<66x100xf32>
      %cst_45 = arith.constant dense<0.000000e+00> : vector<1x100xf32>
      %63 = tpu.matmul %61, %62, %cst_45 {dimension_numbers = #tpu.dot_dimension_numbers<[1], [0], [0], [1], [0, 0, 1, 1], [], []>} : vector<1x66xf32>, vector<66x100xf32>, vector<1x100xf32> -> vector<1x100xf32>
      %c0_46 = arith.constant 0 : index
      %c0_47 = arith.constant 0 : index
      %64 = vector.load %arg15[%c0_46, %c0_47] : memref<1x100xf32, #tpu.memory_space<vmem>>, vector<1x100xf32>
      %65 = arith.addf %63, %64 : vector<1x100xf32>
      %c0_48 = arith.constant 0 : index
      %c0_49 = arith.constant 0 : index
      %66 = vector.load %arg16[%c0_48, %c0_49] : memref<100x512xf32, #tpu.memory_space<vmem>>, vector<100x512xf32>
      %cst_50 = arith.constant dense<0.000000e+00> : vector<1x512xf32>
      %67 = tpu.matmul %65, %66, %cst_50 {dimension_numbers = #tpu.dot_dimension_numbers<[1], [0], [0], [1], [0, 0, 1, 1], [], []>} : vector<1x100xf32>, vector<100x512xf32>, vector<1x512xf32> -> vector<1x512xf32>
      %c0_51 = arith.constant 0 : index
      %c0_52 = arith.constant 0 : index
      %68 = vector.load %arg17[%c0_51, %c0_52] : memref<1x512xf32, #tpu.memory_space<vmem>>, vector<1x512xf32>
      %69 = arith.addf %67, %68 : vector<1x512xf32>
      %cst_53 = arith.constant 0.000000e+00 : f32
      %70 = vector.broadcast %cst_53 : f32 to vector<1x512xf32>
      %71 = arith.maximumf %69, %70 : vector<1x512xf32>
      %c0_54 = arith.constant 0 : index
      %c0_55 = arith.constant 0 : index
      %72 = vector.load %arg18[%c0_54, %c0_55] : memref<512x1024xf32, #tpu.memory_space<vmem>>, vector<512x1024xf32>
      %cst_56 = arith.constant dense<0.000000e+00> : vector<1x1024xf32>
      %73 = tpu.matmul %71, %72, %cst_56 {dimension_numbers = #tpu.dot_dimension_numbers<[1], [0], [0], [1], [0, 0, 1, 1], [], []>} : vector<1x512xf32>, vector<512x1024xf32>, vector<1x1024xf32> -> vector<1x1024xf32>
      %c0_57 = arith.constant 0 : index
      %c0_58 = arith.constant 0 : index
      %74 = vector.load %arg19[%c0_57, %c0_58] : memref<1x1024xf32, #tpu.memory_space<vmem>>, vector<1x1024xf32>
      %75 = arith.addf %73, %74 : vector<1x1024xf32>
      %cst_59 = arith.constant 0.000000e+00 : f32
      %76 = vector.broadcast %cst_59 : f32 to vector<1x1024xf32>
      %77 = arith.maximumf %75, %76 : vector<1x1024xf32>
      %78 = vector.shape_cast %77 : vector<1x1024xf32> to vector<1x1x1024xf32>
      %c0_60 = arith.constant 0 : index
      %c0_61 = arith.constant 0 : index
      %c0_62 = arith.constant 0 : index
      %79 = vector.load %arg20[%c0_60, %c0_61, %c0_62] : memref<1x1x1024xf32, #tpu.memory_space<vmem>>, vector<1x1x1024xf32>
      tpu.vector_store %arg20[%c0_60, %c0_61, %c0_62], %78 {strides = array<i32>} : memref<1x1x1024xf32, #tpu.memory_space<vmem>>, vector<1x1x1024xf32>,
    } else {
    }
    return
  }
  func.func @transform_0(%arg0: i32, %arg1: i32) -> (i32, i32, i32) {
    %c0_i32 = arith.constant 0 : i32
    %c0_i32_0 = arith.constant 0 : i32
    return %arg0, %arg1, %c0_i32 : i32, i32, i32
  }
  func.func @transform_1(%arg0: i32, %arg1: i32) -> (i32, i32, i32) {
    %c0_i32 = arith.constant 0 : i32
    %c0_i32_0 = arith.constant 0 : i32
    %c0_i32_1 = arith.constant 0 : i32
    return %arg0, %c0_i32, %c0_i32_0 : i32, i32, i32
  }
  func.func @transform_2(%arg0: i32, %arg1: i32) -> (i32, i32) {
    %c0_i32 = arith.constant 0 : i32
    %c0_i32_0 = arith.constant 0 : i32
    %c0_i32_1 = arith.constant 0 : i32
    return %c0_i32, %c0_i32_0 : i32, i32
  }
  func.func @transform_3(%arg0: i32, %arg1: i32) -> (i32, i32) {
    %c0_i32 = arith.constant 0 : i32
    %c0_i32_0 = arith.constant 0 : i32
    %c0_i32_1 = arith.constant 0 : i32
    return %c0_i32, %c0_i32_0 : i32, i32
  }
  func.func @transform_4(%arg0: i32, %arg1: i32) -> (i32, i32) {
    %c0_i32 = arith.constant 0 : i32
    %c0_i32_0 = arith.constant 0 : i32
    %c0_i32_1 = arith.constant 0 : i32
    return %c0_i32, %c0_i32_0 : i32, i32
  }
  func.func @transform_5(%arg0: i32, %arg1: i32) -> (i32, i32) {
    %c0_i32 = arith.constant 0 : i32
    %c0_i32_0 = arith.constant 0 : i32
    %c0_i32_1 = arith.constant 0 : i32
    return %c0_i32, %c0_i32_0 : i32, i32
  }
  func.func @transform_6(%arg0: i32, %arg1: i32) -> (i32, i32) {
    %c0_i32 = arith.constant 0 : i32
    %c0_i32_0 = arith.constant 0 : i32
    %c0_i32_1 = arith.constant 0 : i32
    return %c0_i32, %c0_i32_0 : i32, i32
  }
  func.func @transform_7(%arg0: i32, %arg1: i32) -> (i32, i32) {
    %c0_i32 = arith.constant 0 : i32
    %c0_i32_0 = arith.constant 0 : i32
    %c0_i32_1 = arith.constant 0 : i32
    return %c0_i32, %c0_i32_0 : i32, i32
  }
  func.func @transform_8(%arg0: i32, %arg1: i32) -> (i32, i32) {
    %c0_i32 = arith.constant 0 : i32
    %c0_i32_0 = arith.constant 0 : i32
    %c0_i32_1 = arith.constant 0 : i32
    return %c0_i32, %c0_i32_0 : i32, i32
  }
  func.func @transform_9(%arg0: i32, %arg1: i32) -> (i32, i32) {
    %c0_i32 = arith.constant 0 : i32
    %c0_i32_0 = arith.constant 0 : i32
    %c0_i32_1 = arith.constant 0 : i32
    return %c0_i32, %c0_i32_0 : i32, i32
  }
  func.func @transform_10(%arg0: i32, %arg1: i32) -> (i32, i32) {
    %c0_i32 = arith.constant 0 : i32
    %c0_i32_0 = arith.constant 0 : i32
    %c0_i32_1 = arith.constant 0 : i32
    return %c0_i32, %c0_i32_0 : i32, i32
  }
  func.func @transform_11(%arg0: i32, %arg1: i32) -> (i32, i32) {
    %c0_i32 = arith.constant 0 : i32
    %c0_i32_0 = arith.constant 0 : i32
    %c0_i32_1 = arith.constant 0 : i32
    return %c0_i32, %c0_i32_0 : i32, i32
  }
  func.func @transform_12(%arg0: i32, %arg1: i32) -> (i32, i32) {
    %c0_i32 = arith.constant 0 : i32
    %c0_i32_0 = arith.constant 0 : i32
    %c0_i32_1 = arith.constant 0 : i32
    return %c0_i32, %c0_i32_0 : i32, i32
  }
  func.func @transform_13(%arg0: i32, %arg1: i32) -> (i32, i32) {
    %c0_i32 = arith.constant 0 : i32
    %c0_i32_0 = arith.constant 0 : i32
    %c0_i32_1 = arith.constant 0 : i32
    return %c0_i32, %c0_i32_0 : i32, i32
  }
  func.func @transform_14(%arg0: i32, %arg1: i32) -> (i32, i32) {
    %c0_i32 = arith.constant 0 : i32
    %c0_i32_0 = arith.constant 0 : i32
    %c0_i32_1 = arith.constant 0 : i32
    return %c0_i32, %c0_i32_0 : i32, i32
  }
  func.func @transform_15(%arg0: i32, %arg1: i32) -> (i32, i32) {
    %c0_i32 = arith.constant 0 : i32
    %c0_i32_0 = arith.constant 0 : i32
    %c0_i32_1 = arith.constant 0 : i32
    return %c0_i32, %c0_i32_0 : i32, i32
  }
  func.func @transform_16(%arg0: i32, %arg1: i32) -> (i32, i32) {
    %c0_i32 = arith.constant 0 : i32
    %c0_i32_0 = arith.constant 0 : i32
    %c0_i32_1 = arith.constant 0 : i32
    return %c0_i32, %c0_i32_0 : i32, i32
  }
  func.func @transform_17(%arg0: i32, %arg1: i32) -> (i32, i32) {
    %c0_i32 = arith.constant 0 : i32
    %c0_i32_0 = arith.constant 0 : i32
    %c0_i32_1 = arith.constant 0 : i32
    return %c0_i32, %c0_i32_0 : i32, i32
  }
  func.func @transform_18(%arg0: i32, %arg1: i32) -> (i32, i32, i32) {
    %c0_i32 = arith.constant 0 : i32
    %c0_i32_0 = arith.constant 0 : i32
    %c0_i32_1 = arith.constant 0 : i32
    return %arg0, %c0_i32, %c0_i32_0 : i32, i32, i32
  }
}

module attributes {stable_mosaic.version = 11 : i64} {
  func.func @_dec_out_kernel(%arg0: i32, %arg1: memref<2x1024xf32, #tpu.memory_space<vmem>>, %arg2: memref<1024x384xbf16, #tpu.memory_space<vmem>>, %arg3: memref<1x384xf32, #tpu.memory_space<vmem>>, %arg4: memref<2x384xf32, #tpu.memory_space<vmem>>) attributes {dimension_semantics = [#tpu.dimension_semantics<parallel>], iteration_bounds = array<i64: 1>, scalar_prefetch = 0 : i64, scratch_operands = 0 : i64, tpu.core_type = #tpu.core_type<tc>, window_params = [{pipeline_mode = #tpu.pipeline_mode<synchronous>, transform_indices = @transform_0, window_bounds = array<i64: 2, 1024>}, {transform_indices = @transform_1, window_bounds = array<i64: 1024, 384>}, {transform_indices = @transform_2, window_bounds = array<i64: 1, 384>}, {transform_indices = @transform_3, window_bounds = array<i64: 2, 384>}]} {
    %c0 = arith.constant 0 : index
    %c0_0 = arith.constant 0 : index
    %0 = vector.load %arg1[%c0, %c0_0] : memref<2x1024xf32, #tpu.memory_space<vmem>>, vector<2x1024xf32>
    %1 = arith.truncf %0 : vector<2x1024xf32> to vector<2x1024xbf16>
    %c0_1 = arith.constant 0 : index
    %c0_2 = arith.constant 0 : index
    %2 = vector.load %arg2[%c0_1, %c0_2] : memref<1024x384xbf16, #tpu.memory_space<vmem>>, vector<1024x384xbf16>
    %cst = arith.constant dense<0.000000e+00> : vector<2x384xf32>
    %3 = tpu.matmul %1, %2, %cst {dimension_numbers = #tpu.dot_dimension_numbers<[1], [0], [0], [1], [0, 0, 1, 1], [], []>} : vector<2x1024xbf16>, vector<1024x384xbf16>, vector<2x384xf32> -> vector<2x384xf32>
    %c0_3 = arith.constant 0 : index
    %c0_4 = arith.constant 0 : index
    %4 = vector.load %arg3[%c0_3, %c0_4] : memref<1x384xf32, #tpu.memory_space<vmem>>, vector<1x384xf32>
    %5 = vector.broadcast %4 : vector<1x384xf32> to vector<2x384xf32>
    %6 = arith.addf %3, %5 : vector<2x384xf32>
    %c0_5 = arith.constant 0 : index
    %c0_6 = arith.constant 0 : index
    %7 = vector.load %arg4[%c0_5, %c0_6] : memref<2x384xf32, #tpu.memory_space<vmem>>, vector<2x384xf32>
    tpu.vector_store %arg4[%c0_5, %c0_6], %6 {strides = array<i32>} : memref<2x384xf32, #tpu.memory_space<vmem>>, vector<2x384xf32>,
    return
  }
  func.func @transform_0(%arg0: i32) -> (i32, i32) {
    %c0_i32 = arith.constant 0 : i32
    %c0_i32_0 = arith.constant 0 : i32
    %c0_i32_1 = arith.constant 0 : i32
    return %c0_i32, %c0_i32_0 : i32, i32
  }
  func.func @transform_1(%arg0: i32) -> (i32, i32) {
    %c0_i32 = arith.constant 0 : i32
    %c0_i32_0 = arith.constant 0 : i32
    return %c0_i32, %arg0 : i32, i32
  }
  func.func @transform_2(%arg0: i32) -> (i32, i32) {
    %c0_i32 = arith.constant 0 : i32
    %c0_i32_0 = arith.constant 0 : i32
    return %c0_i32, %arg0 : i32, i32
  }
  func.func @transform_3(%arg0: i32) -> (i32, i32) {
    %c0_i32 = arith.constant 0 : i32
    %c0_i32_0 = arith.constant 0 : i32
    return %c0_i32, %arg0 : i32, i32
  }
}

</mosaic_0001>

<bundles_post_ra>
// kernel: pointnet_autoencoder_forward.5
= control target key start
LH: loop header
LB: loop body
LE: loop exit
PB: predicated region body
PF: predicated region fallthrough
CT: control target
= control target key end

     0   :  { %v2254_v36 = vmov 1983009808   ;;  %v23_v38 = vlaneseq  ;;  %s2921_s1 = inlined_call_operand.vmem [shape: bf16[1024,384], index: 1, kind: input, shape index: {}]   ;;  %s2922_s0 = inlined_call_operand.vmem [shape: f32[2,1024], index: 0, kind: input, shape index: {}]   ;;  %s2923_s2 = inlined_call_operand.vmem [shape: f32[1,384], index: 2, kind: input, shape index: {}]   ;;  %s2924_s3 = inlined_call_operand.vmem [shape: f32[2,384], index: 3, kind: output, shape index: {}]  }
   0x1   :  { %v1996_v0 = vld [vmem:[%s2921_s1 + $0xac] ss:$12 sps:$4 sm:$0xff]   ;;  %v2000_v2 = vld [vmem:[%s2921_s1 + $0xa8] ss:$12 sps:$4 sm:$0xff]   ;;  %v2006_v6 = vld [vmem:[%s2921_s1 + $0x90] ss:$12 sps:$4 sm:$0xff]   ;;  %v21_v37 = vunpack.c.l.s4 %v2254_v36 }
   0x2   :  { %v1998_v1 = vld [vmem:[%s2921_s1 + $0x22c] ss:$12 sps:$4 sm:$0xff]   ;;  %1366 = vmatprep.subr.bf16.mxu0 %v1996_v0  ;;  %v2001_v3 = vld [vmem:[%s2921_s1 + $0x228] ss:$12 sps:$4 sm:$0xff]   ;;  %v2007_v7 = vld [vmem:[%s2921_s1 + $0x210] ss:$12 sps:$4 sm:$0xff]  }
   0x3   :  { %1407 = vmatprep.subr.bf16.mxu1 %v1998_v1  ;;  %v2002_v4 = vld [vmem:[%s2921_s1 + $0x94] ss:$12 sps:$4 sm:$0xff]   ;;  %1367 = vmatpush1.bf16.msra.mxu0 %v2000_v2  ;;  %v2008_v8 = vld [vmem:[%s2921_s1 + $0x7c] ss:$12 sps:$4 sm:$0xff]   ;;  %v2012_v10 = vld [vmem:[%s2921_s1 + $0x78] ss:$12 sps:$4 sm:$0xff]   ;;  %v22_v42 = vunpack.c.0.s8 %v21_v37 }
   0x4   :  { %1408 = vmatpush1.bf16.msra.mxu1 %v2001_v3  ;;  %v2004_v5 = vld [vmem:[%s2921_s1 + $0x214] ss:$12 sps:$4 sm:$0xff]   ;;  %1368 = vmatprep.subr.bf16.mxu0 %v2002_v4  ;;  %v2010_v9 = vld [vmem:[%s2921_s1 + $0x1fc] ss:$12 sps:$4 sm:$0xff]   ;;  %v2013_v11 = vld [vmem:[%s2921_s1 + $0x1f8] ss:$12 sps:$4 sm:$0xff]  }
   0x5   :  { %1409 = vmatprep.subr.bf16.mxu1 %v2004_v5  ;;  %v2014_v12 = vld [vmem:[%s2921_s1 + $0x64] ss:$12 sps:$4 sm:$0xff]   ;;  %v2018_v14 = vld [vmem:[%s2921_s1 + $0x60] ss:$12 sps:$4 sm:$0xff]   ;;  %v2024_v18 = vld [vmem:[%s2921_s1 + $0x48] ss:$12 sps:$4 sm:$0xff]  }
   0x6   :  { %v2016_v13 = vld [vmem:[%s2921_s1 + $0x1e4] ss:$12 sps:$4 sm:$0xff]   ;;  %v2019_v15 = vld [vmem:[%s2921_s1 + $0x1e0] ss:$12 sps:$4 sm:$0xff]   ;;  %v2025_v19 = vld [vmem:[%s2921_s1 + $0x1c8] ss:$12 sps:$4 sm:$0xff]  }
   0x7   :  { %1369 = vmatpush1.bf16.msra.mxu0 %v2006_v6  ;;  %v2020_v16 = vld [vmem:[%s2921_s1 + $0x4c] ss:$12 sps:$4 sm:$0xff]   ;;  %v2026_v20 = vld [vmem:[%s2921_s1 + $0x34] ss:$12 sps:$4 sm:$0xff]   ;;  %v2030_v22 = vld [vmem:[%s2921_s1 + $0x30] ss:$12 sps:$4 sm:$0xff]  }
   0x8   :  { %1410 = vmatpush1.bf16.msra.mxu1 %v2007_v7  ;;  %1370 = vmatprep.subr.bf16.mxu0 %v2008_v8  ;;  %v2022_v17 = vld [vmem:[%s2921_s1 + $0x1cc] ss:$12 sps:$4 sm:$0xff]   ;;  %v2028_v21 = vld [vmem:[%s2921_s1 + $0x1b4] ss:$12 sps:$4 sm:$0xff]   ;;  %v2031_v23 = vld [vmem:[%s2921_s1 + $0x1b0] ss:$12 sps:$4 sm:$0xff]  }
   0x9   :  { %1411 = vmatprep.subr.bf16.mxu1 %v2010_v9  ;;  %v2032_v24 = vld [vmem:[%s2921_s1 + $0x1c] ss:$12 sps:$4 sm:$0xff]   ;;  %v2036_v26 = vld [vmem:[%s2921_s1 + $0x18] ss:$12 sps:$4 sm:$0xff]   ;;  %v2042_v30 = vld [vmem:[%s2921_s1] ss:$12 sps:$4 sm:$0xff]  }
   0xa   :  { %v2034_v25 = vld [vmem:[%s2921_s1 + $0x19c] ss:$12 sps:$4 sm:$0xff]   ;;  %v2037_v27 = vld [vmem:[%s2921_s1 + $0x198] ss:$12 sps:$4 sm:$0xff]   ;;  %v2043_v31 = vld [vmem:[%s2921_s1 + $0x180] ss:$12 sps:$4 sm:$0xff]  }
   0xb   :  { %1371 = vmatpush1.bf16.msra.mxu0 %v2012_v10  ;;  %v2038_v28 = vld [vmem:[%s2921_s1 + $0x4] ss:$12 sps:$4 sm:$0xff]   ;;  %v2044_v32 = vld [vmem:[%s2921_s1 + $0x16c] ss:$12 sps:$4 sm:$0xff]   ;;  %v2048_v34 = vld [vmem:[%s2921_s1 + $0x168] ss:$12 sps:$4 sm:$0xff]  }
   0xc   :  { %1412 = vmatpush1.bf16.msra.mxu1 %v2013_v11  ;;  %1372 = vmatprep.subr.bf16.mxu0 %v2014_v12  ;;  %v2040_v29 = vld [vmem:[%s2921_s1 + $0x184] ss:$12 sps:$4 sm:$0xff]   ;;  %v2046_v33 = vld [vmem:[%s2921_s1 + $0x2ec] ss:$12 sps:$4 sm:$0xff]   ;;  %v2049_v35 = vld [vmem:[%s2921_s1 + $0x2e8] ss:$12 sps:$4 sm:$0xff]  }
   0xd   :  { %1413 = vmatprep.subr.bf16.mxu1 %v2016_v13  ;;  %v2050_v39 = vld [vmem:[%s2921_s1 + $0x154] ss:$12 sps:$4 sm:$0xff]   ;;  %v2054_v41 = vld [vmem:[%s2921_s1 + $0x150] ss:$12 sps:$4 sm:$0xff]   ;;  %v2392_v43 = vshrl.u32 %v23_v38, 7  ;;  %v16_v4 = vld [vmem:[%s2922_s0 + $0x8] sm:$0xff] }
   0xe   :  { %v2052_v40 = vld [vmem:[%s2921_s1 + $0x2d4] ss:$12 sps:$4 sm:$0xff]   ;;  %v2055_v44 = vld [vmem:[%s2921_s1 + $0x2d0] ss:$12 sps:$4 sm:$0xff]   ;;  %v2060_v47 = vld [vmem:[%s2921_s1 + $0x138] ss:$12 sps:$4 sm:$0xff]   ;;  %v36_v9 = vcombine.high %v16_v4, %v16_v4 }
   0xf   :  { %1373 = vmatpush1.bf16.msra.mxu0 %v2018_v14  ;;  %v2056_v45 = vld [vmem:[%s2921_s1 + $0x13c] ss:$12 sps:$4 sm:$0xff]   ;;  %v2061_v48 = vld [vmem:[%s2921_s1 + $0x2b8] ss:$12 sps:$4 sm:$0xff]   ;;  %v2410_v49 = vsub.s32 %v22_v42, %v2392_v43  ;;  %v2066_v55 = vld [vmem:[%s2921_s1 + $0x120] ss:$12 sps:$4 sm:$0xff]  }
  0x10   :  { %1414 = vmatpush1.bf16.msra.mxu1 %v2019_v15  ;;  %1374 = vmatprep.subr.bf16.mxu0 %v2020_v16  ;;  %v2058_v46 = vld [vmem:[%s2921_s1 + $0x2bc] ss:$12 sps:$4 sm:$0xff]   ;;  %v2062_v50 = vld [vmem:[%s2921_s1 + $0x124] ss:$12 sps:$4 sm:$0xff]   ;;  %v2067_v56 = vld [vmem:[%s2921_s1 + $0x2a0] ss:$12 sps:$4 sm:$0xff]  }
  0x11   :  { %1415 = vmatprep.subr.bf16.mxu1 %v2022_v17  ;;  %v2064_v51 = vld [vmem:[%s2921_s1 + $0x2a4] ss:$12 sps:$4 sm:$0xff]   ;;  %v2068_v57 = vld [vmem:[%s2921_s1 + $0x10c] ss:$12 sps:$4 sm:$0xff]   ;;  %v2072_v63 = vld [vmem:[%s2921_s1 + $0x108] ss:$12 sps:$4 sm:$0xff]   ;;  %v2481_v14 = vrot.slane %v16_v4, %v2410_v49  ;;  %v2484_v15 = vrot.slane %v36_v9, %v2410_v49 }
  0x12   :  { %v15_v52 = vld [vmem:[%s2922_s0] sm:$0xff]  ;;  %v2070_v58 = vld [vmem:[%s2921_s1 + $0x28c] ss:$12 sps:$4 sm:$0xff]   ;;  %v2073_v0 = vld [vmem:[%s2921_s1 + $0x288] ss:$12 sps:$4 sm:$0xff]  }
  0x13   :  { %1375 = vmatpush1.bf16.msra.mxu0 %v2024_v18  ;;  %v26_v53 = vrot.slane %v15_v52, %v2410_v49  ;;  %v19_v54 = vcombine.high %v15_v52, %v15_v52  ;;  %v2074_v1 = vld [vmem:[%s2921_s1 + $0xf4] ss:$12 sps:$4 sm:$0xff]   ;;  %v2078_v5 = vld [vmem:[%s2921_s1 + $0xf0] ss:$12 sps:$4 sm:$0xff]   ;;  %v2084_v10 = vld [vmem:[%s2921_s1 + $0xd8] ss:$12 sps:$4 sm:$0xff]  }
  0x14   :  { %1416 = vmatpush1.bf16.msra.mxu1 %v2025_v19  ;;  %1376 = vmatprep.subr.bf16.mxu0 %v2026_v20  ;;  %v2076_v2 = vld [vmem:[%s2921_s1 + $0x274] ss:$12 sps:$4 sm:$0xff]   ;;  %v2079_v6 = vld [vmem:[%s2921_s1 + $0x270] ss:$12 sps:$4 sm:$0xff]   ;;  %v2085_v11 = vld [vmem:[%s2921_s1 + $0x258] ss:$12 sps:$4 sm:$0xff]   ;;  %v51_v20 = vcombine.high %v2481_v14, %v2481_v14 }
  0x15   :  { %1417 = vmatprep.subr.bf16.mxu1 %v2028_v21  ;;  %v34_v59 = vcombine.high %v26_v53, %v26_v53  ;;  %v33_v60 = vrot.slane %v19_v54, %v2410_v49  ;;  %v2080_v7 = vld [vmem:[%s2921_s1 + $0xdc] ss:$12 sps:$4 sm:$0xff]   ;;  %v2086_v12 = vld [vmem:[%s2921_s1 + $0xc4] ss:$12 sps:$4 sm:$0xff]   ;;  %v2090_v16 = vld [vmem:[%s2921_s1 + $0xc0] ss:$12 sps:$4 sm:$0xff]   ;;  %v52_v21 = vcombine.high %v2484_v15, %v2484_v15 }
  0x16   :  { %v2082_v8 = vld [vmem:[%s2921_s1 + $0x25c] ss:$12 sps:$4 sm:$0xff]   ;;  %v2088_v13 = vld [vmem:[%s2921_s1 + $0x244] ss:$12 sps:$4 sm:$0xff]   ;;  %v2091_v17 = vld [vmem:[%s2921_s1 + $0x240] ss:$12 sps:$4 sm:$0xff]  }
  0x17   :  { %1377 = vmatpush1.bf16.msra.mxu0 %v2030_v22  ;;  %v2435_v61 = vpack.c.bf16 %v34_v59, %v34_v59  ;;  %v35_v62 = vcombine.high %v33_v60, %v33_v60  ;;  %v2096_v18 = vld [vmem:[%s2921_s1 + $0x3ac] ss:$12 sps:$4 sm:$0xff]   ;;  %v2502_v22 = vpack.c.bf16 %v26_v53, %v26_v53  ;;  %v2114_v36 = vld [vmem:[%s2921_s1 + $0x364] ss:$12 sps:$4 sm:$0xff]   ;;  %v2118_v42 = vld [vmem:[%s2921_s1 + $0x348] ss:$12 sps:$4 sm:$0xff]  }
  0x18   :  { %1418 = vmatpush1.bf16.msra.mxu1 %v2031_v23  ;;  %1378 = vmatprep.subr.bf16.mxu0 %v2032_v24  ;;  %v2099_v19 = vld [vmem:[%s2921_s1 + $0x52c] ss:$12 sps:$4 sm:$0xff]   ;;  %v2504_v23 = vpack.c.bf16 %v33_v60, %v33_v60  ;;  %v2094_v24 = vld [vmem:[%s2921_s1 + $0x3a8] ss:$12 sps:$4 sm:$0xff]   ;;  %v2117_v37 = vld [vmem:[%s2921_s1 + $0x4e4] ss:$12 sps:$4 sm:$0xff]  }
  0x19   :  { %1419 = vmatprep.subr.bf16.mxu1 %v2034_v25  ;;  %v2449_v3 = vpack.c.bf16 %v35_v62, %v35_v62  ;;  %1398 = vmatprep.mubr.bf16.mxu0 %v2435_v61  ;;  %v2097_v25 = vld [vmem:[%s2921_s1 + $0x528] ss:$12 sps:$4 sm:$0xff]   ;;  %v2112_v38 = vld [vmem:[%s2921_s1 + $0x360] ss:$12 sps:$4 sm:$0xff]   ;;  %v2130_v52 = vld [vmem:[%s2921_s1 + $0x318] ss:$12 sps:$4 sm:$0xff]  }
  0x1a   :  { %v2133_v53 = vld [vmem:[%s2921_s1 + $0x498] ss:$12 sps:$4 sm:$0xff]   ;;  %v2142_v60 = vld [vmem:[%s2921_s1 + $0x468] ss:$12 sps:$4 sm:$0xff]  }
  0x1b   :  { %1379 = vmatpush1.bf16.msra.mxu0 %v2036_v26  ;;  %1439 = vmatprep.mubr.bf16.mxu1 %v2449_v3  ;;  %v2102_v26 = vld [vmem:[%s2921_s1 + $0x394] ss:$12 sps:$4 sm:$0xff]   ;;  %v2138_v54 = vld [vmem:[%s2921_s1 + $0x304] ss:$12 sps:$4 sm:$0xff]   ;;  %v2147_v59 = vld [vmem:[%s2921_s1 + $0x5ec] ss:$12 sps:$4 sm:$0xff]  }
  0x1c   :  { %1420 = vmatpush1.bf16.msra.mxu1 %v2037_v27  ;;  %1380 = vmatprep.subr.bf16.mxu0 %v2038_v28  ;;  %v2105_v27 = vld [vmem:[%s2921_s1 + $0x514] ss:$12 sps:$4 sm:$0xff]   ;;  %v2518_v28 = vpack.c.bf16 %v51_v20, %v51_v20  ;;  %v2156_v4 = vld [vmem:[%s2921_s1 + $0x43c] ss:$12 sps:$4 sm:$0xff]   ;;  %v2165_v9 = vld [vmem:[%s2921_s1 + $0x5a4] ss:$12 sps:$4 sm:$0xff]  }
  0x1d   :  { %1421 = vmatprep.subr.bf16.mxu1 %v2040_v29  ;;  %v2520_v29 = vpack.c.bf16 %v52_v21, %v52_v21  ;;  %v2145_v62 = vld [vmem:[%s2921_s1 + $0x5e8] ss:$12 sps:$4 sm:$0xff]   ;;  %v2172_v20 = vld [vmem:[%s2921_s1 + $0x3f0] ss:$12 sps:$4 sm:$0xff]  }
  0x1e   :  { %v2175_v21 = vld [vmem:[%s2921_s1 + $0x570] ss:$12 sps:$4 sm:$0xff]  }
  0x1f   :  { %1381 = vmatpush1.bf16.msra.mxu0 %v2042_v30  ;;  %v2100_v30 = vld [vmem:[%s2921_s1 + $0x390] ss:$12 sps:$4 sm:$0xff]  }
  0x20   :  { %1422 = vmatpush1.bf16.msra.mxu1 %v2043_v31  ;;  %1382 = vmatprep.subr.bf16.mxu0 %v2044_v32  ;;  %v2103_v31 = vld [vmem:[%s2921_s1 + $0x510] ss:$12 sps:$4 sm:$0xff]  }
  0x21   :  { %1423 = vmatprep.subr.bf16.mxu1 %v2046_v33  ;;  %v2108_v32 = vld [vmem:[%s2921_s1 + $0x37c] ss:$12 sps:$4 sm:$0xff]  }
  0x22   :  { %v2111_v33 = vld [vmem:[%s2921_s1 + $0x4fc] ss:$12 sps:$4 sm:$0xff]  }
  0x23   :  { %1383 = vmatpush2.bf16.msra.mxu0 %v2048_v34  ;;  %v2106_v34 = vld [vmem:[%s2921_s1 + $0x378] ss:$12 sps:$4 sm:$0xff]  }
  0x24   :  { %1424 = vmatpush2.bf16.msra.mxu1 %v2049_v35  ;;  %1384 = vmatprep.subr.bf16.mxu0 %v2050_v39  ;;  %v2109_v35 = vld [vmem:[%s2921_s1 + $0x4f8] ss:$12 sps:$4 sm:$0xff]   ;;  %v2115_v39 = vld [vmem:[%s2921_s1 + $0x4e0] ss:$12 sps:$4 sm:$0xff]  }
  0x25   :  { %1425 = vmatprep.subr.bf16.mxu1 %v2052_v40  ;;  %v2120_v40 = vld [vmem:[%s2921_s1 + $0x34c] ss:$12 sps:$4 sm:$0xff]  }
  0x27   :  { %1385 = vmatpush2.bf16.msra.mxu0 %v2054_v41  ;;  %v2123_v41 = vld [vmem:[%s2921_s1 + $0x4cc] ss:$12 sps:$4 sm:$0xff]  }
  0x28   :  { %1426 = vmatpush2.bf16.msra.mxu1 %v2055_v44  ;;  %1386 = vmatprep.subr.bf16.mxu0 %v2056_v45  ;;  %v2121_v44 = vld [vmem:[%s2921_s1 + $0x4c8] ss:$12 sps:$4 sm:$0xff]  }
  0x29   :  { %1427 = vmatprep.subr.bf16.mxu1 %v2058_v46  ;;  %v2126_v45 = vld [vmem:[%s2921_s1 + $0x334] ss:$12 sps:$4 sm:$0xff]  }
  0x2a   :  { %v2129_v46 = vld [vmem:[%s2921_s1 + $0x4b4] ss:$12 sps:$4 sm:$0xff]  }
  0x2b   :  { %1387 = vmatpush2.bf16.msra.mxu0 %v2060_v47  ;;  %v2124_v47 = vld [vmem:[%s2921_s1 + $0x330] ss:$12 sps:$4 sm:$0xff]  }
  0x2c   :  { %1428 = vmatpush2.bf16.msra.mxu1 %v2061_v48  ;;  %1388 = vmatprep.subr.bf16.mxu0 %v2062_v50  ;;  %v2127_v48 = vld [vmem:[%s2921_s1 + $0x4b0] ss:$12 sps:$4 sm:$0xff]  }
  0x2d   :  { %1429 = vmatprep.subr.bf16.mxu1 %v2064_v51  ;;  %v2132_v50 = vld [vmem:[%s2921_s1 + $0x31c] ss:$12 sps:$4 sm:$0xff]  }
  0x2e   :  { %v2135_v51 = vld [vmem:[%s2921_s1 + $0x49c] ss:$12 sps:$4 sm:$0xff]  }
  0x2f   :  { %1389 = vmatpush2.bf16.msra.mxu0 %v2066_v55  ;;  %v2141_v55 = vld [vmem:[%s2921_s1 + $0x484] ss:$12 sps:$4 sm:$0xff]  }
  0x30   :  { %1430 = vmatpush2.bf16.msra.mxu1 %v2067_v56  ;;  %1390 = vmatprep.subr.bf16.mxu0 %v2068_v57  ;;  %v2136_v56 = vld [vmem:[%s2921_s1 + $0x300] ss:$12 sps:$4 sm:$0xff]  }
  0x31   :  { %1431 = vmatprep.subr.bf16.mxu1 %v2070_v58  ;;  %v2139_v57 = vld [vmem:[%s2921_s1 + $0x480] ss:$12 sps:$4 sm:$0xff]  }
  0x32   :  { %v2144_v58 = vld [vmem:[%s2921_s1 + $0x46c] ss:$12 sps:$4 sm:$0xff]  }
  0x33   :  { %1391 = vmatpush2.bf16.msra.mxu0 %v2072_v63  ;;  %v2150_v63 = vld [vmem:[%s2921_s1 + $0x454] ss:$12 sps:$4 sm:$0xff]  }
  0x34   :  { %1432 = vmatpush2.bf16.msra.mxu1 %v2073_v0  ;;  %1392 = vmatprep.subr.bf16.mxu0 %v2074_v1  ;;  %v2153_v0 = vld [vmem:[%s2921_s1 + $0x5d4] ss:$12 sps:$4 sm:$0xff]   ;;  %v2148_v1 = vld [vmem:[%s2921_s1 + $0x450] ss:$12 sps:$4 sm:$0xff]  }
  0x35   :  { %1433 = vmatprep.subr.bf16.mxu1 %v2076_v2  ;;  %v2151_v2 = vld [vmem:[%s2921_s1 + $0x5d0] ss:$12 sps:$4 sm:$0xff]  }
  0x37   :  { %1393 = vmatpush2.bf16.msra.mxu0 %v2078_v5  ;;  %v2159_v5 = vld [vmem:[%s2921_s1 + $0x5bc] ss:$12 sps:$4 sm:$0xff]  }
  0x38   :  { %1434 = vmatpush2.bf16.msra.mxu1 %v2079_v6  ;;  %1394 = vmatprep.subr.bf16.mxu0 %v2080_v7  ;;  %v2154_v6 = vld [vmem:[%s2921_s1 + $0x438] ss:$12 sps:$4 sm:$0xff]  }
  0x39   :  { %1435 = vmatprep.subr.bf16.mxu1 %v2082_v8  ;;  %v2157_v7 = vld [vmem:[%s2921_s1 + $0x5b8] ss:$12 sps:$4 sm:$0xff]  }
  0x3a   :  { %v2162_v8 = vld [vmem:[%s2921_s1 + $0x424] ss:$12 sps:$4 sm:$0xff]  }
  0x3b   :  { %1395 = vmatpush2.bf16.msra.mxu0 %v2084_v10  ;;  %v2160_v10 = vld [vmem:[%s2921_s1 + $0x420] ss:$12 sps:$4 sm:$0xff]  }
  0x3c   :  { %1436 = vmatpush2.bf16.msra.mxu1 %v2085_v11  ;;  %1396 = vmatprep.subr.bf16.mxu0 %v2086_v12  ;;  %v2163_v11 = vld [vmem:[%s2921_s1 + $0x5a0] ss:$12 sps:$4 sm:$0xff]  }
  0x3d   :  { %1437 = vmatprep.subr.bf16.mxu1 %v2088_v13  ;;  %v2168_v12 = vld [vmem:[%s2921_s1 + $0x40c] ss:$12 sps:$4 sm:$0xff]  }
  0x3e   :  { %v2171_v13 = vld [vmem:[%s2921_s1 + $0x58c] ss:$12 sps:$4 sm:$0xff]  }
  0x3f   :  { %1397 = vmatpush2.bf16.msra.mxu0 %v2090_v16  ;;  %v2166_v16 = vld [vmem:[%s2921_s1 + $0x408] ss:$12 sps:$4 sm:$0xff]  }
  0x40   :  { %1438 = vmatpush2.bf16.msra.mxu1 %v2091_v17  ;;  %1448 = vmatprep.subr.bf16.mxu0 %v2096_v18  ;;  %v2169_v17 = vld [vmem:[%s2921_s1 + $0x588] ss:$12 sps:$4 sm:$0xff]  }
  0x41   :  { %1489 = vmatprep.subr.bf16.mxu1 %v2099_v19  ;;  %v2174_v18 = vld [vmem:[%s2921_s1 + $0x3f4] ss:$12 sps:$4 sm:$0xff]  }
  0x42   :  { %1399 = vmatmul.mubr.bf16.vlgmr.msra.gmra.mxu0 %v2502_v22  ;;  %v2177_v19 = vld [vmem:[%s2921_s1 + $0x574] ss:$12 sps:$4 sm:$0xff]  }
  0x43   :  { %1440 = vmatmul.mubr.bf16.vlgmr.msra.gmra.mxu1 %v2504_v23  ;;  %1449 = vmatpush1.bf16.msra.mxu0 %v2094_v24  ;;  %v2180_v24 = vld [vmem:[%s2921_s1 + $0x3dc] ss:$12 sps:$4 sm:$0xff]  }
  0x44   :  { %1490 = vmatpush1.bf16.msra.mxu1 %v2097_v25  ;;  %1450 = vmatprep.subr.bf16.mxu0 %v2102_v26  ;;  %v2183_v25 = vld [vmem:[%s2921_s1 + $0x55c] ss:$12 sps:$4 sm:$0xff]   ;;  %v2178_v26 = vld [vmem:[%s2921_s1 + $0x3d8] ss:$12 sps:$4 sm:$0xff]  }
  0x45   :  { %1491 = vmatprep.subr.bf16.mxu1 %v2105_v27  ;;  %1480 = vmatprep.mubr.bf16.mxu0 %v2518_v28  ;;  %v2181_v27 = vld [vmem:[%s2921_s1 + $0x558] ss:$12 sps:$4 sm:$0xff]  }
  0x46   :  { %1521 = vmatprep.mubr.bf16.mxu1 %v2520_v29 }
  0x47   :  { %1451 = vmatpush1.bf16.msra.mxu0 %v2100_v30  ;;  %v2186_v30 = vld [vmem:[%s2921_s1 + $0x3c4] ss:$12 sps:$4 sm:$0xff]  }
  0x48   :  { %1492 = vmatpush1.bf16.msra.mxu1 %v2103_v31  ;;  %1452 = vmatprep.subr.bf16.mxu0 %v2108_v32  ;;  %v2189_v31 = vld [vmem:[%s2921_s1 + $0x544] ss:$12 sps:$4 sm:$0xff]   ;;  %v2184_v32 = vld [vmem:[%s2921_s1 + $0x3c0] ss:$12 sps:$4 sm:$0xff]  }
  0x49   :  { %1493 = vmatprep.subr.bf16.mxu1 %v2111_v33  ;;  %v2187_v33 = vld [vmem:[%s2921_s1 + $0x540] ss:$12 sps:$4 sm:$0xff]  }
  0x4b   :  { %1453 = vmatpush1.bf16.msra.mxu0 %v2106_v34  ;;  %v2190_v34 = vld [vmem:[%s2921_s1 + $0x170] ss:$12 sps:$4 sm:$0xff]  }
  0x4c   :  { %1494 = vmatpush1.bf16.msra.mxu1 %v2109_v35  ;;  %1454 = vmatprep.subr.bf16.mxu0 %v2114_v36  ;;  %v2191_v35 = vld [vmem:[%s2921_s1 + $0x2f0] ss:$12 sps:$4 sm:$0xff]  }
  0x4d   :  { %1495 = vmatprep.subr.bf16.mxu1 %v2117_v37  ;;  %v2192_v36 = vld [vmem:[%s2921_s1 + $0xb0] ss:$12 sps:$4 sm:$0xff]   ;;  %v2711_v37 = vpack.c.bf16 %v2481_v14, %v2481_v14  ;;  %v2195_v14 = vld [vmem:[%s2921_s1 + $0x2d8] ss:$12 sps:$4 sm:$0xff]  }
  0x4f   :  { %1455 = vmatpush1.bf16.msra.mxu0 %v2112_v38  ;;  %v2715_v38 = vpack.c.bf16 %v2484_v15, %v2484_v15  ;;  %v2196_v15 = vld [vmem:[%s2921_s1 + $0x98] ss:$12 sps:$4 sm:$0xff]  }
  0x50   :  { %1496 = vmatpush1.bf16.msra.mxu1 %v2115_v39  ;;  %1456 = vmatprep.subr.bf16.mxu0 %v2120_v40  ;;  %v2193_v39 = vld [vmem:[%s2921_s1 + $0x230] ss:$12 sps:$4 sm:$0xff]   ;;  %v2194_v40 = vld [vmem:[%s2921_s1 + $0x158] ss:$12 sps:$4 sm:$0xff]  }
  0x51   :  { %1497 = vmatprep.subr.bf16.mxu1 %v2123_v41  ;;  %v2197_v41 = vld [vmem:[%s2921_s1 + $0x218] ss:$12 sps:$4 sm:$0xff]  }
  0x53   :  { %1457 = vmatpush1.bf16.msra.mxu0 %v2118_v42  ;;  %v2198_v42 = vld [vmem:[%s2921_s1 + $0x140] ss:$12 sps:$4 sm:$0xff]  }
  0x54   :  { %1498 = vmatpush1.bf16.msra.mxu1 %v2121_v44  ;;  %1458 = vmatprep.subr.bf16.mxu0 %v2126_v45  ;;  %v2199_v44 = vld [vmem:[%s2921_s1 + $0x2c0] ss:$12 sps:$4 sm:$0xff]  }
  0x55   :  { %1499 = vmatprep.subr.bf16.mxu1 %v2129_v46  ;;  %v2200_v45 = vld [vmem:[%s2921_s1 + $0x80] ss:$12 sps:$4 sm:$0xff]  }
  0x56   :  { %v2201_v46 = vld [vmem:[%s2921_s1 + $0x200] ss:$12 sps:$4 sm:$0xff]  }
  0x57   :  { %1459 = vmatpush1.bf16.msra.mxu0 %v2124_v47  ;;  %v2202_v47 = vld [vmem:[%s2921_s1 + $0x128] ss:$12 sps:$4 sm:$0xff]  }
  0x58   :  { %1500 = vmatpush1.bf16.msra.mxu1 %v2127_v48  ;;  %1460 = vmatprep.subr.bf16.mxu0 %v2132_v50  ;;  %v2203_v48 = vld [vmem:[%s2921_s1 + $0x2a8] ss:$12 sps:$4 sm:$0xff]   ;;  %v2206_v50 = vld [vmem:[%s2921_s1 + $0x110] ss:$12 sps:$4 sm:$0xff]  }
  0x59   :  { %1501 = vmatprep.subr.bf16.mxu1 %v2135_v51  ;;  %v2207_v51 = vld [vmem:[%s2921_s1 + $0x290] ss:$12 sps:$4 sm:$0xff]  }
  0x5b   :  { %1461 = vmatpush1.bf16.msra.mxu0 %v2130_v52  ;;  %v2208_v52 = vld [vmem:[%s2921_s1 + $0x50] ss:$12 sps:$4 sm:$0xff]  }
  0x5c   :  { %1502 = vmatpush1.bf16.msra.mxu1 %v2133_v53  ;;  %1462 = vmatprep.subr.bf16.mxu0 %v2138_v54  ;;  %v2209_v53 = vld [vmem:[%s2921_s1 + $0x1d0] ss:$12 sps:$4 sm:$0xff]   ;;  %v2210_v54 = vld [vmem:[%s2921_s1 + $0xf8] ss:$12 sps:$4 sm:$0xff]  }
  0x5d   :  { %1503 = vmatprep.subr.bf16.mxu1 %v2141_v55  ;;  %v2211_v55 = vld [vmem:[%s2921_s1 + $0x278] ss:$12 sps:$4 sm:$0xff]  }
  0x5f   :  { %1463 = vmatpush1.bf16.msra.mxu0 %v2136_v56  ;;  %v2212_v56 = vld [vmem:[%s2921_s1 + $0x38] ss:$12 sps:$4 sm:$0xff]  }
  0x60   :  { %1504 = vmatpush1.bf16.msra.mxu1 %v2139_v57  ;;  %1464 = vmatprep.subr.bf16.mxu0 %v2144_v58  ;;  %v2213_v57 = vld [vmem:[%s2921_s1 + $0x1b8] ss:$12 sps:$4 sm:$0xff]   ;;  %v2214_v58 = vld [vmem:[%s2921_s1 + $0xe0] ss:$12 sps:$4 sm:$0xff]  }
  0x61   :  { %1505 = vmatprep.subr.bf16.mxu1 %v2147_v59  ;;  %v2215_v59 = vld [vmem:[%s2921_s1 + $0x260] ss:$12 sps:$4 sm:$0xff]  }
  0x63   :  { %1465 = vmatpush2.bf16.msra.mxu0 %v2142_v60  ;;  %v2216_v60 = vld [vmem:[%s2921_s1 + $0x20] ss:$12 sps:$4 sm:$0xff]  }
  0x64   :  { %1506 = vmatpush2.bf16.msra.mxu1 %v2145_v62  ;;  %1466 = vmatprep.subr.bf16.mxu0 %v2150_v63  ;;  %v2217_v62 = vld [vmem:[%s2921_s1 + $0x1a0] ss:$12 sps:$4 sm:$0xff]   ;;  %v2218_v63 = vld [vmem:[%s2921_s1 + $0xc8] ss:$12 sps:$4 sm:$0xff]  }
  0x65   :  { %1507 = vmatprep.subr.bf16.mxu1 %v2153_v0  ;;  %v2219_v0 = vld [vmem:[%s2921_s1 + $0x248] ss:$12 sps:$4 sm:$0xff]  }
  0x67   :  { %1467 = vmatpush2.bf16.msra.mxu0 %v2148_v1  ;;  %v2220_v1 = vld [vmem:[%s2921_s1 + $0x8] ss:$12 sps:$4 sm:$0xff]  }
  0x68   :  { %1508 = vmatpush2.bf16.msra.mxu1 %v2151_v2  ;;  %1468 = vmatprep.subr.bf16.mxu0 %v2156_v4  ;;  %v2221_v2 = vld [vmem:[%s2921_s1 + $0x188] ss:$12 sps:$4 sm:$0xff]   ;;  %v2222_v4 = vld [vmem:[%s2921_s1 + $0x470] ss:$12 sps:$4 sm:$0xff]  }
  0x69   :  { %1509 = vmatprep.subr.bf16.mxu1 %v2159_v5  ;;  %v2223_v5 = vld [vmem:[%s2921_s1 + $0x5f0] ss:$12 sps:$4 sm:$0xff]  }
  0x6b   :  { %1469 = vmatpush2.bf16.msra.mxu0 %v2154_v6  ;;  %v2224_v6 = vld [vmem:[%s2921_s1 + $0x3b0] ss:$12 sps:$4 sm:$0xff]  }
  0x6c   :  { %1510 = vmatpush2.bf16.msra.mxu1 %v2157_v7  ;;  %1470 = vmatprep.subr.bf16.mxu0 %v2162_v8  ;;  %v2225_v7 = vld [vmem:[%s2921_s1 + $0x530] ss:$12 sps:$4 sm:$0xff]   ;;  %v2226_v8 = vld [vmem:[%s2921_s1 + $0x458] ss:$12 sps:$4 sm:$0xff]  }
  0x6d   :  { %1511 = vmatprep.subr.bf16.mxu1 %v2165_v9  ;;  %v2227_v9 = vld [vmem:[%s2921_s1 + $0x5d8] ss:$12 sps:$4 sm:$0xff]  }
  0x6f   :  { %1471 = vmatpush2.bf16.msra.mxu0 %v2160_v10  ;;  %v2228_v10 = vld [vmem:[%s2921_s1 + $0x398] ss:$12 sps:$4 sm:$0xff]  }
  0x70   :  { %1512 = vmatpush2.bf16.msra.mxu1 %v2163_v11  ;;  %1472 = vmatprep.subr.bf16.mxu0 %v2168_v12  ;;  %v2229_v11 = vld [vmem:[%s2921_s1 + $0x518] ss:$12 sps:$4 sm:$0xff]   ;;  %v2230_v12 = vld [vmem:[%s2921_s1 + $0x440] ss:$12 sps:$4 sm:$0xff]  }
  0x71   :  { %1513 = vmatprep.subr.bf16.mxu1 %v2171_v13  ;;  %v2233_v13 = vld [vmem:[%s2921_s1 + $0x500] ss:$12 sps:$4 sm:$0xff]  }
  0x73   :  { %1473 = vmatpush2.bf16.msra.mxu0 %v2166_v16  ;;  %v2234_v16 = vld [vmem:[%s2921_s1 + $0x428] ss:$12 sps:$4 sm:$0xff]  }
  0x74   :  { %1514 = vmatpush2.bf16.msra.mxu1 %v2169_v17  ;;  %1474 = vmatprep.subr.bf16.mxu0 %v2174_v18  ;;  %v2237_v17 = vld [vmem:[%s2921_s1 + $0x4e8] ss:$12 sps:$4 sm:$0xff]   ;;  %v2238_v18 = vld [vmem:[%s2921_s1 + $0x410] ss:$12 sps:$4 sm:$0xff]  }
  0x75   :  { %1515 = vmatprep.subr.bf16.mxu1 %v2177_v19  ;;  %v2239_v19 = vld [vmem:[%s2921_s1 + $0x590] ss:$12 sps:$4 sm:$0xff]  }
  0x77   :  { %1475 = vmatpush2.bf16.msra.mxu0 %v2172_v20  ;;  %v2240_v20 = vld [vmem:[%s2921_s1 + $0x350] ss:$12 sps:$4 sm:$0xff]  }
  0x78   :  { %1516 = vmatpush2.bf16.msra.mxu1 %v2175_v21  ;;  %1476 = vmatprep.subr.bf16.mxu0 %v2180_v24  ;;  %v2241_v21 = vld [vmem:[%s2921_s1 + $0x4d0] ss:$12 sps:$4 sm:$0xff]   ;;  %v2242_v24 = vld [vmem:[%s2921_s1 + $0x3f8] ss:$12 sps:$4 sm:$0xff]  }
  0x79   :  { %1517 = vmatprep.subr.bf16.mxu1 %v2183_v25  ;;  %v2243_v25 = vld [vmem:[%s2921_s1 + $0x578] ss:$12 sps:$4 sm:$0xff]  }
  0x7b   :  { %1477 = vmatpush2.bf16.msra.mxu0 %v2178_v26  ;;  %v2244_v26 = vld [vmem:[%s2921_s1 + $0x338] ss:$12 sps:$4 sm:$0xff]  }
  0x7c   :  { %1518 = vmatpush2.bf16.msra.mxu1 %v2181_v27  ;;  %1478 = vmatprep.subr.bf16.mxu0 %v2186_v30  ;;  %v2245_v27 = vld [vmem:[%s2921_s1 + $0x4b8] ss:$12 sps:$4 sm:$0xff]   ;;  %v2246_v30 = vld [vmem:[%s2921_s1 + $0x3e0] ss:$12 sps:$4 sm:$0xff]  }
  0x7d   :  { %1519 = vmatprep.subr.bf16.mxu1 %v2189_v31  ;;  %v2247_v31 = vld [vmem:[%s2921_s1 + $0x560] ss:$12 sps:$4 sm:$0xff]  }
  0x7f   :  { %1479 = vmatpush2.bf16.msra.mxu0 %v2184_v32  ;;  %v2248_v32 = vld [vmem:[%s2921_s1 + $0x320] ss:$12 sps:$4 sm:$0xff]  }
  0x80   :  { %1520 = vmatpush2.bf16.msra.mxu1 %v2187_v33  ;;  %1907 = vmatprep.subr.bf16.mxu0 %v2190_v34  ;;  %v2249_v33 = vld [vmem:[%s2921_s1 + $0x4a0] ss:$12 sps:$4 sm:$0xff]   ;;  %v2250_v34 = vld [vmem:[%s2921_s1 + $0x3c8] ss:$12 sps:$4 sm:$0xff]  }
  0x81   :  { %1929 = vmatprep.subr.bf16.mxu1 %v2191_v35  ;;  %v2251_v35 = vld [vmem:[%s2921_s1 + $0x548] ss:$12 sps:$4 sm:$0xff]  }
  0x82   :  { %1481 = vmatmul.mubr.bf16.vlgmr.msra.gmra.mxu0 %v2711_v37 }
  0x83   :  { %1522 = vmatmul.mubr.bf16.vlgmr.msra.gmra.mxu1 %v2715_v38  ;;  %1908 = vmatpush3.bf16.msra.mxu0 %v2192_v36  ;;  %v2252_v36 = vld [vmem:[%s2921_s1 + $0x308] ss:$12 sps:$4 sm:$0xff]  }
  0x84   :  { %1930 = vmatpush3.bf16.msra.mxu1 %v2193_v39  ;;  %1909 = vmatprep.subr.bf16.mxu0 %v2194_v40  ;;  %v2253_v39 = vld [vmem:[%s2921_s1 + $0x488] ss:$12 sps:$4 sm:$0xff]   ;;  %v329_v40 = vsub.s32 0, %v2392_v43 }
  0x85   :  { %1931 = vmatprep.subr.bf16.mxu1 %v2195_v14  ;;  %1562 = vmatprep.mubr.bf16.mxu0 %v2435_v61  ;;  %v2204_v61 = vld [vmem:[%s2921_s1 + $0x68] ss:$12 sps:$4 sm:$0xff]   ;;  %v325_v14 = vld [vmem:[%s2923_s2] sm:$0x7] }
  0x86   :  { %1602 = vmatprep.mubr.bf16.mxu1 %v2449_v3  ;;  %v2205_v3 = vld [vmem:[%s2921_s1 + $0x1e8] ss:$12 sps:$4 sm:$0xff]  }
  0x87   :  { %1910 = vmatpush3.bf16.msra.mxu0 %v2196_v15  ;;  %v333_v15 = vsub.s32 1, %v2392_v43 }
  0x88   :  { %1932 = vmatpush3.bf16.msra.mxu1 %v2197_v41  ;;  %1911 = vmatprep.subr.bf16.mxu0 %v2198_v42  ;;  %v330_v41 = vrot.slane %v325_v14, %v329_v40 }
  0x89   :  { %1933 = vmatprep.subr.bf16.mxu1 %v2199_v44  ;;  %v334_v42 = vrot.slane %v325_v14, %v333_v15 }
  0x8b   :  { %1912 = vmatpush3.bf16.msra.mxu0 %v2200_v45 }
  0x8c   :  { %1934 = vmatpush3.bf16.msra.mxu1 %v2201_v46  ;;  %1913 = vmatprep.subr.bf16.mxu0 %v2202_v47 }
  0x8d   :  { %1935 = vmatprep.subr.bf16.mxu1 %v2203_v48 }
  0x8f   :  { %1914 = vmatpush3.bf16.msra.mxu0 %v2204_v61 }
  0x90   :  { %1936 = vmatpush3.bf16.msra.mxu1 %v2205_v3  ;;  %1915 = vmatprep.subr.bf16.mxu0 %v2206_v50 }
  0x91   :  { %1937 = vmatprep.subr.bf16.mxu1 %v2207_v51 }
  0x93   :  { %1916 = vmatpush3.bf16.msra.mxu0 %v2208_v52 }
  0x94   :  { %1938 = vmatpush3.bf16.msra.mxu1 %v2209_v53  ;;  %1917 = vmatprep.subr.bf16.mxu0 %v2210_v54 }
  0x95   :  { %1939 = vmatprep.subr.bf16.mxu1 %v2211_v55 }
  0x97   :  { %1918 = vmatpush3.bf16.msra.mxu0 %v2212_v56 }
  0x98   :  { %1940 = vmatpush3.bf16.msra.mxu1 %v2213_v57  ;;  %1919 = vmatprep.subr.bf16.mxu0 %v2214_v58 }
  0x99   :  { %1941 = vmatprep.subr.bf16.mxu1 %v2215_v59 }
  0x9b   :  { %1920 = vmatpush3.bf16.msra.mxu0 %v2216_v60 }
  0x9c   :  { %1942 = vmatpush3.bf16.msra.mxu1 %v2217_v62  ;;  %1921 = vmatprep.subr.bf16.mxu0 %v2218_v63 }
  0x9d   :  { %1943 = vmatprep.subr.bf16.mxu1 %v2219_v0 }
  0x9f   :  { %1922 = vmatpush3.bf16.msra.mxu0 %v2220_v1 }
  0xa0   :  { %1944 = vmatpush3.bf16.msra.mxu1 %v2221_v2  ;;  %1951 = vmatprep.subr.bf16.mxu0 %v2222_v4 }
  0xa1   :  { %1973 = vmatprep.subr.bf16.mxu1 %v2223_v5 }
  0xa2   :  { %1563 = vmatmul.mubr.bf16.vlgmr.msra.gmra.mxu0 %v2502_v22  ;;  %v2231_v22 = vld [vmem:[%s2921_s1 + $0x5c0] ss:$12 sps:$4 sm:$0xff]  }
  0xa3   :  { %1603 = vmatmul.mubr.bf16.vlgmr.msra.gmra.mxu1 %v2504_v23  ;;  %1952 = vmatpush3.bf16.msra.mxu0 %v2224_v6  ;;  %v2232_v23 = vld [vmem:[%s2921_s1 + $0x380] ss:$12 sps:$4 sm:$0xff]  }
  0xa4   :  { %1974 = vmatpush3.bf16.msra.mxu1 %v2225_v7  ;;  %1953 = vmatprep.subr.bf16.mxu0 %v2226_v8 }
  0xa5   :  { %1975 = vmatprep.subr.bf16.mxu1 %v2227_v9  ;;  %1642 = vmatprep.mubr.bf16.mxu0 %v2518_v28  ;;  %v2235_v28 = vld [vmem:[%s2921_s1 + $0x5a8] ss:$12 sps:$4 sm:$0xff]  }
  0xa6   :  { %1682 = vmatprep.mubr.bf16.mxu1 %v2520_v29  ;;  %v2236_v29 = vld [vmem:[%s2921_s1 + $0x368] ss:$12 sps:$4 sm:$0xff]  }
  0xa7   :  { %1954 = vmatpush3.bf16.msra.mxu0 %v2228_v10 }
  0xa8   :  { %1976 = vmatpush3.bf16.msra.mxu1 %v2229_v11  ;;  %1955 = vmatprep.subr.bf16.mxu0 %v2230_v12  ;;  %v337_v12 = vsub.s32 2, %v2392_v43 }
  0xa9   :  { %1977 = vmatprep.subr.bf16.mxu1 %v2231_v22 }
  0xaa   :  { %v338_v22 = vrot.slane %v325_v14, %v337_v12 }
  0xab   :  { %1956 = vmatpush3.bf16.msra.mxu0 %v2232_v23 }
  0xac   :  { %1978 = vmatpush3.bf16.msra.mxu1 %v2233_v13  ;;  %1957 = vmatprep.subr.bf16.mxu0 %v2234_v16 }
  0xad   :  { %1979 = vmatprep.subr.bf16.mxu1 %v2235_v28 }
  0xaf   :  { %1958 = vmatpush3.bf16.msra.mxu0 %v2236_v29 }
  0xb0   :  { %1980 = vmatpush3.bf16.msra.mxu1 %v2237_v17  ;;  %1959 = vmatprep.subr.bf16.mxu0 %v2238_v18 }
  0xb1   :  { %1981 = vmatprep.subr.bf16.mxu1 %v2239_v19 }
  0xb3   :  { %1960 = vmatpush3.bf16.msra.mxu0 %v2240_v20 }
  0xb4   :  { %1982 = vmatpush3.bf16.msra.mxu1 %v2241_v21  ;;  %1961 = vmatprep.subr.bf16.mxu0 %v2242_v24 }
  0xb5   :  { %1983 = vmatprep.subr.bf16.mxu1 %v2243_v25 }
  0xb7   :  { %1962 = vmatpush3.bf16.msra.mxu0 %v2244_v26 }
  0xb8   :  { %1984 = vmatpush3.bf16.msra.mxu1 %v2245_v27  ;;  %1963 = vmatprep.subr.bf16.mxu0 %v2246_v30 }
  0xb9   :  { %1985 = vmatprep.subr.bf16.mxu1 %v2247_v31 }
  0xbb   :  { %1964 = vmatpush3.bf16.msra.mxu0 %v2248_v32 }
  0xbc   :  { %1986 = vmatpush3.bf16.msra.mxu1 %v2249_v33  ;;  %1965 = vmatprep.subr.bf16.mxu0 %v2250_v34 }
  0xbd   :  { %1987 = vmatprep.subr.bf16.mxu1 %v2251_v35 }
  0xbf   :  { %1966 = vmatpush3.bf16.msra.mxu0 %v2252_v36 }
  0xc0   :  { %1988 = vmatpush3.bf16.msra.mxu1 %v2253_v39 }
  0xc2   :  { %1643 = vmatmul.mubr.bf16.vlgmr.msra.gmra.mxu0 %v2711_v37 }
  0xc3   :  { %1683 = vmatmul.mubr.bf16.vlgmr.msra.gmra.mxu1 %v2715_v38 }
 0x102   :  { %v1400_v44 = vpop.f32.mrf.mxu0 }
 0x103   :  { %v1441_v45 = vpop.f32.mrf.mxu1  ;;  %v1401_v46 = vadd.f32 %v1400_v44, %v330_v41 }
 0x104   :  { %v1402_v47 = vpop.f32.mrf.mxu0 }
 0x105   :  { %v1443_v48 = vpop.f32.mrf.mxu1  ;;  %v1442_v61 = vadd.f32 %v1441_v45, %v1401_v46  ;;  %v1403_v3 = vadd.f32 %v1402_v47, %v334_v42 }
 0x106   :  { %v1404_v37 = vpop.f32.mrf.mxu0 }
 0x107   :  { %v1445_v50 = vpop.f32.mrf.mxu1  ;;  %v1444_v38 = vadd.f32 %v1443_v48, %v1403_v3 }
 0x108   :  { %v1405_v51 = vpop.f32.mrf.mxu0 }
 0x109   :  { %v1446_v52 = vpop.f32.mrf.mxu1 }
 0x142   :  { %v1482_v53 = vpop.f32.mrf.mxu0 }
 0x143   :  { %v1523_v54 = vpop.f32.mrf.mxu1  ;;  %v1483_v55 = vadd.f32 %v1482_v53, %v1442_v61 }
 0x144   :  { %v1484_v56 = vpop.f32.mrf.mxu0 }
 0x145   :  { %v1525_v57 = vpop.f32.mrf.mxu1  ;;  %v1524_v58 = vadd.f32 %v1523_v54, %v1483_v55  ;;  %v1485_v59 = vadd.f32 %v1484_v56, %v1444_v38 }
 0x146   :  { %v1486_v60 = vpop.f32.mrf.mxu0 }
 0x147   :  { %v1527_v62 = vpop.f32.mrf.mxu1  ;;  %v1526_v63 = vadd.f32 %v1525_v57, %v1485_v59 }
 0x148   :  { %v1487_v0 = vpop.f32.mrf.mxu0 }
 0x149   :  { %v1528_v1 = vpop.f32.mrf.mxu1  ;;  %v1693_v2 = vcombine.low %v1524_v58, %v1526_v63 }
 0x14b   :  { %v1700_v32 = vrot.slane %v1693_v2, %v2410_v49 }
 0x162   :  { %v1923_v4 = vpop.f32.mrf.mxu0 }
 0x163   :  { %v1945_v5 = vpop.f32.mrf.mxu1 }
 0x164   :  { %v1924_v6 = vpop.f32.mrf.mxu0 }
 0x165   :  { %v1946_v7 = vpop.f32.mrf.mxu1  ;;  %v1925_v23 = vadd.f32 %v1924_v6, %v1923_v4 }
 0x166   :  { %v1926_v8 = vpop.f32.mrf.mxu0  ;;  %v1947_v16 = vadd.f32 %v1946_v7, %v1945_v5 }
 0x167   :  { %v1948_v9 = vpop.f32.mrf.mxu1  ;;  %v1565_v13 = vadd.f32 %v1925_v23, %v338_v22 }
 0x168   :  { %v1927_v10 = vpop.f32.mrf.mxu0 }
 0x169   :  { %v1949_v11 = vpop.f32.mrf.mxu1  ;;  %v1605_v19 = vadd.f32 %v1947_v16, %v1565_v13 }
 0x182   :  { %v1967_v28 = vpop.f32.mrf.mxu0 }
 0x183   :  { %v1989_v29 = vpop.f32.mrf.mxu1 }
 0x184   :  { %v1968_v17 = vpop.f32.mrf.mxu0 }
 0x185   :  { %v1990_v18 = vpop.f32.mrf.mxu1  ;;  %v1969_v20 = vadd.f32 %v1968_v17, %v1967_v28 }
 0x186   :  { %v1970_v21 = vpop.f32.mrf.mxu0  ;;  %v1991_v26 = vadd.f32 %v1990_v18, %v1989_v29 }
 0x187   :  { %v1992_v24 = vpop.f32.mrf.mxu1  ;;  %v1645_v25 = vadd.f32 %v1969_v20, %v1605_v19 }
 0x188   :  { %v1971_v27 = vpop.f32.mrf.mxu0 }
 0x189   :  { %v1993_v30 = vpop.f32.mrf.mxu1  ;;  %v1685_v31 = vadd.f32 %v1991_v26, %v1645_v25 }
 0x18b   :  { %v1707_v43 = vrot.slane %v1685_v31, %v2410_v49 }
 0x18d   :  { %v1708_v33 = vcombine.low %v1700_v32, %v1707_v43 }
 0x18f   :  { %1710 = vst [vmem:[%s2924_s3] sm:$0x3f] %v1708_v33 }

// kernel: pointnet_autoencoder_forward.4
= control target key start
LH: loop header
LB: loop body
LE: loop exit
PB: predicated region body
PF: predicated region fallthrough
CT: control target
= control target key end

     0   :  { %s5235_s27 = smov 0   ;;  %s5237_s28 = smov 0   ;;  %s8259_s0 = inlined_call_operand.vmem [shape: f32[2,128,3], index: 0, kind: input, shape index: {}]   ;;  %s8260_s1 = inlined_call_operand.vmem [shape: bf16[2,3,64], index: 1, kind: input, shape index: {}]   ;;  %s8261_s2 = inlined_call_operand.vmem [shape: f32[1,64], index: 2, kind: input, shape index: {}]   ;;  %s8262_s3 = inlined_call_operand.vmem [shape: f32[1,64], index: 3, kind: input, shape index: {}]   ;;  %s8263_s4 = inlined_call_operand.vmem [shape: bf16[64,128], index: 4, kind: input, shape index: {}]   ;;  %s8264_s5 = inlined_call_operand.vmem [shape: f32[1,128], index: 5, kind: input, shape index: {}]   ;;  %s8265_s6 = inlined_call_operand.vmem [shape: f32[1,128], index: 6, kind: input, shape index: {}]   ;;  %s8266_s7 = inlined_call_operand.vmem [shape: bf16[128,1024], index: 7, kind: input, shape index: {}]   ;;  %s8267_s8 = inlined_call_operand.vmem [shape: f32[1,1024], index: 8, kind: input, shape index: {}]   ;;  %s8268_s9 = inlined_call_operand.vmem [shape: f32[1,1024], index: 9, kind: input, shape index: {}]   ;;  %s8269_s10 = inlined_call_operand.vmem [shape: f32[1024,66], index: 10, kind: input, shape index: {}]   ;;  %s8270_s11 = inlined_call_operand.vmem [shape: f32[1,66], index: 11, kind: input, shape index: {}]   ;;  %s8271_s12 = inlined_call_operand.vmem [shape: f32[66,100], index: 12, kind: input, shape index: {}]   ;;  %s8272_s13 = inlined_call_operand.vmem [shape: f32[1,100], index: 13, kind: input, shape index: {}]   ;;  %s8273_s14 = inlined_call_operand.vmem [shape: f32[100,512], index: 14, kind: input, shape index: {}]   ;;  %s8274_s15 = inlined_call_operand.vmem [shape: f32[1,512], index: 15, kind: input, shape index: {}]   ;;  %s8275_s16 = inlined_call_operand.vmem [shape: f32[512,1024], index: 16, kind: input, shape index: {}]   ;;  %s8276_s17 = inlined_call_operand.vmem [shape: f32[1,1024], index: 17, kind: input, shape index: {}]   ;;  %s8277_s18 = inlined_call_operand.vmem [shape: f32[2,1,1024], index: 18, kind: output, shape index: {}]  }
   0x1   :  { %8278 = sst [smem:[#allocation3_spill]] %s8259_s0  ;;  %s5239_s29 = smov 0  }
   0x2   :  { %8279 = sst [smem:[#allocation4_spill]] %s8260_s1 }
   0x3   :  { %8280 = sst [smem:[#allocation5_spill]] %s8261_s2 }
   0x4 LB: > { %s40_s30 = sadd.s32 1, %s5129_s28  ;;  %p4740_p0 = scmp.ge.s32.totalorder %s5133_s29, 1  ;;  %s5133_s29 = sphi %s5239_s29, %s28_s29   ;;  %s5129_s28 = sphi %s5237_s28, %s8285_s28   ;;  %s5125_s27 = sphi %s5235_s27, %s8284_s27  }
   0x5   : > { %p42_p1 = scmp.ge.s32.totalorder %s40_s30, 2  ;;  %p540_p2 = scmp.lt.s32.totalorder %s5133_s29, 3 }
   0x7   : > { %s8287_s30 = smov (%p42_p1, %s40_s30), 0  ;;  %p541_p3 = pnand %p4740_p0, %p540_p2 }
   0x8   : > { %p602_p4 = scmp.lt.s32.totalorder (!%p541_p3), %s5125_s27, 1  ;;  %s8281_s21 = sld [smem:[#allocation3_spill]] (!%p541_p3) }
   0x9   : > { %544 = sbr.rel (%p541_p3) target bundleno = 1829 (0x725), region = 92  ;;  %s8282_s24 = sld [smem:[#allocation4_spill]] (!%p541_p3) }
   0xe   : > { %vm675_vm0 = vcmask 1040384   ;;  %vm676_vm1 = vcmask 1041408   ;;  %v5135_v0 = vmov 65535   ;;  %s8289_s27 = smov (!%p602_p4, %s5125_s27), 1  ;;  %vm650_vm2 = vcmask 23552   ;;  %v5107_v29 = vld [vmem:[%s8263_s4 + $0x18] sm:$0xff]  }
   0xf   : > { %v677_v1 = vsel %vm675_vm0, 4294967295, %v5135_v0  ;;  %s4843_s0 = sshll.u32 %s8289_s27, 7  ;;  %s4743_s19 = sshll.u32 %s8289_s27, 1  ;;  %5033 = vmatprep.subr.bf16.mxu1 %v5107_v29  ;;  %v5108_v30 = vld [vmem:[%s8263_s4 + $0x10] sm:$0xff]   ;;  %v5109_v31 = vld [vmem:[%s8263_s4 + $0x8] sm:$0xff]   ;;  %v5110_v32 = vld [vmem:[%s8263_s4] sm:$0xff]  }
  0x10   : > { %v678_v2 = vsel %vm676_vm1, %v677_v1, 0  ;;  %s5261_s22 = scalar_lea.vmem %s8281_s21, %s4843_s0  ;;  %s614_s25 = scalar_lea.vmem %s8282_s24, %s4743_s19  ;;  %5034 = vmatpush3.bf16.msra.mxu1 %v5107_v29  ;;  %v1129_v33 = vld [vmem:[%s8266_s7 + $0x1c0] sm:$0xff]  ;;  %v5311_v35 = vld [vmem:[%s8266_s7 + $0x1c8] sm:$0xff]  ;;  %vm881_vm3 = vcmask 523264   ;;  %vm5139_vm4 = vmmov 0   ;;  %vm3309_vm5 = vcmask 1043456  }
  0x11   : > { %v625_v3 = vld [vmem:[%s614_s25] sm:$0x3]  ;;  %v627_v5 = vld [vmem:[%s5261_s22 + $0x8] sm:$0xff]  ;;  %v628_v8 = vld [vmem:[%s5261_s22 + $0x10] sm:$0xff]  ;;  %5035 = vmatprep.subr.bf16.mxu1 %v5108_v30  ;;  %s8283_s0 = sld [smem:[#allocation5_spill]]  ;;  %vm3154_vm6 = vcmask 539648  }
  0x12   : > { %v626_v4 = vld [vmem:[%s5261_s22] sm:$0xff]  ;;  %v680_v6 = vand.u32 %v678_v2, %v625_v3  ;;  %v629_v9 = vld [vmem:[%s5261_s22 + $0x18] sm:$0xff]  ;;  %v631_v11 = vld [vmem:[%s5261_s22 + $0x28] sm:$0xff]  ;;  %vm3305_vm7 = vcmask 818176   ;;  %s4744_s23 = sshll.u32 %s8289_s27, 3 }
  0x13   : > { %v642_v7 = vpack.c.bf16 %v627_v5, %v626_v4  ;;  %v630_v10 = vld [vmem:[%s5261_s22 + $0x20] sm:$0xff]  ;;  %v643_v12 = vpack.c.bf16 %v629_v9, %v628_v8  ;;  %v632_v14 = vld [vmem:[%s5261_s22 + $0x30] sm:$0xff]  ;;  %v633_v15 = vld [vmem:[%s5261_s22 + $0x38] sm:$0xff]  ;;  %s618_s26 = scalar_lea.vmem %s8277_s18, %s4744_s23 }
  0x14   : > { %5015 = vmatprep.subr.bf16.mxu0 %v680_v6  ;;  %v644_v13 = vpack.c.bf16 %v631_v11, %v630_v10  ;;  %v634_v16 = vld [vmem:[%s5261_s22 + $0x40] sm:$0xff]  ;;  %v635_v17 = vld [vmem:[%s5261_s22 + $0x48] sm:$0xff]  ;;  %v645_v18 = vpack.c.bf16 %v633_v15, %v632_v14  ;;  %v636_v20 = vld [vmem:[%s5261_s22 + $0x50] sm:$0xff]  ;;  %5036 = vmatpush3.bf16.msra.mxu1 %v5108_v30 }
  0x15   : > { %5017 = vmatprep.mubr.msk.bf16.mxu0 %vm650_vm2, %v642_v7  ;;  %5016 = vmatpush3.bf16.msra.mxu0 %v680_v6  ;;  %v646_v19 = vpack.c.bf16 %v635_v17, %v634_v16  ;;  %v637_v21 = vld [vmem:[%s5261_s22 + $0x58] sm:$0xff]  ;;  %v638_v22 = vld [vmem:[%s5261_s22 + $0x60] sm:$0xff]  ;;  %v639_v23 = vld [vmem:[%s5261_s22 + $0x68] sm:$0xff] }
  0x16   : > { %v647_v24 = vpack.c.bf16 %v637_v21, %v636_v20  ;;  %v648_v25 = vpack.c.bf16 %v639_v23, %v638_v22  ;;  %v640_v26 = vld [vmem:[%s5261_s22 + $0x70] sm:$0xff]  ;;  %v641_v27 = vld [vmem:[%s5261_s22 + $0x78] sm:$0xff]  ;;  %5037 = vmatprep.subr.bf16.mxu1 %v5109_v31  ;;  %v1133_v34 = vld [vmem:[%s8266_s7 + $0x1e0] sm:$0xff] }
  0x17   : > { %v649_v28 = vpack.c.bf16 %v641_v27, %v640_v26  ;;  %v4825_v36 = vcombine.low %v1129_v33, %v1133_v34  ;;  %v4826_v37 = vcombine.high %v1129_v33, %v1133_v34  ;;  %v5316_v38 = vld [vmem:[%s8266_s7 + $0x1e8] sm:$0xff]  ;;  %v1121_v39 = vld [vmem:[%s8266_s7 + $0x180] sm:$0xff] }
  0x18   : > { %5018 = vmatmul.mubr.msk.bf16.vlgmr.msra.gmra.mxu0 %vm650_vm2, %v643_v12  ;;  %5038 = vmatpush3.bf16.msra.mxu1 %v5109_v31  ;;  %v1125_v40 = vld [vmem:[%s8266_s7 + $0x1a0] sm:$0xff]  ;;  %v4827_v41 = vcombine.low %v5311_v35, %v5316_v38  ;;  %v4828_v42 = vcombine.high %v5311_v35, %v5316_v38  ;;  %v1122_v14 = vld [vmem:[%s8266_s7 + $0x188] sm:$0xff] }
  0x19   : > { %5021 = vmatprep.mubr.msk.bf16.mxu0 %vm650_vm2, %v644_v13  ;;  %5039 = vmatprep.subr.bf16.mxu1 %v5110_v32  ;;  %v4818_v43 = vcombine.high %v1121_v39, %v1125_v40  ;;  %v1113_v44 = vld [vmem:[%s8266_s7 + $0x140] sm:$0xff]  ;;  %v4817_v46 = vcombine.low %v1121_v39, %v1125_v40  ;;  %v1126_v15 = vld [vmem:[%s8266_s7 + $0x1a8] sm:$0xff] }
  0x1a   : > { %1457 = vmatprep.subr.bf16.mxu0 %v4826_v37  ;;  %v1117_v45 = vld [vmem:[%s8266_s7 + $0x160] sm:$0xff]  ;;  %v1114_v27 = vld [vmem:[%s8266_s7 + $0x148] sm:$0xff]  ;;  %v4819_v31 = vcombine.low %v1122_v14, %v1126_v15 }
  0x1b   : > { %1458 = vmatpush1.bf16.msra.mxu0 %v4825_v36  ;;  %v4810_v47 = vcombine.high %v1113_v44, %v1117_v45  ;;  %v1105_v48 = vld [vmem:[%s8266_s7 + $0x100] sm:$0xff]  ;;  %v4809_v50 = vcombine.low %v1113_v44, %v1117_v45  ;;  %v1110_v44 = vld [vmem:[%s8266_s7 + $0x128] sm:$0xff] }
  0x1c   : > { %5040 = vmatpush3.bf16.msra.mxu1 %v5110_v32  ;;  %1459 = vmatprep.subr.bf16.mxu0 %v4818_v43  ;;  %v1109_v49 = vld [vmem:[%s8266_s7 + $0x120] sm:$0xff]  ;;  %v1106_v43 = vld [vmem:[%s8266_s7 + $0x108] sm:$0xff] }
  0x1d   : > { %1570 = vmatprep.subr.bf16.mxu1 %v4828_v42  ;;  %v4802_v51 = vcombine.high %v1105_v48, %v1109_v49  ;;  %v1097_v52 = vld [vmem:[%s8266_s7 + $0xc0] sm:$0xff]  ;;  %v4801_v54 = vcombine.low %v1105_v48, %v1109_v49 }
  0x1e   : > { %v1101_v53 = vld [vmem:[%s8266_s7 + $0xe0] sm:$0xff] }
  0x1f   : > { %1460 = vmatpush1.bf16.msra.mxu0 %v4817_v46  ;;  %v4794_v55 = vcombine.high %v1097_v52, %v1101_v53  ;;  %v4793_v56 = vcombine.low %v1097_v52, %v1101_v53  ;;  %v5349_v58 = vld [vmem:[%s8283_s0] ss:$0 sm:$0xff]  ;;  %v1098_v53 = vld [vmem:[%s8266_s7 + $0xc8] sm:$0xff] }
  0x20   : > { %5022 = vmatmul.mubr.msk.bf16.gmra.mxu0 %vm650_vm2, %v645_v18  ;;  %1461 = vmatprep.subr.bf16.mxu0 %v4810_v47  ;;  %v5356_v63 = vld [vmem:[%s8262_s3] ss:$0 sm:$0xff] }
  0x21   : > { %5025 = vmatprep.mubr.msk.bf16.mxu0 %vm650_vm2, %v646_v19 }
  0x23   : > { %1462 = vmatpush1.bf16.msra.mxu0 %v4809_v50  ;;  %v4804_v50 = vcombine.high %v1106_v43, %v1110_v44 }
  0x24   : > { %1463 = vmatprep.subr.bf16.mxu0 %v4802_v51 }
  0x27   : > { %1464 = vmatpush1.bf16.msra.mxu0 %v4801_v54  ;;  %v1102_v54 = vld [vmem:[%s8266_s7 + $0xe8] sm:$0xff] }
  0x28   : > { %5026 = vmatmul.mubr.msk.bf16.gmra.mxu0 %vm650_vm2, %v647_v24  ;;  %1465 = vmatprep.subr.bf16.mxu0 %v4794_v55  ;;  %v4820_v24 = vcombine.high %v1122_v14, %v1126_v15 }
  0x29   : > { %5029 = vmatprep.mubr.msk.bf16.mxu0 %vm650_vm2, %v648_v25 }
  0x2b   : > { %1466 = vmatpush1.bf16.msra.mxu0 %v4793_v56 }
  0x30   : > { %5030 = vmatmul.mubr.msk.bf16.gmra.mxu0 %vm650_vm2, %v649_v28  ;;  %v1118_v28 = vld [vmem:[%s8266_s7 + $0x168] sm:$0xff] }
  0x31   : > { %v4812_v39 = vcombine.high %v1114_v27, %v1118_v28  ;;  %v4811_v48 = vcombine.low %v1114_v27, %v1118_v28  ;;  %v1081_v27 = vld [vmem:[%s8266_s7 + $0x40] sm:$0xff] }
  0x32   : > { %v1085_v28 = vld [vmem:[%s8266_s7 + $0x60] sm:$0xff] }
  0xd8   : > { %v5019_v57 = vpop.f32.mrf.mxu0 }
  0xd9   : > { %v788_v61 = vmul.f32 %v5019_v57, %v5349_v58  ;;  %v4803_v57 = vcombine.low %v1106_v43, %v1110_v44 }
  0xda   : > { %v716_v59 = vpop.f32.mrf.mxu0 }
  0xdb   : > { %v786_v60 = vmul.f32 %v5349_v58, %v716_v59  ;;  %v811_v5 = vadd.f32 %v5356_v63, %v788_v61 }
  0xdc   : > { %v5020_v62 = vpop.f32.mrf.mxu0 }
  0xdd   : > { %v789_v0 = vmul.f32 %v5020_v62, %v5349_v58  ;;  %v809_v2 = vadd.f32 %v5356_v63, %v786_v60  ;;  %v827_v16 = vmax.f32 %v811_v5, 0.0 }
  0xde   : > { %v719_v1 = vpop.f32.mrf.mxu0 }
  0xdf   : > { %v812_v3 = vadd.f32 %v5356_v63, %v789_v0  ;;  %v787_v4 = vmul.f32 %v5349_v58, %v719_v1  ;;  %v825_v11 = vmax.f32 %v809_v2, 0.0  ;;  %v4796_v1 = vcombine.high %v1098_v53, %v1102_v54 }
  0xe0   : > { %v5023_v6 = vpop.f32.mrf.mxu0 }
  0xe1   : > { %v810_v7 = vadd.f32 %v5356_v63, %v787_v4  ;;  %v792_v8 = vmul.f32 %v5023_v6, %v5349_v58  ;;  %v828_v9 = vmax.f32 %v812_v3, 0.0 }
  0xe2   : > { %v732_v10 = vpop.f32.mrf.mxu0 }
  0xe3   : > { %v826_v12 = vmax.f32 %v810_v7, 0.0  ;;  %v790_v13 = vmul.f32 %v5349_v58, %v732_v10  ;;  %v815_v17 = vadd.f32 %v5356_v63, %v792_v8  ;;  %v842_v22 = vpack.c.bf16 %v828_v9, %v827_v16 }
  0xe4   : > { %v5024_v18 = vpop.f32.mrf.mxu0  ;;  %v4795_v10 = vcombine.low %v1098_v53, %v1102_v54  ;;  %v5476_v53 = vld [vmem:[%s8264_s5] ss:$0 sm:$0xff] }
  0xe5   : > { %v813_v19 = vadd.f32 %v5356_v63, %v790_v13  ;;  %v793_v20 = vmul.f32 %v5024_v18, %v5349_v58  ;;  %v841_v21 = vpack.c.bf16 %v826_v12, %v825_v11  ;;  %v831_v29 = vmax.f32 %v815_v17, 0.0 }
  0xe6   : > { %v735_v23 = vpop.f32.mrf.mxu0 }
  0xe7   : > { %v816_v25 = vadd.f32 %v5356_v63, %v793_v20  ;;  %v791_v26 = vmul.f32 %v5349_v58, %v735_v23  ;;  %5041 = vmatprep.mubr.msk.bf16.mxu1 %vm881_vm3, %v841_v21  ;;  %v829_v32 = vmax.f32 %v813_v19, 0.0  ;;  %v1089_v21 = vld [vmem:[%s8266_s7 + $0x80] sm:$0xff]  ;;  %v1094_v23 = vld [vmem:[%s8266_s7 + $0xa8] sm:$0xff] }
  0xe8   : > { %5042 = vmatmul.mubr.msk.bf16.vlgmr.msra.gmra.mxu1 %vm881_vm3, %v842_v22  ;;  %v5027_v30 = vpop.f32.mrf.mxu0 }
  0xe9   : > { %v832_v33 = vmax.f32 %v816_v25, 0.0  ;;  %v814_v34 = vadd.f32 %v5356_v63, %v791_v26  ;;  %v796_v36 = vmul.f32 %v5027_v30, %v5349_v58  ;;  %1571 = vmatpush1.bf16.msra.mxu1 %v4827_v41  ;;  %v4778_v30 = vcombine.high %v1081_v27, %v1085_v28 }
  0xea   : > { %v748_v37 = vpop.f32.mrf.mxu0  ;;  %1572 = vmatprep.subr.bf16.mxu1 %v4820_v24 }
  0xeb   : > { %v830_v40 = vmax.f32 %v814_v34, 0.0  ;;  %v794_v42 = vmul.f32 %v5349_v58, %v748_v37  ;;  %v844_v45 = vpack.c.bf16 %v832_v33, %v831_v29  ;;  %v819_v46 = vadd.f32 %v5356_v63, %v796_v36  ;;  %v1082_v29 = vld [vmem:[%s8266_s7 + $0x48] sm:$0xff]  ;;  %v1073_v36 = vld [vmem:[%s8266_s7] sm:$0xff] }
  0xec   : > { %v5028_v47 = vpop.f32.mrf.mxu0  ;;  %v1077_v37 = vld [vmem:[%s8266_s7 + $0x20] sm:$0xff] }
  0xed   : > { %v843_v35 = vpack.c.bf16 %v830_v40, %v829_v32  ;;  %v817_v38 = vadd.f32 %v5356_v63, %v794_v42  ;;  %v797_v41 = vmul.f32 %v5028_v47, %v5349_v58  ;;  %1573 = vmatpush1.bf16.msra.mxu1 %v4819_v31  ;;  %v835_v55 = vmax.f32 %v819_v46, 0.0  ;;  %v1086_v31 = vld [vmem:[%s8266_s7 + $0x68] sm:$0xff]  ;;  %v1131_v47 = vld [vmem:[%s8266_s7 + $0x1d0] sm:$0xff] }
  0xee   : > { %v751_v49 = vpop.f32.mrf.mxu0  ;;  %1574 = vmatprep.subr.bf16.mxu1 %v4812_v39  ;;  %v4777_v32 = vcombine.low %v1081_v27, %v1085_v28  ;;  %v4779_v33 = vcombine.low %v1082_v29, %v1086_v31  ;;  %v4780_v34 = vcombine.high %v1082_v29, %v1086_v31  ;;  %v1074_v39 = vld [vmem:[%s8266_s7 + $0x8] sm:$0xff]  ;;  %v4770_v40 = vcombine.high %v1073_v36, %v1077_v37  ;;  %v1111_v29 = vld [vmem:[%s8266_s7 + $0x130] sm:$0xff]  ;;  %v1112_v31 = vld [vmem:[%s8266_s7 + $0x138] sm:$0xff] }
  0xef   : > { %v820_v51 = vadd.f32 %v5356_v63, %v797_v41  ;;  %5045 = vmatprep.mubr.msk.bf16.mxu1 %vm881_vm3, %v843_v35  ;;  %v795_v52 = vmul.f32 %v5349_v58, %v751_v49  ;;  %v833_v59 = vmax.f32 %v817_v38, 0.0  ;;  %v1078_v42 = vld [vmem:[%s8266_s7 + $0x28] sm:$0xff]  ;;  %v4769_v43 = vcombine.low %v1073_v36, %v1077_v37  ;;  %v1135_v35 = vld [vmem:[%s8266_s7 + $0x1f0] sm:$0xff]  ;;  %v1132_v38 = vld [vmem:[%s8266_s7 + $0x1d8] sm:$0xff] }
  0xf0   : > { %5046 = vmatmul.mubr.msk.bf16.gmra.mxu1 %vm881_vm3, %v844_v45  ;;  %v5031_v56 = vpop.f32.mrf.mxu0  ;;  %v4771_v44 = vcombine.low %v1074_v39, %v1078_v42  ;;  %v4772_v45 = vcombine.high %v1074_v39, %v1078_v42  ;;  %v5136_v46 = vmov 0   ;;  %v4829_v41 = vcombine.low %v1131_v47, %v1135_v35  ;;  %v1136_v49 = vld [vmem:[%s8266_s7 + $0x1f8] sm:$0xff]  ;;  %v1099_v42 = vld [vmem:[%s8266_s7 + $0xd0] sm:$0xff] }
  0xf1   : > { %v836_v60 = vmax.f32 %v820_v51, 0.0  ;;  %v818_v61 = vadd.f32 %v5356_v63, %v795_v52  ;;  %v800_v62 = vmul.f32 %v5031_v56, %v5349_v58  ;;  %1575 = vmatpush1.bf16.msra.mxu1 %v4811_v48  ;;  %1489 = vmatprep.mubr.bf16.mxu0 %v5136_v46  ;;  %v4830_v48 = vcombine.high %v1131_v47, %v1135_v35  ;;  %v1104_v47 = vld [vmem:[%s8266_s7 + $0xf8] sm:$0xff] }
  0xf2   : > { %v764_v0 = vpop.f32.mrf.mxu0  ;;  %1576 = vmatprep.subr.bf16.mxu1 %v4804_v50  ;;  %v4831_v50 = vcombine.low %v1132_v38, %v1136_v49  ;;  %v4832_v51 = vcombine.high %v1132_v38, %v1136_v49 }
  0xf3   : > { %v834_v2 = vmax.f32 %v818_v61, 0.0  ;;  %v798_v3 = vmul.f32 %v5349_v58, %v764_v0  ;;  %v846_v4 = vpack.c.bf16 %v836_v60, %v835_v55  ;;  %v823_v5 = vadd.f32 %v5356_v63, %v800_v62 }
  0xf4   : > { %v5032_v6 = vpop.f32.mrf.mxu0 }
  0xf5   : > { %v845_v7 = vpack.c.bf16 %v834_v2, %v833_v59  ;;  %v821_v8 = vadd.f32 %v5356_v63, %v798_v3  ;;  %v801_v9 = vmul.f32 %v5032_v6, %v5349_v58  ;;  %1577 = vmatpush1.bf16.msra.mxu1 %v4803_v57  ;;  %v839_v14 = vmax.f32 %v823_v5, 0.0  ;;  %v5482_v57 = vld [vmem:[%s8265_s6] ss:$0 sm:$0xff]  ;;  %v1123_v3 = vld [vmem:[%s8266_s7 + $0x190] sm:$0xff] }
  0xf6   : > { %v767_v11 = vpop.f32.mrf.mxu0  ;;  %1578 = vmatprep.subr.bf16.mxu1 %v4796_v1 }
  0xf7   : > { %5049 = vmatprep.mubr.msk.bf16.mxu1 %vm881_vm3, %v845_v7  ;;  %v824_v12 = vadd.f32 %v5356_v63, %v801_v9  ;;  %v799_v13 = vmul.f32 %v5349_v58, %v767_v11  ;;  %v837_v15 = vmax.f32 %v821_v8, 0.0  ;;  %v1093_v58 = vld [vmem:[%s8266_s7 + $0xa0] sm:$0xff]  ;;  %v1127_v7 = vld [vmem:[%s8266_s7 + $0x1b0] sm:$0xff]  ;;  %v1124_v8 = vld [vmem:[%s8266_s7 + $0x198] sm:$0xff] }
  0xf8   : > { %5050 = vmatmul.mubr.msk.bf16.gmra.mxu1 %vm881_vm3, %v846_v4  ;;  %v4786_v22 = vcombine.high %v1089_v21, %v1093_v58  ;;  %v4785_v24 = vcombine.low %v1089_v21, %v1093_v58  ;;  %v1128_v9 = vld [vmem:[%s8266_s7 + $0x1b8] sm:$0xff]  ;;  %v4821_v21 = vcombine.low %v1123_v3, %v1127_v7 }
  0xf9   : > { %v840_v16 = vmax.f32 %v824_v12, 0.0  ;;  %v822_v17 = vadd.f32 %v5356_v63, %v799_v13  ;;  %1579 = vmatpush1.bf16.msra.mxu1 %v4795_v10  ;;  %v1090_v63 = vld [vmem:[%s8266_s7 + $0x88] sm:$0xff]  ;;  %v1115_v13 = vld [vmem:[%s8266_s7 + $0x150] sm:$0xff]  ;;  %v4823_v58 = vcombine.low %v1124_v8, %v1128_v9 }
  0xfa   : > { %v4787_v25 = vcombine.low %v1090_v63, %v1094_v23  ;;  %v4788_v26 = vcombine.high %v1090_v63, %v1094_v23  ;;  %1467 = vmatprep.subr.bf16.mxu0 %v4786_v22 }
  0xfb   : > { %v838_v18 = vmax.f32 %v822_v17, 0.0  ;;  %v848_v19 = vpack.c.bf16 %v840_v16, %v839_v14  ;;  %1468 = vmatpush1.bf16.msra.mxu0 %v4785_v24  ;;  %v4824_v16 = vcombine.high %v1124_v8, %v1128_v9  ;;  %v1119_v17 = vld [vmem:[%s8266_s7 + $0x170] sm:$0xff]  ;;  %v1084_v8 = vld [vmem:[%s8266_s7 + $0x58] sm:$0xff] }
  0xfc   : > { %1580 = vmatprep.subr.bf16.mxu1 %v4788_v26  ;;  %1469 = vmatprep.subr.bf16.mxu0 %v4778_v30  ;;  %v4814_v23 = vcombine.high %v1115_v13, %v1119_v17  ;;  %v1107_v26 = vld [vmem:[%s8266_s7 + $0x110] sm:$0xff]  ;;  %v1108_v30 = vld [vmem:[%s8266_s7 + $0x118] sm:$0xff] }
  0xfd   : > { %v847_v20 = vpack.c.bf16 %v838_v18, %v837_v15  ;;  %1581 = vmatpush1.bf16.msra.mxu1 %v4787_v25  ;;  %v4822_v15 = vcombine.high %v1123_v3, %v1127_v7  ;;  %v1116_v18 = vld [vmem:[%s8266_s7 + $0x158] sm:$0xff]  ;;  %v4806_v39 = vcombine.high %v1107_v26, %v1111_v29  ;;  %v1087_v7 = vld [vmem:[%s8266_s7 + $0x70] sm:$0xff] }
  0xfe   : > { %1582 = vmatprep.subr.bf16.mxu1 %v4780_v34  ;;  %v1088_v9 = vld [vmem:[%s8266_s7 + $0x78] sm:$0xff] }
  0xff   : > { %5053 = vmatprep.mubr.msk.bf16.mxu1 %vm881_vm3, %v847_v20  ;;  %1470 = vmatpush1.bf16.msra.mxu0 %v4777_v32  ;;  %v4813_v32 = vcombine.low %v1115_v13, %v1119_v17 }
 0x100   : > { %5054 = vmatmul.mubr.msk.bf16.gmra.mxu1 %vm881_vm3, %v848_v19  ;;  %1471 = vmatprep.subr.bf16.mxu0 %v4770_v40  ;;  %v1120_v19 = vld [vmem:[%s8266_s7 + $0x178] sm:$0xff]  ;;  %v4808_v40 = vcombine.high %v1108_v30, %v1112_v31 }
 0x101   : > { %1583 = vmatpush1.bf16.msra.mxu1 %v4779_v33  ;;  %1602 = vmatprep.mubr.bf16.mxu1 %v5136_v46  ;;  %v4816_v24 = vcombine.high %v1116_v18, %v1120_v19  ;;  %v4815_v36 = vcombine.low %v1116_v18, %v1120_v19  ;;  %v4784_v18 = vcombine.high %v1084_v8, %v1088_v9  ;;  %v1075_v19 = vld [vmem:[%s8266_s7 + $0x10] sm:$0xff] }
 0x102   : > { %1584 = vmatprep.subr.bf16.mxu1 %v4772_v45  ;;  %v1100_v45 = vld [vmem:[%s8266_s7 + $0xd8] sm:$0xff] }
 0x103   : > { %1472 = vmatpush1.bf16.msra.mxu0 %v4769_v43 }
 0x104   : > { %1683 = vmatprep.subr.bf16.mxu0 %v4830_v48  ;;  %v4807_v48 = vcombine.low %v1108_v30, %v1112_v31 }
 0x105   : > { %1585 = vmatpush1.bf16.msra.mxu1 %v4771_v44  ;;  %v1103_v44 = vld [vmem:[%s8266_s7 + $0xf0] sm:$0xff] }
 0x106   : > { %1796 = vmatprep.subr.bf16.mxu1 %v4832_v51  ;;  %v4800_v51 = vcombine.high %v1100_v45, %v1104_v47 }
 0x1a8   : > { %v5043_v52 = vpop.f32.mrf.mxu1 }
 0x1a9   : > { %v1012_v4 = vmul.f32 %v5043_v52, %v5476_v53  ;;  %v1091_v52 = vld [vmem:[%s8266_s7 + $0x90] sm:$0xff] }
 0x1aa   : > { %v940_v54 = vpop.f32.mrf.mxu1 }
 0x1ab   : > { %v1010_v55 = vmul.f32 %v5476_v53, %v940_v54  ;;  %v1035_v20 = vadd.f32 %v5482_v57, %v1012_v4 }
 0x1ac   : > { %v5044_v56 = vpop.f32.mrf.mxu1 }
 0x1ad   : > { %v1033_v60 = vadd.f32 %v5482_v57, %v1010_v55  ;;  %v1013_v0 = vmul.f32 %v5044_v56, %v5476_v53  ;;  %v1051_v27 = vmax.f32 %v1035_v20, 0.0  ;;  %v1095_v56 = vld [vmem:[%s8266_s7 + $0xb0] sm:$0xff] }
 0x1ae   : > { %v943_v59 = vpop.f32.mrf.mxu1  ;;  %v4790_v3 = vcombine.high %v1091_v52, %v1095_v56 }
 0x1af   : > { %v1011_v61 = vmul.f32 %v5476_v53, %v943_v59  ;;  %v1049_v5 = vmax.f32 %v1033_v60, 0.0  ;;  %v1036_v11 = vadd.f32 %v5482_v57, %v1013_v0  ;;  %v1092_v59 = vld [vmem:[%s8266_s7 + $0x98] sm:$0xff] }
 0x1b0   : > { %v5486_v62 = vpop.f32.mrf.mxu1  ;;  %v1096_v60 = vld [vmem:[%s8266_s7 + $0xb8] sm:$0xff] }
 0x1b1   : > { %v1034_v1 = vadd.f32 %v5482_v57, %v1011_v61  ;;  %v1052_v22 = vmax.f32 %v1036_v11, 0.0  ;;  %v1016_v54 = vmul.f32 %v5486_v62, %v5476_v53  ;;  %v4797_v61 = vcombine.low %v1099_v42, %v1103_v44 }
 0x1b2   : > { %v956_v2 = vpop.f32.mrf.mxu1  ;;  %v4799_v62 = vcombine.low %v1100_v45, %v1104_v47  ;;  %v4792_v4 = vcombine.high %v1092_v59, %v1096_v60 }
 0x1b3   : > { %v1050_v6 = vmax.f32 %v1034_v1, 0.0  ;;  %v1014_v28 = vmul.f32 %v5476_v53, %v956_v2  ;;  %v5539_v33 = vpack.c.bf16 %v1052_v22, %v1051_v27  ;;  %v1080_v22 = vld [vmem:[%s8266_s7 + $0x38] sm:$0xff] }
 0x1b4   : > { %v5048_v10 = vpop.f32.mrf.mxu1 }
 0x1b5   : > { %v5504_v12 = vpack.c.bf16 %v1050_v6, %v1049_v5  ;;  %v1037_v43 = vadd.f32 %v5482_v57, %v1014_v28  ;;  %v1017_v35 = vmul.f32 %v5048_v10, %v5476_v53  ;;  %v1083_v5 = vld [vmem:[%s8266_s7 + $0x50] sm:$0xff]  ;;  %v1039_v6 = vadd.f32 %v5482_v57, %v1016_v54 }
 0x1b6   : > { %v959_v14 = vpop.f32.mrf.mxu1  ;;  %v4789_v10 = vcombine.low %v1091_v52, %v1095_v56  ;;  %v4782_v17 = vcombine.high %v1083_v5, %v1087_v7 }
 0x1b7   : > { %1490 = vmatmul.mubr.bf16.vlgmr.msra.gmra.mxu0 %v5504_v12  ;;  %1603 = vmatmul.mubr.bf16.vlgmr.msra.gmra.mxu1 %v5504_v12  ;;  %v1015_v63 = vmul.f32 %v5476_v53, %v959_v14  ;;  %v1053_v55 = vmax.f32 %v1037_v43, 0.0  ;;  %v1040_v0 = vadd.f32 %v5482_v57, %v1017_v35  ;;  %v1055_v20 = vmax.f32 %v1039_v6, 0.0  ;;  %v2738_v6 = vld [vmem:[%s8269_s10 + $0x168] sm:$0xff] }
 0x1b8   : > { %1684 = vmatpush1.bf16.msra.mxu0 %v4829_v41  ;;  %1797 = vmatpush1.bf16.msra.mxu1 %v4831_v50  ;;  %v5524_v25 = vpop.f32.mrf.mxu1  ;;  %v4805_v41 = vcombine.low %v1107_v26, %v1111_v29  ;;  %v4798_v50 = vcombine.high %v1099_v42, %v1103_v44 }
 0x1b9   : > { %1499 = vmatprep.mubr.bf16.mxu0 %v5136_v46  ;;  %1612 = vmatprep.mubr.bf16.mxu1 %v5136_v46  ;;  %v1038_v34 = vadd.f32 %v5482_v57, %v1015_v63  ;;  %v1056_v11 = vmax.f32 %v1040_v0, 0.0  ;;  %v4781_v63 = vcombine.low %v1083_v5, %v1087_v7  ;;  %v2754_v5 = vld [vmem:[%s8269_s10 + $0x1e8] sm:$0xff]  ;;  %v2721_v7 = vld [vmem:[%s8269_s10 + $0xe0] sm:$0xff] }
 0x1ba   : > { %1685 = vmatprep.subr.bf16.mxu0 %v4822_v15  ;;  %1798 = vmatprep.subr.bf16.mxu1 %v4824_v16  ;;  %v972_v37 = vpop.f32.mrf.mxu1  ;;  %v4791_v15 = vcombine.low %v1092_v59, %v1096_v60 }
 0x1bb   : > { %v1054_v38 = vmax.f32 %v1038_v34, 0.0  ;;  %v1018_v13 = vmul.f32 %v5476_v53, %v972_v37  ;;  %v1020_v34 = vmul.f32 %v5524_v25, %v5476_v53 }
 0x1bc   : > { %1686 = vmatpush1.bf16.msra.mxu0 %v4821_v21  ;;  %1799 = vmatpush1.bf16.msra.mxu1 %v4823_v58  ;;  %v5560_v49 = vpop.f32.mrf.mxu1  ;;  %v1079_v21 = vld [vmem:[%s8266_s7 + $0x30] sm:$0xff]  ;;  %v1076_v58 = vld [vmem:[%s8266_s7 + $0x18] sm:$0xff] }
 0x1bd   : > { %1687 = vmatprep.subr.bf16.mxu0 %v4814_v23  ;;  %1800 = vmatprep.subr.bf16.mxu1 %v4816_v24  ;;  %v5577_v1 = vpack.c.bf16 %v1054_v38, %v1053_v55  ;;  %v4783_v23 = vcombine.low %v1084_v8, %v1088_v9  ;;  %v5610_v24 = vpack.c.bf16 %v1056_v11, %v1055_v20  ;;  %v2705_v8 = vld [vmem:[%s8269_s10 + $0x60] sm:$0xff]  ;;  %v2751_v20 = vld [vmem:[%s8269_s10 + $0x1d0] sm:$0xff] }
 0x1be   : > { %v975_v2 = vpop.f32.mrf.mxu1  ;;  %v1041_v26 = vadd.f32 %v5482_v57, %v1018_v13  ;;  %v4774_v29 = vcombine.high %v1075_v19, %v1079_v21  ;;  %v4776_v30 = vcombine.high %v1076_v58, %v1080_v22  ;;  %v4773_v31 = vcombine.low %v1075_v19, %v1079_v21  ;;  %v2753_v9 = vld [vmem:[%s8269_s10 + $0x1e0] sm:$0xff]  ;;  %v2720_v13 = vld [vmem:[%s8269_s10 + $0xd8] sm:$0xff]  ;;  %v2703_v19 = vld [vmem:[%s8269_s10 + $0x50] sm:$0xff] }
 0x1bf   : > { %1500 = vmatmul.mubr.bf16.gmra.mxu0 %v5539_v33  ;;  %1613 = vmatmul.mubr.bf16.gmra.mxu1 %v5539_v33  ;;  %v1019_v14 = vmul.f32 %v5476_v53, %v975_v2  ;;  %v1021_v37 = vmul.f32 %v5560_v49, %v5476_v53  ;;  %v1043_v42 = vadd.f32 %v5482_v57, %v1020_v34  ;;  %v2739_v2 = vld [vmem:[%s8269_s10 + $0x170] sm:$0xff]  ;;  %v2737_v11 = vld [vmem:[%s8269_s10 + $0x160] sm:$0xff] }
 0x1c0   : > { %1509 = vmatprep.mubr.bf16.mxu0 %v5136_v46  ;;  %1622 = vmatprep.mubr.bf16.mxu1 %v5136_v46  ;;  %v5055_v16 = vpop.f32.mrf.mxu1  ;;  %v2735_v21 = vld [vmem:[%s8269_s10 + $0x150] sm:$0xff]  ;;  %v5779_v34 = vld [vmem:[%s8268_s9] sm:$0xff] }
 0x1c1   : > { %1688 = vmatpush1.bf16.msra.mxu0 %v4813_v32  ;;  %1801 = vmatpush1.bf16.msra.mxu1 %v4815_v36  ;;  %v1042_v27 = vadd.f32 %v5482_v57, %v1019_v14  ;;  %v4775_v32 = vcombine.low %v1076_v58, %v1080_v22  ;;  %v1057_v36 = vmax.f32 %v1041_v26, 0.0  ;;  %v1044_v43 = vadd.f32 %v5482_v57, %v1021_v37  ;;  %v2704_v14 = vld [vmem:[%s8269_s10 + $0x58] sm:$0xff]  ;;  %v2718_v58 = vld [vmem:[%s8269_s10 + $0xc8] sm:$0xff]  ;;  %v2749_v37 = vld [vmem:[%s8269_s10 + $0x1c0] sm:$0xff] }
 0x1c2   : > { %1689 = vmatprep.subr.bf16.mxu0 %v4806_v39  ;;  %1802 = vmatprep.subr.bf16.mxu1 %v4808_v40  ;;  %v988_v28 = vpop.f32.mrf.mxu1  ;;  %v1059_v25 = vmax.f32 %v1043_v42, 0.0 }
 0x1c3   : > { %v1058_v39 = vmax.f32 %v1042_v27, 0.0  ;;  %v1060_v47 = vmax.f32 %v1044_v43, 0.0  ;;  %v1022_v35 = vmul.f32 %v5476_v53, %v988_v28  ;;  %v2702_v27 = vld [vmem:[%s8269_s10 + $0x48] sm:$0xff] }
 0x1c4   : > { %v5056_v40 = vpop.f32.mrf.mxu1  ;;  %v2750_v28 = vld [vmem:[%s8269_s10 + $0x1c8] sm:$0xff] }
 0x1c5   : > { %1690 = vmatpush1.bf16.msra.mxu0 %v4805_v41  ;;  %1803 = vmatpush1.bf16.msra.mxu1 %v4807_v48  ;;  %v1069_v44 = vpack.c.bf16 %v1058_v39, %v1057_v36  ;;  %v1070_v41 = vpack.c.bf16 %v1060_v47, %v1059_v25  ;;  %v1045_v48 = vadd.f32 %v5482_v57, %v1022_v35  ;;  %v2701_v36 = vld [vmem:[%s8269_s10 + $0x40] sm:$0xff] }
 0x1c6   : > { %1691 = vmatprep.subr.bf16.mxu0 %v4798_v50  ;;  %1804 = vmatprep.subr.bf16.mxu1 %v4800_v51  ;;  %v991_v45 = vpop.f32.mrf.mxu1  ;;  %v1024_v50 = vmul.f32 %v5055_v16, %v5476_v53  ;;  %v1025_v52 = vmul.f32 %v5056_v40, %v5476_v53 }
 0x1c7   : > { %1510 = vmatmul.mubr.bf16.gmra.mxu0 %v5577_v1  ;;  %1623 = vmatmul.mubr.bf16.gmra.mxu1 %v5577_v1  ;;  %v1023_v38 = vmul.f32 %v5476_v53, %v991_v45  ;;  %v1061_v51 = vmax.f32 %v1045_v48, 0.0  ;;  %v2724_v53 = vld [vmem:[%s8269_s10 + $0xf8] sm:$0xff] }
 0x1c8   : > { %1519 = vmatprep.mubr.bf16.mxu0 %v5136_v46  ;;  %1632 = vmatprep.mubr.bf16.mxu1 %v5136_v46  ;;  %v1047_v55 = vadd.f32 %v5482_v57, %v1024_v50  ;;  %v1048_v56 = vadd.f32 %v5482_v57, %v1025_v52 }
 0x1c9   : > { %1692 = vmatpush1.bf16.msra.mxu0 %v4797_v61  ;;  %1805 = vmatpush1.bf16.msra.mxu1 %v4799_v62  ;;  %v1046_v49 = vadd.f32 %v5482_v57, %v1023_v38  ;;  %v2708_v57 = vld [vmem:[%s8269_s10 + $0x78] sm:$0xff]  ;;  %v2755_v62 = vld [vmem:[%s8269_s10 + $0x1f0] sm:$0xff] }
 0x1ca   : > { %1693 = vmatprep.subr.bf16.mxu0 %v4790_v3  ;;  %1806 = vmatprep.subr.bf16.mxu1 %v4792_v4  ;;  %v1063_v60 = vmax.f32 %v1047_v55, 0.0  ;;  %v1064_v61 = vmax.f32 %v1048_v56, 0.0  ;;  %v2722_v3 = vld [vmem:[%s8269_s10 + $0xe8] sm:$0xff] }
 0x1cb   : > { %v1062_v54 = vmax.f32 %v1046_v49, 0.0  ;;  %v2706_v4 = vld [vmem:[%s8269_s10 + $0x68] sm:$0xff] }
 0x1cc   : > { %v1072_v0 = vpack.c.bf16 %v1064_v61, %v1063_v60 }
 0x1cd   : > { %1694 = vmatpush1.bf16.msra.mxu0 %v4789_v10  ;;  %1807 = vmatpush1.bf16.msra.mxu1 %v4791_v15  ;;  %v1071_v59 = vpack.c.bf16 %v1062_v54, %v1061_v51  ;;  %v1911_v10 = vlaneseq  ;;  %v2752_v15 = vld [vmem:[%s8269_s10 + $0x1d8] sm:$0xff] }
 0x1ce   : > { %1695 = vmatprep.subr.bf16.mxu0 %v4782_v17  ;;  %1808 = vmatprep.subr.bf16.mxu1 %v4784_v18  ;;  %v2736_v17 = vld [vmem:[%s8269_s10 + $0x158] sm:$0xff]  ;;  %v2719_v18 = vld [vmem:[%s8269_s10 + $0xd0] sm:$0xff] }
 0x1cf   : > { %1520 = vmatmul.mubr.bf16.gmra.mxu0 %v5610_v24  ;;  %1633 = vmatmul.mubr.bf16.gmra.mxu1 %v5610_v24  ;;  %v5719_v16 = vshrl.u32 %v1911_v10, 7 }
 0x1d0   : > { %1529 = vmatprep.mubr.bf16.mxu0 %v5136_v46  ;;  %1642 = vmatprep.mubr.bf16.mxu1 %v5136_v46 }
 0x1d1   : > { %1696 = vmatpush1.bf16.msra.mxu0 %v4781_v63  ;;  %1809 = vmatpush1.bf16.msra.mxu1 %v4783_v23  ;;  %v5740_v22 = vsub.s32 0, %v5719_v16  ;;  %v5743_v63 = vsub.s32 2, %v5719_v16  ;;  %v5748_v23 = vld [vmem:[%s8267_s8] sm:$0xff]  ;;  %v5754_v26 = vsub.s32 3, %v5719_v16 }
 0x1d2   : > { %1697 = vmatprep.subr.bf16.mxu0 %v4774_v29  ;;  %1810 = vmatprep.subr.bf16.mxu1 %v4776_v30 }
 0x1d3   : > { %v5764_v29 = vrot.slane %v5748_v23, %v5740_v22  ;;  %v5768_v30 = vrot.slane %v5748_v23, %v5743_v63  ;;  %v5793_v43 = vrot.slane %v5748_v23, %v5754_v26  ;;  %v5798_v45 = vrot.slane %v5779_v34, %v5740_v22 }
 0x1d4   : > { %v5803_v47 = vrot.slane %v5779_v34, %v5743_v63  ;;  %v5813_v50 = vrot.slane %v5779_v34, %v5754_v26 }
 0x1d5   : > { %1698 = vmatpush1.bf16.msra.mxu0 %v4773_v31  ;;  %1811 = vmatpush1.bf16.msra.mxu1 %v4775_v32  ;;  %v2734_v31 = vld [vmem:[%s8269_s10 + $0x148] sm:$0xff]  ;;  %v2717_v32 = vld [vmem:[%s8269_s10 + $0xc0] sm:$0xff] }
 0x1d6   : > { %4865 = vmatprep.subr.mxu0 %v2724_v53 }
 0x1d7   : > { %1530 = vmatmul.mubr.bf16.gmra.mxu0 %v1069_v44  ;;  %1643 = vmatmul.mubr.bf16.gmra.mxu1 %v1069_v44 }
 0x1d8   : > { %1539 = vmatprep.mubr.bf16.mxu0 %v5136_v46  ;;  %1652 = vmatprep.mubr.bf16.mxu1 %v5136_v46 }
 0x1df   : > { %1540 = vmatmul.mubr.bf16.gmra.mxu0 %v1070_v41  ;;  %1653 = vmatmul.mubr.bf16.gmra.mxu1 %v1070_v41 }
 0x1e0   : > { %1549 = vmatprep.mubr.bf16.mxu0 %v5136_v46  ;;  %1662 = vmatprep.mubr.bf16.mxu1 %v5136_v46 }
 0x1e7   : > { %1550 = vmatmul.mubr.bf16.gmra.mxu0 %v1071_v59  ;;  %1663 = vmatmul.mubr.bf16.gmra.mxu1 %v1071_v59 }
 0x1e8   : > { %1559 = vmatprep.mubr.bf16.mxu0 %v5136_v46  ;;  %1672 = vmatprep.mubr.bf16.mxu1 %v5136_v46 }
 0x1ef   : > { %1560 = vmatmul.mubr.bf16.gmra.mxu0 %v1072_v0  ;;  %1673 = vmatmul.mubr.bf16.gmra.mxu1 %v1072_v0 }
 0x1f0   : > { %1715 = vmatprep.mubr.bf16.mxu0 %v5136_v46  ;;  %1828 = vmatprep.mubr.bf16.mxu1 %v5136_v46 }
 0x1f7   : > { %1716 = vmatmul.mubr.bf16.vlgmr.msra.gmra.mxu0 %v5504_v12  ;;  %1829 = vmatmul.mubr.bf16.vlgmr.msra.gmra.mxu1 %v5504_v12  ;;  %v2756_v12 = vld [vmem:[%s8269_s10 + $0x1f8] sm:$0xff] }
 0x1f8   : > { %1725 = vmatprep.mubr.bf16.mxu0 %v5136_v46  ;;  %1838 = vmatprep.mubr.bf16.mxu1 %v5136_v46 }
 0x1f9   : > { %4866 = vmatpush3.msra.mxu0 %v2708_v57  ;;  %4900 = vmatprep.subr.mxu1 %v2756_v12 }
 0x1ff   : > { %1726 = vmatmul.mubr.bf16.gmra.mxu0 %v5539_v33  ;;  %1839 = vmatmul.mubr.bf16.gmra.mxu1 %v5539_v33  ;;  %v2723_v33 = vld [vmem:[%s8269_s10 + $0xf0] sm:$0xff] }
 0x200   : > { %1735 = vmatprep.mubr.bf16.mxu0 %v5136_v46  ;;  %1848 = vmatprep.mubr.bf16.mxu1 %v5136_v46 }
 0x201   : > { %4867 = vmatprep.subr.mxu0 %v2723_v33 }
 0x207   : > { %1736 = vmatmul.mubr.bf16.gmra.mxu0 %v5577_v1  ;;  %1849 = vmatmul.mubr.bf16.gmra.mxu1 %v5577_v1  ;;  %v2707_v1 = vld [vmem:[%s8269_s10 + $0x70] sm:$0xff] }
 0x208   : > { %1745 = vmatprep.mubr.bf16.mxu0 %v5136_v46  ;;  %1858 = vmatprep.mubr.bf16.mxu1 %v5136_v46 }
 0x209   : > { %4868 = vmatpush3.msra.mxu0 %v2707_v1 }
 0x20a   : > { %4869 = vmatprep.subr.mxu0 %v2722_v3 }
 0x20b   : > { %4870 = vmatpush3.msra.mxu0 %v2706_v4 }
 0x20c   : > { %4871 = vmatprep.subr.mxu0 %v2721_v7 }
 0x20d   : > { %4872 = vmatpush3.msra.mxu0 %v2705_v8 }
 0x20e   : > { %4873 = vmatprep.subr.mxu0 %v2720_v13 }
 0x20f   : > { %1746 = vmatmul.mubr.bf16.gmra.mxu0 %v5610_v24  ;;  %1859 = vmatmul.mubr.bf16.gmra.mxu1 %v5610_v24  ;;  %v5751_v24 = vsub.s32 1, %v5719_v16 }
 0x210   : > { %1755 = vmatprep.mubr.bf16.mxu0 %v5136_v46  ;;  %1868 = vmatprep.mubr.bf16.mxu1 %v5136_v46 }
 0x211   : > { %4874 = vmatpush3.msra.mxu0 %v2704_v14  ;;  %v5789_v42 = vrot.slane %v5748_v23, %v5751_v24  ;;  %v5808_v48 = vrot.slane %v5779_v34, %v5751_v24 }
 0x212   : > { %4875 = vmatprep.subr.mxu0 %v2719_v18 }
 0x213   : > { %4876 = vmatpush3.msra.mxu0 %v2703_v19 }
 0x214   : > { %4877 = vmatprep.subr.mxu0 %v2718_v58 }
 0x215   : > { %4878 = vmatpush3.msra.mxu0 %v2702_v27 }
 0x216   : > { %4879 = vmatprep.subr.mxu0 %v2717_v32 }
 0x217   : > { %1756 = vmatmul.mubr.bf16.gmra.mxu0 %v1069_v44  ;;  %1869 = vmatmul.mubr.bf16.gmra.mxu1 %v1069_v44 }
 0x218   : > { %1765 = vmatprep.mubr.bf16.mxu0 %v5136_v46  ;;  %1878 = vmatprep.mubr.bf16.mxu1 %v5136_v46 }
 0x219   : > { %4880 = vmatpush3.msra.mxu0 %v2701_v36 }
 0x21f   : > { %1766 = vmatmul.mubr.bf16.gmra.mxu0 %v1070_v41  ;;  %1879 = vmatmul.mubr.bf16.gmra.mxu1 %v1070_v41 }
 0x220   : > { %1775 = vmatprep.mubr.bf16.mxu0 %v5136_v46  ;;  %1888 = vmatprep.mubr.bf16.mxu1 %v5136_v46 }
 0x227   : > { %1776 = vmatmul.mubr.bf16.gmra.mxu0 %v1071_v59  ;;  %1889 = vmatmul.mubr.bf16.gmra.mxu1 %v1071_v59 }
 0x228   : > { %1785 = vmatprep.mubr.bf16.mxu0 %v5136_v46  ;;  %1898 = vmatprep.mubr.bf16.mxu1 %v5136_v46  ;;  %v2740_v46 = vld [vmem:[%s8269_s10 + $0x178] sm:$0xff] }
 0x229   : > { %4901 = vmatpush3.msra.mxu1 %v2740_v46 }
 0x22a   : > { %4902 = vmatprep.subr.mxu1 %v2755_v62 }
 0x22b   : > { %4903 = vmatpush3.msra.mxu1 %v2739_v2 }
 0x22c   : > { %4904 = vmatprep.subr.mxu1 %v2754_v5 }
 0x22d   : > { %4905 = vmatpush3.msra.mxu1 %v2738_v6 }
 0x22e   : > { %4906 = vmatprep.subr.mxu1 %v2753_v9 }
 0x22f   : > { %1786 = vmatmul.mubr.bf16.gmra.mxu0 %v1072_v0  ;;  %1899 = vmatmul.mubr.bf16.gmra.mxu1 %v1072_v0 }
 0x230   : > { %4907 = vmatpush3.msra.mxu1 %v2737_v11 }
 0x231   : > { %4908 = vmatprep.subr.mxu1 %v2752_v15 }
 0x232   : > { %4909 = vmatpush3.msra.mxu1 %v2736_v17 }
 0x233   : > { %4910 = vmatprep.subr.mxu1 %v2751_v20 }
 0x234   : > { %4911 = vmatpush3.msra.mxu1 %v2735_v21 }
 0x235   : > { %4912 = vmatprep.subr.mxu1 %v2750_v28 }
 0x236   : > { %4913 = vmatpush3.msra.mxu1 %v2734_v31 }
 0x237   : > { %4914 = vmatprep.subr.mxu1 %v2749_v37  ;;  %v2733_v37 = vld [vmem:[%s8269_s10 + $0x140] sm:$0xff] }
 0x238   : > { %4915 = vmatpush3.msra.mxu1 %v2733_v37 }
 0x277   : > { %v1491_v39 = vpop.f32.mrf.mxu0  ;;  %v1604_v40 = vpop.f32.mrf.mxu1 }
 0x278   : > { %v1951_v44 = vmul.f32 %v5764_v29, %v1491_v39  ;;  %v1953_v25 = vmul.f32 %v5768_v30, %v1604_v40  ;;  %v2716_v39 = vld [vmem:[%s8269_s10 + $0xb8] sm:$0xff] }
 0x279   : > { %v1493_v35 = vpop.f32.mrf.mxu0  ;;  %v1606_v38 = vpop.f32.mrf.mxu1  ;;  %4881 = vmatprep.subr.mxu0 %v2716_v39 }
 0x27a   : > { %v1952_v41 = vmul.f32 %v5789_v42, %v1493_v35  ;;  %v1954_v49 = vmul.f32 %v5793_v43, %v1606_v38  ;;  %v2121_v56 = vadd.f32 %v5798_v45, %v1951_v44  ;;  %v2123_v59 = vadd.f32 %v5803_v47, %v1953_v25  ;;  %v2748_v38 = vld [vmem:[%s8269_s10 + $0x1b8] sm:$0xff] }
 0x27b   : > { %v1495_v51 = vpop.f32.mrf.mxu0  ;;  %v1608_v52 = vpop.f32.mrf.mxu1  ;;  %4916 = vmatprep.subr.mxu1 %v2748_v38 }
 0x27c   : > { %v1959_v54 = vmul.f32 %v5764_v29, %v1495_v51  ;;  %v1961_v55 = vmul.f32 %v5768_v30, %v1608_v52  ;;  %v2122_v46 = vadd.f32 %v5808_v48, %v1952_v41  ;;  %v2124_v33 = vadd.f32 %v5813_v50, %v1954_v49 }
 0x27d   : > { %v1497_v60 = vpop.f32.mrf.mxu0  ;;  %v1610_v61 = vpop.f32.mrf.mxu1 }
 0x27e   : > { %v2129_v0 = vadd.f32 %v5798_v45, %v1959_v54  ;;  %v2131_v53 = vadd.f32 %v5803_v47, %v1961_v55  ;;  %v1960_v57 = vmul.f32 %v5789_v42, %v1497_v60  ;;  %v1962_v12 = vmul.f32 %v5793_v43, %v1610_v61  ;;  %v2700_v54 = vld [vmem:[%s8269_s10 + $0x38] sm:$0xff] }
 0x27f   : > { %v1501_v1 = vpop.f32.mrf.mxu0  ;;  %v1614_v62 = vpop.f32.mrf.mxu1  ;;  %v2732_v55 = vld [vmem:[%s8269_s10 + $0x138] sm:$0xff]  ;;  %4882 = vmatpush3.msra.mxu0 %v2700_v54 }
 0x280   : > { %v2461_v2 = vmax.f32 %v2121_v56, %v2129_v0  ;;  %v2503_v3 = vmax.f32 %v2123_v59, %v2131_v53  ;;  %v2130_v4 = vadd.f32 %v5808_v48, %v1960_v57  ;;  %v2132_v5 = vadd.f32 %v5813_v50, %v1962_v12  ;;  %v2715_v0 = vld [vmem:[%s8269_s10 + $0xb0] sm:$0xff]  ;;  %4917 = vmatpush3.msra.mxu1 %v2732_v55 }
 0x281   : > { %v1967_v6 = vmul.f32 %v5764_v29, %v1501_v1  ;;  %v1969_v7 = vmul.f32 %v5768_v30, %v1614_v62  ;;  %v1503_v8 = vpop.f32.mrf.mxu0  ;;  %v1616_v9 = vpop.f32.mrf.mxu1  ;;  %v2747_v53 = vld [vmem:[%s8269_s10 + $0x1b0] sm:$0xff]  ;;  %4883 = vmatprep.subr.mxu0 %v2715_v0 }
 0x282   : > { %v2482_v10 = vmax.f32 %v2122_v46, %v2130_v4  ;;  %v2524_v11 = vmax.f32 %v2124_v33, %v2132_v5  ;;  %v1968_v13 = vmul.f32 %v5789_v42, %v1503_v8  ;;  %v1970_v14 = vmul.f32 %v5793_v43, %v1616_v9  ;;  %v2699_v1 = vld [vmem:[%s8269_s10 + $0x30] sm:$0xff]  ;;  %4918 = vmatprep.subr.mxu1 %v2747_v53 }
 0x283   : > { %v2137_v15 = vadd.f32 %v5798_v45, %v1967_v6  ;;  %v2139_v17 = vadd.f32 %v5803_v47, %v1969_v7  ;;  %v1505_v18 = vpop.f32.mrf.mxu0  ;;  %v1618_v19 = vpop.f32.mrf.mxu1  ;;  %v2731_v62 = vld [vmem:[%s8269_s10 + $0x130] sm:$0xff]  ;;  %4884 = vmatpush3.msra.mxu0 %v2699_v1  ;;  %v2714_v6 = vld [vmem:[%s8269_s10 + $0xa8] sm:$0xff] }
 0x284   : > { %v2138_v20 = vadd.f32 %v5808_v48, %v1968_v13  ;;  %v2140_v21 = vadd.f32 %v5813_v50, %v1970_v14  ;;  %v1975_v58 = vmul.f32 %v5764_v29, %v1505_v18  ;;  %v1977_v27 = vmul.f32 %v5768_v30, %v1618_v19  ;;  %v2746_v7 = vld [vmem:[%s8269_s10 + $0x1a8] sm:$0xff]  ;;  %4885 = vmatprep.subr.mxu0 %v2714_v6 }
 0x285   : > { %v2462_v28 = vmax.f32 %v2461_v2, %v2137_v15  ;;  %v2504_v31 = vmax.f32 %v2503_v3, %v2139_v17  ;;  %v1507_v32 = vpop.f32.mrf.mxu0  ;;  %v1620_v36 = vpop.f32.mrf.mxu1  ;;  %v2698_v13 = vld [vmem:[%s8269_s10 + $0x28] sm:$0xff]  ;;  %4919 = vmatpush3.msra.mxu1 %v2731_v62 }
 0x286   : > { %v2483_v40 = vmax.f32 %v2482_v10, %v2138_v20  ;;  %v2525_v44 = vmax.f32 %v2524_v11, %v2140_v21  ;;  %v2145_v25 = vadd.f32 %v5798_v45, %v1975_v58  ;;  %v2147_v35 = vadd.f32 %v5803_v47, %v1977_v27  ;;  %v2730_v14 = vld [vmem:[%s8269_s10 + $0x128] sm:$0xff]  ;;  %v2713_v20 = vld [vmem:[%s8269_s10 + $0xa0] sm:$0xff]  ;;  %4886 = vmatpush3.msra.mxu0 %v2698_v13 }
 0x287   : > { %v1976_v41 = vmul.f32 %v5789_v42, %v1507_v32  ;;  %v1978_v49 = vmul.f32 %v5793_v43, %v1620_v36  ;;  %v1511_v51 = vpop.f32.mrf.mxu0  ;;  %v1624_v52 = vpop.f32.mrf.mxu1  ;;  %v2745_v21 = vld [vmem:[%s8269_s10 + $0x1a0] sm:$0xff]  ;;  %4920 = vmatprep.subr.mxu1 %v2746_v7  ;;  %4887 = vmatprep.subr.mxu0 %v2713_v20 }
 0x288   : > { %v2463_v56 = vmax.f32 %v2462_v28, %v2145_v25  ;;  %v2505_v59 = vmax.f32 %v2504_v31, %v2147_v35  ;;  %v1983_v60 = vmul.f32 %v5764_v29, %v1511_v51  ;;  %v1985_v61 = vmul.f32 %v5768_v30, %v1624_v52  ;;  %v2697_v32 = vld [vmem:[%s8269_s10 + $0x20] sm:$0xff]  ;;  %4921 = vmatpush3.msra.mxu1 %v2730_v14  ;;  %v2712_v25 = vld [vmem:[%s8269_s10 + $0x98] sm:$0xff]  ;;  %v2710_v14 = vld [vmem:[%s8269_s10 + $0x88] sm:$0xff] }
 0x289   : > { %v2146_v57 = vadd.f32 %v5808_v48, %v1976_v41  ;;  %v2148_v12 = vadd.f32 %v5813_v50, %v1978_v49  ;;  %v1513_v46 = vpop.f32.mrf.mxu0  ;;  %v1626_v33 = vpop.f32.mrf.mxu1  ;;  %4922 = vmatprep.subr.mxu1 %v2745_v21  ;;  %v2696_v51 = vld [vmem:[%s8269_s10 + $0x18] sm:$0xff]  ;;  %4888 = vmatpush3.msra.mxu0 %v2697_v32  ;;  %v2694_v21 = vld [vmem:[%s8269_s10 + $0x8] sm:$0xff] }
 0x28a   : > { %v2153_v2 = vadd.f32 %v5798_v45, %v1983_v60  ;;  %v2155_v3 = vadd.f32 %v5803_v47, %v1985_v61  ;;  %v1984_v4 = vmul.f32 %v5789_v42, %v1513_v46  ;;  %v1986_v5 = vmul.f32 %v5793_v43, %v1626_v33  ;;  %v2711_v60 = vld [vmem:[%s8269_s10 + $0x90] sm:$0xff]  ;;  %4889 = vmatprep.subr.mxu0 %v2712_v25  ;;  %v2726_v32 = vld [vmem:[%s8269_s10 + $0x108] sm:$0xff]  ;;  %v2693_v25 = vld [vmem:[%s8269_s10] sm:$0xff] }
 0x28b   : > { %v2484_v8 = vmax.f32 %v2483_v40, %v2146_v57  ;;  %v2526_v9 = vmax.f32 %v2525_v44, %v2148_v12  ;;  %v1515_v10 = vpop.f32.mrf.mxu0  ;;  %v1628_v11 = vpop.f32.mrf.mxu1  ;;  %v2729_v44 = vld [vmem:[%s8269_s10 + $0x120] sm:$0xff]  ;;  %v2728_v12 = vld [vmem:[%s8269_s10 + $0x118] sm:$0xff]  ;;  %4890 = vmatpush3.msra.mxu0 %v2696_v51 }
 0x28c   : > { %v2464_v15 = vmax.f32 %v2463_v56, %v2153_v2  ;;  %v2506_v17 = vmax.f32 %v2505_v59, %v2155_v3  ;;  %v2154_v18 = vadd.f32 %v5808_v48, %v1984_v4  ;;  %v2156_v19 = vadd.f32 %v5813_v50, %v1986_v5  ;;  %v2744_v59 = vld [vmem:[%s8269_s10 + $0x198] sm:$0xff]  ;;  %4923 = vmatpush3.msra.mxu1 %v2729_v44  ;;  %v2695_v2 = vld [vmem:[%s8269_s10 + $0x10] sm:$0xff]  ;;  %v2741_v51 = vld [vmem:[%s8269_s10 + $0x180] sm:$0xff] }
 0x28d   : > { %v1991_v58 = vmul.f32 %v5764_v29, %v1515_v10  ;;  %v1993_v27 = vmul.f32 %v5768_v30, %v1628_v11  ;;  %v1517_v28 = vpop.f32.mrf.mxu0  ;;  %v1630_v31 = vpop.f32.mrf.mxu1  ;;  %v2743_v3 = vld [vmem:[%s8269_s10 + $0x190] sm:$0xff]  ;;  %4924 = vmatprep.subr.mxu1 %v2744_v59  ;;  %4891 = vmatprep.subr.mxu0 %v2711_v60  ;;  %v2725_v60 = vld [vmem:[%s8269_s10 + $0x100] sm:$0xff] }
 0x28e   : > { %v5901_v36 = vmax.f32 %v2484_v8, %v2154_v18  ;;  %v5903_v37 = vmax.f32 %v2526_v9, %v2156_v19  ;;  %v1992_v39 = vmul.f32 %v5789_v42, %v1517_v28  ;;  %v1994_v40 = vmul.f32 %v5793_v43, %v1630_v31  ;;  %v2727_v8 = vld [vmem:[%s8269_s10 + $0x110] sm:$0xff]  ;;  %4925 = vmatpush3.msra.mxu1 %v2728_v12  ;;  %v2820_v12 = vld [vmem:[%s8269_s10 + $0x3f8] sm:$0xff] }
 0x28f   : > { %v2161_v35 = vadd.f32 %v5798_v45, %v1991_v58  ;;  %v2163_v38 = vadd.f32 %v5803_v47, %v1993_v27  ;;  %v1521_v41 = vpop.f32.mrf.mxu0  ;;  %v1634_v49 = vpop.f32.mrf.mxu1  ;;  %4892 = vmatpush3.msra.mxu0 %v2695_v2  ;;  %4926 = vmatprep.subr.mxu1 %v2743_v3 }
 0x290   : > { %v2162_v52 = vadd.f32 %v5808_v48, %v1992_v39  ;;  %v2164_v54 = vadd.f32 %v5813_v50, %v1994_v40  ;;  %v1999_v55 = vmul.f32 %v5764_v29, %v1521_v41  ;;  %v2001_v56 = vmul.f32 %v5768_v30, %v1634_v49  ;;  %4927 = vmatpush3.msra.mxu1 %v2727_v8 }
 0x291   : > { %v2465_v61 = vmax.f32 %v2464_v15, %v2161_v35  ;;  %v2507_v0 = vmax.f32 %v2506_v17, %v2163_v38  ;;  %v1523_v53 = vpop.f32.mrf.mxu0  ;;  %v1636_v57 = vpop.f32.mrf.mxu1  ;;  %v2742_v15 = vld [vmem:[%s8269_s10 + $0x188] sm:$0xff]  ;;  %4893 = vmatprep.subr.mxu0 %v2710_v14 }
 0x292   : > { %v2486_v46 = vmax.f32 %v5901_v36, %v2162_v52  ;;  %v2528_v33 = vmax.f32 %v5903_v37, %v2164_v54  ;;  %v2169_v1 = vadd.f32 %v5798_v45, %v1999_v55  ;;  %v2171_v62 = vadd.f32 %v5803_v47, %v2001_v56  ;;  %v2709_v36 = vld [vmem:[%s8269_s10 + $0x80] sm:$0xff]  ;;  %4928 = vmatprep.subr.mxu1 %v2742_v15  ;;  %v2788_v52 = vld [vmem:[%s8269_s10 + $0x2f8] sm:$0xff] }
 0x293   : > { %v2000_v4 = vmul.f32 %v5789_v42, %v1523_v53  ;;  %v2002_v5 = vmul.f32 %v5793_v43, %v1636_v57  ;;  %v1525_v6 = vpop.f32.mrf.mxu0  ;;  %v1638_v7 = vpop.f32.mrf.mxu1  ;;  %4894 = vmatpush3.msra.mxu0 %v2694_v21  ;;  %4929 = vmatpush3.msra.mxu1 %v2726_v32 }
 0x294   : > { %v2466_v9 = vmax.f32 %v2465_v61, %v2169_v1  ;;  %v2508_v10 = vmax.f32 %v2507_v0, %v2171_v62  ;;  %v2007_v11 = vmul.f32 %v5764_v29, %v1525_v6  ;;  %v2009_v13 = vmul.f32 %v5768_v30, %v1638_v7  ;;  %4895 = vmatprep.subr.mxu0 %v2709_v36 }
 0x295   : > { %v2170_v17 = vadd.f32 %v5808_v48, %v2000_v4  ;;  %v2172_v18 = vadd.f32 %v5813_v50, %v2002_v5  ;;  %v1527_v19 = vpop.f32.mrf.mxu0  ;;  %v1640_v20 = vpop.f32.mrf.mxu1  ;;  %4896 = vmatpush3.msra.mxu0 %v2693_v25  ;;  %4930 = vmatprep.subr.mxu1 %v2741_v51 }
 0x296   : > { %v2177_v58 = vadd.f32 %v5798_v45, %v2007_v11  ;;  %v2179_v27 = vadd.f32 %v5803_v47, %v2009_v13  ;;  %v2008_v28 = vmul.f32 %v5789_v42, %v1527_v19  ;;  %v2010_v31 = vmul.f32 %v5793_v43, %v1640_v20  ;;  %4935 = vmatprep.subr.mxu0 %v2788_v52 }
 0x297   : > { %v2487_v37 = vmax.f32 %v2486_v46, %v2170_v17  ;;  %v2529_v39 = vmax.f32 %v2528_v33, %v2172_v18  ;;  %v1531_v40 = vpop.f32.mrf.mxu0  ;;  %v1644_v44 = vpop.f32.mrf.mxu1  ;;  %4931 = vmatpush3.msra.mxu1 %v2725_v60 }
 0x298   : > { %v2467_v35 = vmax.f32 %v2466_v9, %v2177_v58  ;;  %v2509_v38 = vmax.f32 %v2508_v10, %v2179_v27  ;;  %v2178_v41 = vadd.f32 %v5808_v48, %v2008_v28  ;;  %v2180_v49 = vadd.f32 %v5813_v50, %v2010_v31  ;;  %4970 = vmatprep.subr.mxu1 %v2820_v12 }
 0x299   : > { %v2015_v54 = vmul.f32 %v5764_v29, %v1531_v40  ;;  %v2017_v55 = vmul.f32 %v5768_v30, %v1644_v44  ;;  %v1533_v56 = vpop.f32.mrf.mxu0  ;;  %v1646_v59 = vpop.f32.mrf.mxu1 }
 0x29a   : > { %v2488_v61 = vmax.f32 %v2487_v37, %v2178_v41  ;;  %v2530_v0 = vmax.f32 %v2529_v39, %v2180_v49  ;;  %v2016_v53 = vmul.f32 %v5789_v42, %v1533_v56  ;;  %v2018_v57 = vmul.f32 %v5793_v43, %v1646_v59 }
 0x29b   : > { %v2185_v46 = vadd.f32 %v5798_v45, %v2015_v54  ;;  %v2187_v33 = vadd.f32 %v5803_v47, %v2017_v55  ;;  %v1535_v1 = vpop.f32.mrf.mxu0  ;;  %v1648_v62 = vpop.f32.mrf.mxu1 }
 0x29c   : > { %v2186_v2 = vadd.f32 %v5808_v48, %v2016_v53  ;;  %v2188_v3 = vadd.f32 %v5813_v50, %v2018_v57  ;;  %v2023_v4 = vmul.f32 %v5764_v29, %v1535_v1  ;;  %v2025_v5 = vmul.f32 %v5768_v30, %v1648_v62 }
 0x29d   : > { %v2468_v6 = vmax.f32 %v2467_v35, %v2185_v46  ;;  %v2510_v7 = vmax.f32 %v2509_v38, %v2187_v33  ;;  %v1537_v8 = vpop.f32.mrf.mxu0  ;;  %v1650_v9 = vpop.f32.mrf.mxu1 }
 0x29e   : > { %v2489_v10 = vmax.f32 %v2488_v61, %v2186_v2  ;;  %v2531_v11 = vmax.f32 %v2530_v0, %v2188_v3  ;;  %v2193_v13 = vadd.f32 %v5798_v45, %v2023_v4  ;;  %v2195_v14 = vadd.f32 %v5803_v47, %v2025_v5 }
 0x29f   : > { %v2024_v15 = vmul.f32 %v5789_v42, %v1537_v8  ;;  %v2026_v17 = vmul.f32 %v5793_v43, %v1650_v9  ;;  %v1541_v18 = vpop.f32.mrf.mxu0  ;;  %v1654_v19 = vpop.f32.mrf.mxu1 }
 0x2a0   : > { %v2469_v20 = vmax.f32 %v2468_v6, %v2193_v13  ;;  %v2511_v21 = vmax.f32 %v2510_v7, %v2195_v14  ;;  %v2031_v58 = vmul.f32 %v5764_v29, %v1541_v18  ;;  %v2033_v27 = vmul.f32 %v5768_v30, %v1654_v19 }
 0x2a1   : > { %v2194_v28 = vadd.f32 %v5808_v48, %v2024_v15  ;;  %v2196_v31 = vadd.f32 %v5813_v50, %v2026_v17  ;;  %v1543_v32 = vpop.f32.mrf.mxu0  ;;  %v1656_v36 = vpop.f32.mrf.mxu1 }
 0x2a2   : > { %v2201_v37 = vadd.f32 %v5798_v45, %v2031_v58  ;;  %v2203_v39 = vadd.f32 %v5803_v47, %v2033_v27  ;;  %v2032_v40 = vmul.f32 %v5789_v42, %v1543_v32  ;;  %v2034_v44 = vmul.f32 %v5793_v43, %v1656_v36 }
 0x2a3   : > { %v2490_v25 = vmax.f32 %v2489_v10, %v2194_v28  ;;  %v2532_v35 = vmax.f32 %v2531_v11, %v2196_v31  ;;  %v1545_v38 = vpop.f32.mrf.mxu0  ;;  %v1658_v41 = vpop.f32.mrf.mxu1 }
 0x2a4   : > { %v2470_v49 = vmax.f32 %v2469_v20, %v2201_v37  ;;  %v2512_v51 = vmax.f32 %v2511_v21, %v2203_v39  ;;  %v2202_v52 = vadd.f32 %v5808_v48, %v2032_v40  ;;  %v2204_v54 = vadd.f32 %v5813_v50, %v2034_v44 }
 0x2a5   : > { %v2039_v55 = vmul.f32 %v5764_v29, %v1545_v38  ;;  %v2041_v56 = vmul.f32 %v5768_v30, %v1658_v41  ;;  %v1547_v59 = vpop.f32.mrf.mxu0  ;;  %v1660_v60 = vpop.f32.mrf.mxu1 }
 0x2a6   : > { %v2491_v61 = vmax.f32 %v2490_v25, %v2202_v52  ;;  %v2533_v0 = vmax.f32 %v2532_v35, %v2204_v54  ;;  %v2040_v53 = vmul.f32 %v5789_v42, %v1547_v59  ;;  %v2042_v57 = vmul.f32 %v5793_v43, %v1660_v60 }
 0x2a7   : > { %v2209_v12 = vadd.f32 %v5798_v45, %v2039_v55  ;;  %v2211_v46 = vadd.f32 %v5803_v47, %v2041_v56  ;;  %v1551_v33 = vpop.f32.mrf.mxu0  ;;  %v1664_v1 = vpop.f32.mrf.mxu1 }
 0x2a8   : > { %v2210_v62 = vadd.f32 %v5808_v48, %v2040_v53  ;;  %v2212_v2 = vadd.f32 %v5813_v50, %v2042_v57  ;;  %v2047_v3 = vmul.f32 %v5764_v29, %v1551_v33  ;;  %v2049_v4 = vmul.f32 %v5768_v30, %v1664_v1 }
 0x2a9   : > { %v2471_v5 = vmax.f32 %v2470_v49, %v2209_v12  ;;  %v2513_v6 = vmax.f32 %v2512_v51, %v2211_v46  ;;  %v1553_v7 = vpop.f32.mrf.mxu0  ;;  %v1666_v8 = vpop.f32.mrf.mxu1 }
 0x2aa   : > { %v2492_v9 = vmax.f32 %v2491_v61, %v2210_v62  ;;  %v2534_v10 = vmax.f32 %v2533_v0, %v2212_v2  ;;  %v2217_v11 = vadd.f32 %v5798_v45, %v2047_v3  ;;  %v2219_v13 = vadd.f32 %v5803_v47, %v2049_v4 }
 0x2ab   : > { %v2048_v14 = vmul.f32 %v5789_v42, %v1553_v7  ;;  %v2050_v15 = vmul.f32 %v5793_v43, %v1666_v8  ;;  %v1555_v17 = vpop.f32.mrf.mxu0  ;;  %v1668_v18 = vpop.f32.mrf.mxu1 }
 0x2ac   : > { %v2472_v19 = vmax.f32 %v2471_v5, %v2217_v11  ;;  %v2514_v20 = vmax.f32 %v2513_v6, %v2219_v13  ;;  %v2055_v21 = vmul.f32 %v5764_v29, %v1555_v17  ;;  %v2057_v58 = vmul.f32 %v5768_v30, %v1668_v18 }
 0x2ad   : > { %v2218_v27 = vadd.f32 %v5808_v48, %v2048_v14  ;;  %v2220_v28 = vadd.f32 %v5813_v50, %v2050_v15  ;;  %v1557_v31 = vpop.f32.mrf.mxu0  ;;  %v1670_v32 = vpop.f32.mrf.mxu1 }
 0x2ae   : > { %v2225_v36 = vadd.f32 %v5798_v45, %v2055_v21  ;;  %v2227_v37 = vadd.f32 %v5803_v47, %v2057_v58  ;;  %v2056_v39 = vmul.f32 %v5789_v42, %v1557_v31  ;;  %v2058_v40 = vmul.f32 %v5793_v43, %v1670_v32 }
 0x2af   : > { %v2493_v44 = vmax.f32 %v2492_v9, %v2218_v27  ;;  %v2535_v25 = vmax.f32 %v2534_v10, %v2220_v28  ;;  %v1561_v35 = vpop.f32.mrf.mxu0  ;;  %v1674_v38 = vpop.f32.mrf.mxu1 }
 0x2b0   : > { %v2473_v41 = vmax.f32 %v2472_v19, %v2225_v36  ;;  %v2515_v49 = vmax.f32 %v2514_v20, %v2227_v37  ;;  %v2226_v51 = vadd.f32 %v5808_v48, %v2056_v39  ;;  %v2228_v52 = vadd.f32 %v5813_v50, %v2058_v40 }
 0x2b1   : > { %v2063_v54 = vmul.f32 %v5764_v29, %v1561_v35  ;;  %v2065_v55 = vmul.f32 %v5768_v30, %v1674_v38  ;;  %v1563_v56 = vpop.f32.mrf.mxu0  ;;  %v1676_v59 = vpop.f32.mrf.mxu1 }
 0x2b2   : > { %v2494_v60 = vmax.f32 %v2493_v44, %v2226_v51  ;;  %v2536_v61 = vmax.f32 %v2535_v25, %v2228_v52  ;;  %v2064_v0 = vmul.f32 %v5789_v42, %v1563_v56  ;;  %v2066_v53 = vmul.f32 %v5793_v43, %v1676_v59 }
 0x2b3   : > { %v2233_v57 = vadd.f32 %v5798_v45, %v2063_v54  ;;  %v2235_v12 = vadd.f32 %v5803_v47, %v2065_v55  ;;  %v1565_v46 = vpop.f32.mrf.mxu0  ;;  %v1678_v33 = vpop.f32.mrf.mxu1  ;;  %v5137_v44 = vmov 1966171168  }
 0x2b4   : > { %v2234_v1 = vadd.f32 %v5808_v48, %v2064_v0  ;;  %v2236_v62 = vadd.f32 %v5813_v50, %v2066_v53  ;;  %v2071_v2 = vmul.f32 %v5764_v29, %v1565_v46  ;;  %v2073_v3 = vmul.f32 %v5768_v30, %v1678_v33 }
 0x2b5   : > { %v2474_v4 = vmax.f32 %v2473_v41, %v2233_v57  ;;  %v2516_v5 = vmax.f32 %v2515_v49, %v2235_v12  ;;  %v1567_v6 = vpop.f32.mrf.mxu0  ;;  %v1680_v7 = vpop.f32.mrf.mxu1 }
 0x2b6   : > { %v2495_v8 = vmax.f32 %v2494_v60, %v2234_v1  ;;  %v2537_v9 = vmax.f32 %v2536_v61, %v2236_v62  ;;  %v2241_v10 = vadd.f32 %v5798_v45, %v2071_v2  ;;  %v2243_v11 = vadd.f32 %v5803_v47, %v2073_v3 }
 0x2b7   : > { %v2072_v13 = vmul.f32 %v5789_v42, %v1567_v6  ;;  %v2074_v14 = vmul.f32 %v5793_v43, %v1680_v7  ;;  %v6048_v15 = vpop.f32.mrf.mxu0  ;;  %v6050_v17 = vpop.f32.mrf.mxu1  ;;  %v6059_v60 = vsub.s32 4, %v5719_v16  ;;  %v6062_v61 = vsub.s32 6, %v5719_v16 }
 0x2b8   : > { %v2475_v29 = vmax.f32 %v2474_v4, %v2241_v10  ;;  %v2517_v30 = vmax.f32 %v2516_v5, %v2243_v11  ;;  %v6065_v1 = vsub.s32 5, %v5719_v16  ;;  %v6068_v62 = vsub.s32 7, %v5719_v16 }
 0x2b9   : > { %v2242_v18 = vadd.f32 %v5808_v48, %v2072_v13  ;;  %v2244_v19 = vadd.f32 %v5813_v50, %v2074_v14  ;;  %v6054_v20 = vpop.f32.mrf.mxu0  ;;  %v6056_v21 = vpop.f32.mrf.mxu1  ;;  %v2642_v50 = vunpack.c.l.s4 %v5137_v44  ;;  %v6075_v7 = vrot.slane %v5748_v23, %v6059_v60 }
 0x2ba   : > { %v2476_v45 = vrot.slane %v2475_v29, 4  ;;  %v2518_v47 = vrot.slane %v2517_v30, 4 }
 0x2bb   : > { %v2496_v58 = vmax.f32 %v2495_v8, %v2242_v18  ;;  %v2538_v42 = vmax.f32 %v2537_v9, %v2244_v19  ;;  %v1721_v27 = vpop.f32.mrf.mxu0  ;;  %v1834_v43 = vpop.f32.mrf.mxu1  ;;  %v2643_v59 = vunpack.c.0.s8 %v2642_v50  ;;  %v6079_v8 = vrot.slane %v5748_v23, %v6062_v61 }
 0x2bc   : > { %v2477_v28 = vmax.f32 %v2475_v29, %v2476_v45  ;;  %v2519_v31 = vmax.f32 %v2517_v30, %v2518_v47  ;;  %v6083_v30 = vrot.slane %v5779_v34, %v6059_v60  ;;  %v6091_v18 = vrot.slane %v5748_v23, %v6068_v62 }
 0x2bd   : > { %v2497_v32 = vrot.slane %v2496_v58, 4  ;;  %v2539_v36 = vrot.slane %v2538_v42, 4  ;;  %v1723_v37 = vpop.f32.mrf.mxu0  ;;  %v1836_v39 = vpop.f32.mrf.mxu1  ;;  %v6071_v6 = vsub.s32 %v2643_v59, %v5719_v16  ;;  %v6087_v16 = vrot.slane %v5748_v23, %v6065_v1 }
 0x2be   : > { %v2478_v40 = vrot.slane %v2477_v28, 2  ;;  %v2520_v48 = vrot.slane %v2519_v31, 2  ;;  %v1963_v47 = vmul.f32 %v6075_v7, %v1721_v27 }
 0x2bf   : > { %v2498_v25 = vmax.f32 %v2496_v58, %v2497_v32  ;;  %v2540_v35 = vmax.f32 %v2538_v42, %v2539_v36  ;;  %v1727_v38 = vpop.f32.mrf.mxu0  ;;  %v1840_v41 = vpop.f32.mrf.mxu1  ;;  %v1965_v58 = vmul.f32 %v6079_v8, %v1834_v43  ;;  %v6099_v32 = vrot.slane %v5779_v34, %v6062_v61 }
 0x2c0   : > { %v2479_v49 = vmax.f32 %v2477_v28, %v2478_v40  ;;  %v2521_v51 = vmax.f32 %v2519_v31, %v2520_v48  ;;  %v1955_v31 = vmul.f32 %v6075_v7, %v6048_v15  ;;  %v6103_v36 = vrot.slane %v5779_v34, %v6065_v1 }
 0x2c1   : > { %v2499_v52 = vrot.slane %v2498_v25, 2  ;;  %v2541_v54 = vrot.slane %v2540_v35, 2  ;;  %v1729_v55 = vpop.f32.mrf.mxu0  ;;  %v1842_v56 = vpop.f32.mrf.mxu1  ;;  %v1964_v23 = vmul.f32 %v6087_v16, %v1723_v37  ;;  %v1957_v43 = vmul.f32 %v6079_v8, %v6050_v17 }
 0x2c2   : > { %v2480_v0 = vrot.slane %v2479_v49, 1  ;;  %v2522_v53 = vrot.slane %v2521_v51, 1  ;;  %v1966_v15 = vmul.f32 %v6091_v18, %v1836_v39  ;;  %v1956_v50 = vmul.f32 %v6087_v16, %v6054_v20 }
 0x2c3   : > { %v2500_v57 = vmax.f32 %v2498_v25, %v2499_v52  ;;  %v2542_v12 = vmax.f32 %v2540_v35, %v2541_v54  ;;  %v1731_v46 = vpop.f32.mrf.mxu0  ;;  %v1844_v33 = vpop.f32.mrf.mxu1  ;;  %v1958_v25 = vmul.f32 %v6091_v18, %v6056_v21  ;;  %v6121_v37 = vrot.slane %v5779_v34, %v6068_v62 }
 0x2c4   : > { %v2481_v9 = vmax.f32 %v2479_v49, %v2480_v0  ;;  %v2523_v10 = vmax.f32 %v2521_v51, %v2522_v53  ;;  %v1971_v35 = vmul.f32 %v6075_v7, %v1727_v38  ;;  %v2133_v17 = vadd.f32 %v6083_v30, %v1963_v47 }
 0x2c5   : > { %v2501_v2 = vrot.slane %v2500_v57, 1  ;;  %v2543_v3 = vrot.slane %v2542_v12, 1  ;;  %v1733_v4 = vpop.f32.mrf.mxu0  ;;  %v1846_v5 = vpop.f32.mrf.mxu1  ;;  %v2135_v39 = vadd.f32 %v6099_v32, %v1965_v58  ;;  %v1973_v51 = vmul.f32 %v6079_v8, %v1840_v41 }
 0x2c6   : > { %v2134_v54 = vadd.f32 %v6103_v36, %v1964_v23  ;;  %v1972_v21 = vmul.f32 %v6087_v16, %v1729_v55  ;;  %v1974_v34 = vmul.f32 %v6091_v18, %v1842_v56  ;;  %v1979_v59 = vmul.f32 %v6075_v7, %v1731_v46 }
 0x2c7   : > { %v2502_v11 = vmax.f32 %v2500_v57, %v2501_v2  ;;  %v2544_v13 = vmax.f32 %v2542_v12, %v2543_v3  ;;  %v1737_v14 = vpop.f32.mrf.mxu0  ;;  %v1850_v29 = vpop.f32.mrf.mxu1  ;;  %v2125_v38 = vadd.f32 %v6083_v30, %v1955_v31  ;;  %v2127_v0 = vadd.f32 %v6099_v32, %v1957_v43 }
 0x2c8   : > { %v2136_v53 = vadd.f32 %v6121_v37, %v1966_v15  ;;  %v1981_v57 = vmul.f32 %v6079_v8, %v1844_v33  ;;  %v2126_v2 = vadd.f32 %v6103_v36, %v1956_v50  ;;  %v2128_v3 = vadd.f32 %v6121_v37, %v1958_v25 }
 0x2c9   : > { %v2637_v19 = vcombine.low %v2481_v9, %v2502_v11  ;;  %v2638_v45 = vcombine.low %v2523_v10, %v2544_v13  ;;  %v1739_v42 = vpop.f32.mrf.mxu0  ;;  %v1852_v28 = vpop.f32.mrf.mxu1  ;;  %v2141_v55 = vadd.f32 %v6083_v30, %v1971_v35  ;;  %v1980_v56 = vmul.f32 %v6087_v16, %v1733_v4 }
 0x2ca   : > { %v2545_v9 = vmax.f32 %v2125_v38, %v2133_v17  ;;  %v2587_v46 = vmax.f32 %v2127_v0, %v2135_v39  ;;  %v2143_v10 = vadd.f32 %v6099_v32, %v1973_v51  ;;  %v1982_v11 = vmul.f32 %v6091_v18, %v1846_v5 }
 0x2cb   : > { %v6107_v40 = vrot.slane %v2637_v19, %v6071_v6  ;;  %v6110_v27 = vrot.slane %v2638_v45, %v6071_v6  ;;  %v1741_v48 = vpop.f32.mrf.mxu0  ;;  %v1854_v44 = vpop.f32.mrf.mxu1  ;;  %v2566_v45 = vmax.f32 %v2126_v2, %v2134_v54  ;;  %v2142_v33 = vadd.f32 %v6103_v36, %v1972_v21 }
 0x2cc   : > { %v2144_v47 = vadd.f32 %v6121_v37, %v1974_v34  ;;  %v2149_v58 = vadd.f32 %v6083_v30, %v1979_v59  ;;  %v2608_v31 = vmax.f32 %v2128_v3, %v2136_v53  ;;  %v2151_v23 = vadd.f32 %v6099_v32, %v1981_v57 }
 0x2cd   : > { %v2669_v49 = vcombine.low %v6107_v40, %v6110_v27  ;;  %v1743_v52 = vpop.f32.mrf.mxu0  ;;  %v1856_v20 = vpop.f32.mrf.mxu1  ;;  %v1987_v4 = vmul.f32 %v6075_v7, %v1737_v14  ;;  %v1989_v43 = vmul.f32 %v6079_v8, %v1850_v29  ;;  %v2546_v25 = vmax.f32 %v2545_v9, %v2141_v55  ;;  %v2772_v40 = vld [vmem:[%s8269_s10 + $0x278] sm:$0xff] }
 0x2ce   : > { %v2150_v5 = vadd.f32 %v6103_v36, %v1980_v56  ;;  %v1988_v35 = vmul.f32 %v6087_v16, %v1739_v42  ;;  %v1990_v17 = vmul.f32 %v6091_v18, %v1852_v28  ;;  %v2588_v39 = vmax.f32 %v2587_v46, %v2143_v10  ;;  %v2804_v27 = vld [vmem:[%s8269_s10 + $0x378] sm:$0xff] }
 0x2cf   : > { %v1747_v12 = vpop.f32.mrf.mxu0  ;;  %v1860_v41 = vpop.f32.mrf.mxu1  ;;  %v2152_v51 = vadd.f32 %v6121_v37, %v1982_v11  ;;  %v1995_v54 = vmul.f32 %v6075_v7, %v1741_v48  ;;  %v1997_v21 = vmul.f32 %v6079_v8, %v1854_v44  ;;  %v2567_v59 = vmax.f32 %v2566_v45, %v2142_v33 }
 0x2d0   : > { %v2609_v29 = vmax.f32 %v2608_v31, %v2144_v47  ;;  %v2547_v38 = vmax.f32 %v2546_v25, %v2149_v58  ;;  %v1996_v0 = vmul.f32 %v6087_v16, %v1743_v52  ;;  %v2589_v53 = vmax.f32 %v2588_v39, %v2151_v23 }
 0x2d1   : > { %v1749_v13 = vpop.f32.mrf.mxu0  ;;  %v1862_v19 = vpop.f32.mrf.mxu1  ;;  %v2157_v57 = vadd.f32 %v6083_v30, %v1987_v4  ;;  %v2159_v42 = vadd.f32 %v6099_v32, %v1989_v43  ;;  %v1998_v28 = vmul.f32 %v6091_v18, %v1856_v20  ;;  %v2568_v55 = vmax.f32 %v2567_v59, %v2150_v5 }
 0x2d2   : > { %v2158_v48 = vadd.f32 %v6103_v36, %v1988_v35  ;;  %v2160_v44 = vadd.f32 %v6121_v37, %v1990_v17  ;;  %v2003_v56 = vmul.f32 %v6075_v7, %v1747_v12  ;;  %v2610_v9 = vmax.f32 %v2609_v29, %v2152_v51 }
 0x2d3   : > { %v1751_v15 = vpop.f32.mrf.mxu0  ;;  %v1864_v50 = vpop.f32.mrf.mxu1  ;;  %v2165_v46 = vadd.f32 %v6083_v30, %v1995_v54  ;;  %v2167_v52 = vadd.f32 %v6099_v32, %v1997_v21  ;;  %v2005_v10 = vmul.f32 %v6079_v8, %v1860_v41  ;;  %v2166_v20 = vadd.f32 %v6103_v36, %v1996_v0 }
 0x2d4   : > { %v2004_v33 = vmul.f32 %v6087_v16, %v1749_v13  ;;  %v2006_v47 = vmul.f32 %v6091_v18, %v1862_v19  ;;  %v2011_v58 = vmul.f32 %v6075_v7, %v1751_v15  ;;  %v2548_v31 = vmax.f32 %v2547_v38, %v2157_v57 }
 0x2d5   : > { %v1753_v34 = vpop.f32.mrf.mxu0  ;;  %v1866_v14 = vpop.f32.mrf.mxu1  ;;  %v2590_v23 = vmax.f32 %v2589_v53, %v2159_v42  ;;  %v2168_v12 = vadd.f32 %v6121_v37, %v1998_v28  ;;  %v2013_v4 = vmul.f32 %v6079_v8, %v1864_v50  ;;  %v2569_v5 = vmax.f32 %v2568_v55, %v2158_v48 }
 0x2d6   : > { %v2611_v41 = vmax.f32 %v2610_v9, %v2160_v44  ;;  %v2173_v35 = vadd.f32 %v6083_v30, %v2003_v56  ;;  %v2012_v17 = vmul.f32 %v6087_v16, %v1753_v34  ;;  %v2549_v39 = vmax.f32 %v2548_v31, %v2165_v46 }
 0x2d7   : > { %v1757_v2 = vpop.f32.mrf.mxu0  ;;  %v1870_v3 = vpop.f32.mrf.mxu1  ;;  %v2591_v13 = vmax.f32 %v2590_v23, %v2167_v52  ;;  %v2175_v19 = vadd.f32 %v6099_v32, %v2005_v10  ;;  %v2014_v15 = vmul.f32 %v6091_v18, %v1866_v14  ;;  %v2570_v21 = vmax.f32 %v2569_v5, %v2166_v20 }
 0x2d8   : > { %v2174_v59 = vadd.f32 %v6103_v36, %v2004_v33  ;;  %v2176_v50 = vadd.f32 %v6121_v37, %v2006_v47  ;;  %v2181_v29 = vadd.f32 %v6083_v30, %v2011_v58  ;;  %v2612_v38 = vmax.f32 %v2611_v41, %v2168_v12 }
 0x2d9   : > { %v1759_v11 = vpop.f32.mrf.mxu0  ;;  %v1872_v45 = vpop.f32.mrf.mxu1  ;;  %v2183_v0 = vadd.f32 %v6099_v32, %v2013_v4  ;;  %v2019_v34 = vmul.f32 %v6075_v7, %v1757_v2  ;;  %v2021_v53 = vmul.f32 %v6079_v8, %v1870_v3  ;;  %v2550_v28 = vmax.f32 %v2549_v39, %v2173_v35 }
 0x2da   : > { %v2182_v14 = vadd.f32 %v6103_v36, %v2012_v17  ;;  %v2020_v55 = vmul.f32 %v6087_v16, %v1759_v11  ;;  %v2022_v48 = vmul.f32 %v6091_v18, %v1872_v45  ;;  %v2592_v44 = vmax.f32 %v2591_v13, %v2175_v19 }
 0x2db   : > { %v1761_v43 = vpop.f32.mrf.mxu0  ;;  %v1874_v25 = vpop.f32.mrf.mxu1  ;;  %v2184_v56 = vadd.f32 %v6121_v37, %v2014_v15  ;;  %v2571_v10 = vmax.f32 %v2570_v21, %v2174_v59  ;;  %v2613_v3 = vmax.f32 %v2612_v38, %v2176_v50  ;;  %v2551_v20 = vmax.f32 %v2550_v28, %v2181_v29 }
 0x2dc   : > { %v2027_v9 = vmul.f32 %v6075_v7, %v1761_v43  ;;  %v2029_v46 = vmul.f32 %v6079_v8, %v1874_v25  ;;  %v2593_v47 = vmax.f32 %v2592_v44, %v2183_v0  ;;  %v2189_v58 = vadd.f32 %v6083_v30, %v2019_v34 }
 0x2dd   : > { %v1763_v51 = vpop.f32.mrf.mxu0  ;;  %v1876_v54 = vpop.f32.mrf.mxu1  ;;  %v2191_v11 = vadd.f32 %v6099_v32, %v2021_v53  ;;  %v2572_v12 = vmax.f32 %v2571_v10, %v2182_v14  ;;  %v2190_v4 = vadd.f32 %v6103_v36, %v2020_v55  ;;  %v2192_v43 = vadd.f32 %v6121_v37, %v2022_v48 }
 0x2de   : > { %v2028_v33 = vmul.f32 %v6087_v16, %v1763_v51  ;;  %v2030_v45 = vmul.f32 %v6091_v18, %v1876_v54  ;;  %v2614_v5 = vmax.f32 %v2613_v3, %v2184_v56  ;;  %v2197_v41 = vadd.f32 %v6083_v30, %v2027_v9 }
 0x2df   : > { %v1767_v57 = vpop.f32.mrf.mxu0  ;;  %v1880_v42 = vpop.f32.mrf.mxu1  ;;  %v2199_v35 = vadd.f32 %v6099_v32, %v2029_v46  ;;  %v2552_v21 = vmax.f32 %v2551_v20, %v2189_v58  ;;  %v2594_v59 = vmax.f32 %v2593_v47, %v2191_v11  ;;  %v2573_v34 = vmax.f32 %v2572_v12, %v2190_v4 }
 0x2e0   : > { %v2035_v25 = vmul.f32 %v6075_v7, %v1767_v57  ;;  %v2037_v17 = vmul.f32 %v6079_v8, %v1880_v42  ;;  %v2198_v19 = vadd.f32 %v6103_v36, %v2028_v33  ;;  %v2200_v50 = vadd.f32 %v6121_v37, %v2030_v45 }
 0x2e1   : > { %v1769_v52 = vpop.f32.mrf.mxu0  ;;  %v1882_v2 = vpop.f32.mrf.mxu1  ;;  %v2615_v53 = vmax.f32 %v2614_v5, %v2192_v43  ;;  %v2553_v28 = vmax.f32 %v2552_v21, %v2197_v41  ;;  %v2595_v14 = vmax.f32 %v2594_v59, %v2199_v35 }
 0x2e2   : > { %v2036_v15 = vmul.f32 %v6087_v16, %v1769_v52  ;;  %v2038_v51 = vmul.f32 %v6091_v18, %v1882_v2  ;;  %v2205_v57 = vadd.f32 %v6083_v30, %v2035_v25  ;;  %v2207_v55 = vadd.f32 %v6099_v32, %v2037_v17 }
 0x2e3   : > { %v1771_v31 = vpop.f32.mrf.mxu0  ;;  %v1884_v23 = vpop.f32.mrf.mxu1  ;;  %v2574_v9 = vmax.f32 %v2573_v34, %v2198_v19  ;;  %v2616_v10 = vmax.f32 %v2615_v53, %v2200_v50 }
 0x2e4   : > { %v2043_v54 = vmul.f32 %v6075_v7, %v1771_v31  ;;  %v2045_v29 = vmul.f32 %v6079_v8, %v1884_v23  ;;  %v2206_v46 = vadd.f32 %v6103_v36, %v2036_v15  ;;  %v2208_v52 = vadd.f32 %v6121_v37, %v2038_v51 }
 0x2e5   : > { %v1773_v39 = vpop.f32.mrf.mxu0  ;;  %v1886_v13 = vpop.f32.mrf.mxu1  ;;  %v2554_v11 = vmax.f32 %v2553_v28, %v2205_v57  ;;  %v2596_v12 = vmax.f32 %v2595_v14, %v2207_v55 }
 0x2e6   : > { %v2044_v42 = vmul.f32 %v6087_v16, %v1773_v39  ;;  %v2213_v2 = vadd.f32 %v6083_v30, %v2043_v54  ;;  %v2215_v3 = vadd.f32 %v6099_v32, %v2045_v29  ;;  %v2046_v20 = vmul.f32 %v6091_v18, %v1886_v13 }
 0x2e7   : > { %v1777_v38 = vpop.f32.mrf.mxu0  ;;  %v1890_v0 = vpop.f32.mrf.mxu1  ;;  %v2575_v35 = vmax.f32 %v2574_v9, %v2206_v46  ;;  %v2617_v17 = vmax.f32 %v2616_v10, %v2208_v52 }
 0x2e8   : > { %v2051_v48 = vmul.f32 %v6075_v7, %v1777_v38  ;;  %v2053_v33 = vmul.f32 %v6079_v8, %v1890_v0  ;;  %v2214_v45 = vadd.f32 %v6103_v36, %v2044_v42  ;;  %v2555_v39 = vmax.f32 %v2554_v11, %v2213_v2 }
 0x2e9   : > { %v1779_v44 = vpop.f32.mrf.mxu0  ;;  %v1892_v56 = vpop.f32.mrf.mxu1  ;;  %v2597_v19 = vmax.f32 %v2596_v12, %v2215_v3  ;;  %v2216_v15 = vadd.f32 %v6121_v37, %v2046_v20 }
 0x2ea   : > { %v2052_v31 = vmul.f32 %v6087_v16, %v1779_v44  ;;  %v2221_v4 = vadd.f32 %v6083_v30, %v2051_v48  ;;  %v2054_v43 = vmul.f32 %v6091_v18, %v1892_v56  ;;  %v2223_v51 = vadd.f32 %v6099_v32, %v2053_v33 }
 0x2eb   : > { %v1781_v47 = vpop.f32.mrf.mxu0  ;;  %v1894_v58 = vpop.f32.mrf.mxu1  ;;  %v2576_v50 = vmax.f32 %v2575_v35, %v2214_v45  ;;  %v2618_v9 = vmax.f32 %v2617_v17, %v2216_v15 }
 0x2ec   : > { %v2059_v23 = vmul.f32 %v6075_v7, %v1781_v47  ;;  %v2061_v25 = vmul.f32 %v6079_v8, %v1894_v58  ;;  %v2222_v29 = vadd.f32 %v6103_v36, %v2052_v31  ;;  %v2556_v34 = vmax.f32 %v2555_v39, %v2221_v4 }
 0x2ed   : > { %v1783_v5 = vpop.f32.mrf.mxu0  ;;  %v1896_v41 = vpop.f32.mrf.mxu1  ;;  %v2224_v53 = vadd.f32 %v6121_v37, %v2054_v43  ;;  %v2598_v46 = vmax.f32 %v2597_v19, %v2223_v51 }
 0x2ee   : > { %v2060_v13 = vmul.f32 %v6087_v16, %v1783_v5  ;;  %v2062_v54 = vmul.f32 %v6091_v18, %v1896_v41  ;;  %v2229_v38 = vadd.f32 %v6083_v30, %v2059_v23  ;;  %v2231_v57 = vadd.f32 %v6099_v32, %v2061_v25 }
 0x2ef   : > { %v1787_v21 = vpop.f32.mrf.mxu0  ;;  %v1900_v59 = vpop.f32.mrf.mxu1  ;;  %v2577_v20 = vmax.f32 %v2576_v50, %v2222_v29  ;;  %v2619_v11 = vmax.f32 %v2618_v9, %v2224_v53 }
 0x2f0   : > { %v2067_v0 = vmul.f32 %v6075_v7, %v1787_v21  ;;  %v2069_v42 = vmul.f32 %v6079_v8, %v1900_v59  ;;  %v2230_v55 = vadd.f32 %v6103_v36, %v2060_v13  ;;  %v2232_v52 = vadd.f32 %v6121_v37, %v2062_v54 }
 0x2f1   : > { %v1789_v28 = vpop.f32.mrf.mxu0  ;;  %v1902_v14 = vpop.f32.mrf.mxu1  ;;  %v2557_v33 = vmax.f32 %v2556_v34, %v2229_v38  ;;  %v2599_v45 = vmax.f32 %v2598_v46, %v2231_v57 }
 0x2f2   : > { %v2237_v48 = vadd.f32 %v6083_v30, %v2067_v0  ;;  %v2068_v44 = vmul.f32 %v6087_v16, %v1789_v28  ;;  %v2070_v56 = vmul.f32 %v6091_v18, %v1902_v14  ;;  %v2239_v2 = vadd.f32 %v6099_v32, %v2069_v42 }
 0x2f3   : > { %v1791_v10 = vpop.f32.mrf.mxu0  ;;  %v1904_v3 = vpop.f32.mrf.mxu1  ;;  %v2578_v43 = vmax.f32 %v2577_v20, %v2230_v55  ;;  %v2620_v35 = vmax.f32 %v2619_v11, %v2232_v52 }
 0x2f4   : > { %v2238_v47 = vadd.f32 %v6103_v36, %v2068_v44  ;;  %v2075_v58 = vmul.f32 %v6075_v7, %v1791_v10  ;;  %v2240_v31 = vadd.f32 %v6121_v37, %v2070_v56  ;;  %v2077_v23 = vmul.f32 %v6079_v8, %v1904_v3 }
 0x2f5   : > { %v1793_v12 = vpop.f32.mrf.mxu0  ;;  %v1906_v4 = vpop.f32.mrf.mxu1  ;;  %v2558_v25 = vmax.f32 %v2557_v33, %v2237_v48  ;;  %v2600_v17 = vmax.f32 %v2599_v45, %v2239_v2 }
 0x2f6   : > { %v2245_v5 = vadd.f32 %v6083_v30, %v2075_v58  ;;  %v2076_v41 = vmul.f32 %v6087_v16, %v1793_v12  ;;  %v2247_v39 = vadd.f32 %v6099_v32, %v2077_v23  ;;  %v2078_v7 = vmul.f32 %v6091_v18, %v1906_v4 }
 0x2f7   : > { %v2579_v13 = vmax.f32 %v2578_v43, %v2238_v47  ;;  %v2621_v51 = vmax.f32 %v2620_v35, %v2240_v31  ;;  %v2677_v58 = vrot.slane %v2669_v49, %v6071_v6  ;;  %v2787_v49 = vld [vmem:[%s8269_s10 + $0x2f0] sm:$0xff] }
 0x2f8   : > { %v2559_v19 = vmax.f32 %v2558_v25, %v2245_v5  ;;  %v2246_v15 = vadd.f32 %v6103_v36, %v2076_v41  ;;  %v2601_v8 = vmax.f32 %v2600_v17, %v2247_v39  ;;  %v2248_v54 = vadd.f32 %v6121_v37, %v2078_v7  ;;  %v2819_v25 = vld [vmem:[%s8269_s10 + $0x3f0] sm:$0xff]  ;;  %v2786_v17 = vld [vmem:[%s8269_s10 + $0x2e8] sm:$0xff] }
 0x2f9   : > { %v2771_v41 = vld [vmem:[%s8269_s10 + $0x270] sm:$0xff]  ;;  %v2818_v39 = vld [vmem:[%s8269_s10 + $0x3e8] sm:$0xff] }
 0x2fa   : > { %v2560_v21 = vrot.slane %v2559_v19, 4  ;;  %v2580_v59 = vmax.f32 %v2579_v13, %v2246_v15  ;;  %v2602_v50 = vrot.slane %v2601_v8, 4  ;;  %v2622_v30 = vmax.f32 %v2621_v51, %v2248_v54  ;;  %v2803_v35 = vld [vmem:[%s8269_s10 + $0x370] sm:$0xff]  ;;  %v2770_v7 = vld [vmem:[%s8269_s10 + $0x268] sm:$0xff]  ;;  %v2817_v15 = vld [vmem:[%s8269_s10 + $0x3e0] sm:$0xff] }
 0x2fb   : > { %v2802_v13 = vld [vmem:[%s8269_s10 + $0x368] sm:$0xff]  ;;  %v2769_v51 = vld [vmem:[%s8269_s10 + $0x260] sm:$0xff]  ;;  %v2784_v54 = vld [vmem:[%s8269_s10 + $0x2d8] sm:$0xff] }
 0x2fc   : > { %v2561_v29 = vmax.f32 %v2559_v19, %v2560_v21  ;;  %v2581_v16 = vrot.slane %v2580_v59, 4  ;;  %v2603_v38 = vmax.f32 %v2601_v8, %v2602_v50  ;;  %v2623_v0 = vrot.slane %v2622_v30, 4  ;;  %v2785_v19 = vld [vmem:[%s8269_s10 + $0x2e0] sm:$0xff]  ;;  %v2816_v21 = vld [vmem:[%s8269_s10 + $0x3d8] sm:$0xff] }
 0x2fd   : > { %v2801_v8 = vld [vmem:[%s8269_s10 + $0x360] sm:$0xff]  ;;  %v2800_v50 = vld [vmem:[%s8269_s10 + $0x358] sm:$0xff] }
 0x2fe   : > { %v2562_v34 = vrot.slane %v2561_v29, 2  ;;  %v2582_v32 = vmax.f32 %v2580_v59, %v2581_v16  ;;  %v2604_v53 = vrot.slane %v2603_v38, 2  ;;  %v2624_v18 = vmax.f32 %v2622_v30, %v2623_v0  ;;  %v2768_v59 = vld [vmem:[%s8269_s10 + $0x258] sm:$0xff]  ;;  %v2783_v30 = vld [vmem:[%s8269_s10 + $0x2d0] sm:$0xff]  ;;  %v2782_v0 = vld [vmem:[%s8269_s10 + $0x2c8] sm:$0xff] }
 0x2ff   : > { %v2767_v16 = vld [vmem:[%s8269_s10 + $0x250] sm:$0xff] }
 0x300   : > { %v2563_v57 = vmax.f32 %v2561_v29, %v2562_v34  ;;  %v2583_v42 = vrot.slane %v2582_v32, 2  ;;  %v2605_v28 = vmax.f32 %v2603_v38, %v2604_v53  ;;  %v2625_v36 = vrot.slane %v2624_v18, 2  ;;  %v2815_v29 = vld [vmem:[%s8269_s10 + $0x3d0] sm:$0xff]  ;;  %v2814_v34 = vld [vmem:[%s8269_s10 + $0x3c8] sm:$0xff] }
 0x301   : > { %v2799_v38 = vld [vmem:[%s8269_s10 + $0x350] sm:$0xff]  ;;  %v2798_v53 = vld [vmem:[%s8269_s10 + $0x348] sm:$0xff] }
 0x302   : > { %v2564_v14 = vrot.slane %v2563_v57, 1  ;;  %v2584_v55 = vmax.f32 %v2582_v32, %v2583_v42  ;;  %v2606_v48 = vrot.slane %v2605_v28, 1  ;;  %v2626_v37 = vmax.f32 %v2624_v18, %v2625_v36  ;;  %v2766_v32 = vld [vmem:[%s8269_s10 + $0x248] sm:$0xff]  ;;  %v2781_v18 = vld [vmem:[%s8269_s10 + $0x2c0] sm:$0xff]  ;;  %v2780_v36 = vld [vmem:[%s8269_s10 + $0x2b8] sm:$0xff] }
 0x303   : > { %v2765_v42 = vld [vmem:[%s8269_s10 + $0x240] sm:$0xff] }
 0x304   : > { %v2585_v44 = vrot.slane %v2584_v55, 1  ;;  %v2627_v56 = vrot.slane %v2626_v37, 1  ;;  %v2565_v9 = vmax.f32 %v2563_v57, %v2564_v14  ;;  %v2607_v52 = vmax.f32 %v2605_v28, %v2606_v48  ;;  %v2813_v57 = vld [vmem:[%s8269_s10 + $0x3c0] sm:$0xff]  ;;  %v2812_v14 = vld [vmem:[%s8269_s10 + $0x3b8] sm:$0xff] }
 0x305   : > { %v2797_v28 = vld [vmem:[%s8269_s10 + $0x340] sm:$0xff]  ;;  %v2796_v48 = vld [vmem:[%s8269_s10 + $0x338] sm:$0xff] }
 0x306   : > { %v2586_v46 = vmax.f32 %v2584_v55, %v2585_v44  ;;  %v2628_v2 = vmax.f32 %v2626_v37, %v2627_v56  ;;  %v2764_v55 = vld [vmem:[%s8269_s10 + $0x238] sm:$0xff]  ;;  %v2779_v37 = vld [vmem:[%s8269_s10 + $0x2b0] sm:$0xff] }
 0x307   : > { %v2811_v44 = vld [vmem:[%s8269_s10 + $0x3b0] sm:$0xff] }
 0x308   : > { %v2639_v10 = vcombine.low %v2565_v9, %v2586_v46  ;;  %v2640_v3 = vcombine.low %v2607_v52, %v2628_v2  ;;  %v2763_v56 = vld [vmem:[%s8269_s10 + $0x230] sm:$0xff]  ;;  %v2778_v46 = vld [vmem:[%s8269_s10 + $0x2a8] sm:$0xff] }
 0x309   : > { %v2795_v9 = vld [vmem:[%s8269_s10 + $0x330] sm:$0xff]  ;;  %v2810_v52 = vld [vmem:[%s8269_s10 + $0x3a8] sm:$0xff] }
 0x30a   : > { %v2661_v20 = vrot.slane %v2639_v10, %v6071_v6  ;;  %v2668_v33 = vrot.slane %v2640_v3, %v6071_v6  ;;  %v2762_v2 = vld [vmem:[%s8269_s10 + $0x228] sm:$0xff]  ;;  %v2777_v3 = vld [vmem:[%s8269_s10 + $0x2a0] sm:$0xff] }
 0x30b   : > { %v2794_v10 = vld [vmem:[%s8269_s10 + $0x328] sm:$0xff] }
 0x30c   : > { %v2670_v47 = vcombine.low %v2661_v20, %v2668_v33  ;;  %v2809_v20 = vld [vmem:[%s8269_s10 + $0x3a0] sm:$0xff] }
 0x30d   : > { %v2761_v33 = vld [vmem:[%s8269_s10 + $0x220] sm:$0xff] }
 0x30e   : > { %v2684_v11 = vrot.slane %v2670_v47, %v6071_v6  ;;  %v2793_v47 = vld [vmem:[%s8269_s10 + $0x320] sm:$0xff] }
 0x310   : > { %v6252_v45 = vcombine.low %v2677_v58, %v2684_v11  ;;  %v2776_v58 = vld [vmem:[%s8269_s10 + $0x298] sm:$0xff] }
 0x311   : > { %v2808_v11 = vld [vmem:[%s8269_s10 + $0x398] sm:$0xff] }
 0x312   : > { %v2830_v31 = vrot.slane %v6252_v45, %v5751_v24  ;;  %v2838_v23 = vrot.slane %v6252_v45, %v5754_v26  ;;  %v2826_v12 = vrot.slane %v6252_v45, %v5740_v22  ;;  %v2834_v4 = vrot.slane %v6252_v45, %v5743_v63 }
 0x313   : > { %v2846_v43 = vrot.slane %v6252_v45, %v6065_v1  ;;  %v2854_v5 = vrot.slane %v6252_v45, %v6068_v62 }
 0x314   : > { %2927 = vmatprep.mubr.f32.mxu0 %v2830_v31  ;;  %2997 = vmatprep.mubr.f32.mxu1 %v2838_v23  ;;  %v2760_v31 = vld [vmem:[%s8269_s10 + $0x218] sm:$0xff] }
 0x315   : > { %2928 = vmatmul.mubr.f32.vlgmr.msra.gmra.mxu0 %v2826_v12  ;;  %2998 = vmatmul.mubr.f32.vlgmr.msra.gmra.mxu1 %v2834_v4  ;;  %v2792_v23 = vld [vmem:[%s8269_s10 + $0x318] sm:$0xff]  ;;  %v2775_v12 = vld [vmem:[%s8269_s10 + $0x290] sm:$0xff] }
 0x316   : > { %4936 = vmatpush3.msra.mxu0 %v2772_v40  ;;  %4971 = vmatpush3.msra.mxu1 %v2804_v27  ;;  %v2807_v4 = vld [vmem:[%s8269_s10 + $0x390] sm:$0xff] }
 0x317   : > { %4937 = vmatprep.subr.mxu0 %v2787_v49  ;;  %3067 = vmatprep.mubr.f32.mxu0 %v2846_v43  ;;  %v2759_v40 = vld [vmem:[%s8269_s10 + $0x210] sm:$0xff]  ;;  %v2774_v49 = vld [vmem:[%s8269_s10 + $0x288] sm:$0xff] }
 0x318   : > { %4972 = vmatprep.subr.mxu1 %v2819_v25  ;;  %3137 = vmatprep.mubr.f32.mxu1 %v2854_v5  ;;  %v2791_v27 = vld [vmem:[%s8269_s10 + $0x310] sm:$0xff]  ;;  %v2806_v43 = vld [vmem:[%s8269_s10 + $0x388] sm:$0xff] }
 0x319   : > { %4938 = vmatpush3.msra.mxu0 %v2771_v41  ;;  %4973 = vmatpush3.msra.mxu1 %v2803_v35  ;;  %v2758_v25 = vld [vmem:[%s8269_s10 + $0x208] sm:$0xff]  ;;  %v2773_v41 = vld [vmem:[%s8269_s10 + $0x280] sm:$0xff] }
 0x31a   : > { %4939 = vmatprep.subr.mxu0 %v2786_v17  ;;  %4974 = vmatprep.subr.mxu1 %v2818_v39  ;;  %v2790_v5 = vld [vmem:[%s8269_s10 + $0x308] sm:$0xff]  ;;  %v2805_v35 = vld [vmem:[%s8269_s10 + $0x380] sm:$0xff] }
 0x31b   : > { %4940 = vmatpush3.msra.mxu0 %v2770_v7  ;;  %4975 = vmatpush3.msra.mxu1 %v2802_v13  ;;  %v2757_v17 = vld [vmem:[%s8269_s10 + $0x200] sm:$0xff]  ;;  %v2842_v7 = vrot.slane %v6252_v45, %v6059_v60  ;;  %v2850_v13 = vrot.slane %v6252_v45, %v6062_v61  ;;  %v3150_v45 = vld [vmem:[%s8271_s12 + $0x30] sm:$0xff] }
 0x31c   : > { %4941 = vmatprep.subr.mxu0 %v2785_v19  ;;  %4976 = vmatprep.subr.mxu1 %v2817_v15  ;;  %v2789_v39 = vld [vmem:[%s8269_s10 + $0x300] sm:$0xff]  ;;  %v5138_v15 = vmov 0.0  }
 0x31d   : > { %4942 = vmatpush3.msra.mxu0 %v2769_v51  ;;  %4977 = vmatpush3.msra.mxu1 %v2801_v8  ;;  %v3152_v19 = vld [vmem:[%s8271_s12 + $0x40] sm:$0x3]  ;;  %v3151_v51 = vld [vmem:[%s8271_s12 + $0x38] sm:$0xff]  ;;  %v3149_v8 = vld [vmem:[%s8271_s12 + $0x28] sm:$0xff] }
 0x31e   : > { %4943 = vmatprep.subr.mxu0 %v2784_v54  ;;  %4978 = vmatprep.subr.mxu1 %v2816_v21  ;;  %v3148_v54 = vld [vmem:[%s8271_s12 + $0x20] sm:$0xff]  ;;  %v3147_v21 = vld [vmem:[%s8271_s12 + $0x18] sm:$0xff] }
 0x31f   : > { %4944 = vmatpush3.msra.mxu0 %v2768_v59  ;;  %4979 = vmatpush3.msra.mxu1 %v2800_v50  ;;  %v3146_v59 = vld [vmem:[%s8271_s12 + $0x10] sm:$0xff]  ;;  %v3145_v50 = vld [vmem:[%s8271_s12 + $0x8] sm:$0xff] }
 0x320   : > { %4945 = vmatprep.subr.mxu0 %v2783_v30  ;;  %4980 = vmatprep.subr.mxu1 %v2815_v29  ;;  %v3144_v30 = vld [vmem:[%s8271_s12] sm:$0xff]  ;;  %v3280_v29 = vld [vmem:[%s8273_s14 + $0x188] sm:$0xf] }
 0x321   : > { %4946 = vmatpush3.msra.mxu0 %v2767_v16  ;;  %4981 = vmatpush3.msra.mxu1 %v2799_v38  ;;  %v3282_v16 = vld [vmem:[%s8273_s14 + $0x198] sm:$0xf]  ;;  %v3279_v38 = vld [vmem:[%s8273_s14 + $0x180] sm:$0xf] }
 0x322   : > { %4947 = vmatprep.subr.mxu0 %v2782_v0  ;;  %4982 = vmatprep.subr.mxu1 %v2814_v34  ;;  %v3276_v0 = vld [vmem:[%s8273_s14 + $0x168] sm:$0xff]  ;;  %v3275_v34 = vld [vmem:[%s8273_s14 + $0x160] sm:$0xff] }
 0x323   : > { %4948 = vmatpush3.msra.mxu0 %v2766_v32  ;;  %4983 = vmatpush3.msra.mxu1 %v2798_v53  ;;  %v3272_v32 = vld [vmem:[%s8273_s14 + $0x148] sm:$0xff]  ;;  %v3271_v53 = vld [vmem:[%s8273_s14 + $0x140] sm:$0xff] }
 0x324   : > { %4949 = vmatprep.subr.mxu0 %v2781_v18  ;;  %4984 = vmatprep.subr.mxu1 %v2813_v57  ;;  %v3268_v18 = vld [vmem:[%s8273_s14 + $0x128] sm:$0xff]  ;;  %v3267_v57 = vld [vmem:[%s8273_s14 + $0x120] sm:$0xff] }
 0x325   : > { %4950 = vmatpush3.msra.mxu0 %v2765_v42  ;;  %4985 = vmatpush3.msra.mxu1 %v2797_v28  ;;  %v3264_v42 = vld [vmem:[%s8273_s14 + $0x108] sm:$0xff]  ;;  %v3263_v28 = vld [vmem:[%s8273_s14 + $0x100] sm:$0xff] }
 0x326   : > { %4951 = vmatprep.subr.mxu0 %v2780_v36  ;;  %4986 = vmatprep.subr.mxu1 %v2812_v14  ;;  %v3260_v36 = vld [vmem:[%s8273_s14 + $0xe8] sm:$0xff]  ;;  %v3259_v14 = vld [vmem:[%s8273_s14 + $0xe0] sm:$0xff] }
 0x327   : > { %4952 = vmatpush3.msra.mxu0 %v2764_v55  ;;  %4987 = vmatpush3.msra.mxu1 %v2796_v48  ;;  %v3256_v55 = vld [vmem:[%s8273_s14 + $0xc8] sm:$0xff]  ;;  %v3255_v48 = vld [vmem:[%s8273_s14 + $0xc0] sm:$0xff] }
 0x328   : > { %4953 = vmatprep.subr.mxu0 %v2779_v37  ;;  %4988 = vmatprep.subr.mxu1 %v2811_v44  ;;  %v3252_v37 = vld [vmem:[%s8273_s14 + $0xa8] sm:$0xff]  ;;  %v3251_v44 = vld [vmem:[%s8273_s14 + $0xa0] sm:$0xff] }
 0x329   : > { %4954 = vmatpush3.msra.mxu0 %v2763_v56  ;;  %4989 = vmatpush3.msra.mxu1 %v2795_v9  ;;  %v3248_v56 = vld [vmem:[%s8273_s14 + $0x88] sm:$0xff]  ;;  %v3247_v9 = vld [vmem:[%s8273_s14 + $0x80] sm:$0xff] }
 0x32a   : > { %4955 = vmatprep.subr.mxu0 %v2778_v46  ;;  %4990 = vmatprep.subr.mxu1 %v2810_v52  ;;  %v3244_v46 = vld [vmem:[%s8273_s14 + $0x68] sm:$0xff]  ;;  %v3243_v52 = vld [vmem:[%s8273_s14 + $0x60] sm:$0xff] }
 0x32b   : > { %4956 = vmatpush3.msra.mxu0 %v2762_v2  ;;  %4991 = vmatpush3.msra.mxu1 %v2794_v10  ;;  %v3240_v2 = vld [vmem:[%s8273_s14 + $0x48] sm:$0xff]  ;;  %v3239_v10 = vld [vmem:[%s8273_s14 + $0x40] sm:$0xff] }
 0x32c   : > { %4957 = vmatprep.subr.mxu0 %v2777_v3  ;;  %4992 = vmatprep.subr.mxu1 %v2809_v20  ;;  %v3236_v3 = vld [vmem:[%s8273_s14 + $0x28] sm:$0xff] }
 0x32d   : > { %4958 = vmatpush3.msra.mxu0 %v2761_v33  ;;  %4993 = vmatpush3.msra.mxu1 %v2793_v47 }
 0x32e   : > { %4959 = vmatprep.subr.mxu0 %v2776_v58  ;;  %4994 = vmatprep.subr.mxu1 %v2808_v11  ;;  %v2821_v11 = vld [vmem:[%s8270_s11] sm:$0x1] }
 0x32f   : > { %4960 = vmatpush3.msra.mxu0 %v2760_v31  ;;  %4995 = vmatpush3.msra.mxu1 %v2792_v23 }
 0x330   : > { %4961 = vmatprep.subr.mxu0 %v2775_v12  ;;  %4996 = vmatprep.subr.mxu1 %v2807_v4 }
 0x331   : > { %4962 = vmatpush3.msra.mxu0 %v2759_v40  ;;  %4997 = vmatpush3.msra.mxu1 %v2791_v27 }
 0x332   : > { %4963 = vmatprep.subr.mxu0 %v2774_v49  ;;  %4998 = vmatprep.subr.mxu1 %v2806_v43 }
 0x333   : > { %4964 = vmatpush3.msra.mxu0 %v2758_v25  ;;  %4999 = vmatpush3.msra.mxu1 %v2790_v5 }
 0x334   : > { %4965 = vmatprep.subr.mxu0 %v2773_v41  ;;  %5000 = vmatprep.subr.mxu1 %v2805_v35 }
 0x335   : > { %4966 = vmatpush3.msra.mxu0 %v2757_v17  ;;  %5001 = vmatpush3.msra.mxu1 %v2789_v39  ;;  %v3281_v39 = vld [vmem:[%s8273_s14 + $0x190] sm:$0xf] }
 0x336   : > { %3068 = vmatmul.mubr.f32.vlgmr.msra.gmra.mxu0 %v2842_v7  ;;  %3138 = vmatmul.mubr.f32.vlgmr.msra.gmra.mxu1 %v2850_v13  ;;  %v3278_v7 = vld [vmem:[%s8273_s14 + $0x178] sm:$0xff]  ;;  %v3277_v13 = vld [vmem:[%s8273_s14 + $0x170] sm:$0xff] }
 0x337   : > { %5057 = vmatprep.subr.mxu0 %v5138_v15  ;;  %3386 = vmatprep.mubr.f32.mxu1 %v5138_v15 }
 0x338   : > { %5058 = vmatpush3.msk.msra.mxu0 %vm676_vm1, %v3152_v19  ;;  %5075 = vmatprep.mubr.msk.f32.mxu0 %vm5139_vm4, %v5138_v15  ;;  %v3274_v19 = vld [vmem:[%s8273_s14 + $0x158] sm:$0xff] }
 0x339   : > { %5059 = vmatprep.subr.mxu0 %v5138_v15  ;;  %4835 = vmatprep.subr.msk.mxu1 %vm3309_vm5, %v3280_v29  ;;  %v3254_v29 = vld [vmem:[%s8273_s14 + $0xb8] sm:$0xff] }
 0x33a   : > { %5060 = vmatpush3.msra.mxu0 %v3151_v51  ;;  %4836 = vmatpush1.msk.msra.mxu1 %vm3309_vm5, %v3279_v38  ;;  %v3273_v51 = vld [vmem:[%s8273_s14 + $0x150] sm:$0xff]  ;;  %v3250_v38 = vld [vmem:[%s8273_s14 + $0x98] sm:$0xff] }
 0x33b   : > { %5061 = vmatprep.subr.mxu0 %v5138_v15  ;;  %3330 = vmatprep.subr.mxu1 %v3276_v0  ;;  %v3249_v0 = vld [vmem:[%s8273_s14 + $0x90] sm:$0xff] }
 0x33c   : > { %5062 = vmatpush3.msra.mxu0 %v3150_v45  ;;  %3331 = vmatpush1.msra.mxu1 %v3275_v34  ;;  %v3270_v45 = vld [vmem:[%s8273_s14 + $0x138] sm:$0xff] }
 0x33d   : > { %5063 = vmatprep.subr.mxu0 %v5138_v15  ;;  %3332 = vmatprep.subr.mxu1 %v3272_v32  ;;  %v3246_v34 = vld [vmem:[%s8273_s14 + $0x78] sm:$0xff]  ;;  %v3245_v32 = vld [vmem:[%s8273_s14 + $0x70] sm:$0xff] }
 0x33e   : > { %5064 = vmatpush3.msra.mxu0 %v3149_v8  ;;  %3333 = vmatpush1.msra.mxu1 %v3271_v53  ;;  %v3269_v8 = vld [vmem:[%s8273_s14 + $0x130] sm:$0xff]  ;;  %v3242_v53 = vld [vmem:[%s8273_s14 + $0x58] sm:$0xff] }
 0x33f   : > { %5065 = vmatprep.subr.mxu0 %v5138_v15  ;;  %3334 = vmatprep.subr.mxu1 %v3268_v18  ;;  %v3241_v18 = vld [vmem:[%s8273_s14 + $0x50] sm:$0xff] }
 0x340   : > { %5066 = vmatpush3.msra.mxu0 %v3148_v54  ;;  %3335 = vmatpush1.msra.mxu1 %v3267_v57  ;;  %v3265_v54 = vld [vmem:[%s8273_s14 + $0x110] sm:$0xff]  ;;  %v3238_v57 = vld [vmem:[%s8273_s14 + $0x38] sm:$0xff] }
 0x341   : > { %5067 = vmatprep.subr.mxu0 %v5138_v15  ;;  %3336 = vmatprep.subr.mxu1 %v3264_v42  ;;  %v3235_v42 = vld [vmem:[%s8273_s14 + $0x20] sm:$0xff] }
 0x342   : > { %5068 = vmatpush3.msra.mxu0 %v3147_v21  ;;  %3337 = vmatpush1.msra.mxu1 %v3263_v28  ;;  %v3262_v21 = vld [vmem:[%s8273_s14 + $0xf8] sm:$0xff]  ;;  %v3237_v28 = vld [vmem:[%s8273_s14 + $0x30] sm:$0xff] }
 0x343   : > { %5069 = vmatprep.subr.mxu0 %v5138_v15  ;;  %3338 = vmatprep.subr.mxu1 %v3260_v36  ;;  %v3232_v36 = vld [vmem:[%s8273_s14 + $0x8] sm:$0xff] }
 0x344   : > { %5070 = vmatpush3.msra.mxu0 %v3146_v59  ;;  %3339 = vmatpush1.msra.mxu1 %v3259_v14  ;;  %v3261_v59 = vld [vmem:[%s8273_s14 + $0xf0] sm:$0xff]  ;;  %v3234_v14 = vld [vmem:[%s8273_s14 + $0x18] sm:$0xff] }
 0x345   : > { %5071 = vmatprep.subr.mxu0 %v5138_v15  ;;  %3340 = vmatprep.subr.mxu1 %v3256_v55  ;;  %v3231_v55 = vld [vmem:[%s8273_s14] sm:$0xff] }
 0x346   : > { %5072 = vmatpush3.msra.mxu0 %v3145_v50  ;;  %3341 = vmatpush1.msra.mxu1 %v3255_v48  ;;  %v3258_v50 = vld [vmem:[%s8273_s14 + $0xd8] sm:$0xff]  ;;  %v3233_v48 = vld [vmem:[%s8273_s14 + $0x10] sm:$0xff] }
 0x347   : > { %5073 = vmatprep.subr.mxu0 %v5138_v15  ;;  %3342 = vmatprep.subr.mxu1 %v3252_v37  ;;  %v3589_v37 = vld [vmem:[%s8275_s16 + $0x3c8] sm:$0xff] }
 0x348   : > { %5074 = vmatpush3.msra.mxu0 %v3144_v30  ;;  %3343 = vmatpush1.msra.mxu1 %v3251_v44  ;;  %v3257_v30 = vld [vmem:[%s8273_s14 + $0xd0] sm:$0xff]  ;;  %v3845_v44 = vld [vmem:[%s8275_s16 + $0xbc8] sm:$0xff] }
 0x349   : > { %4838 = vmatprep.subr.msk.mxu0 %vm3309_vm5, %v3282_v16  ;;  %3344 = vmatprep.subr.mxu1 %v3248_v56  ;;  %v3253_v16 = vld [vmem:[%s8273_s14 + $0xb0] sm:$0xff]  ;;  %v3153_v56 = vld [vmem:[%s8272_s13] sm:$0x1] }
 0x34a   : > { %3345 = vmatpush1.msra.mxu1 %v3247_v9 }
 0x34b   : > { %3346 = vmatprep.subr.mxu1 %v3244_v46 }
 0x34c   : > { %3347 = vmatpush1.msra.mxu1 %v3243_v52  ;;  %v3588_v52 = vld [vmem:[%s8275_s16 + $0x3c0] sm:$0xff] }
 0x34d   : > { %3348 = vmatprep.subr.mxu1 %v3240_v2  ;;  %v3844_v2 = vld [vmem:[%s8275_s16 + $0xbc0] sm:$0xff] }
 0x34e   : > { %3349 = vmatpush1.msra.mxu1 %v3239_v10 }
 0x34f   : > { %3350 = vmatprep.subr.mxu1 %v3236_v3  ;;  %v3581_v3 = vld [vmem:[%s8275_s16 + $0x388] sm:$0xff] }
 0x350   : > { %3351 = vmatpush1.msra.mxu1 %v3235_v42  ;;  %v3757_v42 = vld [vmem:[%s8275_s16 + $0x908] sm:$0xff] }
 0x351   : > { %3352 = vmatprep.subr.mxu1 %v3232_v36  ;;  %v3756_v36 = vld [vmem:[%s8275_s16 + $0x900] sm:$0xff] }
 0x352   : > { %3353 = vmatpush1.msra.mxu1 %v3231_v55  ;;  %v3749_v55 = vld [vmem:[%s8275_s16 + $0x8c8] sm:$0xff] }
 0x353   : > { %4022 = vmatprep.subr.mxu1 %v3589_v37  ;;  %v3748_v37 = vld [vmem:[%s8275_s16 + $0x8c0] sm:$0xff] }
 0x3d5   : > { %v4897_v20 = vpop.f32.mrf.mxu0  ;;  %v4932_v47 = vpop.f32.mrf.mxu1 }
 0x3d7   : > { %v4898_v33 = vpop.f32.mrf.mxu0  ;;  %v4933_v31 = vpop.f32.mrf.mxu1 }
 0x3d8   : > { %v4899_v58 = vadd.f32 %v4898_v33, %v4897_v20  ;;  %v4934_v40 = vadd.f32 %v4933_v31, %v4932_v47  ;;  %v3837_v20 = vld [vmem:[%s8275_s16 + $0xb88] sm:$0xff]  ;;  %v3580_v33 = vld [vmem:[%s8275_s16 + $0x380] sm:$0xff] }
 0x3d9   : > { %v3836_v47 = vld [vmem:[%s8275_s16 + $0xb80] sm:$0xff] }
 0x3da   : > { %v2930_v23 = vadd.f32 %v4899_v58, %v2821_v11  ;;  %v3573_v58 = vld [vmem:[%s8275_s16 + $0x348] sm:$0xff]  ;;  %v3572_v31 = vld [vmem:[%s8275_s16 + $0x340] sm:$0xff] }
 0x3db   : > { %v3829_v11 = vld [vmem:[%s8275_s16 + $0xb48] sm:$0xff] }
 0x3dc   : > { %v3000_v43 = vadd.f32 %v4934_v40, %v2930_v23  ;;  %v3828_v23 = vld [vmem:[%s8275_s16 + $0xb40] sm:$0xff] }
 0x3dd   : > { %v3564_v40 = vld [vmem:[%s8275_s16 + $0x300] sm:$0xff] }
 0x3f6   : > { %v4967_v12 = vpop.f32.mrf.mxu0  ;;  %v5002_v4 = vpop.f32.mrf.mxu1 }
 0x3f8   : > { %v4968_v27 = vpop.f32.mrf.mxu0  ;;  %v5003_v49 = vpop.f32.mrf.mxu1 }
 0x3f9   : > { %v4969_v25 = vadd.f32 %v4968_v27, %v4967_v12  ;;  %v5004_v41 = vadd.f32 %v5003_v49, %v5002_v4  ;;  %v3565_v12 = vld [vmem:[%s8275_s16 + $0x308] sm:$0xff]  ;;  %v3820_v27 = vld [vmem:[%s8275_s16 + $0xb00] sm:$0xff] }
 0x3fa   : > { %v3821_v4 = vld [vmem:[%s8275_s16 + $0xb08] sm:$0xff] }
 0x3fb   : > { %v3070_v5 = vadd.f32 %v4969_v25, %v3000_v43  ;;  %v3557_v49 = vld [vmem:[%s8275_s16 + $0x2c8] sm:$0xff]  ;;  %v3556_v25 = vld [vmem:[%s8275_s16 + $0x2c0] sm:$0xff] }
 0x3fc   : > { %v3813_v43 = vld [vmem:[%s8275_s16 + $0xac8] sm:$0xff] }
 0x3fd   : > { %v3140_v35 = vadd.f32 %v5004_v41, %v3070_v5  ;;  %v3812_v5 = vld [vmem:[%s8275_s16 + $0xac0] sm:$0xff]  ;;  %v3549_v41 = vld [vmem:[%s8275_s16 + $0x288] sm:$0xff] }
 0x3ff   : > { %v3143_v17 = vmax.f32 %v3140_v35, 0.0  ;;  %v3805_v35 = vld [vmem:[%s8275_s16 + $0xa88] sm:$0xff] }
 0x401   : > { %5076 = vmatmul.mubr.msk.f32.vlgmr.msra.gmra.mxu0 %vm3154_vm6, %v3143_v17  ;;  %v3548_v17 = vld [vmem:[%s8275_s16 + $0x280] sm:$0xff] }
 0x402   : > { %4839 = vmatpush1.msk.msra.mxu0 %vm3309_vm5, %v3281_v39  ;;  %3457 = vmatprep.mubr.f32.mxu0 %v5138_v15  ;;  %v3266_v15 = vld [vmem:[%s8273_s14 + $0x118] sm:$0xff]  ;;  %v3804_v39 = vld [vmem:[%s8275_s16 + $0xa80] sm:$0xff] }
 0x403   : > { %3401 = vmatprep.subr.mxu0 %v3278_v7  ;;  %v3541_v7 = vld [vmem:[%s8275_s16 + $0x248] sm:$0xff] }
 0x404   : > { %3402 = vmatpush1.msra.mxu0 %v3277_v13  ;;  %v3797_v13 = vld [vmem:[%s8275_s16 + $0xa48] sm:$0xff] }
 0x405   : > { %3403 = vmatprep.subr.mxu0 %v3274_v19  ;;  %v3540_v19 = vld [vmem:[%s8275_s16 + $0x240] sm:$0xff] }
 0x406   : > { %3404 = vmatpush1.msra.mxu0 %v3273_v51  ;;  %v3796_v51 = vld [vmem:[%s8275_s16 + $0xa40] sm:$0xff] }
 0x407   : > { %3405 = vmatprep.subr.mxu0 %v3270_v45  ;;  %v3533_v45 = vld [vmem:[%s8275_s16 + $0x208] sm:$0xff] }
 0x408   : > { %3406 = vmatpush1.msra.mxu0 %v3269_v8  ;;  %v3789_v8 = vld [vmem:[%s8275_s16 + $0xa08] sm:$0xff] }
 0x409   : > { %3407 = vmatprep.subr.mxu0 %v3266_v15  ;;  %v3532_v15 = vld [vmem:[%s8275_s16 + $0x200] sm:$0xff] }
 0x40a   : > { %3408 = vmatpush1.msra.mxu0 %v3265_v54  ;;  %v3788_v54 = vld [vmem:[%s8275_s16 + $0xa00] sm:$0xff] }
 0x40b   : > { %3409 = vmatprep.subr.mxu0 %v3262_v21  ;;  %v3525_v21 = vld [vmem:[%s8275_s16 + $0x1c8] sm:$0xff] }
 0x40c   : > { %3410 = vmatpush1.msra.mxu0 %v3261_v59  ;;  %v3781_v59 = vld [vmem:[%s8275_s16 + $0x9c8] sm:$0xff] }
 0x40d   : > { %3411 = vmatprep.subr.mxu0 %v3258_v50  ;;  %v3524_v50 = vld [vmem:[%s8275_s16 + $0x1c0] sm:$0xff] }
 0x40e   : > { %3412 = vmatpush1.msra.mxu0 %v3257_v30  ;;  %v3780_v30 = vld [vmem:[%s8275_s16 + $0x9c0] sm:$0xff] }
 0x40f   : > { %3413 = vmatprep.subr.mxu0 %v3254_v29  ;;  %v3517_v29 = vld [vmem:[%s8275_s16 + $0x188] sm:$0xff] }
 0x410   : > { %3414 = vmatpush1.msra.mxu0 %v3253_v16  ;;  %v3773_v16 = vld [vmem:[%s8275_s16 + $0x988] sm:$0xff] }
 0x411   : > { %3415 = vmatprep.subr.mxu0 %v3250_v38  ;;  %v3516_v38 = vld [vmem:[%s8275_s16 + $0x180] sm:$0xff] }
 0x412   : > { %3416 = vmatpush1.msra.mxu0 %v3249_v0  ;;  %v3772_v0 = vld [vmem:[%s8275_s16 + $0x980] sm:$0xff] }
 0x413   : > { %3417 = vmatprep.subr.mxu0 %v3246_v34  ;;  %v3509_v34 = vld [vmem:[%s8275_s16 + $0x148] sm:$0xff] }
 0x414   : > { %3418 = vmatpush1.msra.mxu0 %v3245_v32  ;;  %v3765_v32 = vld [vmem:[%s8275_s16 + $0x948] sm:$0xff] }
 0x415   : > { %3419 = vmatprep.subr.mxu0 %v3242_v53  ;;  %v3508_v53 = vld [vmem:[%s8275_s16 + $0x140] sm:$0xff] }
 0x416   : > { %3420 = vmatpush1.msra.mxu0 %v3241_v18  ;;  %v3764_v18 = vld [vmem:[%s8275_s16 + $0x940] sm:$0xff] }
 0x417   : > { %3421 = vmatprep.subr.mxu0 %v3238_v57  ;;  %v3501_v57 = vld [vmem:[%s8275_s16 + $0x108] sm:$0xff] }
 0x418   : > { %3422 = vmatpush1.msra.mxu0 %v3237_v28  ;;  %v3500_v28 = vld [vmem:[%s8275_s16 + $0x100] sm:$0xff] }
 0x419   : > { %3423 = vmatprep.subr.mxu0 %v3234_v14  ;;  %v3493_v14 = vld [vmem:[%s8275_s16 + $0xc8] sm:$0xff] }
 0x41a   : > { %3424 = vmatpush1.msra.mxu0 %v3233_v48  ;;  %v3492_v48 = vld [vmem:[%s8275_s16 + $0xc0] sm:$0xff] }
 0x41b   : > { %4093 = vmatprep.subr.mxu0 %v3845_v44  ;;  %v3485_v44 = vld [vmem:[%s8275_s16 + $0x88] sm:$0xff] }
 0x4c1   : > { %v3227_v9 = vpop.f32.mrf.mxu0 }
 0x4c2   : > { %v3228_v46 = vadd.f32 %v3227_v9, %v3153_v56  ;;  %v3741_v56 = vld [vmem:[%s8275_s16 + $0x888] sm:$0xff]  ;;  %v3484_v9 = vld [vmem:[%s8275_s16 + $0x80] sm:$0xff] }
 0x4c3   : > { %v5077_v10 = vpop.f32.mrf.mxu0 }
 0x4c4   : > { %4837 = vmatmul.mubr.msk.f32.vlgmr.msra.gmra.mxu1 %vm3305_vm7, %v3228_v46  ;;  %4840 = vmatmul.mubr.msk.f32.vlgmr.msra.gmra.mxu0 %vm3305_vm7, %v3228_v46  ;;  %v3740_v46 = vld [vmem:[%s8275_s16 + $0x880] sm:$0xff] }
 0x4c5   : > { %4023 = vmatpush1.msra.mxu1 %v3588_v52  ;;  %4094 = vmatpush1.msra.mxu0 %v3844_v2  ;;  %v3477_v52 = vld [vmem:[%s8275_s16 + $0x48] sm:$0xff]  ;;  %v3476_v10 = vld [vmem:[%s8275_s16 + $0x40] sm:$0xff] }
 0x4c6   : > { %4024 = vmatprep.subr.mxu1 %v3581_v3  ;;  %4095 = vmatprep.subr.mxu0 %v3837_v20  ;;  %v3733_v2 = vld [vmem:[%s8275_s16 + $0x848] sm:$0xff]  ;;  %v3732_v3 = vld [vmem:[%s8275_s16 + $0x840] sm:$0xff] }
 0x4c7   : > { %4025 = vmatpush1.msra.mxu1 %v3580_v33  ;;  %4096 = vmatpush1.msra.mxu0 %v3836_v47  ;;  %v3469_v20 = vld [vmem:[%s8275_s16 + $0x8] sm:$0xff]  ;;  %v3468_v47 = vld [vmem:[%s8275_s16] sm:$0xff] }
 0x4c8   : > { %4026 = vmatprep.subr.mxu1 %v3573_v58  ;;  %4097 = vmatprep.subr.mxu0 %v3829_v11  ;;  %v3725_v33 = vld [vmem:[%s8275_s16 + $0x808] sm:$0xff]  ;;  %v3724_v58 = vld [vmem:[%s8275_s16 + $0x800] sm:$0xff] }
 0x4c9   : > { %4027 = vmatpush1.msra.mxu1 %v3572_v31  ;;  %4098 = vmatpush1.msra.mxu0 %v3828_v23  ;;  %v3717_v11 = vld [vmem:[%s8275_s16 + $0x7c8] sm:$0xff]  ;;  %v3716_v23 = vld [vmem:[%s8275_s16 + $0x7c0] sm:$0xff] }
 0x4ca   : > { %4028 = vmatprep.subr.mxu1 %v3565_v12  ;;  %4099 = vmatprep.subr.mxu0 %v3821_v4  ;;  %v3973_v31 = vld [vmem:[%s8275_s16 + $0xfc8] sm:$0xff]  ;;  %v3972_v12 = vld [vmem:[%s8275_s16 + $0xfc0] sm:$0xff] }
 0x4cb   : > { %4029 = vmatpush1.msra.mxu1 %v3564_v40  ;;  %4100 = vmatpush1.msra.mxu0 %v3820_v27  ;;  %v3709_v4 = vld [vmem:[%s8275_s16 + $0x788] sm:$0xff]  ;;  %v3708_v27 = vld [vmem:[%s8275_s16 + $0x780] sm:$0xff] }
 0x4cc   : > { %4030 = vmatprep.subr.mxu1 %v3557_v49  ;;  %4101 = vmatprep.subr.mxu0 %v3813_v43  ;;  %v3965_v40 = vld [vmem:[%s8275_s16 + $0xf88] sm:$0xff]  ;;  %v3964_v49 = vld [vmem:[%s8275_s16 + $0xf80] sm:$0xff] }
 0x4cd   : > { %4031 = vmatpush1.msra.mxu1 %v3556_v25  ;;  %4102 = vmatpush1.msra.mxu0 %v3812_v5  ;;  %v3701_v43 = vld [vmem:[%s8275_s16 + $0x748] sm:$0xff]  ;;  %v3700_v5 = vld [vmem:[%s8275_s16 + $0x740] sm:$0xff] }
 0x4ce   : > { %4032 = vmatprep.subr.mxu1 %v3549_v41  ;;  %4103 = vmatprep.subr.mxu0 %v3805_v35  ;;  %v3957_v25 = vld [vmem:[%s8275_s16 + $0xf48] sm:$0xff]  ;;  %v3956_v41 = vld [vmem:[%s8275_s16 + $0xf40] sm:$0xff] }
 0x4cf   : > { %4033 = vmatpush1.msra.mxu1 %v3548_v17  ;;  %4104 = vmatpush1.msra.mxu0 %v3804_v39  ;;  %v3693_v35 = vld [vmem:[%s8275_s16 + $0x708] sm:$0xff]  ;;  %v3692_v39 = vld [vmem:[%s8275_s16 + $0x700] sm:$0xff] }
 0x4d0   : > { %4034 = vmatprep.subr.mxu1 %v3541_v7  ;;  %4105 = vmatprep.subr.mxu0 %v3797_v13  ;;  %v3949_v17 = vld [vmem:[%s8275_s16 + $0xf08] sm:$0xff]  ;;  %v3948_v7 = vld [vmem:[%s8275_s16 + $0xf00] sm:$0xff] }
 0x4d1   : > { %4035 = vmatpush1.msra.mxu1 %v3540_v19  ;;  %4106 = vmatpush1.msra.mxu0 %v3796_v51  ;;  %v3685_v13 = vld [vmem:[%s8275_s16 + $0x6c8] sm:$0xff]  ;;  %v3684_v51 = vld [vmem:[%s8275_s16 + $0x6c0] sm:$0xff] }
 0x4d2   : > { %4036 = vmatprep.subr.mxu1 %v3533_v45  ;;  %4107 = vmatprep.subr.mxu0 %v3789_v8  ;;  %v3941_v19 = vld [vmem:[%s8275_s16 + $0xec8] sm:$0xff]  ;;  %v3940_v45 = vld [vmem:[%s8275_s16 + $0xec0] sm:$0xff] }
 0x4d3   : > { %4037 = vmatpush1.msra.mxu1 %v3532_v15  ;;  %4108 = vmatpush1.msra.mxu0 %v3788_v54  ;;  %v3677_v8 = vld [vmem:[%s8275_s16 + $0x688] sm:$0xff]  ;;  %v3676_v54 = vld [vmem:[%s8275_s16 + $0x680] sm:$0xff] }
 0x4d4   : > { %4038 = vmatprep.subr.mxu1 %v3525_v21  ;;  %4109 = vmatprep.subr.mxu0 %v3781_v59  ;;  %v3933_v15 = vld [vmem:[%s8275_s16 + $0xe88] sm:$0xff]  ;;  %v3932_v21 = vld [vmem:[%s8275_s16 + $0xe80] sm:$0xff] }
 0x4d5   : > { %4039 = vmatpush1.msra.mxu1 %v3524_v50  ;;  %4110 = vmatpush1.msra.mxu0 %v3780_v30  ;;  %v3669_v59 = vld [vmem:[%s8275_s16 + $0x648] sm:$0xff]  ;;  %v3668_v30 = vld [vmem:[%s8275_s16 + $0x640] sm:$0xff] }
 0x4d6   : > { %4040 = vmatprep.subr.mxu1 %v3517_v29  ;;  %4111 = vmatprep.subr.mxu0 %v3773_v16  ;;  %v3925_v50 = vld [vmem:[%s8275_s16 + $0xe48] sm:$0xff]  ;;  %v3924_v29 = vld [vmem:[%s8275_s16 + $0xe40] sm:$0xff] }
 0x4d7   : > { %4041 = vmatpush1.msra.mxu1 %v3516_v38  ;;  %4112 = vmatpush1.msra.mxu0 %v3772_v0  ;;  %v3661_v16 = vld [vmem:[%s8275_s16 + $0x608] sm:$0xff]  ;;  %v3660_v0 = vld [vmem:[%s8275_s16 + $0x600] sm:$0xff] }
 0x4d8   : > { %4042 = vmatprep.subr.mxu1 %v3509_v34  ;;  %4113 = vmatprep.subr.mxu0 %v3765_v32  ;;  %v3917_v38 = vld [vmem:[%s8275_s16 + $0xe08] sm:$0xff]  ;;  %v3916_v34 = vld [vmem:[%s8275_s16 + $0xe00] sm:$0xff] }
 0x4d9   : > { %4043 = vmatpush1.msra.mxu1 %v3508_v53  ;;  %4114 = vmatpush1.msra.mxu0 %v3764_v18  ;;  %v3653_v32 = vld [vmem:[%s8275_s16 + $0x5c8] sm:$0xff]  ;;  %v3652_v18 = vld [vmem:[%s8275_s16 + $0x5c0] sm:$0xff] }
 0x4da   : > { %4044 = vmatprep.subr.mxu1 %v3501_v57  ;;  %4115 = vmatprep.subr.mxu0 %v3757_v42  ;;  %v3909_v53 = vld [vmem:[%s8275_s16 + $0xdc8] sm:$0xff]  ;;  %v3908_v57 = vld [vmem:[%s8275_s16 + $0xdc0] sm:$0xff] }
 0x4db   : > { %4045 = vmatpush1.msra.mxu1 %v3500_v28  ;;  %4116 = vmatpush1.msra.mxu0 %v3756_v36  ;;  %v3645_v42 = vld [vmem:[%s8275_s16 + $0x588] sm:$0xff]  ;;  %v3644_v36 = vld [vmem:[%s8275_s16 + $0x580] sm:$0xff] }
 0x4dc   : > { %4046 = vmatprep.subr.mxu1 %v3493_v14  ;;  %4117 = vmatprep.subr.mxu0 %v3749_v55  ;;  %v3901_v28 = vld [vmem:[%s8275_s16 + $0xd88] sm:$0xff]  ;;  %v3900_v14 = vld [vmem:[%s8275_s16 + $0xd80] sm:$0xff] }
 0x4dd   : > { %4047 = vmatpush1.msra.mxu1 %v3492_v48  ;;  %4118 = vmatpush1.msra.mxu0 %v3748_v37  ;;  %v3637_v55 = vld [vmem:[%s8275_s16 + $0x548] sm:$0xff]  ;;  %v3636_v37 = vld [vmem:[%s8275_s16 + $0x540] sm:$0xff] }
 0x4de   : > { %4048 = vmatprep.subr.mxu1 %v3485_v44  ;;  %4119 = vmatprep.subr.mxu0 %v3741_v56  ;;  %v3893_v48 = vld [vmem:[%s8275_s16 + $0xd48] sm:$0xff]  ;;  %v3892_v44 = vld [vmem:[%s8275_s16 + $0xd40] sm:$0xff] }
 0x4df   : > { %4049 = vmatpush1.msra.mxu1 %v3484_v9  ;;  %4120 = vmatpush1.msra.mxu0 %v3740_v46  ;;  %v3629_v56 = vld [vmem:[%s8275_s16 + $0x508] sm:$0xff]  ;;  %v3628_v46 = vld [vmem:[%s8275_s16 + $0x500] sm:$0xff] }
 0x4e0   : > { %4050 = vmatprep.subr.mxu1 %v3477_v52  ;;  %4121 = vmatprep.subr.mxu0 %v3733_v2  ;;  %v3885_v9 = vld [vmem:[%s8275_s16 + $0xd08] sm:$0xff]  ;;  %v3884_v52 = vld [vmem:[%s8275_s16 + $0xd00] sm:$0xff] }
 0x4e1   : > { %4051 = vmatpush1.msra.mxu1 %v3476_v10  ;;  %4122 = vmatpush1.msra.mxu0 %v3732_v3  ;;  %v3621_v2 = vld [vmem:[%s8275_s16 + $0x4c8] sm:$0xff]  ;;  %v3620_v3 = vld [vmem:[%s8275_s16 + $0x4c0] sm:$0xff] }
 0x4e2   : > { %4052 = vmatprep.subr.mxu1 %v3469_v20  ;;  %4123 = vmatprep.subr.mxu0 %v3725_v33  ;;  %v3877_v10 = vld [vmem:[%s8275_s16 + $0xcc8] sm:$0xff]  ;;  %v3876_v20 = vld [vmem:[%s8275_s16 + $0xcc0] sm:$0xff] }
 0x4e3   : > { %4053 = vmatpush1.msra.mxu1 %v3468_v47  ;;  %4124 = vmatpush1.msra.mxu0 %v3724_v58  ;;  %v3613_v33 = vld [vmem:[%s8275_s16 + $0x488] sm:$0xff]  ;;  %v3612_v58 = vld [vmem:[%s8275_s16 + $0x480] sm:$0xff] }
 0x4e4   : > { %4054 = vmatprep.subr.mxu1 %v3717_v11  ;;  %4125 = vmatprep.subr.mxu0 %v3973_v31  ;;  %v3869_v47 = vld [vmem:[%s8275_s16 + $0xc88] sm:$0xff]  ;;  %v3868_v11 = vld [vmem:[%s8275_s16 + $0xc80] sm:$0xff] }
 0x4e5   : > { %4055 = vmatpush2.msra.mxu1 %v3716_v23  ;;  %4126 = vmatpush2.msra.mxu0 %v3972_v12  ;;  %v3605_v31 = vld [vmem:[%s8275_s16 + $0x448] sm:$0xff]  ;;  %v3604_v12 = vld [vmem:[%s8275_s16 + $0x440] sm:$0xff] }
 0x4e6   : > { %4056 = vmatprep.subr.mxu1 %v3709_v4  ;;  %4127 = vmatprep.subr.mxu0 %v3965_v40  ;;  %v3861_v23 = vld [vmem:[%s8275_s16 + $0xc48] sm:$0xff]  ;;  %v3860_v4 = vld [vmem:[%s8275_s16 + $0xc40] sm:$0xff] }
 0x4e7   : > { %4057 = vmatpush2.msra.mxu1 %v3708_v27  ;;  %4128 = vmatpush2.msra.mxu0 %v3964_v49  ;;  %v3597_v40 = vld [vmem:[%s8275_s16 + $0x408] sm:$0xff]  ;;  %v3596_v49 = vld [vmem:[%s8275_s16 + $0x400] sm:$0xff] }
 0x4e8   : > { %4058 = vmatprep.subr.mxu1 %v3701_v43  ;;  %4129 = vmatprep.subr.mxu0 %v3957_v25  ;;  %v3853_v27 = vld [vmem:[%s8275_s16 + $0xc08] sm:$0xff]  ;;  %v3852_v43 = vld [vmem:[%s8275_s16 + $0xc00] sm:$0xff]  ;;  %v3591_v25 = vld [vmem:[%s8275_s16 + $0x3d8] sm:$0xff] }
 0x4e9   : > { %4059 = vmatpush2.msra.mxu1 %v3700_v5  ;;  %4130 = vmatpush2.msra.mxu0 %v3956_v41  ;;  %v3847_v5 = vld [vmem:[%s8275_s16 + $0xbd8] sm:$0xff]  ;;  %v3283_v41 = vld [vmem:[%s8274_s15] sm:$0xf] }
 0x4ea   : > { %4060 = vmatprep.subr.mxu1 %v3693_v35  ;;  %4131 = vmatprep.subr.mxu0 %v3949_v17  ;;  %v3288_v35 = vrot.slane %v3283_v41, %v5740_v22  ;;  %v3296_v17 = vrot.slane %v3283_v41, %v5743_v63 }
 0x4eb   : > { %4061 = vmatpush2.msra.mxu1 %v3692_v39  ;;  %4132 = vmatpush2.msra.mxu0 %v3948_v7  ;;  %v3292_v39 = vrot.slane %v3283_v41, %v5751_v24  ;;  %v3300_v7 = vrot.slane %v3283_v41, %v5754_v26  ;;  %v3511_v41 = vld [vmem:[%s8275_s16 + $0x158] sm:$0xff] }
 0x4ec   : > { %4062 = vmatprep.subr.mxu1 %v3685_v13  ;;  %4133 = vmatprep.subr.mxu0 %v3941_v19 }
 0x4ed   : > { %4063 = vmatpush2.msra.mxu1 %v3684_v51  ;;  %4134 = vmatpush2.msra.mxu0 %v3940_v45 }
 0x4ee   : > { %4064 = vmatprep.subr.mxu1 %v3677_v8  ;;  %4135 = vmatprep.subr.mxu0 %v3933_v15 }
 0x4ef   : > { %4065 = vmatpush2.msra.mxu1 %v3676_v54  ;;  %4136 = vmatpush2.msra.mxu0 %v3932_v21 }
 0x4f0   : > { %4066 = vmatprep.subr.mxu1 %v3669_v59  ;;  %4137 = vmatprep.subr.mxu0 %v3925_v50 }
 0x4f1   : > { %4067 = vmatpush2.msra.mxu1 %v3668_v30  ;;  %4138 = vmatpush2.msra.mxu0 %v3924_v29 }
 0x4f2   : > { %4068 = vmatprep.subr.mxu1 %v3661_v16  ;;  %4139 = vmatprep.subr.mxu0 %v3917_v38  ;;  %v3590_v16 = vld [vmem:[%s8275_s16 + $0x3d0] sm:$0xff] }
 0x4f3   : > { %4069 = vmatpush2.msra.mxu1 %v3660_v0  ;;  %4140 = vmatpush2.msra.mxu0 %v3916_v34  ;;  %v3846_v38 = vld [vmem:[%s8275_s16 + $0xbd0] sm:$0xff]  ;;  %v3583_v0 = vld [vmem:[%s8275_s16 + $0x398] sm:$0xff] }
 0x4f4   : > { %4070 = vmatprep.subr.mxu1 %v3653_v32  ;;  %4141 = vmatprep.subr.mxu0 %v3909_v53  ;;  %v3839_v34 = vld [vmem:[%s8275_s16 + $0xb98] sm:$0xff]  ;;  %v3582_v32 = vld [vmem:[%s8275_s16 + $0x390] sm:$0xff] }
 0x4f5   : > { %4071 = vmatpush2.msra.mxu1 %v3652_v18  ;;  %4142 = vmatpush2.msra.mxu0 %v3908_v57  ;;  %v3838_v53 = vld [vmem:[%s8275_s16 + $0xb90] sm:$0xff]  ;;  %v3575_v18 = vld [vmem:[%s8275_s16 + $0x358] sm:$0xff] }
 0x4f6   : > { %4072 = vmatprep.subr.mxu1 %v3645_v42  ;;  %4143 = vmatprep.subr.mxu0 %v3901_v28  ;;  %v3831_v57 = vld [vmem:[%s8275_s16 + $0xb58] sm:$0xff]  ;;  %v3574_v42 = vld [vmem:[%s8275_s16 + $0x350] sm:$0xff] }
 0x4f7   : > { %4073 = vmatpush2.msra.mxu1 %v3644_v36  ;;  %4144 = vmatpush2.msra.mxu0 %v3900_v14  ;;  %v3830_v28 = vld [vmem:[%s8275_s16 + $0xb50] sm:$0xff]  ;;  %v3567_v36 = vld [vmem:[%s8275_s16 + $0x318] sm:$0xff] }
 0x4f8   : > { %4074 = vmatprep.subr.mxu1 %v3637_v55  ;;  %4145 = vmatprep.subr.mxu0 %v3893_v48  ;;  %v3823_v14 = vld [vmem:[%s8275_s16 + $0xb18] sm:$0xff]  ;;  %v3566_v55 = vld [vmem:[%s8275_s16 + $0x310] sm:$0xff] }
 0x4f9   : > { %4075 = vmatpush2.msra.mxu1 %v3636_v37  ;;  %4146 = vmatpush2.msra.mxu0 %v3892_v44  ;;  %v3822_v48 = vld [vmem:[%s8275_s16 + $0xb10] sm:$0xff]  ;;  %v3559_v37 = vld [vmem:[%s8275_s16 + $0x2d8] sm:$0xff] }
 0x4fa   : > { %4076 = vmatprep.subr.mxu1 %v3629_v56  ;;  %4147 = vmatprep.subr.mxu0 %v3885_v9  ;;  %v3815_v44 = vld [vmem:[%s8275_s16 + $0xad8] sm:$0xff]  ;;  %v3558_v56 = vld [vmem:[%s8275_s16 + $0x2d0] sm:$0xff] }
 0x4fb   : > { %4077 = vmatpush2.msra.mxu1 %v3628_v46  ;;  %4148 = vmatpush2.msra.mxu0 %v3884_v52  ;;  %v3814_v9 = vld [vmem:[%s8275_s16 + $0xad0] sm:$0xff]  ;;  %v3551_v46 = vld [vmem:[%s8275_s16 + $0x298] sm:$0xff] }
 0x4fc   : > { %4078 = vmatprep.subr.mxu1 %v3621_v2  ;;  %4149 = vmatprep.subr.mxu0 %v3877_v10  ;;  %v3807_v52 = vld [vmem:[%s8275_s16 + $0xa98] sm:$0xff]  ;;  %v3550_v2 = vld [vmem:[%s8275_s16 + $0x290] sm:$0xff] }
 0x4fd   : > { %4079 = vmatpush2.msra.mxu1 %v3620_v3  ;;  %4150 = vmatpush2.msra.mxu0 %v3876_v20  ;;  %v3806_v10 = vld [vmem:[%s8275_s16 + $0xa90] sm:$0xff]  ;;  %v3543_v3 = vld [vmem:[%s8275_s16 + $0x258] sm:$0xff] }
 0x4fe   : > { %4080 = vmatprep.subr.mxu1 %v3613_v33  ;;  %4151 = vmatprep.subr.mxu0 %v3869_v47  ;;  %v3799_v20 = vld [vmem:[%s8275_s16 + $0xa58] sm:$0xff]  ;;  %v3542_v33 = vld [vmem:[%s8275_s16 + $0x250] sm:$0xff] }
 0x4ff   : > { %4081 = vmatpush2.msra.mxu1 %v3612_v58  ;;  %4152 = vmatpush2.msra.mxu0 %v3868_v11  ;;  %v3798_v47 = vld [vmem:[%s8275_s16 + $0xa50] sm:$0xff]  ;;  %v3535_v58 = vld [vmem:[%s8275_s16 + $0x218] sm:$0xff] }
 0x500   : > { %4082 = vmatprep.subr.mxu1 %v3605_v31  ;;  %4153 = vmatprep.subr.mxu0 %v3861_v23  ;;  %v3791_v11 = vld [vmem:[%s8275_s16 + $0xa18] sm:$0xff]  ;;  %v3534_v31 = vld [vmem:[%s8275_s16 + $0x210] sm:$0xff] }
 0x501   : > { %4083 = vmatpush2.msra.mxu1 %v3604_v12  ;;  %4154 = vmatpush2.msra.mxu0 %v3860_v4  ;;  %v3790_v23 = vld [vmem:[%s8275_s16 + $0xa10] sm:$0xff]  ;;  %v3527_v12 = vld [vmem:[%s8275_s16 + $0x1d8] sm:$0xff] }
 0x502   : > { %4084 = vmatprep.subr.mxu1 %v3597_v40  ;;  %4155 = vmatprep.subr.mxu0 %v3853_v27  ;;  %v3783_v4 = vld [vmem:[%s8275_s16 + $0x9d8] sm:$0xff]  ;;  %v3526_v40 = vld [vmem:[%s8275_s16 + $0x1d0] sm:$0xff] }
 0x503   : > { %4085 = vmatpush2.msra.mxu1 %v3596_v49  ;;  %4156 = vmatpush2.msra.mxu0 %v3852_v43  ;;  %v3782_v27 = vld [vmem:[%s8275_s16 + $0x9d0] sm:$0xff]  ;;  %v3519_v49 = vld [vmem:[%s8275_s16 + $0x198] sm:$0xff] }
 0x504   : > { %4164 = vmatprep.subr.mxu1 %v3591_v25  ;;  %4235 = vmatprep.subr.mxu0 %v3847_v5  ;;  %v3775_v43 = vld [vmem:[%s8275_s16 + $0x998] sm:$0xff]  ;;  %v3518_v25 = vld [vmem:[%s8275_s16 + $0x190] sm:$0xff] }
 0x505   : > { %v3774_v5 = vld [vmem:[%s8275_s16 + $0x990] sm:$0xff] }
 0x584   : > { %v3388_v13 = vpop.f32.mrf.mxu1  ;;  %v3459_v19 = vpop.f32.mrf.mxu0 }
 0x585   : > { %v3389_v51 = vadd.f32 %v3388_v13, %v3288_v35  ;;  %v3460_v45 = vadd.f32 %v3459_v19, %v3296_v17  ;;  %v3767_v35 = vld [vmem:[%s8275_s16 + $0x958] sm:$0xff]  ;;  %v3510_v17 = vld [vmem:[%s8275_s16 + $0x150] sm:$0xff] }
 0x586   : > { %v3390_v8 = vpop.f32.mrf.mxu1  ;;  %v3461_v15 = vpop.f32.mrf.mxu0  ;;  %v3759_v13 = vld [vmem:[%s8275_s16 + $0x918] sm:$0xff]  ;;  %v3502_v19 = vld [vmem:[%s8275_s16 + $0x110] sm:$0xff] }
 0x587   : > { %v3391_v54 = vadd.f32 %v3390_v8, %v3292_v39  ;;  %v3462_v21 = vadd.f32 %v3461_v15, %v3300_v7  ;;  %v7063_v30 = vmax.f32 %v3389_v51, 0.0  ;;  %v7065_v29 = vmax.f32 %v3460_v45, 0.0  ;;  %v3766_v39 = vld [vmem:[%s8275_s16 + $0x950] sm:$0xff]  ;;  %v3503_v7 = vld [vmem:[%s8275_s16 + $0x118] sm:$0xff] }
 0x588   : > { %v3758_v51 = vld [vmem:[%s8275_s16 + $0x910] sm:$0xff]  ;;  %v3495_v45 = vld [vmem:[%s8275_s16 + $0xd8] sm:$0xff] }
 0x589   : > { %v7059_v59 = vmax.f32 %v3391_v54, 0.0  ;;  %v7061_v50 = vmax.f32 %v3462_v21, 0.0  ;;  %v3751_v8 = vld [vmem:[%s8275_s16 + $0x8d8] sm:$0xff]  ;;  %v3494_v15 = vld [vmem:[%s8275_s16 + $0xd0] sm:$0xff] }
 0x58a   : > { %v3750_v54 = vld [vmem:[%s8275_s16 + $0x8d0] sm:$0xff]  ;;  %v3487_v21 = vld [vmem:[%s8275_s16 + $0x98] sm:$0xff] }
 0x58b   : > { %4086 = vmatprep.mubr.f32.mxu1 %v7059_v59  ;;  %4157 = vmatprep.mubr.f32.mxu0 %v7061_v50 }
 0x58c   : > { %4087 = vmatmul.mubr.f32.vlgmr.msra.gmra.mxu1 %v7063_v30  ;;  %4158 = vmatmul.mubr.f32.vlgmr.msra.gmra.mxu0 %v7065_v29 }
 0x58d   : > { %4165 = vmatpush1.msra.mxu1 %v3590_v16  ;;  %4236 = vmatpush1.msra.mxu0 %v3846_v38  ;;  %v3743_v16 = vld [vmem:[%s8275_s16 + $0x898] sm:$0xff]  ;;  %v3486_v38 = vld [vmem:[%s8275_s16 + $0x90] sm:$0xff] }
 0x58e   : > { %4166 = vmatprep.subr.mxu1 %v3583_v0  ;;  %4228 = vmatprep.mubr.f32.mxu1 %v7059_v59  ;;  %v3742_v0 = vld [vmem:[%s8275_s16 + $0x890] sm:$0xff] }
 0x58f   : > { %4237 = vmatprep.subr.mxu0 %v3839_v34  ;;  %4299 = vmatprep.mubr.f32.mxu0 %v7061_v50  ;;  %v3479_v34 = vld [vmem:[%s8275_s16 + $0x58] sm:$0xff] }
 0x590   : > { %4167 = vmatpush1.msra.mxu1 %v3582_v32  ;;  %4238 = vmatpush1.msra.mxu0 %v3838_v53  ;;  %v3735_v32 = vld [vmem:[%s8275_s16 + $0x858] sm:$0xff]  ;;  %v3478_v53 = vld [vmem:[%s8275_s16 + $0x50] sm:$0xff] }
 0x591   : > { %4168 = vmatprep.subr.mxu1 %v3575_v18  ;;  %4239 = vmatprep.subr.mxu0 %v3831_v57  ;;  %v3734_v18 = vld [vmem:[%s8275_s16 + $0x850] sm:$0xff]  ;;  %v3471_v57 = vld [vmem:[%s8275_s16 + $0x18] sm:$0xff] }
 0x592   : > { %4169 = vmatpush1.msra.mxu1 %v3574_v42  ;;  %4240 = vmatpush1.msra.mxu0 %v3830_v28  ;;  %v3727_v42 = vld [vmem:[%s8275_s16 + $0x818] sm:$0xff]  ;;  %v3470_v28 = vld [vmem:[%s8275_s16 + $0x10] sm:$0xff] }
 0x593   : > { %4170 = vmatprep.subr.mxu1 %v3567_v36  ;;  %4241 = vmatprep.subr.mxu0 %v3823_v14  ;;  %v3726_v36 = vld [vmem:[%s8275_s16 + $0x810] sm:$0xff]  ;;  %v3719_v14 = vld [vmem:[%s8275_s16 + $0x7d8] sm:$0xff] }
 0x594   : > { %4171 = vmatpush1.msra.mxu1 %v3566_v55  ;;  %4242 = vmatpush1.msra.mxu0 %v3822_v48  ;;  %v3975_v55 = vld [vmem:[%s8275_s16 + $0xfd8] sm:$0xff]  ;;  %v3718_v48 = vld [vmem:[%s8275_s16 + $0x7d0] sm:$0xff] }
 0x595   : > { %4172 = vmatprep.subr.mxu1 %v3559_v37  ;;  %4243 = vmatprep.subr.mxu0 %v3815_v44  ;;  %v3974_v37 = vld [vmem:[%s8275_s16 + $0xfd0] sm:$0xff]  ;;  %v3711_v44 = vld [vmem:[%s8275_s16 + $0x798] sm:$0xff] }
 0x596   : > { %4173 = vmatpush1.msra.mxu1 %v3558_v56  ;;  %4244 = vmatpush1.msra.mxu0 %v3814_v9  ;;  %v3967_v56 = vld [vmem:[%s8275_s16 + $0xf98] sm:$0xff]  ;;  %v3710_v9 = vld [vmem:[%s8275_s16 + $0x790] sm:$0xff] }
 0x597   : > { %4174 = vmatprep.subr.mxu1 %v3551_v46  ;;  %4245 = vmatprep.subr.mxu0 %v3807_v52  ;;  %v3966_v46 = vld [vmem:[%s8275_s16 + $0xf90] sm:$0xff]  ;;  %v3703_v52 = vld [vmem:[%s8275_s16 + $0x758] sm:$0xff] }
 0x598   : > { %4175 = vmatpush1.msra.mxu1 %v3550_v2  ;;  %4246 = vmatpush1.msra.mxu0 %v3806_v10  ;;  %v3959_v2 = vld [vmem:[%s8275_s16 + $0xf58] sm:$0xff]  ;;  %v3702_v10 = vld [vmem:[%s8275_s16 + $0x750] sm:$0xff] }
 0x599   : > { %4176 = vmatprep.subr.mxu1 %v3543_v3  ;;  %4247 = vmatprep.subr.mxu0 %v3799_v20  ;;  %v3958_v3 = vld [vmem:[%s8275_s16 + $0xf50] sm:$0xff]  ;;  %v3695_v20 = vld [vmem:[%s8275_s16 + $0x718] sm:$0xff] }
 0x59a   : > { %4177 = vmatpush1.msra.mxu1 %v3542_v33  ;;  %4248 = vmatpush1.msra.mxu0 %v3798_v47  ;;  %v3951_v33 = vld [vmem:[%s8275_s16 + $0xf18] sm:$0xff]  ;;  %v3694_v47 = vld [vmem:[%s8275_s16 + $0x710] sm:$0xff] }
 0x59b   : > { %4178 = vmatprep.subr.mxu1 %v3535_v58  ;;  %4249 = vmatprep.subr.mxu0 %v3791_v11  ;;  %v3950_v58 = vld [vmem:[%s8275_s16 + $0xf10] sm:$0xff]  ;;  %v3687_v11 = vld [vmem:[%s8275_s16 + $0x6d8] sm:$0xff] }
 0x59c   : > { %4179 = vmatpush1.msra.mxu1 %v3534_v31  ;;  %4250 = vmatpush1.msra.mxu0 %v3790_v23  ;;  %v3943_v31 = vld [vmem:[%s8275_s16 + $0xed8] sm:$0xff]  ;;  %v3686_v23 = vld [vmem:[%s8275_s16 + $0x6d0] sm:$0xff] }
 0x59d   : > { %4180 = vmatprep.subr.mxu1 %v3527_v12  ;;  %4251 = vmatprep.subr.mxu0 %v3783_v4  ;;  %v3942_v12 = vld [vmem:[%s8275_s16 + $0xed0] sm:$0xff]  ;;  %v3679_v4 = vld [vmem:[%s8275_s16 + $0x698] sm:$0xff] }
 0x59e   : > { %4181 = vmatpush1.msra.mxu1 %v3526_v40  ;;  %4252 = vmatpush1.msra.mxu0 %v3782_v27  ;;  %v3935_v40 = vld [vmem:[%s8275_s16 + $0xe98] sm:$0xff]  ;;  %v3678_v27 = vld [vmem:[%s8275_s16 + $0x690] sm:$0xff] }
 0x59f   : > { %4182 = vmatprep.subr.mxu1 %v3519_v49  ;;  %4253 = vmatprep.subr.mxu0 %v3775_v43  ;;  %v3934_v49 = vld [vmem:[%s8275_s16 + $0xe90] sm:$0xff]  ;;  %v3671_v43 = vld [vmem:[%s8275_s16 + $0x658] sm:$0xff] }
 0x5a0   : > { %4183 = vmatpush1.msra.mxu1 %v3518_v25  ;;  %4254 = vmatpush1.msra.mxu0 %v3774_v5  ;;  %v3927_v25 = vld [vmem:[%s8275_s16 + $0xe58] sm:$0xff]  ;;  %v3670_v5 = vld [vmem:[%s8275_s16 + $0x650] sm:$0xff] }
 0x5a1   : > { %4184 = vmatprep.subr.mxu1 %v3511_v41  ;;  %4255 = vmatprep.subr.mxu0 %v3767_v35  ;;  %v3926_v41 = vld [vmem:[%s8275_s16 + $0xe50] sm:$0xff]  ;;  %v3663_v35 = vld [vmem:[%s8275_s16 + $0x618] sm:$0xff] }
 0x5a2   : > { %4185 = vmatpush1.msra.mxu1 %v3510_v17  ;;  %4256 = vmatpush1.msra.mxu0 %v3766_v39  ;;  %v3919_v17 = vld [vmem:[%s8275_s16 + $0xe18] sm:$0xff]  ;;  %v3662_v39 = vld [vmem:[%s8275_s16 + $0x610] sm:$0xff] }
 0x5a3   : > { %4186 = vmatprep.subr.mxu1 %v3503_v7  ;;  %4257 = vmatprep.subr.mxu0 %v3759_v13  ;;  %v3918_v7 = vld [vmem:[%s8275_s16 + $0xe10] sm:$0xff]  ;;  %v3655_v13 = vld [vmem:[%s8275_s16 + $0x5d8] sm:$0xff] }
 0x5a4   : > { %4187 = vmatpush1.msra.mxu1 %v3502_v19  ;;  %4258 = vmatpush1.msra.mxu0 %v3758_v51  ;;  %v3911_v19 = vld [vmem:[%s8275_s16 + $0xdd8] sm:$0xff]  ;;  %v3654_v51 = vld [vmem:[%s8275_s16 + $0x5d0] sm:$0xff] }
 0x5a5   : > { %4188 = vmatprep.subr.mxu1 %v3495_v45  ;;  %4259 = vmatprep.subr.mxu0 %v3751_v8  ;;  %v3910_v45 = vld [vmem:[%s8275_s16 + $0xdd0] sm:$0xff]  ;;  %v3647_v8 = vld [vmem:[%s8275_s16 + $0x598] sm:$0xff] }
 0x5a6   : > { %4189 = vmatpush1.msra.mxu1 %v3494_v15  ;;  %4260 = vmatpush1.msra.mxu0 %v3750_v54  ;;  %v3903_v15 = vld [vmem:[%s8275_s16 + $0xd98] sm:$0xff]  ;;  %v3646_v54 = vld [vmem:[%s8275_s16 + $0x590] sm:$0xff] }
 0x5a7   : > { %4190 = vmatprep.subr.mxu1 %v3487_v21  ;;  %4261 = vmatprep.subr.mxu0 %v3743_v16  ;;  %v3902_v21 = vld [vmem:[%s8275_s16 + $0xd90] sm:$0xff]  ;;  %v3639_v16 = vld [vmem:[%s8275_s16 + $0x558] sm:$0xff] }
 0x5a8   : > { %4191 = vmatpush1.msra.mxu1 %v3486_v38  ;;  %4262 = vmatpush1.msra.mxu0 %v3742_v0  ;;  %v3895_v38 = vld [vmem:[%s8275_s16 + $0xd58] sm:$0xff]  ;;  %v3638_v0 = vld [vmem:[%s8275_s16 + $0x550] sm:$0xff] }
 0x5a9   : > { %4192 = vmatprep.subr.mxu1 %v3479_v34  ;;  %4263 = vmatprep.subr.mxu0 %v3735_v32  ;;  %v3894_v34 = vld [vmem:[%s8275_s16 + $0xd50] sm:$0xff]  ;;  %v3631_v32 = vld [vmem:[%s8275_s16 + $0x518] sm:$0xff] }
 0x5aa   : > { %4193 = vmatpush1.msra.mxu1 %v3478_v53  ;;  %4264 = vmatpush1.msra.mxu0 %v3734_v18  ;;  %v3887_v53 = vld [vmem:[%s8275_s16 + $0xd18] sm:$0xff]  ;;  %v3630_v18 = vld [vmem:[%s8275_s16 + $0x510] sm:$0xff] }
 0x5ab   : > { %4194 = vmatprep.subr.mxu1 %v3471_v57  ;;  %4265 = vmatprep.subr.mxu0 %v3727_v42  ;;  %v3886_v57 = vld [vmem:[%s8275_s16 + $0xd10] sm:$0xff]  ;;  %v3623_v42 = vld [vmem:[%s8275_s16 + $0x4d8] sm:$0xff] }
 0x5ac   : > { %4195 = vmatpush1.msra.mxu1 %v3470_v28  ;;  %4266 = vmatpush1.msra.mxu0 %v3726_v36  ;;  %v3879_v28 = vld [vmem:[%s8275_s16 + $0xcd8] sm:$0xff]  ;;  %v3622_v36 = vld [vmem:[%s8275_s16 + $0x4d0] sm:$0xff] }
 0x5ad   : > { %4196 = vmatprep.subr.mxu1 %v3719_v14  ;;  %4267 = vmatprep.subr.mxu0 %v3975_v55  ;;  %v3878_v14 = vld [vmem:[%s8275_s16 + $0xcd0] sm:$0xff]  ;;  %v3615_v55 = vld [vmem:[%s8275_s16 + $0x498] sm:$0xff] }
 0x5ae   : > { %4197 = vmatpush2.msra.mxu1 %v3718_v48  ;;  %4268 = vmatpush2.msra.mxu0 %v3974_v37  ;;  %v3871_v48 = vld [vmem:[%s8275_s16 + $0xc98] sm:$0xff]  ;;  %v3614_v37 = vld [vmem:[%s8275_s16 + $0x490] sm:$0xff] }
 0x5af   : > { %4198 = vmatprep.subr.mxu1 %v3711_v44  ;;  %4269 = vmatprep.subr.mxu0 %v3967_v56  ;;  %v3870_v44 = vld [vmem:[%s8275_s16 + $0xc90] sm:$0xff]  ;;  %v3607_v56 = vld [vmem:[%s8275_s16 + $0x458] sm:$0xff] }
 0x5b0   : > { %4199 = vmatpush2.msra.mxu1 %v3710_v9  ;;  %4270 = vmatpush2.msra.mxu0 %v3966_v46  ;;  %v3863_v9 = vld [vmem:[%s8275_s16 + $0xc58] sm:$0xff]  ;;  %v3606_v46 = vld [vmem:[%s8275_s16 + $0x450] sm:$0xff] }
 0x5b1   : > { %4200 = vmatprep.subr.mxu1 %v3703_v52  ;;  %4271 = vmatprep.subr.mxu0 %v3959_v2  ;;  %v3862_v52 = vld [vmem:[%s8275_s16 + $0xc50] sm:$0xff]  ;;  %v3599_v2 = vld [vmem:[%s8275_s16 + $0x418] sm:$0xff] }
 0x5b2   : > { %4201 = vmatpush2.msra.mxu1 %v3702_v10  ;;  %4272 = vmatpush2.msra.mxu0 %v3958_v3  ;;  %v3855_v10 = vld [vmem:[%s8275_s16 + $0xc18] sm:$0xff]  ;;  %v3598_v3 = vld [vmem:[%s8275_s16 + $0x410] sm:$0xff] }
 0x5b3   : > { %4202 = vmatprep.subr.mxu1 %v3695_v20  ;;  %4273 = vmatprep.subr.mxu0 %v3951_v33  ;;  %v3854_v20 = vld [vmem:[%s8275_s16 + $0xc10] sm:$0xff]  ;;  %v3593_v33 = vld [vmem:[%s8275_s16 + $0x3e8] sm:$0xff] }
 0x5b4   : > { %4203 = vmatpush2.msra.mxu1 %v3694_v47  ;;  %4274 = vmatpush2.msra.mxu0 %v3950_v58  ;;  %v3849_v47 = vld [vmem:[%s8275_s16 + $0xbe8] sm:$0xff]  ;;  %v3592_v58 = vld [vmem:[%s8275_s16 + $0x3e0] sm:$0xff] }
 0x5b5   : > { %4204 = vmatprep.subr.mxu1 %v3687_v11  ;;  %4275 = vmatprep.subr.mxu0 %v3943_v31  ;;  %v3848_v11 = vld [vmem:[%s8275_s16 + $0xbe0] sm:$0xff]  ;;  %v3585_v31 = vld [vmem:[%s8275_s16 + $0x3a8] sm:$0xff] }
 0x5b6   : > { %4205 = vmatpush2.msra.mxu1 %v3686_v23  ;;  %4276 = vmatpush2.msra.mxu0 %v3942_v12  ;;  %v3841_v23 = vld [vmem:[%s8275_s16 + $0xba8] sm:$0xff]  ;;  %v3584_v12 = vld [vmem:[%s8275_s16 + $0x3a0] sm:$0xff] }
 0x5b7   : > { %4206 = vmatprep.subr.mxu1 %v3679_v4  ;;  %4277 = vmatprep.subr.mxu0 %v3935_v40  ;;  %v3840_v4 = vld [vmem:[%s8275_s16 + $0xba0] sm:$0xff]  ;;  %v3577_v40 = vld [vmem:[%s8275_s16 + $0x368] sm:$0xff] }
 0x5b8   : > { %4207 = vmatpush2.msra.mxu1 %v3678_v27  ;;  %4278 = vmatpush2.msra.mxu0 %v3934_v49  ;;  %v3833_v27 = vld [vmem:[%s8275_s16 + $0xb68] sm:$0xff]  ;;  %v3576_v49 = vld [vmem:[%s8275_s16 + $0x360] sm:$0xff] }
 0x5b9   : > { %4208 = vmatprep.subr.mxu1 %v3671_v43  ;;  %4279 = vmatprep.subr.mxu0 %v3927_v25  ;;  %v3832_v43 = vld [vmem:[%s8275_s16 + $0xb60] sm:$0xff]  ;;  %v3569_v25 = vld [vmem:[%s8275_s16 + $0x328] sm:$0xff] }
 0x5ba   : > { %4209 = vmatpush2.msra.mxu1 %v3670_v5  ;;  %4280 = vmatpush2.msra.mxu0 %v3926_v41  ;;  %v3825_v5 = vld [vmem:[%s8275_s16 + $0xb28] sm:$0xff]  ;;  %v3568_v41 = vld [vmem:[%s8275_s16 + $0x320] sm:$0xff] }
 0x5bb   : > { %4210 = vmatprep.subr.mxu1 %v3663_v35  ;;  %4281 = vmatprep.subr.mxu0 %v3919_v17  ;;  %v3824_v35 = vld [vmem:[%s8275_s16 + $0xb20] sm:$0xff]  ;;  %v3561_v17 = vld [vmem:[%s8275_s16 + $0x2e8] sm:$0xff] }
 0x5bc   : > { %4211 = vmatpush2.msra.mxu1 %v3662_v39  ;;  %4282 = vmatpush2.msra.mxu0 %v3918_v7  ;;  %v3817_v39 = vld [vmem:[%s8275_s16 + $0xae8] sm:$0xff]  ;;  %v3560_v7 = vld [vmem:[%s8275_s16 + $0x2e0] sm:$0xff] }
 0x5bd   : > { %4212 = vmatprep.subr.mxu1 %v3655_v13  ;;  %4283 = vmatprep.subr.mxu0 %v3911_v19  ;;  %v3816_v13 = vld [vmem:[%s8275_s16 + $0xae0] sm:$0xff]  ;;  %v3553_v19 = vld [vmem:[%s8275_s16 + $0x2a8] sm:$0xff] }
 0x5be   : > { %4213 = vmatpush2.msra.mxu1 %v3654_v51  ;;  %4284 = vmatpush2.msra.mxu0 %v3910_v45  ;;  %v3809_v51 = vld [vmem:[%s8275_s16 + $0xaa8] sm:$0xff]  ;;  %v3552_v45 = vld [vmem:[%s8275_s16 + $0x2a0] sm:$0xff] }
 0x5bf   : > { %4214 = vmatprep.subr.mxu1 %v3647_v8  ;;  %4285 = vmatprep.subr.mxu0 %v3903_v15  ;;  %v3808_v8 = vld [vmem:[%s8275_s16 + $0xaa0] sm:$0xff]  ;;  %v3545_v15 = vld [vmem:[%s8275_s16 + $0x268] sm:$0xff] }
 0x5c0   : > { %4215 = vmatpush2.msra.mxu1 %v3646_v54  ;;  %4286 = vmatpush2.msra.mxu0 %v3902_v21  ;;  %v3801_v54 = vld [vmem:[%s8275_s16 + $0xa68] sm:$0xff]  ;;  %v3544_v21 = vld [vmem:[%s8275_s16 + $0x260] sm:$0xff] }
 0x5c1   : > { %4216 = vmatprep.subr.mxu1 %v3639_v16  ;;  %4287 = vmatprep.subr.mxu0 %v3895_v38  ;;  %v3800_v16 = vld [vmem:[%s8275_s16 + $0xa60] sm:$0xff]  ;;  %v3537_v38 = vld [vmem:[%s8275_s16 + $0x228] sm:$0xff] }
 0x5c2   : > { %4217 = vmatpush2.msra.mxu1 %v3638_v0  ;;  %4288 = vmatpush2.msra.mxu0 %v3894_v34  ;;  %v3793_v0 = vld [vmem:[%s8275_s16 + $0xa28] sm:$0xff]  ;;  %v3536_v34 = vld [vmem:[%s8275_s16 + $0x220] sm:$0xff] }
 0x5c3   : > { %4218 = vmatprep.subr.mxu1 %v3631_v32  ;;  %4289 = vmatprep.subr.mxu0 %v3887_v53  ;;  %v3792_v32 = vld [vmem:[%s8275_s16 + $0xa20] sm:$0xff]  ;;  %v3529_v53 = vld [vmem:[%s8275_s16 + $0x1e8] sm:$0xff] }
 0x5c4   : > { %4219 = vmatpush2.msra.mxu1 %v3630_v18  ;;  %4290 = vmatpush2.msra.mxu0 %v3886_v57  ;;  %v3785_v18 = vld [vmem:[%s8275_s16 + $0x9e8] sm:$0xff]  ;;  %v3528_v57 = vld [vmem:[%s8275_s16 + $0x1e0] sm:$0xff] }
 0x5c5   : > { %4220 = vmatprep.subr.mxu1 %v3623_v42  ;;  %4291 = vmatprep.subr.mxu0 %v3879_v28  ;;  %v3784_v42 = vld [vmem:[%s8275_s16 + $0x9e0] sm:$0xff]  ;;  %v3521_v28 = vld [vmem:[%s8275_s16 + $0x1a8] sm:$0xff] }
 0x5c6   : > { %4221 = vmatpush2.msra.mxu1 %v3622_v36  ;;  %4292 = vmatpush2.msra.mxu0 %v3878_v14  ;;  %v3777_v36 = vld [vmem:[%s8275_s16 + $0x9a8] sm:$0xff]  ;;  %v3520_v14 = vld [vmem:[%s8275_s16 + $0x1a0] sm:$0xff] }
 0x5c7   : > { %4222 = vmatprep.subr.mxu1 %v3615_v55  ;;  %4293 = vmatprep.subr.mxu0 %v3871_v48  ;;  %v3776_v55 = vld [vmem:[%s8275_s16 + $0x9a0] sm:$0xff]  ;;  %v3513_v48 = vld [vmem:[%s8275_s16 + $0x168] sm:$0xff] }
 0x5c8   : > { %4223 = vmatpush2.msra.mxu1 %v3614_v37  ;;  %4294 = vmatpush2.msra.mxu0 %v3870_v44  ;;  %v3769_v37 = vld [vmem:[%s8275_s16 + $0x968] sm:$0xff]  ;;  %v3512_v44 = vld [vmem:[%s8275_s16 + $0x160] sm:$0xff] }
 0x5c9   : > { %4224 = vmatprep.subr.mxu1 %v3607_v56  ;;  %4295 = vmatprep.subr.mxu0 %v3863_v9  ;;  %v3768_v56 = vld [vmem:[%s8275_s16 + $0x960] sm:$0xff]  ;;  %v3505_v9 = vld [vmem:[%s8275_s16 + $0x128] sm:$0xff] }
 0x5ca   : > { %4225 = vmatpush2.msra.mxu1 %v3606_v46  ;;  %4296 = vmatpush2.msra.mxu0 %v3862_v52  ;;  %v3761_v46 = vld [vmem:[%s8275_s16 + $0x928] sm:$0xff]  ;;  %v3504_v52 = vld [vmem:[%s8275_s16 + $0x120] sm:$0xff] }
 0x5cb   : > { %4226 = vmatprep.subr.mxu1 %v3599_v2  ;;  %4297 = vmatprep.subr.mxu0 %v3855_v10  ;;  %v3760_v2 = vld [vmem:[%s8275_s16 + $0x920] sm:$0xff]  ;;  %v3497_v10 = vld [vmem:[%s8275_s16 + $0xe8] sm:$0xff] }
 0x5cc   : > { %4227 = vmatpush2.msra.mxu1 %v3598_v3  ;;  %4298 = vmatpush2.msra.mxu0 %v3854_v20  ;;  %v3753_v3 = vld [vmem:[%s8275_s16 + $0x8e8] sm:$0xff]  ;;  %v3496_v20 = vld [vmem:[%s8275_s16 + $0xe0] sm:$0xff] }
 0x5cd   : > { %4229 = vmatmul.mubr.f32.vlgmr.msra.gmra.mxu1 %v7063_v30  ;;  %4300 = vmatmul.mubr.f32.vlgmr.msra.gmra.mxu0 %v7065_v29 }
 0x5ce   : > { %4306 = vmatprep.subr.mxu1 %v3593_v33  ;;  %4377 = vmatprep.subr.mxu0 %v3849_v47  ;;  %v3752_v33 = vld [vmem:[%s8275_s16 + $0x8e0] sm:$0xff]  ;;  %v3489_v47 = vld [vmem:[%s8275_s16 + $0xa8] sm:$0xff] }
 0x5cf   : > { %4307 = vmatpush1.msra.mxu1 %v3592_v58  ;;  %4370 = vmatprep.mubr.f32.mxu1 %v7059_v59  ;;  %v3745_v58 = vld [vmem:[%s8275_s16 + $0x8a8] sm:$0xff] }
 0x5d0   : > { %4378 = vmatpush1.msra.mxu0 %v3848_v11  ;;  %4441 = vmatprep.mubr.f32.mxu0 %v7061_v50  ;;  %v3488_v11 = vld [vmem:[%s8275_s16 + $0xa0] sm:$0xff] }
 0x5d1   : > { %4308 = vmatprep.subr.mxu1 %v3585_v31  ;;  %4379 = vmatprep.subr.mxu0 %v3841_v23  ;;  %v3744_v31 = vld [vmem:[%s8275_s16 + $0x8a0] sm:$0xff]  ;;  %v3481_v23 = vld [vmem:[%s8275_s16 + $0x68] sm:$0xff] }
 0x5d2   : > { %4309 = vmatpush1.msra.mxu1 %v3584_v12  ;;  %4380 = vmatpush1.msra.mxu0 %v3840_v4  ;;  %v3737_v12 = vld [vmem:[%s8275_s16 + $0x868] sm:$0xff]  ;;  %v3480_v4 = vld [vmem:[%s8275_s16 + $0x60] sm:$0xff] }
 0x5d3   : > { %4310 = vmatprep.subr.mxu1 %v3577_v40  ;;  %4381 = vmatprep.subr.mxu0 %v3833_v27  ;;  %v3736_v40 = vld [vmem:[%s8275_s16 + $0x860] sm:$0xff]  ;;  %v3473_v27 = vld [vmem:[%s8275_s16 + $0x28] sm:$0xff] }
 0x5d4   : > { %4311 = vmatpush1.msra.mxu1 %v3576_v49  ;;  %4382 = vmatpush1.msra.mxu0 %v3832_v43  ;;  %v3729_v49 = vld [vmem:[%s8275_s16 + $0x828] sm:$0xff]  ;;  %v3472_v43 = vld [vmem:[%s8275_s16 + $0x20] sm:$0xff] }
 0x5d5   : > { %4312 = vmatprep.subr.mxu1 %v3569_v25  ;;  %4383 = vmatprep.subr.mxu0 %v3825_v5  ;;  %v3728_v25 = vld [vmem:[%s8275_s16 + $0x820] sm:$0xff]  ;;  %v3721_v5 = vld [vmem:[%s8275_s16 + $0x7e8] sm:$0xff] }
 0x5d6   : > { %4313 = vmatpush1.msra.mxu1 %v3568_v41  ;;  %4384 = vmatpush1.msra.mxu0 %v3824_v35  ;;  %v3977_v41 = vld [vmem:[%s8275_s16 + $0xfe8] sm:$0xff]  ;;  %v3720_v35 = vld [vmem:[%s8275_s16 + $0x7e0] sm:$0xff] }
 0x5d7   : > { %4314 = vmatprep.subr.mxu1 %v3561_v17  ;;  %4385 = vmatprep.subr.mxu0 %v3817_v39  ;;  %v3976_v17 = vld [vmem:[%s8275_s16 + $0xfe0] sm:$0xff]  ;;  %v3713_v39 = vld [vmem:[%s8275_s16 + $0x7a8] sm:$0xff] }
 0x5d8   : > { %4315 = vmatpush1.msra.mxu1 %v3560_v7  ;;  %4386 = vmatpush1.msra.mxu0 %v3816_v13  ;;  %v3969_v7 = vld [vmem:[%s8275_s16 + $0xfa8] sm:$0xff]  ;;  %v3712_v13 = vld [vmem:[%s8275_s16 + $0x7a0] sm:$0xff] }
 0x5d9   : > { %4316 = vmatprep.subr.mxu1 %v3553_v19  ;;  %4387 = vmatprep.subr.mxu0 %v3809_v51  ;;  %v3968_v19 = vld [vmem:[%s8275_s16 + $0xfa0] sm:$0xff]  ;;  %v3705_v51 = vld [vmem:[%s8275_s16 + $0x768] sm:$0xff] }
 0x5da   : > { %4317 = vmatpush1.msra.mxu1 %v3552_v45  ;;  %4388 = vmatpush1.msra.mxu0 %v3808_v8  ;;  %v3961_v45 = vld [vmem:[%s8275_s16 + $0xf68] sm:$0xff]  ;;  %v3704_v8 = vld [vmem:[%s8275_s16 + $0x760] sm:$0xff] }
 0x5db   : > { %4318 = vmatprep.subr.mxu1 %v3545_v15  ;;  %4389 = vmatprep.subr.mxu0 %v3801_v54  ;;  %v3960_v15 = vld [vmem:[%s8275_s16 + $0xf60] sm:$0xff]  ;;  %v3697_v54 = vld [vmem:[%s8275_s16 + $0x728] sm:$0xff] }
 0x5dc   : > { %4319 = vmatpush1.msra.mxu1 %v3544_v21  ;;  %4390 = vmatpush1.msra.mxu0 %v3800_v16  ;;  %v3953_v21 = vld [vmem:[%s8275_s16 + $0xf28] sm:$0xff]  ;;  %v3696_v16 = vld [vmem:[%s8275_s16 + $0x720] sm:$0xff] }
 0x5dd   : > { %4320 = vmatprep.subr.mxu1 %v3537_v38  ;;  %4391 = vmatprep.subr.mxu0 %v3793_v0  ;;  %v3952_v38 = vld [vmem:[%s8275_s16 + $0xf20] sm:$0xff]  ;;  %v3689_v0 = vld [vmem:[%s8275_s16 + $0x6e8] sm:$0xff] }
 0x5de   : > { %4321 = vmatpush1.msra.mxu1 %v3536_v34  ;;  %4392 = vmatpush1.msra.mxu0 %v3792_v32  ;;  %v3945_v34 = vld [vmem:[%s8275_s16 + $0xee8] sm:$0xff]  ;;  %v3688_v32 = vld [vmem:[%s8275_s16 + $0x6e0] sm:$0xff] }
 0x5df   : > { %4322 = vmatprep.subr.mxu1 %v3529_v53  ;;  %4393 = vmatprep.subr.mxu0 %v3785_v18  ;;  %v3944_v53 = vld [vmem:[%s8275_s16 + $0xee0] sm:$0xff]  ;;  %v3681_v18 = vld [vmem:[%s8275_s16 + $0x6a8] sm:$0xff] }
 0x5e0   : > { %4323 = vmatpush1.msra.mxu1 %v3528_v57  ;;  %4394 = vmatpush1.msra.mxu0 %v3784_v42  ;;  %v3937_v57 = vld [vmem:[%s8275_s16 + $0xea8] sm:$0xff]  ;;  %v3680_v42 = vld [vmem:[%s8275_s16 + $0x6a0] sm:$0xff] }
 0x5e1   : > { %4324 = vmatprep.subr.mxu1 %v3521_v28  ;;  %4395 = vmatprep.subr.mxu0 %v3777_v36  ;;  %v3936_v28 = vld [vmem:[%s8275_s16 + $0xea0] sm:$0xff]  ;;  %v3673_v36 = vld [vmem:[%s8275_s16 + $0x668] sm:$0xff] }
 0x5e2   : > { %4325 = vmatpush1.msra.mxu1 %v3520_v14  ;;  %4396 = vmatpush1.msra.mxu0 %v3776_v55  ;;  %v3929_v14 = vld [vmem:[%s8275_s16 + $0xe68] sm:$0xff]  ;;  %v3672_v55 = vld [vmem:[%s8275_s16 + $0x660] sm:$0xff] }
 0x5e3   : > { %4326 = vmatprep.subr.mxu1 %v3513_v48  ;;  %4397 = vmatprep.subr.mxu0 %v3769_v37  ;;  %v3928_v48 = vld [vmem:[%s8275_s16 + $0xe60] sm:$0xff]  ;;  %v3665_v37 = vld [vmem:[%s8275_s16 + $0x628] sm:$0xff] }
 0x5e4   : > { %4327 = vmatpush1.msra.mxu1 %v3512_v44  ;;  %4398 = vmatpush1.msra.mxu0 %v3768_v56  ;;  %v3921_v44 = vld [vmem:[%s8275_s16 + $0xe28] sm:$0xff]  ;;  %v3664_v56 = vld [vmem:[%s8275_s16 + $0x620] sm:$0xff] }
 0x5e5   : > { %4328 = vmatprep.subr.mxu1 %v3505_v9  ;;  %4399 = vmatprep.subr.mxu0 %v3761_v46  ;;  %v3920_v9 = vld [vmem:[%s8275_s16 + $0xe20] sm:$0xff]  ;;  %v3657_v46 = vld [vmem:[%s8275_s16 + $0x5e8] sm:$0xff] }
 0x5e6   : > { %4329 = vmatpush1.msra.mxu1 %v3504_v52  ;;  %4400 = vmatpush1.msra.mxu0 %v3760_v2  ;;  %v3913_v52 = vld [vmem:[%s8275_s16 + $0xde8] sm:$0xff]  ;;  %v3656_v2 = vld [vmem:[%s8275_s16 + $0x5e0] sm:$0xff] }
 0x5e7   : > { %4330 = vmatprep.subr.mxu1 %v3497_v10  ;;  %4401 = vmatprep.subr.mxu0 %v3753_v3  ;;  %v3912_v10 = vld [vmem:[%s8275_s16 + $0xde0] sm:$0xff]  ;;  %v3649_v3 = vld [vmem:[%s8275_s16 + $0x5a8] sm:$0xff] }
 0x5e8   : > { %4331 = vmatpush1.msra.mxu1 %v3496_v20  ;;  %4402 = vmatpush1.msra.mxu0 %v3752_v33  ;;  %v3905_v20 = vld [vmem:[%s8275_s16 + $0xda8] sm:$0xff]  ;;  %v3648_v33 = vld [vmem:[%s8275_s16 + $0x5a0] sm:$0xff] }
 0x5e9   : > { %4332 = vmatprep.subr.mxu1 %v3489_v47  ;;  %4403 = vmatprep.subr.mxu0 %v3745_v58  ;;  %v3904_v47 = vld [vmem:[%s8275_s16 + $0xda0] sm:$0xff]  ;;  %v3641_v58 = vld [vmem:[%s8275_s16 + $0x568] sm:$0xff] }
 0x5ea   : > { %4333 = vmatpush1.msra.mxu1 %v3488_v11  ;;  %4404 = vmatpush1.msra.mxu0 %v3744_v31  ;;  %v3897_v11 = vld [vmem:[%s8275_s16 + $0xd68] sm:$0xff]  ;;  %v3640_v31 = vld [vmem:[%s8275_s16 + $0x560] sm:$0xff] }
 0x5eb   : > { %4334 = vmatprep.subr.mxu1 %v3481_v23  ;;  %4405 = vmatprep.subr.mxu0 %v3737_v12  ;;  %v3896_v23 = vld [vmem:[%s8275_s16 + $0xd60] sm:$0xff]  ;;  %v3633_v12 = vld [vmem:[%s8275_s16 + $0x528] sm:$0xff] }
 0x5ec   : > { %4335 = vmatpush1.msra.mxu1 %v3480_v4  ;;  %4406 = vmatpush1.msra.mxu0 %v3736_v40  ;;  %v3889_v4 = vld [vmem:[%s8275_s16 + $0xd28] sm:$0xff]  ;;  %v3632_v40 = vld [vmem:[%s8275_s16 + $0x520] sm:$0xff] }
 0x5ed   : > { %4336 = vmatprep.subr.mxu1 %v3473_v27  ;;  %4407 = vmatprep.subr.mxu0 %v3729_v49  ;;  %v3888_v27 = vld [vmem:[%s8275_s16 + $0xd20] sm:$0xff]  ;;  %v3625_v49 = vld [vmem:[%s8275_s16 + $0x4e8] sm:$0xff] }
 0x5ee   : > { %4337 = vmatpush1.msra.mxu1 %v3472_v43  ;;  %4408 = vmatpush1.msra.mxu0 %v3728_v25  ;;  %v3881_v43 = vld [vmem:[%s8275_s16 + $0xce8] sm:$0xff]  ;;  %v3624_v25 = vld [vmem:[%s8275_s16 + $0x4e0] sm:$0xff] }
 0x5ef   : > { %4338 = vmatprep.subr.mxu1 %v3721_v5  ;;  %4409 = vmatprep.subr.mxu0 %v3977_v41  ;;  %v3880_v5 = vld [vmem:[%s8275_s16 + $0xce0] sm:$0xff]  ;;  %v3617_v41 = vld [vmem:[%s8275_s16 + $0x4a8] sm:$0xff] }
 0x5f0   : > { %4339 = vmatpush2.msra.mxu1 %v3720_v35  ;;  %4410 = vmatpush2.msra.mxu0 %v3976_v17  ;;  %v3873_v35 = vld [vmem:[%s8275_s16 + $0xca8] sm:$0xff]  ;;  %v3616_v17 = vld [vmem:[%s8275_s16 + $0x4a0] sm:$0xff] }
 0x5f1   : > { %4340 = vmatprep.subr.mxu1 %v3713_v39  ;;  %4411 = vmatprep.subr.mxu0 %v3969_v7  ;;  %v3872_v39 = vld [vmem:[%s8275_s16 + $0xca0] sm:$0xff]  ;;  %v3609_v7 = vld [vmem:[%s8275_s16 + $0x468] sm:$0xff] }
 0x5f2   : > { %4341 = vmatpush2.msra.mxu1 %v3712_v13  ;;  %4412 = vmatpush2.msra.mxu0 %v3968_v19  ;;  %v3865_v13 = vld [vmem:[%s8275_s16 + $0xc68] sm:$0xff]  ;;  %v3608_v19 = vld [vmem:[%s8275_s16 + $0x460] sm:$0xff] }
 0x5f3   : > { %4342 = vmatprep.subr.mxu1 %v3705_v51  ;;  %4413 = vmatprep.subr.mxu0 %v3961_v45  ;;  %v3864_v51 = vld [vmem:[%s8275_s16 + $0xc60] sm:$0xff]  ;;  %v3601_v45 = vld [vmem:[%s8275_s16 + $0x428] sm:$0xff] }
 0x5f4   : > { %4343 = vmatpush2.msra.mxu1 %v3704_v8  ;;  %4414 = vmatpush2.msra.mxu0 %v3960_v15  ;;  %v3857_v8 = vld [vmem:[%s8275_s16 + $0xc28] sm:$0xff]  ;;  %v3600_v15 = vld [vmem:[%s8275_s16 + $0x420] sm:$0xff] }
 0x5f5   : > { %4344 = vmatprep.subr.mxu1 %v3697_v54  ;;  %4415 = vmatprep.subr.mxu0 %v3953_v21  ;;  %v3856_v54 = vld [vmem:[%s8275_s16 + $0xc20] sm:$0xff]  ;;  %v3595_v21 = vld [vmem:[%s8275_s16 + $0x3f8] sm:$0xff] }
 0x5f6   : > { %4345 = vmatpush2.msra.mxu1 %v3696_v16  ;;  %4416 = vmatpush2.msra.mxu0 %v3952_v38  ;;  %v3851_v16 = vld [vmem:[%s8275_s16 + $0xbf8] sm:$0xff]  ;;  %v3594_v38 = vld [vmem:[%s8275_s16 + $0x3f0] sm:$0xff] }
 0x5f7   : > { %4346 = vmatprep.subr.mxu1 %v3689_v0  ;;  %4417 = vmatprep.subr.mxu0 %v3945_v34  ;;  %v3850_v0 = vld [vmem:[%s8275_s16 + $0xbf0] sm:$0xff]  ;;  %v3587_v34 = vld [vmem:[%s8275_s16 + $0x3b8] sm:$0xff] }
 0x5f8   : > { %4347 = vmatpush2.msra.mxu1 %v3688_v32  ;;  %4418 = vmatpush2.msra.mxu0 %v3944_v53  ;;  %v3843_v32 = vld [vmem:[%s8275_s16 + $0xbb8] sm:$0xff]  ;;  %v3586_v53 = vld [vmem:[%s8275_s16 + $0x3b0] sm:$0xff] }
 0x5f9   : > { %4348 = vmatprep.subr.mxu1 %v3681_v18  ;;  %4419 = vmatprep.subr.mxu0 %v3937_v57  ;;  %v3842_v18 = vld [vmem:[%s8275_s16 + $0xbb0] sm:$0xff]  ;;  %v3579_v57 = vld [vmem:[%s8275_s16 + $0x378] sm:$0xff] }
 0x5fa   : > { %4349 = vmatpush2.msra.mxu1 %v3680_v42  ;;  %4420 = vmatpush2.msra.mxu0 %v3936_v28  ;;  %v3835_v42 = vld [vmem:[%s8275_s16 + $0xb78] sm:$0xff]  ;;  %v3834_v28 = vld [vmem:[%s8275_s16 + $0xb70] sm:$0xff] }
 0x5fb   : > { %4350 = vmatprep.subr.mxu1 %v3673_v36  ;;  %4421 = vmatprep.subr.mxu0 %v3929_v14  ;;  %v3827_v36 = vld [vmem:[%s8275_s16 + $0xb38] sm:$0xff]  ;;  %v3570_v14 = vld [vmem:[%s8275_s16 + $0x330] sm:$0xff] }
 0x5fc   : > { %4351 = vmatpush2.msra.mxu1 %v3672_v55  ;;  %4422 = vmatpush2.msra.mxu0 %v3928_v48  ;;  %v3826_v55 = vld [vmem:[%s8275_s16 + $0xb30] sm:$0xff]  ;;  %v3563_v48 = vld [vmem:[%s8275_s16 + $0x2f8] sm:$0xff] }
 0x5fd   : > { %4352 = vmatprep.subr.mxu1 %v3665_v37  ;;  %4423 = vmatprep.subr.mxu0 %v3921_v44  ;;  %v3819_v37 = vld [vmem:[%s8275_s16 + $0xaf8] sm:$0xff]  ;;  %v3562_v44 = vld [vmem:[%s8275_s16 + $0x2f0] sm:$0xff] }
 0x5fe   : > { %4353 = vmatpush2.msra.mxu1 %v3664_v56  ;;  %4424 = vmatpush2.msra.mxu0 %v3920_v9  ;;  %v3818_v56 = vld [vmem:[%s8275_s16 + $0xaf0] sm:$0xff]  ;;  %v3555_v9 = vld [vmem:[%s8275_s16 + $0x2b8] sm:$0xff] }
 0x5ff   : > { %4354 = vmatprep.subr.mxu1 %v3657_v46  ;;  %4425 = vmatprep.subr.mxu0 %v3913_v52  ;;  %v3811_v46 = vld [vmem:[%s8275_s16 + $0xab8] sm:$0xff]  ;;  %v3554_v52 = vld [vmem:[%s8275_s16 + $0x2b0] sm:$0xff] }
 0x600   : > { %4355 = vmatpush2.msra.mxu1 %v3656_v2  ;;  %4426 = vmatpush2.msra.mxu0 %v3912_v10  ;;  %v3810_v2 = vld [vmem:[%s8275_s16 + $0xab0] sm:$0xff]  ;;  %v3547_v10 = vld [vmem:[%s8275_s16 + $0x278] sm:$0xff] }
 0x601   : > { %4356 = vmatprep.subr.mxu1 %v3649_v3  ;;  %4427 = vmatprep.subr.mxu0 %v3905_v20  ;;  %v3803_v3 = vld [vmem:[%s8275_s16 + $0xa78] sm:$0xff]  ;;  %v3546_v20 = vld [vmem:[%s8275_s16 + $0x270] sm:$0xff] }
 0x602   : > { %4357 = vmatpush2.msra.mxu1 %v3648_v33  ;;  %4428 = vmatpush2.msra.mxu0 %v3904_v47  ;;  %v3802_v33 = vld [vmem:[%s8275_s16 + $0xa70] sm:$0xff]  ;;  %v3539_v47 = vld [vmem:[%s8275_s16 + $0x238] sm:$0xff] }
 0x603   : > { %4358 = vmatprep.subr.mxu1 %v3641_v58  ;;  %4429 = vmatprep.subr.mxu0 %v3897_v11  ;;  %v3795_v58 = vld [vmem:[%s8275_s16 + $0xa38] sm:$0xff]  ;;  %v3538_v11 = vld [vmem:[%s8275_s16 + $0x230] sm:$0xff] }
 0x604   : > { %4359 = vmatpush2.msra.mxu1 %v3640_v31  ;;  %4430 = vmatpush2.msra.mxu0 %v3896_v23  ;;  %v3794_v31 = vld [vmem:[%s8275_s16 + $0xa30] sm:$0xff]  ;;  %v3531_v23 = vld [vmem:[%s8275_s16 + $0x1f8] sm:$0xff] }
 0x605   : > { %4360 = vmatprep.subr.mxu1 %v3633_v12  ;;  %4431 = vmatprep.subr.mxu0 %v3889_v4  ;;  %v3787_v12 = vld [vmem:[%s8275_s16 + $0x9f8] sm:$0xff]  ;;  %v3530_v4 = vld [vmem:[%s8275_s16 + $0x1f0] sm:$0xff] }
 0x606   : > { %4361 = vmatpush2.msra.mxu1 %v3632_v40  ;;  %4432 = vmatpush2.msra.mxu0 %v3888_v27  ;;  %v3786_v40 = vld [vmem:[%s8275_s16 + $0x9f0] sm:$0xff]  ;;  %v3523_v27 = vld [vmem:[%s8275_s16 + $0x1b8] sm:$0xff] }
 0x607   : > { %4362 = vmatprep.subr.mxu1 %v3625_v49  ;;  %4433 = vmatprep.subr.mxu0 %v3881_v43  ;;  %v3779_v49 = vld [vmem:[%s8275_s16 + $0x9b8] sm:$0xff]  ;;  %v3522_v43 = vld [vmem:[%s8275_s16 + $0x1b0] sm:$0xff] }
 0x608   : > { %4363 = vmatpush2.msra.mxu1 %v3624_v25  ;;  %4434 = vmatpush2.msra.mxu0 %v3880_v5  ;;  %v3778_v25 = vld [vmem:[%s8275_s16 + $0x9b0] sm:$0xff]  ;;  %v3515_v5 = vld [vmem:[%s8275_s16 + $0x178] sm:$0xff] }
 0x609   : > { %4364 = vmatprep.subr.mxu1 %v3617_v41  ;;  %4435 = vmatprep.subr.mxu0 %v3873_v35  ;;  %v3771_v41 = vld [vmem:[%s8275_s16 + $0x978] sm:$0xff]  ;;  %v3514_v35 = vld [vmem:[%s8275_s16 + $0x170] sm:$0xff] }
 0x60a   : > { %4365 = vmatpush2.msra.mxu1 %v3616_v17  ;;  %4436 = vmatpush2.msra.mxu0 %v3872_v39  ;;  %v3770_v17 = vld [vmem:[%s8275_s16 + $0x970] sm:$0xff]  ;;  %v3507_v39 = vld [vmem:[%s8275_s16 + $0x138] sm:$0xff] }
 0x60b   : > { %4366 = vmatprep.subr.mxu1 %v3609_v7  ;;  %4437 = vmatprep.subr.mxu0 %v3865_v13  ;;  %v3763_v7 = vld [vmem:[%s8275_s16 + $0x938] sm:$0xff]  ;;  %v3506_v13 = vld [vmem:[%s8275_s16 + $0x130] sm:$0xff] }
 0x60c   : > { %4367 = vmatpush2.msra.mxu1 %v3608_v19  ;;  %4438 = vmatpush2.msra.mxu0 %v3864_v51  ;;  %v3762_v19 = vld [vmem:[%s8275_s16 + $0x930] sm:$0xff]  ;;  %v3499_v51 = vld [vmem:[%s8275_s16 + $0xf8] sm:$0xff] }
 0x60d   : > { %4368 = vmatprep.subr.mxu1 %v3601_v45  ;;  %4439 = vmatprep.subr.mxu0 %v3857_v8  ;;  %v3755_v45 = vld [vmem:[%s8275_s16 + $0x8f8] sm:$0xff]  ;;  %v3498_v8 = vld [vmem:[%s8275_s16 + $0xf0] sm:$0xff] }
 0x60e   : > { %4369 = vmatpush2.msra.mxu1 %v3600_v15  ;;  %4440 = vmatpush2.msra.mxu0 %v3856_v54  ;;  %v3754_v15 = vld [vmem:[%s8275_s16 + $0x8f0] sm:$0xff]  ;;  %v3491_v54 = vld [vmem:[%s8275_s16 + $0xb8] sm:$0xff] }
 0x60f   : > { %4371 = vmatmul.mubr.f32.vlgmr.msra.gmra.mxu1 %v7063_v30  ;;  %4442 = vmatmul.mubr.f32.vlgmr.msra.gmra.mxu0 %v7065_v29 }
 0x610   : > { %4448 = vmatprep.subr.mxu1 %v3595_v21  ;;  %4519 = vmatprep.subr.mxu0 %v3851_v16  ;;  %v3747_v21 = vld [vmem:[%s8275_s16 + $0x8b8] sm:$0xff]  ;;  %v3490_v16 = vld [vmem:[%s8275_s16 + $0xb0] sm:$0xff] }
 0x611   : > { %4449 = vmatpush1.msra.mxu1 %v3594_v38  ;;  %4512 = vmatprep.mubr.f32.mxu1 %v7059_v59  ;;  %v3578_v59 = vld [vmem:[%s8275_s16 + $0x370] sm:$0xff] }
 0x612   : > { %4520 = vmatpush1.msra.mxu0 %v3850_v0  ;;  %4583 = vmatprep.mubr.f32.mxu0 %v7061_v50  ;;  %v3571_v50 = vld [vmem:[%s8275_s16 + $0x338] sm:$0xff]  ;;  %v3746_v38 = vld [vmem:[%s8275_s16 + $0x8b0] sm:$0xff] }
 0x613   : > { %4450 = vmatprep.subr.mxu1 %v3587_v34  ;;  %4521 = vmatprep.subr.mxu0 %v3843_v32  ;;  %v3483_v0 = vld [vmem:[%s8275_s16 + $0x78] sm:$0xff]  ;;  %v3482_v32 = vld [vmem:[%s8275_s16 + $0x70] sm:$0xff] }
 0x614   : > { %4451 = vmatpush1.msra.mxu1 %v3586_v53  ;;  %4522 = vmatpush1.msra.mxu0 %v3842_v18  ;;  %v3739_v34 = vld [vmem:[%s8275_s16 + $0x878] sm:$0xff]  ;;  %v3738_v53 = vld [vmem:[%s8275_s16 + $0x870] sm:$0xff] }
 0x615   : > { %4452 = vmatprep.subr.mxu1 %v3579_v57  ;;  %4523 = vmatprep.subr.mxu0 %v3835_v42  ;;  %v3475_v18 = vld [vmem:[%s8275_s16 + $0x38] sm:$0xff]  ;;  %v3474_v42 = vld [vmem:[%s8275_s16 + $0x30] sm:$0xff] }
 0x616   : > { %4453 = vmatpush1.msra.mxu1 %v3578_v59  ;;  %4524 = vmatpush1.msra.mxu0 %v3834_v28  ;;  %v3731_v57 = vld [vmem:[%s8275_s16 + $0x838] sm:$0xff]  ;;  %v3730_v59 = vld [vmem:[%s8275_s16 + $0x830] sm:$0xff] }
 0x617   : > { %4454 = vmatprep.subr.mxu1 %v3571_v50  ;;  %4525 = vmatprep.subr.mxu0 %v3827_v36  ;;  %v3723_v28 = vld [vmem:[%s8275_s16 + $0x7f8] sm:$0xff]  ;;  %v3722_v36 = vld [vmem:[%s8275_s16 + $0x7f0] sm:$0xff] }
 0x618   : > { %4455 = vmatpush1.msra.mxu1 %v3570_v14  ;;  %4526 = vmatpush1.msra.mxu0 %v3826_v55  ;;  %v3979_v50 = vld [vmem:[%s8275_s16 + $0xff8] sm:$0xff]  ;;  %v3978_v14 = vld [vmem:[%s8275_s16 + $0xff0] sm:$0xff] }
 0x619   : > { %4456 = vmatprep.subr.mxu1 %v3563_v48  ;;  %4527 = vmatprep.subr.mxu0 %v3819_v37  ;;  %v3715_v55 = vld [vmem:[%s8275_s16 + $0x7b8] sm:$0xff]  ;;  %v3714_v37 = vld [vmem:[%s8275_s16 + $0x7b0] sm:$0xff] }
 0x61a   : > { %4457 = vmatpush1.msra.mxu1 %v3562_v44  ;;  %4528 = vmatpush1.msra.mxu0 %v3818_v56  ;;  %v3971_v48 = vld [vmem:[%s8275_s16 + $0xfb8] sm:$0xff]  ;;  %v3970_v44 = vld [vmem:[%s8275_s16 + $0xfb0] sm:$0xff] }
 0x61b   : > { %4458 = vmatprep.subr.mxu1 %v3555_v9  ;;  %4529 = vmatprep.subr.mxu0 %v3811_v46  ;;  %v3707_v56 = vld [vmem:[%s8275_s16 + $0x778] sm:$0xff]  ;;  %v3706_v46 = vld [vmem:[%s8275_s16 + $0x770] sm:$0xff] }
 0x61c   : > { %4459 = vmatpush1.msra.mxu1 %v3554_v52  ;;  %4530 = vmatpush1.msra.mxu0 %v3810_v2  ;;  %v3963_v9 = vld [vmem:[%s8275_s16 + $0xf78] sm:$0xff]  ;;  %v3962_v52 = vld [vmem:[%s8275_s16 + $0xf70] sm:$0xff] }
 0x61d   : > { %4460 = vmatprep.subr.mxu1 %v3547_v10  ;;  %4531 = vmatprep.subr.mxu0 %v3803_v3  ;;  %v3699_v2 = vld [vmem:[%s8275_s16 + $0x738] sm:$0xff]  ;;  %v3698_v3 = vld [vmem:[%s8275_s16 + $0x730] sm:$0xff] }
 0x61e   : > { %4461 = vmatpush1.msra.mxu1 %v3546_v20  ;;  %4532 = vmatpush1.msra.mxu0 %v3802_v33  ;;  %v3955_v10 = vld [vmem:[%s8275_s16 + $0xf38] sm:$0xff]  ;;  %v3954_v20 = vld [vmem:[%s8275_s16 + $0xf30] sm:$0xff] }
 0x61f   : > { %4462 = vmatprep.subr.mxu1 %v3539_v47  ;;  %4533 = vmatprep.subr.mxu0 %v3795_v58  ;;  %v3691_v33 = vld [vmem:[%s8275_s16 + $0x6f8] sm:$0xff]  ;;  %v3690_v58 = vld [vmem:[%s8275_s16 + $0x6f0] sm:$0xff] }
 0x620   : > { %4463 = vmatpush1.msra.mxu1 %v3538_v11  ;;  %4534 = vmatpush1.msra.mxu0 %v3794_v31  ;;  %v3947_v47 = vld [vmem:[%s8275_s16 + $0xef8] sm:$0xff]  ;;  %v3946_v11 = vld [vmem:[%s8275_s16 + $0xef0] sm:$0xff] }
 0x621   : > { %4464 = vmatprep.subr.mxu1 %v3531_v23  ;;  %4535 = vmatprep.subr.mxu0 %v3787_v12  ;;  %v3683_v31 = vld [vmem:[%s8275_s16 + $0x6b8] sm:$0xff]  ;;  %v3682_v12 = vld [vmem:[%s8275_s16 + $0x6b0] sm:$0xff] }
 0x622   : > { %4465 = vmatpush1.msra.mxu1 %v3530_v4  ;;  %4536 = vmatpush1.msra.mxu0 %v3786_v40  ;;  %v3939_v23 = vld [vmem:[%s8275_s16 + $0xeb8] sm:$0xff]  ;;  %v3938_v4 = vld [vmem:[%s8275_s16 + $0xeb0] sm:$0xff] }
 0x623   : > { %4466 = vmatprep.subr.mxu1 %v3523_v27  ;;  %4537 = vmatprep.subr.mxu0 %v3779_v49  ;;  %v3675_v40 = vld [vmem:[%s8275_s16 + $0x678] sm:$0xff]  ;;  %v3674_v49 = vld [vmem:[%s8275_s16 + $0x670] sm:$0xff] }
 0x624   : > { %4467 = vmatpush1.msra.mxu1 %v3522_v43  ;;  %4538 = vmatpush1.msra.mxu0 %v3778_v25  ;;  %v3931_v27 = vld [vmem:[%s8275_s16 + $0xe78] sm:$0xff]  ;;  %v3930_v43 = vld [vmem:[%s8275_s16 + $0xe70] sm:$0xff] }
 0x625   : > { %4468 = vmatprep.subr.mxu1 %v3515_v5  ;;  %4539 = vmatprep.subr.mxu0 %v3771_v41  ;;  %v3667_v25 = vld [vmem:[%s8275_s16 + $0x638] sm:$0xff]  ;;  %v3666_v41 = vld [vmem:[%s8275_s16 + $0x630] sm:$0xff] }
 0x626   : > { %4469 = vmatpush1.msra.mxu1 %v3514_v35  ;;  %4540 = vmatpush1.msra.mxu0 %v3770_v17  ;;  %v3923_v5 = vld [vmem:[%s8275_s16 + $0xe38] sm:$0xff]  ;;  %v3922_v35 = vld [vmem:[%s8275_s16 + $0xe30] sm:$0xff] }
 0x627   : > { %4470 = vmatprep.subr.mxu1 %v3507_v39  ;;  %4541 = vmatprep.subr.mxu0 %v3763_v7  ;;  %v3659_v17 = vld [vmem:[%s8275_s16 + $0x5f8] sm:$0xff]  ;;  %v3658_v7 = vld [vmem:[%s8275_s16 + $0x5f0] sm:$0xff] }
 0x628   : > { %4471 = vmatpush1.msra.mxu1 %v3506_v13  ;;  %4542 = vmatpush1.msra.mxu0 %v3762_v19  ;;  %v3915_v39 = vld [vmem:[%s8275_s16 + $0xdf8] sm:$0xff]  ;;  %v3914_v13 = vld [vmem:[%s8275_s16 + $0xdf0] sm:$0xff] }
 0x629   : > { %4472 = vmatprep.subr.mxu1 %v3499_v51  ;;  %4543 = vmatprep.subr.mxu0 %v3755_v45  ;;  %v3651_v19 = vld [vmem:[%s8275_s16 + $0x5b8] sm:$0xff]  ;;  %v3650_v45 = vld [vmem:[%s8275_s16 + $0x5b0] sm:$0xff] }
 0x62a   : > { %4473 = vmatpush1.msra.mxu1 %v3498_v8  ;;  %4544 = vmatpush1.msra.mxu0 %v3754_v15  ;;  %v3907_v51 = vld [vmem:[%s8275_s16 + $0xdb8] sm:$0xff]  ;;  %v3906_v8 = vld [vmem:[%s8275_s16 + $0xdb0] sm:$0xff] }
 0x62b   : > { %4474 = vmatprep.subr.mxu1 %v3491_v54  ;;  %4545 = vmatprep.subr.mxu0 %v3747_v21  ;;  %v3643_v15 = vld [vmem:[%s8275_s16 + $0x578] sm:$0xff]  ;;  %v3642_v21 = vld [vmem:[%s8275_s16 + $0x570] sm:$0xff] }
 0x62c   : > { %4475 = vmatpush1.msra.mxu1 %v3490_v16  ;;  %4546 = vmatpush1.msra.mxu0 %v3746_v38  ;;  %v3899_v54 = vld [vmem:[%s8275_s16 + $0xd78] sm:$0xff]  ;;  %v3898_v16 = vld [vmem:[%s8275_s16 + $0xd70] sm:$0xff] }
 0x62d   : > { %4476 = vmatprep.subr.mxu1 %v3483_v0  ;;  %4547 = vmatprep.subr.mxu0 %v3739_v34  ;;  %v3635_v38 = vld [vmem:[%s8275_s16 + $0x538] sm:$0xff]  ;;  %v3634_v34 = vld [vmem:[%s8275_s16 + $0x530] sm:$0xff] }
 0x62e   : > { %4477 = vmatpush1.msra.mxu1 %v3482_v32  ;;  %4548 = vmatpush1.msra.mxu0 %v3738_v53  ;;  %v3891_v0 = vld [vmem:[%s8275_s16 + $0xd38] sm:$0xff]  ;;  %v3890_v32 = vld [vmem:[%s8275_s16 + $0xd30] sm:$0xff] }
 0x62f   : > { %4478 = vmatprep.subr.mxu1 %v3475_v18  ;;  %4549 = vmatprep.subr.mxu0 %v3731_v57  ;;  %v3627_v53 = vld [vmem:[%s8275_s16 + $0x4f8] sm:$0xff]  ;;  %v3626_v57 = vld [vmem:[%s8275_s16 + $0x4f0] sm:$0xff] }
 0x630   : > { %4479 = vmatpush1.msra.mxu1 %v3474_v42  ;;  %4550 = vmatpush1.msra.mxu0 %v3730_v59  ;;  %v3883_v18 = vld [vmem:[%s8275_s16 + $0xcf8] sm:$0xff]  ;;  %v3882_v42 = vld [vmem:[%s8275_s16 + $0xcf0] sm:$0xff] }
 0x631   : > { %4480 = vmatprep.subr.mxu1 %v3723_v28  ;;  %4551 = vmatprep.subr.mxu0 %v3979_v50  ;;  %v3619_v59 = vld [vmem:[%s8275_s16 + $0x4b8] sm:$0xff]  ;;  %v3618_v50 = vld [vmem:[%s8275_s16 + $0x4b0] sm:$0xff] }
 0x632   : > { %4481 = vmatpush2.msra.mxu1 %v3722_v36  ;;  %4552 = vmatpush2.msra.mxu0 %v3978_v14  ;;  %v3875_v28 = vld [vmem:[%s8275_s16 + $0xcb8] sm:$0xff]  ;;  %v3874_v36 = vld [vmem:[%s8275_s16 + $0xcb0] sm:$0xff] }
 0x633   : > { %4482 = vmatprep.subr.mxu1 %v3715_v55  ;;  %4553 = vmatprep.subr.mxu0 %v3971_v48  ;;  %v3611_v14 = vld [vmem:[%s8275_s16 + $0x478] sm:$0xff]  ;;  %v3610_v48 = vld [vmem:[%s8275_s16 + $0x470] sm:$0xff] }
 0x634   : > { %4483 = vmatpush2.msra.mxu1 %v3714_v37  ;;  %4554 = vmatpush2.msra.mxu0 %v3970_v44  ;;  %v3867_v55 = vld [vmem:[%s8275_s16 + $0xc78] sm:$0xff]  ;;  %v3866_v37 = vld [vmem:[%s8275_s16 + $0xc70] sm:$0xff] }
 0x635   : > { %4484 = vmatprep.subr.mxu1 %v3707_v56  ;;  %4555 = vmatprep.subr.mxu0 %v3963_v9  ;;  %v3603_v44 = vld [vmem:[%s8275_s16 + $0x438] sm:$0xff]  ;;  %v3602_v9 = vld [vmem:[%s8275_s16 + $0x430] sm:$0xff] }
 0x636   : > { %4485 = vmatpush2.msra.mxu1 %v3706_v46  ;;  %4556 = vmatpush2.msra.mxu0 %v3962_v52  ;;  %v3859_v56 = vld [vmem:[%s8275_s16 + $0xc38] sm:$0xff]  ;;  %v3858_v46 = vld [vmem:[%s8275_s16 + $0xc30] sm:$0xff] }
 0x637   : > { %4486 = vmatprep.subr.mxu1 %v3699_v2  ;;  %4557 = vmatprep.subr.mxu0 %v3955_v10 }
 0x638   : > { %4487 = vmatpush2.msra.mxu1 %v3698_v3  ;;  %4558 = vmatpush2.msra.mxu0 %v3954_v20  ;;  %v3980_v20 = vld [vmem:[%s8276_s17] sm:$0xff] }
 0x639   : > { %4488 = vmatprep.subr.mxu1 %v3691_v33  ;;  %4559 = vmatprep.subr.mxu0 %v3947_v47 }
 0x63a   : > { %4489 = vmatpush2.msra.mxu1 %v3690_v58  ;;  %4560 = vmatpush2.msra.mxu0 %v3946_v11  ;;  %v3997_v58 = vrot.slane %v3980_v20, %v5754_v26 }
 0x63b   : > { %4490 = vmatprep.subr.mxu1 %v3683_v31  ;;  %4561 = vmatprep.subr.mxu0 %v3939_v23  ;;  %v3989_v23 = vrot.slane %v3980_v20, %v5751_v24 }
 0x63c   : > { %4491 = vmatpush2.msra.mxu1 %v3682_v12  ;;  %4562 = vmatpush2.msra.mxu0 %v3938_v4  ;;  %v4005_v4 = vrot.slane %v3980_v20, %v6065_v1  ;;  %v4013_v1 = vrot.slane %v3980_v20, %v6068_v62 }
 0x63d   : > { %4492 = vmatprep.subr.mxu1 %v3675_v40  ;;  %4563 = vmatprep.subr.mxu0 %v3931_v27 }
 0x63e   : > { %4493 = vmatpush2.msra.mxu1 %v3674_v49  ;;  %4564 = vmatpush2.msra.mxu0 %v3930_v43 }
 0x63f   : > { %4494 = vmatprep.subr.mxu1 %v3667_v25  ;;  %4565 = vmatprep.subr.mxu0 %v3923_v5  ;;  %v4001_v25 = vrot.slane %v3980_v20, %v6059_v60 }
 0x640   : > { %4495 = vmatpush2.msra.mxu1 %v3666_v41  ;;  %4566 = vmatpush2.msra.mxu0 %v3922_v35 }
 0x641   : > { %4496 = vmatprep.subr.mxu1 %v3659_v17  ;;  %4567 = vmatprep.subr.mxu0 %v3915_v39 }
 0x642   : > { %4497 = vmatpush2.msra.mxu1 %v3658_v7  ;;  %4568 = vmatpush2.msra.mxu0 %v3914_v13 }
 0x643   : > { %4498 = vmatprep.subr.mxu1 %v3651_v19  ;;  %4569 = vmatprep.subr.mxu0 %v3907_v51 }
 0x644   : > { %4499 = vmatpush2.msra.mxu1 %v3650_v45  ;;  %4570 = vmatpush2.msra.mxu0 %v3906_v8 }
 0x645   : > { %4500 = vmatprep.subr.mxu1 %v3643_v15  ;;  %4571 = vmatprep.subr.mxu0 %v3899_v54 }
 0x646   : > { %4501 = vmatpush2.msra.mxu1 %v3642_v21  ;;  %4572 = vmatpush2.msra.mxu0 %v3898_v16 }
 0x647   : > { %4502 = vmatprep.subr.mxu1 %v3635_v38  ;;  %4573 = vmatprep.subr.mxu0 %v3891_v0 }
 0x648   : > { %4503 = vmatpush2.msra.mxu1 %v3634_v34  ;;  %4574 = vmatpush2.msra.mxu0 %v3890_v32 }
 0x649   : > { %4504 = vmatprep.subr.mxu1 %v3627_v53  ;;  %4575 = vmatprep.subr.mxu0 %v3883_v18 }
 0x64a   : > { %4505 = vmatpush2.msra.mxu1 %v3626_v57  ;;  %4576 = vmatpush2.msra.mxu0 %v3882_v42 }
 0x64b   : > { %4506 = vmatprep.subr.mxu1 %v3619_v59  ;;  %4577 = vmatprep.subr.mxu0 %v3875_v28 }
 0x64c   : > { %4507 = vmatpush2.msra.mxu1 %v3618_v50  ;;  %4578 = vmatpush2.msra.mxu0 %v3874_v36  ;;  %v4088_v52 = vpop.f32.mrf.mxu1  ;;  %v4159_v10 = vpop.f32.mrf.mxu0 }
 0x64d   : > { %4508 = vmatprep.subr.mxu1 %v3611_v14  ;;  %4579 = vmatprep.subr.mxu0 %v3867_v55 }
 0x64e   : > { %4509 = vmatpush2.msra.mxu1 %v3610_v48  ;;  %4580 = vmatpush2.msra.mxu0 %v3866_v37  ;;  %v4090_v2 = vpop.f32.mrf.mxu1  ;;  %v4161_v33 = vpop.f32.mrf.mxu0 }
 0x64f   : > { %4510 = vmatprep.subr.mxu1 %v3603_v44  ;;  %4581 = vmatprep.subr.mxu0 %v3859_v56  ;;  %v4091_v49 = vadd.f32 %v4090_v2, %v3989_v23 }
 0x650   : > { %4511 = vmatpush2.msra.mxu1 %v3602_v9  ;;  %4582 = vmatpush2.msra.mxu0 %v3858_v46 }
 0x651   : > { %4513 = vmatmul.mubr.f32.vlgmr.msra.gmra.mxu1 %v7063_v30  ;;  %4584 = vmatmul.mubr.f32.vlgmr.msra.gmra.mxu0 %v7065_v29  ;;  %v3993_v30 = vrot.slane %v3980_v20, %v5743_v63  ;;  %v3985_v29 = vrot.slane %v3980_v20, %v5740_v22  ;;  %v4162_v17 = vadd.f32 %v4161_v33, %v4091_v49 }
 0x652   : > { %v4009_v63 = vrot.slane %v3980_v20, %v6062_v61 }
 0x653   : > { %v4089_v5 = vadd.f32 %v4088_v52, %v3985_v29  ;;  %v4591_v8 = vmax.f32 %v4162_v17, 0.0 }
 0x655   : > { %v4160_v7 = vadd.f32 %v4159_v10, %v4089_v5 }
 0x657   : > { %v4590_v21 = vmax.f32 %v4160_v7, 0.0 }
 0x659   : > { %v4606_v53 = vcombine.low %v4590_v21, %v4591_v8 }
 0x65b   : > { %v4616_v50 = vrot.slane %v4606_v53, %v6071_v6 }
 0x68d   : > { %v4230_v3 = vpop.f32.mrf.mxu1  ;;  %v4301_v11 = vpop.f32.mrf.mxu0 }
 0x68e   : > { %v4231_v43 = vadd.f32 %v4230_v3, %v3993_v30 }
 0x68f   : > { %v4232_v47 = vpop.f32.mrf.mxu1  ;;  %v4303_v40 = vpop.f32.mrf.mxu0 }
 0x690   : > { %v4233_v12 = vadd.f32 %v4232_v47, %v3997_v58  ;;  %v4302_v39 = vadd.f32 %v4301_v11, %v4231_v43 }
 0x692   : > { %v4304_v26 = vadd.f32 %v4303_v40, %v4233_v12  ;;  %v4592_v15 = vmax.f32 %v4302_v39, 0.0 }
 0x694   : > { %v4593_v13 = vmax.f32 %v4304_v26, 0.0 }
 0x696   : > { %v4607_v38 = vcombine.low %v4592_v15, %v4593_v13 }
 0x698   : > { %v4623_v42 = vrot.slane %v4607_v38, %v6071_v6 }
 0x69a   : > { %v4638_v14 = vcombine.low %v4616_v50, %v4623_v42 }
 0x69c   : > { %v4646_v44 = vrot.slane %v4638_v14, %v6071_v6 }
 0x6cf   : > { %v4372_v31 = vpop.f32.mrf.mxu1  ;;  %v4443_v41 = vpop.f32.mrf.mxu0 }
 0x6d0   : > { %v4373_v24 = vadd.f32 %v4372_v31, %v4001_v25 }
 0x6d1   : > { %v4374_v27 = vpop.f32.mrf.mxu1  ;;  %v4445_v22 = vpop.f32.mrf.mxu0 }
 0x6d2   : > { %v4375_v35 = vadd.f32 %v4374_v27, %v4005_v4  ;;  %v4444_v60 = vadd.f32 %v4443_v41, %v4373_v24 }
 0x6d4   : > { %v4446_v19 = vadd.f32 %v4445_v22, %v4375_v35  ;;  %v4594_v18 = vmax.f32 %v4444_v60, 0.0 }
 0x6d6   : > { %v4595_v0 = vmax.f32 %v4446_v19, 0.0 }
 0x6d8   : > { %v4608_v62 = vcombine.low %v4594_v18, %v4595_v0 }
 0x6da   : > { %v4630_v55 = vrot.slane %v4608_v62, %v6071_v6 }
 0x711   : > { %v4514_v51 = vpop.f32.mrf.mxu1  ;;  %v4585_v45 = vpop.f32.mrf.mxu0 }
 0x712   : > { %v4515_v54 = vadd.f32 %v4514_v51, %v4009_v63 }
 0x713   : > { %v4516_v16 = vpop.f32.mrf.mxu1  ;;  %v4587_v61 = vpop.f32.mrf.mxu0 }
 0x714   : > { %v4586_v34 = vadd.f32 %v4585_v45, %v4515_v54  ;;  %v4517_v32 = vadd.f32 %v4516_v16, %v4013_v1 }
 0x716   : > { %v4588_v57 = vadd.f32 %v4587_v61, %v4517_v32  ;;  %v4596_v59 = vmax.f32 %v4586_v34, 0.0 }
 0x718   : > { %v4597_v28 = vmax.f32 %v4588_v57, 0.0 }
 0x71a   : > { %v4609_v36 = vcombine.low %v4596_v59, %v4597_v28 }
 0x71c   : > { %v4637_v48 = vrot.slane %v4609_v36, %v6071_v6 }
 0x71e   : > { %v4639_v37 = vcombine.low %v4630_v55, %v4637_v48 }
 0x720   : > { %v4653_v56 = vrot.slane %v4639_v37, %v6071_v6 }
 0x722   : > { %v4654_v9 = vcombine.low %v4646_v44, %v4653_v56 }
 0x724   : > { %4656 = vst [vmem:[%s618_s26] sm:$0xff] %v4654_v9 }
 0x725 PF: > { %s28_s29 = sadd.s32 1, %s5133_s29   ;;  %s8284_s27 = smov %s5129_s28 }
 0x726   : > { %p25_p5 = scmp.ge.s32.totalorder %s28_s29, 4   ;;  %s8285_s28 = smov %s8287_s30 }
 0x728   :  { %27 = sbr.rel (!%p25_p5) target bundleno = 4 (0x4), region = 133 }

// kernel: pointnet_autoencoder_forward.3
= control target key start
LH: loop header
LB: loop body
LE: loop exit
PB: predicated region body
PF: predicated region fallthrough
CT: control target
= control target key end

     0   :  { %s6813_s0 = inlined_call_operand.vmem [shape: f32[2,128,3], index: 0, kind: input, shape index: {}]   ;;  %s6814_s1 = inlined_call_operand.hbm [shape: bf16[3,64], index: 1, kind: input, shape index: {}]   ;;  %s6815_s2 = inlined_call_operand.hbm [shape: f32[1,64], index: 2, kind: input, shape index: {}]   ;;  %s6816_s3 = inlined_call_operand.hbm [shape: f32[1,64], index: 3, kind: input, shape index: {}]   ;;  %s6817_s4 = inlined_call_operand.hbm [shape: bf16[64,128], index: 4, kind: input, shape index: {}]   ;;  %s6818_s5 = inlined_call_operand.hbm [shape: f32[1,128], index: 5, kind: input, shape index: {}]   ;;  %s6819_s6 = inlined_call_operand.hbm [shape: f32[1,128], index: 6, kind: input, shape index: {}]   ;;  %s6820_s7 = inlined_call_operand.hbm [shape: bf16[128,1024], index: 7, kind: input, shape index: {}]   ;;  %s6821_s8 = inlined_call_operand.hbm [shape: f32[1,1024], index: 8, kind: input, shape index: {}]   ;;  %s6822_s9 = inlined_call_operand.hbm [shape: f32[1,1024], index: 9, kind: input, shape index: {}]   ;;  %s6823_s10 = inlined_call_operand.hbm [shape: f32[1024,512], index: 10, kind: input, shape index: {}]   ;;  %s6824_s11 = inlined_call_operand.hbm [shape: f32[1,512], index: 11, kind: input, shape index: {}]   ;;  %s6825_s12 = inlined_call_operand.hbm [shape: f32[1,512], index: 12, kind: input, shape index: {}]   ;;  %s6826_s13 = inlined_call_operand.hbm [shape: f32[512,256], index: 13, kind: input, shape index: {}]   ;;  %s6827_s14 = inlined_call_operand.hbm [shape: f32[1,256], index: 14, kind: input, shape index: {}]   ;;  %s6828_s15 = inlined_call_operand.hbm [shape: f32[1,256], index: 15, kind: input, shape index: {}]   ;;  %s6829_s16 = inlined_call_operand.vmem [shape: f32[256,9], index: 16, kind: input, shape index: {}]   ;;  %s6830_s17 = inlined_call_operand.hbm [shape: f32[1,9], index: 17, kind: input, shape index: {}]   ;;  %s6831_s18 = inlined_call_operand.vmem [shape: f32[2,1,9], index: 18, kind: output, shape index: {}]  }
   0x1   :  { %6839 = sst [smem:[#allocation38_spill]] %s6813_s0 }
   0x2   :  { %6840 = sst [smem:[#allocation39_spill]] %s6814_s1 }
   0x3   :  { %6841 = sst [smem:[#allocation40_spill]] %s6815_s2 }
   0x4   :  { %6842 = sst [smem:[#allocation41_spill]] %s6816_s3 }
   0x5   :  { %6843 = sst [smem:[#allocation42_spill]] %s6829_s16 }
   0x6   :  { %6844 = sst [smem:[#allocation43_spill]] %s6831_s18 }
   0x7   :  { %23 = vsyncpa [#allocation4], 0 }
   0x8   :  { %24 = vsyncpa [#allocation6], 0 }
   0x9   :  { %25 = vsyncpa [#allocation9], 0 }
   0xa   :  { %26 = vsyncpa [#allocation12], 0 }
   0xb   :  { %27 = vsyncpa [#allocation15], 0 }
   0xc   :  { %28 = vsyncpa [#allocation18], 0 }
   0xd   :  { %29 = vsyncpa [#allocation21], 0 }
   0xe   :  { %30 = vsyncpa [#allocation24], 0 }
   0xf   :  { %31 = vsyncpa [#allocation27], 0  ;;  %s5833_s27 = smov 0   ;;  %s5835_s28 = smov 0  }
  0x10   :  { %s5837_s29 = smov 0  }
  0x11 LB: > { %6845 = sst [smem:[#allocation37_spill]] %s5711_s29  ;;  %s5713_s30 = smov [#allocation5]   ;;  %s5711_s29 = sphi %s5837_s29, %s37_s29   ;;  %s5707_s28 = sphi %s5835_s28, %s6862_s28   ;;  %s5703_s27 = sphi %s5833_s27, %s6861_s27  }
  0x12   : > { %s489_s0 = sshll.u32 %s5713_s30, 4  ;;  %s4810_s19 = sadd.s32 4294967295, %s5711_s29   ;;  %s490_s0 = int_to_ptr.vmem [resolvable:$true] %s489_s0 }
  0x13   : > { %p4812_p0 = scmp.ge.s32.totalorder %s5711_s29, 1  ;;  %p465_p1 = scmp.lt.s32.totalorder %s5711_s29, 3 }
  0x14   : > { %p5851_p2 = scmp.eq.s32.totalorder %s4810_s19, 0  ;;  %s5714_s21 = smov [#allocation8]  }
  0x15   : > { %p5855_p3 = pnand %p4812_p0, %p465_p1  ;;  %s510_s22 = sshll.u32 %s5714_s21, 4  ;;  %s5861_s22 = int_to_ptr.vmem [resolvable:$true] %s510_s22 }
  0x16   : > { %s6846_s1 = scalar_select %p5851_p2, 1, 0 }
  0x17   : > { %s6847_s20 = scalar_select %p5855_p3, 1, 0 }
  0x18   : > { %p5102_p4 = pneg %p5855_p3  ;;  %s5715_s23 = smov [#allocation11]  }
  0x19   : > { %s535_s24 = sshll.u32 %s5715_s23, 4  ;;  %s5716_s25 = smov [#allocation14]   ;;  %s5869_s24 = int_to_ptr.vmem [resolvable:$true] %s535_s24 }
  0x1a   : > { %p5865_p5 = pnand %p5851_p2, %p5102_p4  ;;  %s5871_s26 = sshll.u32 %s5716_s25, 4  ;;  %s560_s26 = int_to_ptr.vmem [resolvable:$true] %s5871_s26 }
  0x1b   : > { %s5248_s19 = scalar_lea.vmem %s490_s0, 16  ;;  %s5255_s21 = scalar_lea.vmem %s490_s0, 32 }
  0x1c   : > { %p5875_p6 = pneg %p5865_p5  ;;  %p5249_p7 = scmp.ne.s32.totalorder %s490_s0, %s5248_s19 }
  0x1d   : > { %p5256_p10 = scmp.lt.s32.totalorder %s490_s0, %s490_s0  ;;  %p5257_p11 = scmp.lt.s32.totalorder %s5255_s21, %s5248_s19 }
  0x1e   : > { %p5251_p8 = pnand %p5249_p7, %p5875_p6 }
  0x1f   : > { %p5258_p12 = por %p5257_p11, %p5256_p10 }
  0x20   : > { %p5252_p9 = pneg %p5251_p8 }
  0x22   : > { %p5259_p13 = pnand %p5258_p12, %p5252_p9 }
  0x24   : > { %5262 = shalt.err (!%p5259_p13)
}
  0x25   : > { %s6850_s29 = sld [smem:[#allocation40_spill]]  ;;  %s5274_s18 = scalar_lea.vmem %s5861_s22, 512 }
  0x26   : > { %p5275_p0 = scmp.ne.s32.totalorder %s5861_s22, %s5274_s18  ;;  %p5282_p7 = scmp.lt.s32.totalorder %s5861_s22, %s5861_s22 }
  0x27   : > { %p5283_p8 = scmp.lt.s32.totalorder %s5274_s18, %s5274_s18 }
  0x28   : > { %p5277_p1 = pnand %p5275_p0, %p5875_p6 }
  0x29   : > { %p5284_p9 = por %p5283_p8, %p5282_p7 }
  0x2a   : > { %p5278_p4 = pneg %p5277_p1 }
  0x2b   : > { %5108 = dma.hbm_to_vmem [thread:$0]  (!%p5865_p5), %s6850_s29, 16, %s490_s0, [#allocation6]  }
  0x2c   : > { %p5285_p10 = pnand %p5284_p9, %p5278_p4 }
  0x2e   : > { %5288 = shalt.err (!%p5285_p10)
}
  0x2f   : > { %s5717_s19 = smov 64   ;;  %s5718_s29 = smov 4  }
  0x30   : > { %5114 = dma.hbm_to_vmem [thread:$0]  (!%p5865_p5), %s6817_s4, 512, %s5861_s22, [#allocation9], %s5717_s19, %s5717_s19, %s5718_s29  }
  0x31   : > { %s5300_s23 = scalar_lea.vmem %s5869_s24, 16  ;;  %s5307_s18 = scalar_lea.vmem %s5869_s24, 32 }
  0x32   : > { %p5301_p11 = scmp.ne.s32.totalorder %s5869_s24, %s5300_s23  ;;  %p5308_p0 = scmp.lt.s32.totalorder %s5869_s24, %s5869_s24 }
  0x33   : > { %p5309_p1 = scmp.lt.s32.totalorder %s5307_s18, %s5300_s23 }
  0x34   : > { %p5303_p12 = pnand %p5301_p11, %p5875_p6 }
  0x35   : > { %p5310_p4 = por %p5309_p1, %p5308_p0 }
  0x36   : > { %p5304_p13 = pneg %p5303_p12 }
  0x38   : > { %p5311_p7 = pnand %p5310_p4, %p5304_p13 }
  0x3a   : > { %5314 = shalt.err (!%p5311_p7)
}
  0x3b   : > { %5120 = dma.hbm_to_vmem [thread:$0]  (!%p5865_p5), %s6819_s6, 16, %s5869_s24, [#allocation12]  }
  0x3c   : > { %s5326_s22 = scalar_lea.vmem %s560_s26, 128  ;;  %p5334_p11 = scmp.lt.s32.totalorder %s560_s26, %s560_s26 }
  0x3d   : > { %p5327_p8 = scmp.ne.s32.totalorder %s560_s26, %s5326_s22  ;;  %p5335_p12 = scmp.lt.s32.totalorder %s5326_s22, %s5326_s22 }
  0x3f   : > { %p5329_p9 = pnand %p5327_p8, %p5875_p6  ;;  %p5336_p0 = por %p5335_p12, %p5334_p11 }
  0x41   : > { %p5330_p10 = pneg %p5329_p9 }
  0x43   : > { %p5337_p13 = pnand %p5336_p0, %p5330_p10 }
  0x45   : > { %5340 = shalt.err (!%p5337_p13)
}
  0x46   : > { %5126 = dma.hbm_to_vmem [thread:$0]  (!%p5865_p5), %s6821_s8, 128, %s560_s26, [#allocation15]  }
  0x47   : > { %s5719_s16 = smov [#allocation17]   ;;  %s5720_s0 = smov [#allocation20]  }
  0x48   : > { %s580_s24 = sshll.u32 %s5719_s16, 4  ;;  %s605_s21 = sshll.u32 %s5720_s0, 4  ;;  %s581_s24 = int_to_ptr.vmem [resolvable:$true] %s580_s24  ;;  %s606_s21 = int_to_ptr.vmem [resolvable:$true] %s605_s21 }
  0x49   : > { %s5352_s23 = scalar_lea.vmem %s581_s24, 65536  ;;  %p5360_p8 = scmp.lt.s32.totalorder %s581_s24, %s581_s24 }
  0x4a   : > { %p5353_p1 = scmp.ne.s32.totalorder %s581_s24, %s5352_s23  ;;  %p5361_p9 = scmp.lt.s32.totalorder %s5352_s23, %s5352_s23 }
  0x4c   : > { %p5355_p4 = pnand %p5353_p1, %p5875_p6  ;;  %p5362_p10 = por %p5361_p9, %p5360_p8 }
  0x4e   : > { %p5356_p7 = pneg %p5355_p4 }
  0x50   : > { %p5363_p11 = pnand %p5362_p10, %p5356_p7 }
  0x52   : > { %5366 = shalt.err (!%p5363_p11)
}
  0x53   : > { %s6834_s18 = smov 512   ;;  %s6835_s25 = smov 32  }
  0x54   : > { %5132 = dma.hbm_to_vmem [thread:$0]  (!%p5865_p5), %s6823_s10, 65536, %s581_s24, [#allocation18], %s6834_s18, %s6834_s18, %s6835_s25  }
  0x55   : > { %s5378_s19 = scalar_lea.vmem %s606_s21, 64  ;;  %p5386_p1 = scmp.lt.s32.totalorder %s606_s21, %s606_s21 }
  0x56   : > { %p5379_p12 = scmp.ne.s32.totalorder %s606_s21, %s5378_s19  ;;  %p5387_p4 = scmp.lt.s32.totalorder %s5378_s19, %s5378_s19 }
  0x58   : > { %p5381_p0 = pnand %p5379_p12, %p5875_p6  ;;  %p5388_p7 = por %p5387_p4, %p5386_p1 }
  0x5a   : > { %p5382_p13 = pneg %p5381_p0 }
  0x5c   : > { %p5389_p8 = pnand %p5388_p7, %p5382_p13 }
  0x5e   : > { %5392 = shalt.err (!%p5389_p8)
}
  0x5f   : > { %5138 = dma.hbm_to_vmem [thread:$0]  (!%p5865_p5), %s6825_s12, 64, %s606_s21, [#allocation21]  }
  0x60   : > { %s5723_s0 = smov [#allocation23]  }
  0x61   : > { %s629_s24 = sshll.u32 %s5723_s0, 4  ;;  %s630_s24 = int_to_ptr.vmem [resolvable:$true] %s629_s24 }
  0x62   : > { %s5404_s23 = scalar_lea.vmem %s630_s24, 32  ;;  %p5412_p12 = scmp.lt.s32.totalorder %s630_s24, %s630_s24 }
  0x63   : > { %p5405_p9 = scmp.ne.s32.totalorder %s630_s24, %s5404_s23  ;;  %p5413_p0 = scmp.lt.s32.totalorder %s5404_s23, %s5404_s23 }
  0x65   : > { %p5407_p10 = pnand %p5405_p9, %p5875_p6  ;;  %p5414_p1 = por %p5413_p0, %p5412_p12 }
  0x67   : > { %p5408_p11 = pneg %p5407_p10 }
  0x69   : > { %p5415_p13 = pnand %p5414_p1, %p5408_p11 }
  0x6b   : > { %5418 = shalt.err (!%p5415_p13)
}
  0x6c   : > { %5144 = dma.hbm_to_vmem [thread:$0]  (!%p5865_p5), %s6827_s14, 32, %s630_s24, [#allocation24]  }
  0x6d   : > { %s49_s21 = sadd.s32 1, %s5707_s28  ;;  %s5724_s19 = smov [#allocation3]  }
  0x6e   : > { %p51_p4 = scmp.ge.s32.totalorder %s49_s21, 2  ;;  %s478_s29 = sshll.u32 %s5724_s19, 4  ;;  %s479_s29 = int_to_ptr.vmem [resolvable:$true] %s478_s29 }
  0x6f   : > { %s5430_s16 = scalar_lea.vmem %s479_s29, 32  ;;  %p5438_p10 = scmp.lt.s32.totalorder %s479_s29, %s479_s29 }
  0x70   : > { %s6864_s21 = smov (%p51_p4, %s49_s21), 0  ;;  %p5431_p7 = scmp.ne.s32.totalorder %s479_s29, %s5430_s16 }
  0x71   : > { %p5439_p11 = scmp.lt.s32.totalorder %s5430_s16, %s5430_s16 }
  0x72   : > { %p5433_p8 = pnand %p5431_p7, %p5875_p6 }
  0x73   : > { %p5440_p12 = por %p5439_p11, %p5438_p10 }
  0x74   : > { %p5434_p9 = pneg %p5433_p8 }
  0x76   : > { %p5441_p0 = pnand %p5440_p12, %p5434_p9 }
  0x78   : > { %5444 = shalt.err (!%p5441_p0)
}
  0x79   : > { %s6851_s23 = sld [smem:[#allocation39_spill]]  ;;  %s5725_s26 = smov [#allocation7]  }
  0x7a   : > { %s500_s22 = sshll.u32 %s5725_s26, 4  ;;  %s5726_s19 = smov [#allocation10]   ;;  %s501_s22 = int_to_ptr.vmem [resolvable:$true] %s500_s22 }
  0x7b   : > { %s524_s18 = sshll.u32 %s5726_s19, 4  ;;  %s5456_s25 = scalar_lea.vmem %s501_s22, 16  ;;  %s525_s18 = int_to_ptr.vmem [resolvable:$true] %s524_s18 }
  0x7c   : > { %p5457_p1 = scmp.ne.s32.totalorder %s501_s22, %s5456_s25  ;;  %s5463_s16 = scalar_lea.vmem %s501_s22, 32 }
  0x7d   : > { %p5464_p7 = scmp.lt.s32.totalorder %s501_s22, %s501_s22  ;;  %p5465_p8 = scmp.lt.s32.totalorder %s5463_s16, %s5456_s25 }
  0x7e   : > { %p5459_p13 = pnand %p5457_p1, %p5875_p6 }
  0x7f   : > { %5105 = dma.hbm_to_vmem [thread:$0]  (!%p5865_p5), %s6851_s23, 32, %s479_s29, [#allocation4]  }
  0x80   : > { %p5460_p4 = pneg %p5459_p13  ;;  %p5466_p9 = por %p5465_p8, %p5464_p7 }
  0x82   : > { %p5467_p10 = pnand %p5466_p9, %p5460_p4 }
  0x84   : > { %5470 = shalt.err (!%p5467_p10)
}
  0x85   : > { %s6852_s3 = sld [smem:[#allocation41_spill]]  ;;  %s5482_s24 = scalar_lea.vmem %s525_s18, 16 }
  0x86   : > { %p5483_p11 = scmp.ne.s32.totalorder %s525_s18, %s5482_s24  ;;  %s5489_s23 = scalar_lea.vmem %s525_s18, 32 }
  0x87   : > { %p5490_p1 = scmp.lt.s32.totalorder %s525_s18, %s525_s18  ;;  %p5491_p13 = scmp.lt.s32.totalorder %s5489_s23, %s5482_s24 }
  0x88   : > { %p5485_p12 = pnand %p5483_p11, %p5875_p6 }
  0x89   : > { %p5492_p2 = por %p5491_p13, %p5490_p1 }
  0x8a   : > { %p5486_p0 = pneg %p5485_p12 }
  0x8b   : > { %5111 = dma.hbm_to_vmem [thread:$0]  (!%p5865_p5), %s6852_s3, 16, %s501_s22, [#allocation6]  }
  0x8c   : > { %p5493_p7 = pnand %p5492_p2, %p5486_p0 }
  0x8e   : > { %5496 = shalt.err (!%p5493_p7)
}
  0x8f   : > { %5117 = dma.hbm_to_vmem [thread:$0]  (!%p5865_p5), %s6818_s5, 16, %s525_s18, [#allocation9]  }
  0x90   : > { %s5727_s22 = smov [#allocation13]   ;;  %s5728_s16 = smov [#allocation16]  }
  0x91   : > { %s545_s19 = sshll.u32 %s5727_s22, 4  ;;  %s570_s0 = sshll.u32 %s5728_s16, 4  ;;  %s546_s19 = int_to_ptr.vmem [resolvable:$true] %s545_s19  ;;  %s571_s0 = int_to_ptr.vmem [resolvable:$true] %s570_s0 }
  0x92   : > { %s5508_s29 = scalar_lea.vmem %s546_s19, 8192  ;;  %p5516_p10 = scmp.lt.s32.totalorder %s546_s19, %s546_s19 }
  0x93   : > { %p5509_p4 = scmp.ne.s32.totalorder %s546_s19, %s5508_s29  ;;  %p5517_p2 = scmp.lt.s32.totalorder %s5508_s29, %s5508_s29 }
  0x95   : > { %p5511_p8 = pnand %p5509_p4, %p5875_p6  ;;  %p5518_p11 = por %p5517_p2, %p5516_p10 }
  0x97   : > { %p5512_p9 = pneg %p5511_p8 }
  0x99   : > { %p5519_p12 = pnand %p5518_p11, %p5512_p9 }
  0x9b   : > { %5522 = shalt.err (!%p5519_p12)
}
  0x9c   : > { %s6853_s24 = smov 32   ;;  %s6854_s23 = smov 512  }
  0x9d   : > { %5123 = dma.hbm_to_vmem [thread:$0]  (!%p5865_p5), %s6820_s7, 8192, %s546_s19, [#allocation12], %s6854_s23, %s6854_s23, %s6853_s24  }
  0x9e   : > { %s5534_s26 = scalar_lea.vmem %s571_s0, 128  ;;  %p5542_p7 = scmp.lt.s32.totalorder %s571_s0, %s571_s0 }
  0x9f   : > { %p5535_p0 = scmp.ne.s32.totalorder %s571_s0, %s5534_s26  ;;  %p5543_p4 = scmp.lt.s32.totalorder %s5534_s26, %s5534_s26 }
  0xa1   : > { %p5537_p1 = pnand %p5535_p0, %p5875_p6  ;;  %p5544_p8 = por %p5543_p4, %p5542_p7 }
  0xa3   : > { %p5538_p13 = pneg %p5537_p1 }
  0xa5   : > { %p5545_p9 = pnand %p5544_p8, %p5538_p13 }
  0xa7   : > { %5548 = shalt.err (!%p5545_p9)
}
  0xa8   : > { %5129 = dma.hbm_to_vmem [thread:$0]  (!%p5865_p5), %s6822_s9, 128, %s571_s0, [#allocation15]  }
  0xa9   : > { %s5729_s29 = smov [#allocation19]   ;;  %s5730_s24 = smov [#allocation22]  }
  0xaa   : > { %s594_s19 = sshll.u32 %s5729_s29, 4  ;;  %s615_s23 = sshll.u32 %s5730_s24, 4  ;;  %s595_s19 = int_to_ptr.vmem [resolvable:$true] %s594_s19  ;;  %s616_s23 = int_to_ptr.vmem [resolvable:$true] %s615_s23 }
  0xab   : > { %s5560_s18 = scalar_lea.vmem %s595_s19, 64  ;;  %p5568_p12 = scmp.lt.s32.totalorder %s595_s19, %s595_s19 }
  0xac   : > { %p5561_p10 = scmp.ne.s32.totalorder %s595_s19, %s5560_s18  ;;  %p5569_p0 = scmp.lt.s32.totalorder %s5560_s18, %s5560_s18 }
  0xae   : > { %p5563_p2 = pnand %p5561_p10, %p5875_p6  ;;  %p5570_p1 = por %p5569_p0, %p5568_p12 }
  0xb0   : > { %p5564_p11 = pneg %p5563_p2 }
  0xb2   : > { %p5571_p13 = pnand %p5570_p1, %p5564_p11 }
  0xb4   : > { %5574 = shalt.err (!%p5571_p13)
}
  0xb5   : > { %5135 = dma.hbm_to_vmem [thread:$0]  (!%p5865_p5), %s6824_s11, 64, %s595_s19, [#allocation18]  }
  0xb6   : > { %s5586_s0 = scalar_lea.vmem %s616_s23, 16384  ;;  %p5594_p9 = scmp.lt.s32.totalorder %s616_s23, %s616_s23 }
  0xb7   : > { %p5587_p7 = scmp.ne.s32.totalorder %s616_s23, %s5586_s0  ;;  %p5595_p10 = scmp.lt.s32.totalorder %s5586_s0, %s5586_s0 }
  0xb9   : > { %p5589_p4 = pnand %p5587_p7, %p5875_p6  ;;  %p5596_p2 = por %p5595_p10, %p5594_p9 }
  0xbb   : > { %p5590_p8 = pneg %p5589_p4 }
  0xbd   : > { %p5597_p3 = pnand %p5596_p2, %p5590_p8 }
  0xbf   : > { %5600 = shalt.err (!%p5597_p3)
}
  0xc0   : > { %s5731_s22 = smov 256   ;;  %s5732_s16 = smov 16  }
  0xc1   : > { %5141 = dma.hbm_to_vmem [thread:$0]  (!%p5865_p5), %s6826_s13, 16384, %s616_s23, [#allocation21], %s5731_s22, %s5731_s22, %s5732_s16  }
  0xc2   : > { %s5733_s19 = smov [#allocation25]   ;;  %s5734_s25 = smov [#allocation26]  }
  0xc3   : > { %s640_s18 = sshll.u32 %s5733_s19, 4  ;;  %s654_s26 = sshll.u32 %s5734_s25, 4  ;;  %s641_s18 = int_to_ptr.vmem [resolvable:$true] %s640_s18  ;;  %s655_s26 = int_to_ptr.vmem [resolvable:$true] %s654_s26 }
  0xc4   : > { %s5612_s3 = scalar_lea.vmem %s641_s18, 32  ;;  %p5620_p3 = scmp.lt.s32.totalorder %s641_s18, %s641_s18 }
  0xc5   : > { %p5613_p11 = scmp.ne.s32.totalorder %s641_s18, %s5612_s3  ;;  %p5621_p1 = scmp.lt.s32.totalorder %s5612_s3, %s5612_s3 }
  0xc7   : > { %p5615_p12 = pnand %p5613_p11, %p5875_p6  ;;  %p5622_p13 = por %p5621_p1, %p5620_p3 }
  0xc9   : > { %p5616_p0 = pneg %p5615_p12 }
  0xcb   : > { %p5623_p7 = pnand %p5622_p13, %p5616_p0 }
  0xcd   : > { %5626 = shalt.err (!%p5623_p7)
}
  0xce   : > { %5147 = dma.hbm_to_vmem [thread:$0]  (!%p5865_p5), %s6828_s15, 32, %s641_s18, [#allocation24]  }
  0xcf   : > { %s5638_s23 = scalar_lea.vmem %s655_s26, 16  ;;  %s5645_s22 = scalar_lea.vmem %s655_s26, 32 }
  0xd0   : > { %p5639_p4 = scmp.ne.s32.totalorder %s655_s26, %s5638_s23  ;;  %p5646_p10 = scmp.lt.s32.totalorder %s655_s26, %s655_s26 }
  0xd1   : > { %p5647_p2 = scmp.lt.s32.totalorder %s5645_s22, %s5638_s23 }
  0xd2   : > { %p5641_p8 = pnand %p5639_p4, %p5875_p6 }
  0xd3   : > { %p5648_p11 = por %p5647_p2, %p5646_p10 }
  0xd4   : > { %p5642_p9 = pneg %p5641_p8 }
  0xd6   : > { %p5649_p12 = pnand %p5648_p11, %p5642_p9 }
  0xd8   : > { %5652 = shalt.err (!%p5649_p12)
}
  0xd9   : > { %5150 = dma.hbm_to_vmem [thread:$0]  (!%p5865_p5), %s6830_s17, 16, %s655_s26, [#allocation27]  }
  0xda   : > { %p6855_p0 = scmp.ne.s32.totalorder %s6847_s20, 0 }
  0xdb   : > { %p6856_p3 = scmp.ne.s32.totalorder (!%p6855_p0), %s6846_s1, 0 }
  0xdc   : > { %680 = sbr.rel (%p6855_p0) target bundleno = 1836 (0x72c), region = 92 }
  0xe1   : > { %5666 = dma.done.wait (%p6856_p3), [#allocation4], 32  }
  0xe2   : > { %5668 = vsyncadd (%p6856_p3), [#allocation4], 4294967264 }
  0xe3   : > { %5670 = dma.done.wait (%p6856_p3), [#allocation6], 32  }
  0xe4   : > { %5672 = vsyncadd (%p6856_p3), [#allocation6], 4294967264 }
  0xe5   : > { %5674 = dma.done.wait (%p6856_p3), [#allocation9], 528  }
  0xe6   : > { %5676 = vsyncadd (%p6856_p3), [#allocation9], 4294966768 }
  0xe7   : > { %5678 = dma.done.wait (%p6856_p3), [#allocation12], 8208  }
  0xe8   : > { %5680 = vsyncadd (%p6856_p3), [#allocation12], 4294959088 }
  0xe9   : > { %5682 = dma.done.wait (%p6856_p3), [#allocation15], 256  }
  0xea   : > { %5684 = vsyncadd (%p6856_p3), [#allocation15], 4294967040 }
  0xeb   : > { %5686 = dma.done.wait (%p6856_p3), [#allocation18], 65600  }
  0xec   : > { %5688 = vsyncadd (%p6856_p3), [#allocation18], 4294901696 }
  0xed   : > { %5690 = dma.done.wait (%p6856_p3), [#allocation21], 16448  }
  0xee   : > { %5692 = vsyncadd (%p6856_p3), [#allocation21], 4294950848 }
  0xef   : > { %5694 = dma.done.wait (%p6856_p3), [#allocation24], 64  }
  0xf0   : > { %5696 = vsyncadd (%p6856_p3), [#allocation24], 4294967232 }
  0xf1   : > { %5698 = dma.done.wait (%p6856_p3), [#allocation27], 16  }
  0xf2   : > { %5700 = vsyncadd (%p6856_p3), [#allocation27], 4294967280  ;;  %vm865_vm0 = vcmask 1040384   ;;  %p797_p5 = scmp.lt.s32.totalorder %s5703_s27, 1  ;;  %vm866_vm1 = vcmask 1041408   ;;  %v5735_v0 = vmov 65535  }
  0xf3   : > { %v867_v1 = vsel %vm865_vm0, 4294967295, %v5735_v0  ;;  %s6857_s24 = sld [smem:[#allocation38_spill]]  ;;  %v839_v3 = vld [vmem:[#allocation3] sm:$0x3]  ;;  %vm840_vm2 = vcmask 23552   ;;  %v5233_v30 = vld [vmem:[#allocation8 + $0x10] sm:$0xff]  }
  0xf4   : > { %s6866_s27 = smov (!%p797_p5, %s5703_s27), 1  ;;  %v868_v2 = vsel %vm866_vm1, %v867_v1, 0  ;;  %v5232_v29 = vld [vmem:[#allocation8 + $0x18] sm:$0xff]   ;;  %v5234_v31 = vld [vmem:[#allocation8 + $0x8] sm:$0xff]   ;;  %v5235_v32 = vld [vmem:[#allocation8] sm:$0xff]   ;;  %vm1071_vm3 = vcmask 523264  }
  0xf5   : > { %s4939_s20 = sshll.u32 %s6866_s27, 7  ;;  %v870_v6 = vand.u32 %v868_v2, %v839_v3  ;;  %5014 = vmatprep.subr.bf16.mxu1 %v5232_v29  ;;  %v1319_v33 = vld [vmem:[#allocation13 + $0x1c0] sm:$0xff]  ;;  %v6084_v35 = vld [vmem:[#allocation13 + $0x1c8] sm:$0xff]  ;;  %v6092_v58 = vld [vmem:[#allocation5] ss:$0 sm:$0xff]  ;;  %s6858_s25 = sld [smem:[#allocation42_spill]] }
  0xf6   : > { %5015 = vmatpush3.bf16.msra.mxu1 %v5232_v29  ;;  %v1323_v34 = vld [vmem:[#allocation13 + $0x1e0] sm:$0xff]  ;;  %v6086_v38 = vld [vmem:[#allocation13 + $0x1e8] sm:$0xff]  ;;  %v6096_v63 = vld [vmem:[#allocation7] ss:$0 sm:$0xff]  ;;  %s6859_s2 = sld [smem:[#allocation43_spill]]  ;;  %vm4591_vm4 = vcmask 65536  }
  0xf7   : > { %4996 = vmatprep.subr.bf16.mxu0 %v870_v6  ;;  %5016 = vmatprep.subr.bf16.mxu1 %v5233_v30  ;;  %v4929_v36 = vcombine.low %v1319_v33, %v1323_v34  ;;  %v4930_v37 = vcombine.high %v1319_v33, %v1323_v34  ;;  %v1311_v39 = vld [vmem:[#allocation13 + $0x180] sm:$0xff]  ;;  %v4931_v41 = vcombine.low %v6084_v35, %v6086_v38 }
  0xf8   : > { %4997 = vmatpush3.bf16.msra.mxu0 %v870_v6  ;;  %v1315_v40 = vld [vmem:[#allocation13 + $0x1a0] sm:$0xff]  ;;  %v4932_v42 = vcombine.high %v6084_v35, %v6086_v38 }
  0xf9   : > { %s6058_s19 = scalar_lea.vmem %s6857_s24, %s4939_s20  ;;  %v4922_v43 = vcombine.high %v1311_v39, %v1315_v40  ;;  %v1303_v44 = vld [vmem:[#allocation13 + $0x140] sm:$0xff]  ;;  %1647 = vmatprep.subr.bf16.mxu0 %v4930_v37  ;;  %v4921_v46 = vcombine.low %v1311_v39, %v1315_v40 }
  0xfa   : > { %v815_v4 = vld [vmem:[%s6058_s19] sm:$0xff]  ;;  %v816_v5 = vld [vmem:[%s6058_s19 + $0x8] sm:$0xff]  ;;  %v817_v8 = vld [vmem:[%s6058_s19 + $0x10] sm:$0xff]  ;;  %5017 = vmatpush3.bf16.msra.mxu1 %v5233_v30 }
  0xfb   : > { %v831_v7 = vpack.c.bf16 %v816_v5, %v815_v4  ;;  %v818_v9 = vld [vmem:[%s6058_s19 + $0x18] sm:$0xff]  ;;  %v819_v10 = vld [vmem:[%s6058_s19 + $0x20] sm:$0xff]  ;;  %v820_v11 = vld [vmem:[%s6058_s19 + $0x28] sm:$0xff]  ;;  %5018 = vmatprep.subr.bf16.mxu1 %v5234_v31 }
  0xfc   : > { %v832_v12 = vpack.c.bf16 %v818_v9, %v817_v8  ;;  %v833_v13 = vpack.c.bf16 %v820_v11, %v819_v10  ;;  %v821_v14 = vld [vmem:[%s6058_s19 + $0x30] sm:$0xff]  ;;  %v822_v15 = vld [vmem:[%s6058_s19 + $0x38] sm:$0xff]  ;;  %v823_v16 = vld [vmem:[%s6058_s19 + $0x40] sm:$0xff]  ;;  %s808_s30 = scalar_lea.vmem %s6859_s2, %s6866_s27 }
  0xfd   : > { %4998 = vmatprep.mubr.msk.bf16.mxu0 %vm840_vm2, %v831_v7  ;;  %v824_v17 = vld [vmem:[%s6058_s19 + $0x48] sm:$0xff]  ;;  %v834_v18 = vpack.c.bf16 %v822_v15, %v821_v14  ;;  %v825_v20 = vld [vmem:[%s6058_s19 + $0x50] sm:$0xff]  ;;  %v826_v21 = vld [vmem:[%s6058_s19 + $0x58] sm:$0xff] }
  0xfe   : > { %4999 = vmatmul.mubr.msk.bf16.vlgmr.msra.gmra.mxu0 %vm840_vm2, %v832_v12  ;;  %v835_v19 = vpack.c.bf16 %v824_v17, %v823_v16  ;;  %v827_v22 = vld [vmem:[%s6058_s19 + $0x60] sm:$0xff]  ;;  %v828_v23 = vld [vmem:[%s6058_s19 + $0x68] sm:$0xff]  ;;  %v836_v24 = vpack.c.bf16 %v826_v21, %v825_v20  ;;  %v829_v26 = vld [vmem:[%s6058_s19 + $0x70] sm:$0xff]  ;;  %5019 = vmatpush3.bf16.msra.mxu1 %v5234_v31 }
  0xff   : > { %5002 = vmatprep.mubr.msk.bf16.mxu0 %vm840_vm2, %v833_v13  ;;  %v837_v25 = vpack.c.bf16 %v828_v23, %v827_v22  ;;  %v830_v27 = vld [vmem:[%s6058_s19 + $0x78] sm:$0xff]  ;;  %5020 = vmatprep.subr.bf16.mxu1 %v5235_v32  ;;  %v1307_v45 = vld [vmem:[#allocation13 + $0x160] sm:$0xff] }
 0x100   : > { %v838_v28 = vpack.c.bf16 %v830_v27, %v829_v26  ;;  %1648 = vmatpush1.bf16.msra.mxu0 %v4929_v36  ;;  %v4914_v47 = vcombine.high %v1303_v44, %v1307_v45  ;;  %v1295_v48 = vld [vmem:[#allocation13 + $0x100] sm:$0xff]  ;;  %v4913_v50 = vcombine.low %v1303_v44, %v1307_v45  ;;  %v1312_v14 = vld [vmem:[#allocation13 + $0x188] sm:$0xff] }
 0x101   : > { %1649 = vmatprep.subr.bf16.mxu0 %v4922_v43  ;;  %v1299_v49 = vld [vmem:[#allocation13 + $0x120] sm:$0xff]  ;;  %v1316_v15 = vld [vmem:[#allocation13 + $0x1a8] sm:$0xff] }
 0x102   : > { %5021 = vmatpush3.bf16.msra.mxu1 %v5235_v32  ;;  %v4906_v51 = vcombine.high %v1295_v48, %v1299_v49  ;;  %v1287_v52 = vld [vmem:[#allocation13 + $0xc0] sm:$0xff]  ;;  %v4905_v54 = vcombine.low %v1295_v48, %v1299_v49  ;;  %v1304_v27 = vld [vmem:[#allocation13 + $0x148] sm:$0xff]  ;;  %v4923_v31 = vcombine.low %v1312_v14, %v1316_v15 }
 0x103   : > { %1760 = vmatprep.subr.bf16.mxu1 %v4932_v42  ;;  %v1291_v53 = vld [vmem:[#allocation13 + $0xe0] sm:$0xff]  ;;  %v1296_v43 = vld [vmem:[#allocation13 + $0x108] sm:$0xff] }
 0x104   : > { %1650 = vmatpush1.bf16.msra.mxu0 %v4921_v46  ;;  %v4898_v55 = vcombine.high %v1287_v52, %v1291_v53  ;;  %v4897_v56 = vcombine.low %v1287_v52, %v1291_v53  ;;  %v1300_v44 = vld [vmem:[#allocation13 + $0x128] sm:$0xff] }
 0x105   : > { %1651 = vmatprep.subr.bf16.mxu0 %v4914_v47  ;;  %v1288_v53 = vld [vmem:[#allocation13 + $0xc8] sm:$0xff] }
 0x106   : > { %5003 = vmatmul.mubr.msk.bf16.gmra.mxu0 %vm840_vm2, %v834_v18 }
 0x107   : > { %5006 = vmatprep.mubr.msk.bf16.mxu0 %vm840_vm2, %v835_v19 }
 0x108   : > { %1652 = vmatpush1.bf16.msra.mxu0 %v4913_v50 }
 0x109   : > { %1653 = vmatprep.subr.bf16.mxu0 %v4906_v51 }
 0x10c   : > { %1654 = vmatpush1.bf16.msra.mxu0 %v4905_v54  ;;  %v1292_v54 = vld [vmem:[#allocation13 + $0xe8] sm:$0xff] }
 0x10d   : > { %1655 = vmatprep.subr.bf16.mxu0 %v4898_v55 }
 0x10e   : > { %5007 = vmatmul.mubr.msk.bf16.gmra.mxu0 %vm840_vm2, %v836_v24  ;;  %v4924_v24 = vcombine.high %v1312_v14, %v1316_v15 }
 0x10f   : > { %5010 = vmatprep.mubr.msk.bf16.mxu0 %vm840_vm2, %v837_v25 }
 0x110   : > { %1656 = vmatpush1.bf16.msra.mxu0 %v4897_v56 }
 0x116   : > { %5011 = vmatmul.mubr.msk.bf16.gmra.mxu0 %vm840_vm2, %v838_v28  ;;  %v1308_v28 = vld [vmem:[#allocation13 + $0x168] sm:$0xff] }
 0x117   : > { %v4916_v39 = vcombine.high %v1304_v27, %v1308_v28  ;;  %v4915_v35 = vcombine.low %v1304_v27, %v1308_v28  ;;  %v1275_v28 = vld [vmem:[#allocation13 + $0x60] sm:$0xff] }
 0x1be   : > { %v5000_v57 = vpop.f32.mrf.mxu0 }
 0x1bf   : > { %v978_v61 = vmul.f32 %v5000_v57, %v6092_v58  ;;  %v4907_v57 = vcombine.low %v1296_v43, %v1300_v44 }
 0x1c0   : > { %v906_v59 = vpop.f32.mrf.mxu0 }
 0x1c1   : > { %v976_v60 = vmul.f32 %v6092_v58, %v906_v59  ;;  %v1001_v5 = vadd.f32 %v6096_v63, %v978_v61 }
 0x1c2   : > { %v5001_v62 = vpop.f32.mrf.mxu0 }
 0x1c3   : > { %v979_v0 = vmul.f32 %v5001_v62, %v6092_v58  ;;  %v999_v2 = vadd.f32 %v6096_v63, %v976_v60  ;;  %v1017_v16 = vmax.f32 %v1001_v5, 0.0 }
 0x1c4   : > { %v909_v1 = vpop.f32.mrf.mxu0 }
 0x1c5   : > { %v1002_v3 = vadd.f32 %v6096_v63, %v979_v0  ;;  %v977_v4 = vmul.f32 %v6092_v58, %v909_v1  ;;  %v1015_v11 = vmax.f32 %v999_v2, 0.0  ;;  %v4900_v1 = vcombine.high %v1288_v53, %v1292_v54 }
 0x1c6   : > { %v5004_v6 = vpop.f32.mrf.mxu0 }
 0x1c7   : > { %v1000_v7 = vadd.f32 %v6096_v63, %v977_v4  ;;  %v982_v8 = vmul.f32 %v5004_v6, %v6092_v58  ;;  %v1018_v9 = vmax.f32 %v1002_v3, 0.0 }
 0x1c8   : > { %v922_v10 = vpop.f32.mrf.mxu0 }
 0x1c9   : > { %v1016_v12 = vmax.f32 %v1000_v7, 0.0  ;;  %v980_v13 = vmul.f32 %v6092_v58, %v922_v10  ;;  %v1005_v17 = vadd.f32 %v6096_v63, %v982_v8  ;;  %v1032_v22 = vpack.c.bf16 %v1018_v9, %v1017_v16 }
 0x1ca   : > { %v5005_v18 = vpop.f32.mrf.mxu0  ;;  %v4899_v10 = vcombine.low %v1288_v53, %v1292_v54  ;;  %v6141_v53 = vld [vmem:[#allocation10] ss:$0 sm:$0xff] }
 0x1cb   : > { %v1003_v19 = vadd.f32 %v6096_v63, %v980_v13  ;;  %v983_v20 = vmul.f32 %v5005_v18, %v6092_v58  ;;  %v1031_v21 = vpack.c.bf16 %v1016_v12, %v1015_v11  ;;  %v1021_v29 = vmax.f32 %v1005_v17, 0.0 }
 0x1cc   : > { %v925_v23 = vpop.f32.mrf.mxu0 }
 0x1cd   : > { %v1006_v25 = vadd.f32 %v6096_v63, %v983_v20  ;;  %v981_v26 = vmul.f32 %v6092_v58, %v925_v23  ;;  %5022 = vmatprep.mubr.msk.bf16.mxu1 %vm1071_vm3, %v1031_v21  ;;  %v1019_v32 = vmax.f32 %v1003_v19, 0.0  ;;  %v1279_v21 = vld [vmem:[#allocation13 + $0x80] sm:$0xff] }
 0x1ce   : > { %5023 = vmatmul.mubr.msk.bf16.vlgmr.msra.gmra.mxu1 %vm1071_vm3, %v1032_v22  ;;  %v5008_v30 = vpop.f32.mrf.mxu0  ;;  %v1283_v22 = vld [vmem:[#allocation13 + $0xa0] sm:$0xff] }
 0x1cf   : > { %v1022_v33 = vmax.f32 %v1006_v25, 0.0  ;;  %v1004_v34 = vadd.f32 %v6096_v63, %v981_v26  ;;  %v986_v36 = vmul.f32 %v5008_v30, %v6092_v58  ;;  %1761 = vmatpush1.bf16.msra.mxu1 %v4931_v41  ;;  %v4908_v41 = vcombine.high %v1296_v43, %v1300_v44 }
 0x1d0   : > { %v938_v37 = vpop.f32.mrf.mxu0  ;;  %1762 = vmatprep.subr.bf16.mxu1 %v4924_v24  ;;  %v4890_v23 = vcombine.high %v1279_v21, %v1283_v22  ;;  %v1280_v24 = vld [vmem:[#allocation13 + $0x88] sm:$0xff]  ;;  %v4889_v25 = vcombine.low %v1279_v21, %v1283_v22 }
 0x1d1   : > { %v1020_v40 = vmax.f32 %v1004_v34, 0.0  ;;  %v984_v42 = vmul.f32 %v6092_v58, %v938_v37  ;;  %v1034_v45 = vpack.c.bf16 %v1022_v33, %v1021_v29  ;;  %v1009_v46 = vadd.f32 %v6096_v63, %v986_v36  ;;  %v1272_v29 = vld [vmem:[#allocation13 + $0x48] sm:$0xff]  ;;  %v1263_v36 = vld [vmem:[#allocation13] sm:$0xff] }
 0x1d2   : > { %v5009_v47 = vpop.f32.mrf.mxu0  ;;  %1657 = vmatprep.subr.bf16.mxu0 %v4890_v23  ;;  %v1267_v37 = vld [vmem:[#allocation13 + $0x20] sm:$0xff] }
 0x1d3   : > { %v1033_v48 = vpack.c.bf16 %v1020_v40, %v1019_v32  ;;  %v1007_v49 = vadd.f32 %v6096_v63, %v984_v42  ;;  %v987_v50 = vmul.f32 %v5009_v47, %v6092_v58  ;;  %1763 = vmatpush1.bf16.msra.mxu1 %v4923_v31  ;;  %v1025_v55 = vmax.f32 %v1009_v46, 0.0  ;;  %1658 = vmatpush1.bf16.msra.mxu0 %v4889_v25  ;;  %v1276_v31 = vld [vmem:[#allocation13 + $0x68] sm:$0xff]  ;;  %v1321_v47 = vld [vmem:[#allocation13 + $0x1d0] sm:$0xff] }
 0x1d4   : > { %v941_v38 = vpop.f32.mrf.mxu0  ;;  %1764 = vmatprep.subr.bf16.mxu1 %v4916_v39  ;;  %v4883_v33 = vcombine.low %v1272_v29, %v1276_v31  ;;  %v4884_v34 = vcombine.high %v1272_v29, %v1276_v31  ;;  %v1264_v39 = vld [vmem:[#allocation13 + $0x8] sm:$0xff]  ;;  %v4874_v40 = vcombine.high %v1263_v36, %v1267_v37  ;;  %v4873_v43 = vcombine.low %v1263_v36, %v1267_v37  ;;  %v1301_v29 = vld [vmem:[#allocation13 + $0x130] sm:$0xff]  ;;  %v1302_v31 = vld [vmem:[#allocation13 + $0x138] sm:$0xff] }
 0x1d5   : > { %v1010_v51 = vadd.f32 %v6096_v63, %v987_v50  ;;  %5026 = vmatprep.mubr.msk.bf16.mxu1 %vm1071_vm3, %v1033_v48  ;;  %v985_v52 = vmul.f32 %v6092_v58, %v941_v38  ;;  %v1023_v59 = vmax.f32 %v1007_v49, 0.0  ;;  %v1268_v42 = vld [vmem:[#allocation13 + $0x28] sm:$0xff]  ;;  %v5736_v46 = vmov 0   ;;  %v1325_v48 = vld [vmem:[#allocation13 + $0x1f0] sm:$0xff]  ;;  %v1322_v49 = vld [vmem:[#allocation13 + $0x1d8] sm:$0xff] }
 0x1d6   : > { %5027 = vmatmul.mubr.msk.bf16.gmra.mxu1 %vm1071_vm3, %v1034_v45  ;;  %v5012_v56 = vpop.f32.mrf.mxu0  ;;  %v4875_v44 = vcombine.low %v1264_v39, %v1268_v42  ;;  %v4876_v45 = vcombine.high %v1264_v39, %v1268_v42  ;;  %1679 = vmatprep.mubr.bf16.mxu0 %v5736_v46  ;;  %v4933_v50 = vcombine.low %v1321_v47, %v1325_v48  ;;  %v1326_v38 = vld [vmem:[#allocation13 + $0x1f8] sm:$0xff]  ;;  %v1289_v42 = vld [vmem:[#allocation13 + $0xd0] sm:$0xff] }
 0x1d7   : > { %v1026_v60 = vmax.f32 %v1010_v51, 0.0  ;;  %v1008_v61 = vadd.f32 %v6096_v63, %v985_v52  ;;  %v990_v62 = vmul.f32 %v5012_v56, %v6092_v58  ;;  %1765 = vmatpush1.bf16.msra.mxu1 %v4915_v35  ;;  %v4934_v35 = vcombine.high %v1321_v47, %v1325_v48  ;;  %v1294_v47 = vld [vmem:[#allocation13 + $0xf8] sm:$0xff] }
 0x1d8   : > { %v954_v0 = vpop.f32.mrf.mxu0  ;;  %1766 = vmatprep.subr.bf16.mxu1 %v4908_v41  ;;  %v4935_v41 = vcombine.low %v1322_v49, %v1326_v38  ;;  %v4936_v51 = vcombine.high %v1322_v49, %v1326_v38 }
 0x1d9   : > { %v1024_v2 = vmax.f32 %v1008_v61, 0.0  ;;  %v988_v3 = vmul.f32 %v6092_v58, %v954_v0  ;;  %v1036_v4 = vpack.c.bf16 %v1026_v60, %v1025_v55  ;;  %v1013_v5 = vadd.f32 %v6096_v63, %v990_v62 }
 0x1da   : > { %v5013_v6 = vpop.f32.mrf.mxu0 }
 0x1db   : > { %v1035_v7 = vpack.c.bf16 %v1024_v2, %v1023_v59  ;;  %v1011_v8 = vadd.f32 %v6096_v63, %v988_v3  ;;  %v991_v9 = vmul.f32 %v5013_v6, %v6092_v58  ;;  %1767 = vmatpush1.bf16.msra.mxu1 %v4907_v57  ;;  %v1029_v14 = vmax.f32 %v1013_v5, 0.0  ;;  %v6144_v57 = vld [vmem:[#allocation11] ss:$0 sm:$0xff]  ;;  %v1313_v3 = vld [vmem:[#allocation13 + $0x190] sm:$0xff] }
 0x1dc   : > { %v957_v11 = vpop.f32.mrf.mxu0  ;;  %1768 = vmatprep.subr.bf16.mxu1 %v4900_v1 }
 0x1dd   : > { %5030 = vmatprep.mubr.msk.bf16.mxu1 %vm1071_vm3, %v1035_v7  ;;  %v1014_v12 = vadd.f32 %v6096_v63, %v991_v9  ;;  %v989_v13 = vmul.f32 %v6092_v58, %v957_v11  ;;  %v1027_v15 = vmax.f32 %v1011_v8, 0.0  ;;  %v1284_v58 = vld [vmem:[#allocation13 + $0xa8] sm:$0xff]  ;;  %v1317_v7 = vld [vmem:[#allocation13 + $0x1b0] sm:$0xff]  ;;  %v1314_v8 = vld [vmem:[#allocation13 + $0x198] sm:$0xff] }
 0x1de   : > { %5031 = vmatmul.mubr.msk.bf16.gmra.mxu1 %vm1071_vm3, %v1036_v4  ;;  %v4891_v26 = vcombine.low %v1280_v24, %v1284_v58  ;;  %v4892_v27 = vcombine.high %v1280_v24, %v1284_v58  ;;  %v1318_v9 = vld [vmem:[#allocation13 + $0x1b8] sm:$0xff]  ;;  %v4925_v21 = vcombine.low %v1313_v3, %v1317_v7 }
 0x1df   : > { %v1030_v16 = vmax.f32 %v1014_v12, 0.0  ;;  %v1012_v17 = vadd.f32 %v6096_v63, %v989_v13  ;;  %1769 = vmatpush1.bf16.msra.mxu1 %v4899_v10  ;;  %v1271_v63 = vld [vmem:[#allocation13 + $0x40] sm:$0xff]  ;;  %v1305_v13 = vld [vmem:[#allocation13 + $0x150] sm:$0xff]  ;;  %v4927_v22 = vcombine.low %v1314_v8, %v1318_v9 }
 0x1e0   : > { %1770 = vmatprep.subr.bf16.mxu1 %v4892_v27  ;;  %v4882_v30 = vcombine.high %v1271_v63, %v1275_v28  ;;  %v4881_v32 = vcombine.low %v1271_v63, %v1275_v28  ;;  %v1297_v27 = vld [vmem:[#allocation13 + $0x110] sm:$0xff] }
 0x1e1   : > { %v1028_v18 = vmax.f32 %v1012_v17, 0.0  ;;  %v1038_v19 = vpack.c.bf16 %v1030_v16, %v1029_v14  ;;  %v4928_v16 = vcombine.high %v1314_v8, %v1318_v9  ;;  %v1309_v17 = vld [vmem:[#allocation13 + $0x170] sm:$0xff]  ;;  %v4910_v39 = vcombine.high %v1297_v27, %v1301_v29  ;;  %v1274_v8 = vld [vmem:[#allocation13 + $0x58] sm:$0xff] }
 0x1e2   : > { %1659 = vmatprep.subr.bf16.mxu0 %v4882_v30  ;;  %v4918_v58 = vcombine.high %v1305_v13, %v1309_v17  ;;  %v1298_v30 = vld [vmem:[#allocation13 + $0x118] sm:$0xff] }
 0x1e3   : > { %v1037_v20 = vpack.c.bf16 %v1028_v18, %v1027_v15  ;;  %1771 = vmatpush1.bf16.msra.mxu1 %v4891_v26  ;;  %1660 = vmatpush1.bf16.msra.mxu0 %v4881_v32  ;;  %v4926_v15 = vcombine.high %v1313_v3, %v1317_v7  ;;  %v1306_v18 = vld [vmem:[#allocation13 + $0x158] sm:$0xff]  ;;  %v4917_v32 = vcombine.low %v1305_v13, %v1309_v17  ;;  %v1277_v7 = vld [vmem:[#allocation13 + $0x70] sm:$0xff] }
 0x1e4   : > { %1772 = vmatprep.subr.bf16.mxu1 %v4884_v34  ;;  %1661 = vmatprep.subr.bf16.mxu0 %v4874_v40  ;;  %v4912_v40 = vcombine.high %v1298_v30, %v1302_v31  ;;  %v1278_v9 = vld [vmem:[#allocation13 + $0x78] sm:$0xff] }
 0x1e5   : > { %5034 = vmatprep.mubr.msk.bf16.mxu1 %vm1071_vm3, %v1037_v20 }
 0x1e6   : > { %5035 = vmatmul.mubr.msk.bf16.gmra.mxu1 %vm1071_vm3, %v1038_v19  ;;  %v1310_v19 = vld [vmem:[#allocation13 + $0x178] sm:$0xff] }
 0x1e7   : > { %1773 = vmatpush1.bf16.msra.mxu1 %v4883_v33  ;;  %1662 = vmatpush1.bf16.msra.mxu0 %v4873_v43  ;;  %v4920_v25 = vcombine.high %v1306_v18, %v1310_v19  ;;  %v4919_v36 = vcombine.low %v1306_v18, %v1310_v19  ;;  %v4888_v18 = vcombine.high %v1274_v8, %v1278_v9  ;;  %v1265_v19 = vld [vmem:[#allocation13 + $0x10] sm:$0xff] }
 0x1e8   : > { %1774 = vmatprep.subr.bf16.mxu1 %v4876_v45  ;;  %1792 = vmatprep.mubr.bf16.mxu1 %v5736_v46  ;;  %v1290_v45 = vld [vmem:[#allocation13 + $0xd8] sm:$0xff] }
 0x1e9   : > { %1873 = vmatprep.subr.bf16.mxu0 %v4934_v35  ;;  %v4911_v35 = vcombine.low %v1298_v30, %v1302_v31 }
 0x1eb   : > { %1775 = vmatpush1.bf16.msra.mxu1 %v4875_v44  ;;  %v1293_v44 = vld [vmem:[#allocation13 + $0xf0] sm:$0xff] }
 0x1ec   : > { %1986 = vmatprep.subr.bf16.mxu1 %v4936_v51  ;;  %v4904_v51 = vcombine.high %v1290_v45, %v1294_v47 }
 0x28e   : > { %v5024_v52 = vpop.f32.mrf.mxu1 }
 0x28f   : > { %v1202_v4 = vmul.f32 %v5024_v52, %v6141_v53  ;;  %v1281_v52 = vld [vmem:[#allocation13 + $0x90] sm:$0xff] }
 0x290   : > { %v1130_v54 = vpop.f32.mrf.mxu1 }
 0x291   : > { %v1200_v55 = vmul.f32 %v6141_v53, %v1130_v54  ;;  %v1225_v20 = vadd.f32 %v6144_v57, %v1202_v4 }
 0x292   : > { %v5025_v56 = vpop.f32.mrf.mxu1 }
 0x293   : > { %v1223_v60 = vadd.f32 %v6144_v57, %v1200_v55  ;;  %v1203_v0 = vmul.f32 %v5025_v56, %v6141_v53  ;;  %v1241_v63 = vmax.f32 %v1225_v20, 0.0  ;;  %v1285_v56 = vld [vmem:[#allocation13 + $0xb0] sm:$0xff] }
 0x294   : > { %v1133_v59 = vpop.f32.mrf.mxu1  ;;  %v4894_v4 = vcombine.high %v1281_v52, %v1285_v56 }
 0x295   : > { %v1201_v61 = vmul.f32 %v6141_v53, %v1133_v59  ;;  %v1239_v5 = vmax.f32 %v1223_v60, 0.0  ;;  %v1226_v11 = vadd.f32 %v6144_v57, %v1203_v0  ;;  %v1282_v59 = vld [vmem:[#allocation13 + $0x98] sm:$0xff] }
 0x296   : > { %v6148_v62 = vpop.f32.mrf.mxu1  ;;  %v1286_v60 = vld [vmem:[#allocation13 + $0xb8] sm:$0xff] }
 0x297   : > { %v1224_v1 = vadd.f32 %v6144_v57, %v1201_v61  ;;  %v1242_v23 = vmax.f32 %v1226_v11, 0.0  ;;  %v1206_v54 = vmul.f32 %v6148_v62, %v6141_v53  ;;  %v4901_v61 = vcombine.low %v1289_v42, %v1293_v44 }
 0x298   : > { %v1146_v2 = vpop.f32.mrf.mxu1 }
 0x299   : > { %v1240_v6 = vmax.f32 %v1224_v1, 0.0  ;;  %v1204_v28 = vmul.f32 %v6141_v53, %v1146_v2  ;;  %v6165_v33 = vpack.c.bf16 %v1242_v23, %v1241_v63  ;;  %v4903_v2 = vcombine.low %v1290_v45, %v1294_v47  ;;  %v1270_v23 = vld [vmem:[#allocation13 + $0x38] sm:$0xff] }
 0x29a   : > { %v5029_v10 = vpop.f32.mrf.mxu1  ;;  %v1229_v62 = vadd.f32 %v6144_v57, %v1206_v54 }
 0x29b   : > { %v6154_v12 = vpack.c.bf16 %v1240_v6, %v1239_v5  ;;  %v1227_v43 = vadd.f32 %v6144_v57, %v1204_v28  ;;  %v1207_v48 = vmul.f32 %v5029_v10, %v6141_v53  ;;  %v4896_v5 = vcombine.high %v1282_v59, %v1286_v60  ;;  %v1273_v6 = vld [vmem:[#allocation13 + $0x50] sm:$0xff] }
 0x29c   : > { %v1149_v14 = vpop.f32.mrf.mxu1  ;;  %v4893_v10 = vcombine.low %v1281_v52, %v1285_v56  ;;  %v4886_v17 = vcombine.high %v1273_v6, %v1277_v7  ;;  %v1245_v20 = vmax.f32 %v1229_v62, 0.0  ;;  %v3191_v62 = vld [vmem:[#allocation17 + $0x5a0] sm:$0xff] }
 0x29d   : > { %1680 = vmatmul.mubr.bf16.vlgmr.msra.gmra.mxu0 %v6154_v12  ;;  %1793 = vmatmul.mubr.bf16.vlgmr.msra.gmra.mxu1 %v6154_v12  ;;  %v1205_v24 = vmul.f32 %v6141_v53, %v1149_v14  ;;  %v1243_v55 = vmax.f32 %v1227_v43, 0.0  ;;  %v1230_v0 = vadd.f32 %v6144_v57, %v1207_v48 }
 0x29e   : > { %1874 = vmatpush1.bf16.msra.mxu0 %v4933_v50  ;;  %1987 = vmatpush1.bf16.msra.mxu1 %v4935_v41  ;;  %v6162_v26 = vpop.f32.mrf.mxu1  ;;  %v4909_v50 = vcombine.low %v1297_v27, %v1301_v29  ;;  %v4902_v41 = vcombine.high %v1289_v42, %v1293_v44 }
 0x29f   : > { %1689 = vmatprep.mubr.bf16.mxu0 %v5736_v46  ;;  %1802 = vmatprep.mubr.bf16.mxu1 %v5736_v46  ;;  %v1228_v34 = vadd.f32 %v6144_v57, %v1205_v24  ;;  %v1246_v11 = vmax.f32 %v1230_v0, 0.0  ;;  %v4885_v24 = vcombine.low %v1273_v6, %v1277_v7  ;;  %v3063_v6 = vld [vmem:[#allocation17 + $0x1a0] sm:$0xff]  ;;  %v3060_v7 = vld [vmem:[#allocation17 + $0x188] sm:$0xff] }
 0x2a0   : > { %1875 = vmatprep.subr.bf16.mxu0 %v4926_v15  ;;  %1988 = vmatprep.subr.bf16.mxu1 %v4928_v16  ;;  %v1162_v37 = vpop.f32.mrf.mxu1  ;;  %v4895_v15 = vcombine.low %v1282_v59, %v1286_v60 }
 0x2a1   : > { %v1244_v49 = vmax.f32 %v1228_v34, 0.0  ;;  %v1208_v13 = vmul.f32 %v6141_v53, %v1162_v37  ;;  %v1210_v34 = vmul.f32 %v6162_v26, %v6141_v53 }
 0x2a2   : > { %1876 = vmatpush1.bf16.msra.mxu0 %v4925_v21  ;;  %1989 = vmatpush1.bf16.msra.mxu1 %v4927_v22  ;;  %v6174_v38 = vpop.f32.mrf.mxu1  ;;  %v1269_v21 = vld [vmem:[#allocation13 + $0x30] sm:$0xff]  ;;  %v1266_v22 = vld [vmem:[#allocation13 + $0x18] sm:$0xff] }
 0x2a3   : > { %1877 = vmatprep.subr.bf16.mxu0 %v4918_v58  ;;  %1990 = vmatprep.subr.bf16.mxu1 %v4920_v25  ;;  %v6179_v1 = vpack.c.bf16 %v1244_v49, %v1243_v55  ;;  %v4887_v58 = vcombine.low %v1274_v8, %v1278_v9  ;;  %v6188_v25 = vpack.c.bf16 %v1246_v11, %v1245_v20  ;;  %v3188_v8 = vld [vmem:[#allocation17 + $0x588] sm:$0xff]  ;;  %v3059_v9 = vld [vmem:[#allocation17 + $0x180] sm:$0xff] }
 0x2a4   : > { %v1165_v3 = vpop.f32.mrf.mxu1  ;;  %v1231_v27 = vadd.f32 %v6144_v57, %v1208_v13  ;;  %v4878_v29 = vcombine.high %v1265_v19, %v1269_v21  ;;  %v4880_v30 = vcombine.high %v1266_v22, %v1270_v23  ;;  %v4877_v31 = vcombine.low %v1265_v19, %v1269_v21  ;;  %v3056_v11 = vld [vmem:[#allocation17 + $0x168] sm:$0xff]  ;;  %v3051_v19 = vld [vmem:[#allocation17 + $0x140] sm:$0xff] }
 0x2a5   : > { %1690 = vmatmul.mubr.bf16.gmra.mxu0 %v6165_v33  ;;  %1803 = vmatmul.mubr.bf16.gmra.mxu1 %v6165_v33  ;;  %v1209_v14 = vmul.f32 %v6141_v53, %v1165_v3  ;;  %v1211_v37 = vmul.f32 %v6174_v38, %v6141_v53  ;;  %v1233_v42 = vadd.f32 %v6144_v57, %v1210_v34  ;;  %v3067_v3 = vld [vmem:[#allocation17 + $0x1c0] sm:$0xff]  ;;  %v3184_v13 = vld [vmem:[#allocation17 + $0x568] sm:$0xff] }
 0x2a6   : > { %1699 = vmatprep.mubr.bf16.mxu0 %v5736_v46  ;;  %1812 = vmatprep.mubr.bf16.mxu1 %v5736_v46  ;;  %v5036_v16 = vpop.f32.mrf.mxu1  ;;  %v3179_v20 = vld [vmem:[#allocation17 + $0x540] sm:$0xff]  ;;  %v3048_v21 = vld [vmem:[#allocation17 + $0x128] sm:$0xff] }
 0x2a7   : > { %1878 = vmatpush1.bf16.msra.mxu0 %v4917_v32  ;;  %1991 = vmatpush1.bf16.msra.mxu1 %v4919_v36  ;;  %v1232_v63 = vadd.f32 %v6144_v57, %v1209_v14  ;;  %v4879_v32 = vcombine.low %v1266_v22, %v1270_v23  ;;  %v1247_v36 = vmax.f32 %v1231_v27, 0.0  ;;  %v1234_v43 = vadd.f32 %v6144_v57, %v1211_v37  ;;  %v3055_v14 = vld [vmem:[#allocation17 + $0x160] sm:$0xff]  ;;  %v3176_v22 = vld [vmem:[#allocation17 + $0x528] sm:$0xff] }
 0x2a8   : > { %1879 = vmatprep.subr.bf16.mxu0 %v4910_v39  ;;  %1992 = vmatprep.subr.bf16.mxu1 %v4912_v40  ;;  %v1178_v28 = vpop.f32.mrf.mxu1  ;;  %v1249_v26 = vmax.f32 %v1233_v42, 0.0  ;;  %v3047_v23 = vld [vmem:[#allocation17 + $0x120] sm:$0xff]  ;;  %v3172_v27 = vld [vmem:[#allocation17 + $0x508] sm:$0xff] }
 0x2a9   : > { %v1248_v39 = vmax.f32 %v1232_v63, 0.0  ;;  %v1250_v47 = vmax.f32 %v1234_v43, 0.0  ;;  %v1212_v48 = vmul.f32 %v6141_v53, %v1178_v28  ;;  %v3043_v63 = vld [vmem:[#allocation17 + $0x100] sm:$0xff]  ;;  %v3036_v37 = vld [vmem:[#allocation17 + $0xc8] sm:$0xff] }
 0x2aa   : > { %v5037_v40 = vpop.f32.mrf.mxu1  ;;  %v3171_v28 = vld [vmem:[#allocation17 + $0x500] sm:$0xff] }
 0x2ab   : > { %1880 = vmatpush1.bf16.msra.mxu0 %v4909_v50  ;;  %1993 = vmatpush1.bf16.msra.mxu1 %v4911_v35  ;;  %v1259_v44 = vpack.c.bf16 %v1248_v39, %v1247_v36  ;;  %v1260_v50 = vpack.c.bf16 %v1250_v47, %v1249_v26  ;;  %v1235_v35 = vadd.f32 %v6144_v57, %v1212_v48  ;;  %v3164_v39 = vld [vmem:[#allocation17 + $0x4c8] sm:$0xff]  ;;  %v3035_v42 = vld [vmem:[#allocation17 + $0xc0] sm:$0xff] }
 0x2ac   : > { %1881 = vmatprep.subr.bf16.mxu0 %v4902_v41  ;;  %1994 = vmatprep.subr.bf16.mxu1 %v4904_v51  ;;  %v1181_v45 = vpop.f32.mrf.mxu1  ;;  %v1214_v41 = vmul.f32 %v5036_v16, %v6141_v53  ;;  %v1215_v52 = vmul.f32 %v5037_v40, %v6141_v53  ;;  %v2101_v16 = vlaneseq  ;;  %v6248_v40 = vld [vmem:[#allocation14] sm:$0xff]  ;;  %v3163_v43 = vld [vmem:[#allocation17 + $0x4c0] sm:$0xff]  ;;  %v3032_v26 = vld [vmem:[#allocation17 + $0xa8] sm:$0xff] }
 0x2ad   : > { %1700 = vmatmul.mubr.bf16.gmra.mxu0 %v6179_v1  ;;  %1813 = vmatmul.mubr.bf16.gmra.mxu1 %v6179_v1  ;;  %v1213_v49 = vmul.f32 %v6141_v53, %v1181_v45  ;;  %v1251_v51 = vmax.f32 %v1235_v35, 0.0  ;;  %v3072_v53 = vld [vmem:[#allocation17 + $0x1e8] sm:$0xff]  ;;  %v3031_v48 = vld [vmem:[#allocation17 + $0xa0] sm:$0xff]  ;;  %v6260_v35 = vld [vmem:[#allocation16] sm:$0xff] }
 0x2ae   : > { %1709 = vmatprep.mubr.bf16.mxu0 %v5736_v46  ;;  %1822 = vmatprep.mubr.bf16.mxu1 %v5736_v46  ;;  %v1237_v55 = vadd.f32 %v6144_v57, %v1214_v41  ;;  %v1238_v56 = vadd.f32 %v6144_v57, %v1215_v52  ;;  %v3160_v47 = vld [vmem:[#allocation17 + $0x4a8] sm:$0xff] }
 0x2af   : > { %1882 = vmatpush1.bf16.msra.mxu0 %v4901_v61  ;;  %1995 = vmatpush1.bf16.msra.mxu1 %v4903_v2  ;;  %v1236_v38 = vadd.f32 %v6144_v57, %v1213_v49  ;;  %v3200_v57 = vld [vmem:[#allocation17 + $0x5e8] sm:$0xff]  ;;  %v3159_v49 = vld [vmem:[#allocation17 + $0x4a0] sm:$0xff] }
 0x2b0   : > { %1883 = vmatprep.subr.bf16.mxu0 %v4894_v4  ;;  %1996 = vmatprep.subr.bf16.mxu1 %v4896_v5  ;;  %v1253_v60 = vmax.f32 %v1237_v55, 0.0  ;;  %v1254_v61 = vmax.f32 %v1238_v56, 0.0  ;;  %v3196_v2 = vld [vmem:[#allocation17 + $0x5c8] sm:$0xff]  ;;  %v3195_v4 = vld [vmem:[#allocation17 + $0x5c0] sm:$0xff] }
 0x2b1   : > { %v1252_v54 = vmax.f32 %v1236_v38, 0.0  ;;  %v3064_v5 = vld [vmem:[#allocation17 + $0x1a8] sm:$0xff]  ;;  %v3027_v55 = vld [vmem:[#allocation17 + $0x80] sm:$0xff] }
 0x2b2   : > { %v1262_v0 = vpack.c.bf16 %v1254_v61, %v1253_v60  ;;  %v3028_v41 = vld [vmem:[#allocation17 + $0x88] sm:$0xff]  ;;  %v3155_v56 = vld [vmem:[#allocation17 + $0x480] sm:$0xff] }
 0x2b3   : > { %1884 = vmatpush1.bf16.msra.mxu0 %v4893_v10  ;;  %1997 = vmatpush1.bf16.msra.mxu1 %v4895_v15  ;;  %v1261_v59 = vpack.c.bf16 %v1252_v54, %v1251_v51  ;;  %v3187_v10 = vld [vmem:[#allocation17 + $0x580] sm:$0xff]  ;;  %v3156_v51 = vld [vmem:[#allocation17 + $0x488] sm:$0xff] }
 0x2b4   : > { %1885 = vmatprep.subr.bf16.mxu0 %v4886_v17  ;;  %1998 = vmatprep.subr.bf16.mxu1 %v4888_v18  ;;  %v3183_v15 = vld [vmem:[#allocation17 + $0x560] sm:$0xff]  ;;  %v3052_v17 = vld [vmem:[#allocation17 + $0x148] sm:$0xff] }
 0x2b5   : > { %1710 = vmatmul.mubr.bf16.gmra.mxu0 %v6188_v25  ;;  %1823 = vmatmul.mubr.bf16.gmra.mxu1 %v6188_v25  ;;  %v3180_v18 = vld [vmem:[#allocation17 + $0x548] sm:$0xff] }
 0x2b6   : > { %1719 = vmatprep.mubr.bf16.mxu0 %v5736_v46  ;;  %1832 = vmatprep.mubr.bf16.mxu1 %v5736_v46  ;;  %v3024_v61 = vld [vmem:[#allocation17 + $0x68] sm:$0xff] }
 0x2b7   : > { %1886 = vmatpush1.bf16.msra.mxu0 %v4885_v24  ;;  %1999 = vmatpush1.bf16.msra.mxu1 %v4887_v58  ;;  %v3175_v24 = vld [vmem:[#allocation17 + $0x520] sm:$0xff]  ;;  %v6240_v58 = vshrl.u32 %v2101_v16, 7 }
 0x2b8   : > { %1887 = vmatprep.subr.bf16.mxu0 %v4878_v29  ;;  %2000 = vmatprep.subr.bf16.mxu1 %v4880_v30  ;;  %v3040_v29 = vld [vmem:[#allocation17 + $0xe8] sm:$0xff] }
 0x2b9   : > { %v3168_v30 = vld [vmem:[#allocation17 + $0x4e8] sm:$0xff]  ;;  %v6243_v34 = vsub.s32 0, %v6240_v58  ;;  %v6246_v36 = vsub.s32 2, %v6240_v58  ;;  %v6254_v45 = vsub.s32 3, %v6240_v58  ;;  %v6267_v52 = vsub.s32 4, %v6240_v58 }
 0x2ba   : > { %v6270_v54 = vsub.s32 6, %v6240_v58 }
 0x2bb   : > { %1888 = vmatpush1.bf16.msra.mxu0 %v4877_v31  ;;  %2001 = vmatpush1.bf16.msra.mxu1 %v4879_v32  ;;  %v3039_v31 = vld [vmem:[#allocation17 + $0xe0] sm:$0xff]  ;;  %v6264_v38 = vrot.slane %v6248_v40, %v6246_v36  ;;  %v6278_v60 = vrot.slane %v6248_v40, %v6254_v45 }
 0x2bc   : > { %3564 = vmatprep.subr.mxu0 %v3072_v53  ;;  %3635 = vmatprep.subr.mxu1 %v3200_v57  ;;  %v3167_v32 = vld [vmem:[#allocation17 + $0x4e0] sm:$0xff]  ;;  %v6282_v57 = vrot.slane %v6260_v35, %v6243_v34 }
 0x2bd   : > { %1720 = vmatmul.mubr.bf16.gmra.mxu0 %v1259_v44  ;;  %1833 = vmatmul.mubr.bf16.gmra.mxu1 %v1259_v44 }
 0x2be   : > { %1729 = vmatprep.mubr.bf16.mxu0 %v5736_v46  ;;  %1842 = vmatprep.mubr.bf16.mxu1 %v5736_v46 }
 0x2c5   : > { %1730 = vmatmul.mubr.bf16.gmra.mxu0 %v1260_v50  ;;  %1843 = vmatmul.mubr.bf16.gmra.mxu1 %v1260_v50 }
 0x2c6   : > { %1739 = vmatprep.mubr.bf16.mxu0 %v5736_v46  ;;  %1852 = vmatprep.mubr.bf16.mxu1 %v5736_v46 }
 0x2cd   : > { %1740 = vmatmul.mubr.bf16.gmra.mxu0 %v1261_v59  ;;  %1853 = vmatmul.mubr.bf16.gmra.mxu1 %v1261_v59 }
 0x2ce   : > { %1749 = vmatprep.mubr.bf16.mxu0 %v5736_v46  ;;  %1862 = vmatprep.mubr.bf16.mxu1 %v5736_v46 }
 0x2d5   : > { %1750 = vmatmul.mubr.bf16.gmra.mxu0 %v1262_v0  ;;  %1863 = vmatmul.mubr.bf16.gmra.mxu1 %v1262_v0 }
 0x2d6   : > { %1905 = vmatprep.mubr.bf16.mxu0 %v5736_v46  ;;  %2018 = vmatprep.mubr.bf16.mxu1 %v5736_v46 }
 0x2dd   : > { %1906 = vmatmul.mubr.bf16.vlgmr.msra.gmra.mxu0 %v6154_v12  ;;  %2019 = vmatmul.mubr.bf16.vlgmr.msra.gmra.mxu1 %v6154_v12  ;;  %v3071_v12 = vld [vmem:[#allocation17 + $0x1e0] sm:$0xff] }
 0x2de   : > { %1915 = vmatprep.mubr.bf16.mxu0 %v5736_v46  ;;  %2028 = vmatprep.mubr.bf16.mxu1 %v5736_v46 }
 0x2df   : > { %3565 = vmatpush1.msra.mxu0 %v3071_v12 }
 0x2e5   : > { %1916 = vmatmul.mubr.bf16.gmra.mxu0 %v6165_v33  ;;  %2029 = vmatmul.mubr.bf16.gmra.mxu1 %v6165_v33  ;;  %v3199_v33 = vld [vmem:[#allocation17 + $0x5e0] sm:$0xff] }
 0x2e6   : > { %1925 = vmatprep.mubr.bf16.mxu0 %v5736_v46  ;;  %2038 = vmatprep.mubr.bf16.mxu1 %v5736_v46 }
 0x2e7   : > { %3636 = vmatpush1.msra.mxu1 %v3199_v33  ;;  %v6286_v33 = vrot.slane %v6260_v35, %v6246_v36 }
 0x2e8   : > { %3637 = vmatprep.subr.mxu1 %v3196_v2  ;;  %v3023_v2 = vld [vmem:[#allocation17 + $0x60] sm:$0xff] }
 0x2e9   : > { %3638 = vmatpush1.msra.mxu1 %v3195_v4 }
 0x2ed   : > { %1926 = vmatmul.mubr.bf16.gmra.mxu0 %v6179_v1  ;;  %2039 = vmatmul.mubr.bf16.gmra.mxu1 %v6179_v1  ;;  %v3068_v1 = vld [vmem:[#allocation17 + $0x1c8] sm:$0xff] }
 0x2ee   : > { %1935 = vmatprep.mubr.bf16.mxu0 %v5736_v46  ;;  %2048 = vmatprep.mubr.bf16.mxu1 %v5736_v46 }
 0x2ef   : > { %3566 = vmatprep.subr.mxu0 %v3068_v1 }
 0x2f0   : > { %3567 = vmatpush1.msra.mxu0 %v3067_v3  ;;  %v3151_v3 = vld [vmem:[#allocation17 + $0x460] sm:$0xff] }
 0x2f1   : > { %3568 = vmatprep.subr.mxu0 %v3064_v5 }
 0x2f2   : > { %3569 = vmatpush1.msra.mxu0 %v3063_v6  ;;  %v6298_v6 = vsub.s32 7, %v6240_v58 }
 0x2f3   : > { %3570 = vmatprep.subr.mxu0 %v3060_v7  ;;  %v3148_v7 = vld [vmem:[#allocation17 + $0x448] sm:$0xff] }
 0x2f4   : > { %3571 = vmatpush1.msra.mxu0 %v3059_v9 }
 0x2f5   : > { %1936 = vmatmul.mubr.bf16.gmra.mxu0 %v6188_v25  ;;  %2049 = vmatmul.mubr.bf16.gmra.mxu1 %v6188_v25  ;;  %v3044_v25 = vld [vmem:[#allocation17 + $0x108] sm:$0xff] }
 0x2f6   : > { %1945 = vmatprep.mubr.bf16.mxu0 %v5736_v46  ;;  %2058 = vmatprep.mubr.bf16.mxu1 %v5736_v46 }
 0x2f7   : > { %3572 = vmatprep.subr.mxu0 %v3056_v11  ;;  %v6306_v11 = vrot.slane %v6248_v40, %v6267_v52 }
 0x2f8   : > { %3573 = vmatpush1.msra.mxu0 %v3055_v14  ;;  %v3019_v14 = vld [vmem:[#allocation17 + $0x40] sm:$0xff] }
 0x2f9   : > { %3574 = vmatprep.subr.mxu0 %v3052_v17 }
 0x2fa   : > { %3575 = vmatpush1.msra.mxu0 %v3051_v19 }
 0x2fb   : > { %3576 = vmatprep.subr.mxu0 %v3048_v21  ;;  %v3016_v21 = vld [vmem:[#allocation17 + $0x28] sm:$0xff] }
 0x2fc   : > { %3577 = vmatpush1.msra.mxu0 %v3047_v23 }
 0x2fd   : > { %1946 = vmatmul.mubr.bf16.gmra.mxu0 %v1259_v44  ;;  %2059 = vmatmul.mubr.bf16.gmra.mxu1 %v1259_v44  ;;  %v6251_v44 = vsub.s32 1, %v6240_v58 }
 0x2fe   : > { %1955 = vmatprep.mubr.bf16.mxu0 %v5736_v46  ;;  %2068 = vmatprep.mubr.bf16.mxu1 %v5736_v46 }
 0x2ff   : > { %3578 = vmatprep.subr.mxu0 %v3044_v25  ;;  %v6290_v1 = vrot.slane %v6260_v35, %v6251_v44 }
 0x300   : > { %3579 = vmatpush1.msra.mxu0 %v3043_v63  ;;  %v6328_v63 = vrot.slane %v6260_v35, %v6270_v54 }
 0x301   : > { %3580 = vmatprep.subr.mxu0 %v3040_v29  ;;  %v3143_v29 = vld [vmem:[#allocation17 + $0x420] sm:$0xff] }
 0x302   : > { %3581 = vmatpush1.msra.mxu0 %v3039_v31 }
 0x303   : > { %3582 = vmatprep.subr.mxu0 %v3036_v37  ;;  %v3012_v37 = vld [vmem:[#allocation17 + $0x8] sm:$0xff] }
 0x304   : > { %3583 = vmatpush1.msra.mxu0 %v3035_v42 }
 0x305   : > { %1956 = vmatmul.mubr.bf16.gmra.mxu0 %v1260_v50  ;;  %2069 = vmatmul.mubr.bf16.gmra.mxu1 %v1260_v50  ;;  %v6258_v50 = vrot.slane %v6248_v40, %v6243_v34 }
 0x306   : > { %1965 = vmatprep.mubr.bf16.mxu0 %v5736_v46  ;;  %2078 = vmatprep.mubr.bf16.mxu1 %v5736_v46 }
 0x307   : > { %3584 = vmatprep.subr.mxu0 %v3032_v26 }
 0x308   : > { %3585 = vmatpush1.msra.mxu0 %v3031_v48 }
 0x309   : > { %3586 = vmatprep.subr.mxu0 %v3028_v41  ;;  %v3139_v41 = vld [vmem:[#allocation17 + $0x400] sm:$0xff] }
 0x30a   : > { %3587 = vmatpush1.msra.mxu0 %v3027_v55 }
 0x30b   : > { %3588 = vmatprep.subr.mxu0 %v3024_v61  ;;  %v3136_v61 = vld [vmem:[#allocation17 + $0x3e8] sm:$0xff] }
 0x30c   : > { %3589 = vmatpush1.msra.mxu0 %v3023_v2 }
 0x30d   : > { %1966 = vmatmul.mubr.bf16.gmra.mxu0 %v1261_v59  ;;  %2079 = vmatmul.mubr.bf16.gmra.mxu1 %v1261_v59  ;;  %v6274_v59 = vrot.slane %v6248_v40, %v6251_v44 }
 0x30e   : > { %1975 = vmatprep.mubr.bf16.mxu0 %v5736_v46  ;;  %2088 = vmatprep.mubr.bf16.mxu1 %v5736_v46  ;;  %v3192_v46 = vld [vmem:[#allocation17 + $0x5a8] sm:$0xff] }
 0x30f   : > { %3639 = vmatprep.subr.mxu1 %v3192_v46  ;;  %v6295_v46 = vsub.s32 5, %v6240_v58 }
 0x310   : > { %3640 = vmatpush1.msra.mxu1 %v3191_v62  ;;  %v3020_v62 = vld [vmem:[#allocation17 + $0x48] sm:$0xff] }
 0x311   : > { %3641 = vmatprep.subr.mxu1 %v3188_v8  ;;  %3590 = vmatprep.subr.mxu0 %v3020_v62  ;;  %v6335_v31 = vrot.slane %v6248_v40, %v6295_v46  ;;  %v3135_v62 = vld [vmem:[#allocation17 + $0x3e0] sm:$0xff] }
 0x312   : > { %3642 = vmatpush1.msra.mxu1 %v3187_v10  ;;  %v6302_v10 = vrot.slane %v6260_v35, %v6254_v45  ;;  %3591 = vmatpush1.msra.mxu0 %v3019_v14 }
 0x313   : > { %3643 = vmatprep.subr.mxu1 %v3184_v13  ;;  %v6310_v13 = vrot.slane %v6248_v40, %v6270_v54  ;;  %3592 = vmatprep.subr.mxu0 %v3016_v21 }
 0x314   : > { %3644 = vmatpush1.msra.mxu1 %v3183_v15  ;;  %v3147_v15 = vld [vmem:[#allocation17 + $0x440] sm:$0xff] }
 0x315   : > { %1976 = vmatmul.mubr.bf16.gmra.mxu0 %v1262_v0  ;;  %2089 = vmatmul.mubr.bf16.gmra.mxu1 %v1262_v0  ;;  %v3152_v0 = vld [vmem:[#allocation17 + $0x468] sm:$0xff] }
 0x316   : > { %3645 = vmatprep.subr.mxu1 %v3180_v18  ;;  %v5737_v18 = vmov 1966171168  }
 0x317   : > { %3646 = vmatpush1.msra.mxu1 %v3179_v20  ;;  %v6314_v19 = vunpack.c.l.s4 %v5737_v18  ;;  %v6318_v20 = vrot.slane %v6260_v35, %v6267_v52 }
 0x318   : > { %3647 = vmatprep.subr.mxu1 %v3176_v22  ;;  %v3144_v22 = vld [vmem:[#allocation17 + $0x428] sm:$0xff] }
 0x319   : > { %3648 = vmatpush1.msra.mxu1 %v3175_v24  ;;  %v2961_v55 = vunpack.c.0.s8 %v6314_v19 }
 0x31a   : > { %3649 = vmatprep.subr.mxu1 %v3172_v27 }
 0x31b   : > { %3650 = vmatpush1.msra.mxu1 %v3171_v28  ;;  %v3015_v28 = vld [vmem:[#allocation17 + $0x20] sm:$0xff] }
 0x31c   : > { %3651 = vmatprep.subr.mxu1 %v3168_v30  ;;  %3593 = vmatpush1.msra.mxu0 %v3015_v28 }
 0x31d   : > { %3652 = vmatpush1.msra.mxu1 %v3167_v32  ;;  %v6339_v32 = vrot.slane %v6248_v40, %v6298_v6  ;;  %3594 = vmatprep.subr.mxu0 %v3012_v37 }
 0x31e   : > { %3653 = vmatprep.subr.mxu1 %v3164_v39  ;;  %v3140_v39 = vld [vmem:[#allocation17 + $0x408] sm:$0xff] }
 0x31f   : > { %3654 = vmatpush1.msra.mxu1 %v3163_v43 }
 0x320   : > { %3655 = vmatprep.subr.mxu1 %v3160_v47 }
 0x321   : > { %3656 = vmatpush1.msra.mxu1 %v3159_v49  ;;  %v3011_v49 = vld [vmem:[#allocation17] sm:$0xff] }
 0x322   : > { %3657 = vmatprep.subr.mxu1 %v3156_v51  ;;  %3595 = vmatpush1.msra.mxu0 %v3011_v49 }
 0x323   : > { %3658 = vmatpush1.msra.mxu1 %v3155_v56  ;;  %v6349_v56 = vrot.slane %v6260_v35, %v6295_v46  ;;  %3596 = vmatprep.subr.mxu0 %v3136_v61 }
 0x324   : > { %3659 = vmatprep.subr.mxu1 %v3152_v0  ;;  %v3264_v0 = vld [vmem:[#allocation17 + $0x7e8] sm:$0xff]  ;;  %3597 = vmatpush2.msra.mxu0 %v3135_v62 }
 0x325   : > { %3660 = vmatpush1.msra.mxu1 %v3151_v3 }
 0x326   : > { %3661 = vmatprep.subr.mxu1 %v3148_v7  ;;  %v3263_v7 = vld [vmem:[#allocation17 + $0x7e0] sm:$0xff] }
 0x327   : > { %3662 = vmatpush1.msra.mxu1 %v3147_v15  ;;  %v3132_v15 = vld [vmem:[#allocation17 + $0x3c8] sm:$0xff] }
 0x328   : > { %3663 = vmatprep.subr.mxu1 %v3144_v22  ;;  %3598 = vmatprep.subr.mxu0 %v3132_v15 }
 0x329   : > { %3664 = vmatpush1.msra.mxu1 %v3143_v29 }
 0x32a   : > { %3665 = vmatprep.subr.mxu1 %v3140_v39 }
 0x32b   : > { %3666 = vmatpush1.msra.mxu1 %v3139_v41 }
 0x32c   : > { %3667 = vmatprep.subr.mxu1 %v3264_v0 }
 0x32d   : > { %3668 = vmatpush2.msra.mxu1 %v3263_v7 }
 0x35d   : > { %v1681_v53 = vpop.f32.mrf.mxu0  ;;  %v1794_v12 = vpop.f32.mrf.mxu1 }
 0x35e   : > { %v2141_v4 = vmul.f32 %v6258_v50, %v1681_v53  ;;  %v2143_v5 = vmul.f32 %v6264_v38, %v1794_v12 }
 0x35f   : > { %v1683_v8 = vpop.f32.mrf.mxu0  ;;  %v1796_v9 = vpop.f32.mrf.mxu1 }
 0x360   : > { %v2142_v16 = vmul.f32 %v6274_v59, %v1683_v8  ;;  %v2144_v17 = vmul.f32 %v6278_v60, %v1796_v9  ;;  %v6321_v23 = vadd.f32 %v6282_v57, %v2141_v4  ;;  %v6324_v24 = vadd.f32 %v6286_v33, %v2143_v5 }
 0x361   : > { %v1685_v25 = vpop.f32.mrf.mxu0  ;;  %v1798_v27 = vpop.f32.mrf.mxu1 }
 0x362   : > { %v6331_v30 = vadd.f32 %v6290_v1, %v2142_v16  ;;  %v2314_v42 = vadd.f32 %v6302_v10, %v2144_v17  ;;  %v2149_v43 = vmul.f32 %v6258_v50, %v1685_v25  ;;  %v2151_v26 = vmul.f32 %v6264_v38, %v1798_v27  ;;  %v3260_v16 = vld [vmem:[#allocation17 + $0x7c8] sm:$0xff]  ;;  %v3131_v25 = vld [vmem:[#allocation17 + $0x3c0] sm:$0xff] }
 0x363   : > { %v1687_v47 = vpop.f32.mrf.mxu0  ;;  %v1800_v48 = vpop.f32.mrf.mxu1  ;;  %v2439_v53 = vmax.f32 %v6321_v23, 0.0  ;;  %v2441_v12 = vmax.f32 %v6324_v24, 0.0  ;;  %v3259_v27 = vld [vmem:[#allocation17 + $0x7c0] sm:$0xff]  ;;  %3669 = vmatprep.subr.mxu1 %v3260_v16  ;;  %3599 = vmatpush2.msra.mxu0 %v3131_v25 }
 0x364   : > { %v2150_v51 = vmul.f32 %v6274_v59, %v1687_v47  ;;  %v2152_v40 = vmul.f32 %v6278_v60, %v1800_v48  ;;  %v2319_v2 = vadd.f32 %v6282_v57, %v2149_v43  ;;  %v2321_v3 = vadd.f32 %v6286_v33, %v2151_v26  ;;  %v3128_v43 = vld [vmem:[#allocation17 + $0x3a8] sm:$0xff]  ;;  %3670 = vmatpush2.msra.mxu1 %v3259_v27 }
 0x365   : > { %v1691_v4 = vpop.f32.mrf.mxu0  ;;  %v1804_v5 = vpop.f32.mrf.mxu1  ;;  %v2440_v17 = vmax.f32 %v6331_v30, 0.0  ;;  %v2442_v18 = vmax.f32 %v2314_v42, 0.0  ;;  %v3256_v26 = vld [vmem:[#allocation17 + $0x7a8] sm:$0xff]  ;;  %3600 = vmatprep.subr.mxu0 %v3128_v43 }
 0x366   : > { %v2320_v35 = vadd.f32 %v6290_v1, %v2150_v51  ;;  %v2322_v8 = vadd.f32 %v6302_v10, %v2152_v40  ;;  %v2157_v9 = vmul.f32 %v6258_v50, %v1691_v4  ;;  %v2159_v14 = vmul.f32 %v6264_v38, %v1804_v5  ;;  %v3127_v51 = vld [vmem:[#allocation17 + $0x3a0] sm:$0xff]  ;;  %v3124_v4 = vld [vmem:[#allocation17 + $0x388] sm:$0xff]  ;;  %3671 = vmatprep.subr.mxu1 %v3256_v26 }
 0x367   : > { %v2447_v21 = vmax.f32 %v2319_v2, 0.0  ;;  %v2449_v22 = vmax.f32 %v2321_v3, 0.0  ;;  %v1693_v23 = vpop.f32.mrf.mxu0  ;;  %v1806_v24 = vpop.f32.mrf.mxu1  ;;  %v3255_v3 = vld [vmem:[#allocation17 + $0x7a0] sm:$0xff]  ;;  %3601 = vmatpush2.msra.mxu0 %v3127_v51 }
 0x368   : > { %v2448_v28 = vmax.f32 %v2320_v35, 0.0  ;;  %v2450_v29 = vmax.f32 %v2322_v8, 0.0  ;;  %v2327_v37 = vadd.f32 %v6282_v57, %v2157_v9  ;;  %v2329_v39 = vadd.f32 %v6286_v33, %v2159_v14  ;;  %v3252_v8 = vld [vmem:[#allocation17 + $0x788] sm:$0xff]  ;;  %3672 = vmatpush2.msra.mxu1 %v3255_v3  ;;  %3602 = vmatprep.subr.mxu0 %v3124_v4 }
 0x369   : > { %v2779_v30 = vmax.f32 %v2439_v53, %v2447_v21  ;;  %v2821_v42 = vmax.f32 %v2441_v12, %v2449_v22  ;;  %v2158_v47 = vmul.f32 %v6274_v59, %v1693_v23  ;;  %v2160_v48 = vmul.f32 %v6278_v60, %v1806_v24  ;;  %v1695_v49 = vpop.f32.mrf.mxu0  ;;  %v1808_v41 = vpop.f32.mrf.mxu1  ;;  %3673 = vmatprep.subr.mxu1 %v3252_v8 }
 0x36a   : > { %v2800_v40 = vmax.f32 %v2440_v17, %v2448_v28  ;;  %v2842_v61 = vmax.f32 %v2442_v18, %v2450_v29  ;;  %v2455_v0 = vmax.f32 %v2327_v37, 0.0  ;;  %v2457_v2 = vmax.f32 %v2329_v39, 0.0  ;;  %v3123_v17 = vld [vmem:[#allocation17 + $0x380] sm:$0xff]  ;;  %v3120_v28 = vld [vmem:[#allocation17 + $0x368] sm:$0xff] }
 0x36b   : > { %v2328_v5 = vadd.f32 %v6290_v1, %v2158_v47  ;;  %v2330_v53 = vadd.f32 %v6302_v10, %v2160_v48  ;;  %v2165_v12 = vmul.f32 %v6258_v50, %v1695_v49  ;;  %v2167_v62 = vmul.f32 %v6264_v38, %v1808_v41  ;;  %v1697_v7 = vpop.f32.mrf.mxu0  ;;  %v1810_v35 = vpop.f32.mrf.mxu1  ;;  %v3251_v18 = vld [vmem:[#allocation17 + $0x780] sm:$0xff]  ;;  %v3248_v29 = vld [vmem:[#allocation17 + $0x768] sm:$0xff]  ;;  %3603 = vmatpush2.msra.mxu0 %v3123_v17 }
 0x36c   : > { %v2780_v9 = vmax.f32 %v2779_v30, %v2455_v0  ;;  %v2822_v14 = vmax.f32 %v2821_v42, %v2457_v2  ;;  %v2166_v15 = vmul.f32 %v6274_v59, %v1697_v7  ;;  %v2168_v16 = vmul.f32 %v6278_v60, %v1810_v35  ;;  %v3119_v30 = vld [vmem:[#allocation17 + $0x360] sm:$0xff]  ;;  %3674 = vmatpush2.msra.mxu1 %v3251_v18  ;;  %v3116_v2 = vld [vmem:[#allocation17 + $0x348] sm:$0xff] }
 0x36d   : > { %v2456_v21 = vmax.f32 %v2328_v5, 0.0  ;;  %v2458_v22 = vmax.f32 %v2330_v53, 0.0  ;;  %v2335_v23 = vadd.f32 %v6282_v57, %v2165_v12  ;;  %v2337_v24 = vadd.f32 %v6286_v33, %v2167_v62  ;;  %v1701_v25 = vpop.f32.mrf.mxu0  ;;  %v1814_v27 = vpop.f32.mrf.mxu1  ;;  %v3247_v0 = vld [vmem:[#allocation17 + $0x760] sm:$0xff]  ;;  %3604 = vmatprep.subr.mxu0 %v3120_v28  ;;  %3675 = vmatprep.subr.mxu1 %v3248_v29  ;;  %v3244_v12 = vld [vmem:[#allocation17 + $0x748] sm:$0xff] }
 0x36e   : > { %v2336_v37 = vadd.f32 %v6290_v1, %v2166_v15  ;;  %v2338_v39 = vadd.f32 %v6302_v10, %v2168_v16  ;;  %v2173_v43 = vmul.f32 %v6258_v50, %v1701_v25  ;;  %v2175_v26 = vmul.f32 %v6264_v38, %v1814_v27  ;;  %3605 = vmatpush2.msra.mxu0 %v3119_v30  ;;  %v3115_v15 = vld [vmem:[#allocation17 + $0x340] sm:$0xff]  ;;  %v3240_v29 = vld [vmem:[#allocation17 + $0x728] sm:$0xff] }
 0x36f   : > { %v2801_v42 = vmax.f32 %v2800_v40, %v2456_v21  ;;  %v2843_v47 = vmax.f32 %v2842_v61, %v2458_v22  ;;  %v2463_v48 = vmax.f32 %v2335_v23, 0.0  ;;  %v2465_v49 = vmax.f32 %v2337_v24, 0.0  ;;  %v1703_v41 = vpop.f32.mrf.mxu0  ;;  %v1816_v51 = vpop.f32.mrf.mxu1  ;;  %3676 = vmatpush2.msra.mxu1 %v3247_v0  ;;  %3606 = vmatprep.subr.mxu0 %v3116_v2  ;;  %v3243_v22 = vld [vmem:[#allocation17 + $0x740] sm:$0xff]  ;;  %v3112_v23 = vld [vmem:[#allocation17 + $0x328] sm:$0xff] }
 0x370   : > { %v2464_v3 = vmax.f32 %v2336_v37, 0.0  ;;  %v2466_v4 = vmax.f32 %v2338_v39, 0.0  ;;  %v2343_v5 = vadd.f32 %v6282_v57, %v2173_v43  ;;  %v2345_v53 = vadd.f32 %v6286_v33, %v2175_v26  ;;  %3677 = vmatprep.subr.mxu1 %v3244_v12  ;;  %3607 = vmatpush2.msra.mxu0 %v3115_v15  ;;  %v3111_v30 = vld [vmem:[#allocation17 + $0x320] sm:$0xff]  ;;  %v3108_v2 = vld [vmem:[#allocation17 + $0x308] sm:$0xff] }
 0x371   : > { %v2781_v62 = vmax.f32 %v2780_v9, %v2463_v48  ;;  %v2823_v40 = vmax.f32 %v2822_v14, %v2465_v49  ;;  %v2174_v61 = vmul.f32 %v6274_v59, %v1703_v41  ;;  %v2176_v7 = vmul.f32 %v6278_v60, %v1816_v51  ;;  %v1705_v35 = vpop.f32.mrf.mxu0  ;;  %v1818_v8 = vpop.f32.mrf.mxu1  ;;  %3678 = vmatpush2.msra.mxu1 %v3243_v22 }
 0x372   : > { %v2802_v16 = vmax.f32 %v2801_v42, %v2464_v3  ;;  %v2844_v17 = vmax.f32 %v2843_v47, %v2466_v4  ;;  %v2471_v18 = vmax.f32 %v2343_v5, 0.0  ;;  %v2473_v21 = vmax.f32 %v2345_v53, 0.0  ;;  %v3239_v42 = vld [vmem:[#allocation17 + $0x720] sm:$0xff]  ;;  %3608 = vmatprep.subr.mxu0 %v3112_v23  ;;  %v3236_v3 = vld [vmem:[#allocation17 + $0x708] sm:$0xff]  ;;  %3679 = vmatprep.subr.mxu1 %v3240_v29 }
 0x373   : > { %v2344_v24 = vadd.f32 %v6290_v1, %v2174_v61  ;;  %v2346_v9 = vadd.f32 %v6302_v10, %v2176_v7  ;;  %v2181_v14 = vmul.f32 %v6258_v50, %v1705_v35  ;;  %v2183_v25 = vmul.f32 %v6264_v38, %v1818_v8  ;;  %v1707_v27 = vpop.f32.mrf.mxu0  ;;  %v1820_v28 = vpop.f32.mrf.mxu1  ;;  %3609 = vmatpush2.msra.mxu0 %v3111_v30 }
 0x374   : > { %v2782_v37 = vmax.f32 %v2781_v62, %v2471_v18  ;;  %v2824_v39 = vmax.f32 %v2823_v40, %v2473_v21  ;;  %v2182_v43 = vmul.f32 %v6274_v59, %v1707_v27  ;;  %v2184_v26 = vmul.f32 %v6278_v60, %v1820_v28  ;;  %v3107_v62 = vld [vmem:[#allocation17 + $0x300] sm:$0xff]  ;;  %3680 = vmatpush2.msra.mxu1 %v3239_v42  ;;  %v3104_v21 = vld [vmem:[#allocation17 + $0x2e8] sm:$0xff] }
 0x375   : > { %v2472_v47 = vmax.f32 %v2344_v24, 0.0  ;;  %v2474_v48 = vmax.f32 %v2346_v9, 0.0  ;;  %v2351_v49 = vadd.f32 %v6282_v57, %v2181_v14  ;;  %v2353_v41 = vadd.f32 %v6286_v33, %v2183_v25  ;;  %v1711_v51 = vpop.f32.mrf.mxu0  ;;  %v1824_v0 = vpop.f32.mrf.mxu1  ;;  %v3235_v18 = vld [vmem:[#allocation17 + $0x700] sm:$0xff]  ;;  %3610 = vmatprep.subr.mxu0 %v3108_v2  ;;  %3681 = vmatprep.subr.mxu1 %v3236_v3  ;;  %v3232_v14 = vld [vmem:[#allocation17 + $0x6e8] sm:$0xff] }
 0x376   : > { %v2352_v4 = vadd.f32 %v6290_v1, %v2182_v43  ;;  %v2354_v5 = vadd.f32 %v6302_v10, %v2184_v26  ;;  %v2189_v53 = vmul.f32 %v6258_v50, %v1711_v51  ;;  %v2191_v12 = vmul.f32 %v6264_v38, %v1824_v0  ;;  %3611 = vmatpush2.msra.mxu0 %v3107_v62  ;;  %v3103_v43 = vld [vmem:[#allocation17 + $0x2e0] sm:$0xff]  ;;  %v3228_v3 = vld [vmem:[#allocation17 + $0x6c8] sm:$0xff] }
 0x377   : > { %v2803_v40 = vmax.f32 %v2802_v16, %v2472_v47  ;;  %v2845_v61 = vmax.f32 %v2844_v17, %v2474_v48  ;;  %v2479_v7 = vmax.f32 %v2351_v49, 0.0  ;;  %v2481_v35 = vmax.f32 %v2353_v41, 0.0  ;;  %v1713_v8 = vpop.f32.mrf.mxu0  ;;  %v1826_v15 = vpop.f32.mrf.mxu1  ;;  %3682 = vmatpush2.msra.mxu1 %v3235_v18  ;;  %3612 = vmatprep.subr.mxu0 %v3104_v21  ;;  %v3231_v48 = vld [vmem:[#allocation17 + $0x6e0] sm:$0xff]  ;;  %v3100_v49 = vld [vmem:[#allocation17 + $0x2c8] sm:$0xff] }
 0x378   : > { %v2480_v22 = vmax.f32 %v2352_v4, 0.0  ;;  %v2482_v23 = vmax.f32 %v2354_v5, 0.0  ;;  %v2359_v24 = vadd.f32 %v6282_v57, %v2189_v53  ;;  %v2361_v9 = vadd.f32 %v6286_v33, %v2191_v12  ;;  %3683 = vmatprep.subr.mxu1 %v3232_v14  ;;  %3613 = vmatpush2.msra.mxu0 %v3103_v43  ;;  %v3099_v62 = vld [vmem:[#allocation17 + $0x2c0] sm:$0xff]  ;;  %v3096_v21 = vld [vmem:[#allocation17 + $0x2a8] sm:$0xff] }
 0x379   : > { %v2783_v25 = vmax.f32 %v2782_v37, %v2479_v7  ;;  %v2825_v16 = vmax.f32 %v2824_v39, %v2481_v35  ;;  %v2190_v17 = vmul.f32 %v6274_v59, %v1713_v8  ;;  %v2192_v27 = vmul.f32 %v6278_v60, %v1826_v15  ;;  %v1715_v28 = vpop.f32.mrf.mxu0  ;;  %v1828_v29 = vpop.f32.mrf.mxu1  ;;  %3684 = vmatpush2.msra.mxu1 %v3231_v48 }
 0x37a   : > { %v2804_v26 = vmax.f32 %v2803_v40, %v2480_v22  ;;  %v2846_v30 = vmax.f32 %v2845_v61, %v2482_v23  ;;  %v2487_v42 = vmax.f32 %v2359_v24, 0.0  ;;  %v2489_v47 = vmax.f32 %v2361_v9, 0.0  ;;  %v3227_v40 = vld [vmem:[#allocation17 + $0x6c0] sm:$0xff]  ;;  %3614 = vmatprep.subr.mxu0 %v3100_v49  ;;  %v3224_v22 = vld [vmem:[#allocation17 + $0x6a8] sm:$0xff]  ;;  %3685 = vmatprep.subr.mxu1 %v3228_v3 }
 0x37b   : > { %v2360_v41 = vadd.f32 %v6290_v1, %v2190_v17  ;;  %v2362_v37 = vadd.f32 %v6302_v10, %v2192_v27  ;;  %v2197_v39 = vmul.f32 %v6258_v50, %v1715_v28  ;;  %v2199_v51 = vmul.f32 %v6264_v38, %v1828_v29  ;;  %v1717_v0 = vpop.f32.mrf.mxu0  ;;  %v1830_v2 = vpop.f32.mrf.mxu1  ;;  %3615 = vmatpush2.msra.mxu0 %v3099_v62 }
 0x37c   : > { %v2784_v4 = vmax.f32 %v2783_v25, %v2487_v42  ;;  %v2826_v5 = vmax.f32 %v2825_v16, %v2489_v47  ;;  %v2198_v53 = vmul.f32 %v6274_v59, %v1717_v0  ;;  %v2200_v12 = vmul.f32 %v6278_v60, %v1830_v2  ;;  %v3095_v25 = vld [vmem:[#allocation17 + $0x2a0] sm:$0xff]  ;;  %3686 = vmatpush2.msra.mxu1 %v3227_v40  ;;  %v3092_v47 = vld [vmem:[#allocation17 + $0x288] sm:$0xff] }
 0x37d   : > { %v2488_v61 = vmax.f32 %v2360_v41, 0.0  ;;  %v2490_v7 = vmax.f32 %v2362_v37, 0.0  ;;  %v2367_v35 = vadd.f32 %v6282_v57, %v2197_v39  ;;  %v2369_v8 = vadd.f32 %v6286_v33, %v2199_v51  ;;  %v1721_v15 = vpop.f32.mrf.mxu0  ;;  %v1834_v18 = vpop.f32.mrf.mxu1  ;;  %v3223_v42 = vld [vmem:[#allocation17 + $0x6a0] sm:$0xff]  ;;  %3616 = vmatprep.subr.mxu0 %v3096_v21  ;;  %3687 = vmatprep.subr.mxu1 %v3224_v22  ;;  %v3220_v39 = vld [vmem:[#allocation17 + $0x688] sm:$0xff] }
 0x37e   : > { %v2368_v23 = vadd.f32 %v6290_v1, %v2198_v53  ;;  %v2370_v24 = vadd.f32 %v6302_v10, %v2200_v12  ;;  %v2205_v9 = vmul.f32 %v6258_v50, %v1721_v15  ;;  %v2207_v14 = vmul.f32 %v6264_v38, %v1834_v18  ;;  %3617 = vmatpush2.msra.mxu0 %v3095_v25  ;;  %v3091_v53 = vld [vmem:[#allocation17 + $0x280] sm:$0xff]  ;;  %v3216_v22 = vld [vmem:[#allocation17 + $0x668] sm:$0xff] }
 0x37f   : > { %v2805_v16 = vmax.f32 %v2804_v26, %v2488_v61  ;;  %v2847_v17 = vmax.f32 %v2846_v30, %v2490_v7  ;;  %v2495_v27 = vmax.f32 %v2367_v35, 0.0  ;;  %v2497_v28 = vmax.f32 %v2369_v8, 0.0  ;;  %v1723_v29 = vpop.f32.mrf.mxu0  ;;  %v1836_v43 = vpop.f32.mrf.mxu1  ;;  %3688 = vmatpush2.msra.mxu1 %v3223_v42  ;;  %3618 = vmatprep.subr.mxu0 %v3092_v47  ;;  %v3219_v7 = vld [vmem:[#allocation17 + $0x680] sm:$0xff]  ;;  %v3088_v35 = vld [vmem:[#allocation17 + $0x268] sm:$0xff] }
 0x380   : > { %v2496_v48 = vmax.f32 %v2368_v23, 0.0  ;;  %v2498_v49 = vmax.f32 %v2370_v24, 0.0  ;;  %v2375_v41 = vadd.f32 %v6282_v57, %v2205_v9  ;;  %v2377_v37 = vadd.f32 %v6286_v33, %v2207_v14  ;;  %3689 = vmatprep.subr.mxu1 %v3220_v39  ;;  %3619 = vmatpush2.msra.mxu0 %v3091_v53  ;;  %v3087_v25 = vld [vmem:[#allocation17 + $0x260] sm:$0xff]  ;;  %v3084_v47 = vld [vmem:[#allocation17 + $0x248] sm:$0xff] }
 0x381   : > { %v2785_v51 = vmax.f32 %v2784_v4, %v2495_v27  ;;  %v2827_v26 = vmax.f32 %v2826_v5, %v2497_v28  ;;  %v2206_v30 = vmul.f32 %v6274_v59, %v1723_v29  ;;  %v2208_v0 = vmul.f32 %v6278_v60, %v1836_v43  ;;  %v1725_v2 = vpop.f32.mrf.mxu0  ;;  %v1838_v3 = vpop.f32.mrf.mxu1  ;;  %3690 = vmatpush2.msra.mxu1 %v3219_v7 }
 0x382   : > { %v2806_v12 = vmax.f32 %v2805_v16, %v2496_v48  ;;  %v2848_v62 = vmax.f32 %v2847_v17, %v2498_v49  ;;  %v2503_v40 = vmax.f32 %v2375_v41, 0.0  ;;  %v2505_v61 = vmax.f32 %v2377_v37, 0.0  ;;  %v3215_v16 = vld [vmem:[#allocation17 + $0x660] sm:$0xff]  ;;  %3620 = vmatprep.subr.mxu0 %v3088_v35  ;;  %v3212_v48 = vld [vmem:[#allocation17 + $0x648] sm:$0xff]  ;;  %3691 = vmatprep.subr.mxu1 %v3216_v22 }
 0x383   : > { %v2376_v8 = vadd.f32 %v6290_v1, %v2206_v30  ;;  %v2378_v4 = vadd.f32 %v6302_v10, %v2208_v0  ;;  %v2213_v5 = vmul.f32 %v6258_v50, %v1725_v2  ;;  %v2215_v15 = vmul.f32 %v6264_v38, %v1838_v3  ;;  %v1727_v18 = vpop.f32.mrf.mxu0  ;;  %v1840_v21 = vpop.f32.mrf.mxu1  ;;  %3621 = vmatpush2.msra.mxu0 %v3087_v25 }
 0x384   : > { %v2786_v23 = vmax.f32 %v2785_v51, %v2503_v40  ;;  %v2828_v24 = vmax.f32 %v2827_v26, %v2505_v61  ;;  %v2214_v9 = vmul.f32 %v6274_v59, %v1727_v18  ;;  %v2216_v14 = vmul.f32 %v6278_v60, %v1840_v21  ;;  %v3083_v51 = vld [vmem:[#allocation17 + $0x240] sm:$0xff]  ;;  %3692 = vmatpush2.msra.mxu1 %v3215_v16  ;;  %v3080_v61 = vld [vmem:[#allocation17 + $0x228] sm:$0xff] }
 0x385   : > { %v2504_v17 = vmax.f32 %v2376_v8, 0.0  ;;  %v2506_v27 = vmax.f32 %v2378_v4, 0.0  ;;  %v2383_v28 = vadd.f32 %v6282_v57, %v2213_v5  ;;  %v2385_v29 = vadd.f32 %v6286_v33, %v2215_v15  ;;  %v1731_v43 = vpop.f32.mrf.mxu0  ;;  %v1844_v42 = vpop.f32.mrf.mxu1  ;;  %v3211_v40 = vld [vmem:[#allocation17 + $0x640] sm:$0xff]  ;;  %3622 = vmatprep.subr.mxu0 %v3084_v47  ;;  %3693 = vmatprep.subr.mxu1 %v3212_v48  ;;  %v3208_v5 = vld [vmem:[#allocation17 + $0x628] sm:$0xff] }
 0x386   : > { %v2384_v49 = vadd.f32 %v6290_v1, %v2214_v9  ;;  %v2386_v41 = vadd.f32 %v6302_v10, %v2216_v14  ;;  %v2221_v37 = vmul.f32 %v6258_v50, %v1731_v43  ;;  %v2223_v39 = vmul.f32 %v6264_v38, %v1844_v42  ;;  %3623 = vmatpush2.msra.mxu0 %v3083_v51  ;;  %v3079_v9 = vld [vmem:[#allocation17 + $0x220] sm:$0xff]  ;;  %v3204_v48 = vld [vmem:[#allocation17 + $0x608] sm:$0xff] }
 0x387   : > { %v2807_v26 = vmax.f32 %v2806_v12, %v2504_v17  ;;  %v2849_v30 = vmax.f32 %v2848_v62, %v2506_v27  ;;  %v2511_v0 = vmax.f32 %v2383_v28, 0.0  ;;  %v2513_v2 = vmax.f32 %v2385_v29, 0.0  ;;  %v1733_v3 = vpop.f32.mrf.mxu0  ;;  %v1846_v53 = vpop.f32.mrf.mxu1  ;;  %3694 = vmatpush2.msra.mxu1 %v3211_v40  ;;  %3624 = vmatprep.subr.mxu0 %v3080_v61  ;;  %v3207_v27 = vld [vmem:[#allocation17 + $0x620] sm:$0xff]  ;;  %v3076_v28 = vld [vmem:[#allocation17 + $0x208] sm:$0xff] }
 0x388   : > { %v2512_v7 = vmax.f32 %v2384_v49, 0.0  ;;  %v2514_v35 = vmax.f32 %v2386_v41, 0.0  ;;  %v2391_v8 = vadd.f32 %v6282_v57, %v2221_v37  ;;  %v2393_v4 = vadd.f32 %v6286_v33, %v2223_v39  ;;  %3695 = vmatprep.subr.mxu1 %v3208_v5  ;;  %3625 = vmatpush2.msra.mxu0 %v3079_v9  ;;  %v3075_v51 = vld [vmem:[#allocation17 + $0x200] sm:$0xff]  ;;  %v3328_v61 = vld [vmem:[#allocation17 + $0x9e8] sm:$0xff] }
 0x389   : > { %v2787_v15 = vmax.f32 %v2786_v23, %v2511_v0  ;;  %v2829_v12 = vmax.f32 %v2828_v24, %v2513_v2  ;;  %v2222_v62 = vmul.f32 %v6274_v59, %v1733_v3  ;;  %v2224_v18 = vmul.f32 %v6278_v60, %v1846_v53  ;;  %v1735_v21 = vpop.f32.mrf.mxu0  ;;  %v1848_v22 = vpop.f32.mrf.mxu1  ;;  %3696 = vmatpush2.msra.mxu1 %v3207_v27 }
 0x38a   : > { %v2808_v14 = vmax.f32 %v2807_v26, %v2512_v7  ;;  %v2850_v25 = vmax.f32 %v2849_v30, %v2514_v35  ;;  %v2519_v16 = vmax.f32 %v2391_v8, 0.0  ;;  %v2521_v17 = vmax.f32 %v2393_v4, 0.0  ;;  %v3203_v26 = vld [vmem:[#allocation17 + $0x600] sm:$0xff]  ;;  %3626 = vmatprep.subr.mxu0 %v3076_v28  ;;  %v3456_v7 = vld [vmem:[#allocation17 + $0xde8] sm:$0xff]  ;;  %3697 = vmatprep.subr.mxu1 %v3204_v48 }
 0x38b   : > { %v2392_v29 = vadd.f32 %v6290_v1, %v2222_v62  ;;  %v2394_v23 = vadd.f32 %v6302_v10, %v2224_v18  ;;  %v2229_v24 = vmul.f32 %v6258_v50, %v1735_v21  ;;  %v2231_v43 = vmul.f32 %v6264_v38, %v1848_v22  ;;  %v1737_v42 = vpop.f32.mrf.mxu0  ;;  %v1850_v47 = vpop.f32.mrf.mxu1  ;;  %3627 = vmatpush2.msra.mxu0 %v3075_v51 }
 0x38c   : > { %v2788_v49 = vmax.f32 %v2787_v15, %v2519_v16  ;;  %v2830_v41 = vmax.f32 %v2829_v12, %v2521_v17  ;;  %v2230_v37 = vmul.f32 %v6274_v59, %v1737_v42  ;;  %v2232_v39 = vmul.f32 %v6278_v60, %v1850_v47  ;;  %3698 = vmatpush2.msra.mxu1 %v3203_v26 }
 0x38d   : > { %v2520_v30 = vmax.f32 %v2392_v29, 0.0  ;;  %v2522_v0 = vmax.f32 %v2394_v23, 0.0  ;;  %v2399_v2 = vadd.f32 %v6282_v57, %v2229_v24  ;;  %v2401_v3 = vadd.f32 %v6286_v33, %v2231_v43  ;;  %v1741_v53 = vpop.f32.mrf.mxu0  ;;  %v1854_v40 = vpop.f32.mrf.mxu1  ;;  %3706 = vmatprep.subr.mxu0 %v3328_v61  ;;  %3777 = vmatprep.subr.mxu1 %v3456_v7 }
 0x38e   : > { %v2400_v35 = vadd.f32 %v6290_v1, %v2230_v37  ;;  %v2402_v8 = vadd.f32 %v6302_v10, %v2232_v39  ;;  %v2237_v4 = vmul.f32 %v6258_v50, %v1741_v53  ;;  %v2239_v5 = vmul.f32 %v6264_v38, %v1854_v40 }
 0x38f   : > { %v2809_v15 = vmax.f32 %v2808_v14, %v2520_v30  ;;  %v2851_v12 = vmax.f32 %v2850_v25, %v2522_v0  ;;  %v2527_v62 = vmax.f32 %v2399_v2, 0.0  ;;  %v2529_v18 = vmax.f32 %v2401_v3, 0.0  ;;  %v1743_v21 = vpop.f32.mrf.mxu0  ;;  %v1856_v22 = vpop.f32.mrf.mxu1 }
 0x390   : > { %v2528_v9 = vmax.f32 %v2400_v35, 0.0  ;;  %v2530_v16 = vmax.f32 %v2402_v8, 0.0  ;;  %v2407_v17 = vadd.f32 %v6282_v57, %v2237_v4  ;;  %v2409_v27 = vadd.f32 %v6286_v33, %v2239_v5 }
 0x391   : > { %v2789_v28 = vmax.f32 %v2788_v49, %v2527_v62  ;;  %v2831_v29 = vmax.f32 %v2830_v41, %v2529_v18  ;;  %v2238_v23 = vmul.f32 %v6274_v59, %v1743_v21  ;;  %v2240_v14 = vmul.f32 %v6278_v60, %v1856_v22  ;;  %v1745_v25 = vpop.f32.mrf.mxu0  ;;  %v1858_v24 = vpop.f32.mrf.mxu1 }
 0x392   : > { %v2810_v43 = vmax.f32 %v2809_v15, %v2528_v9  ;;  %v2852_v42 = vmax.f32 %v2851_v12, %v2530_v16  ;;  %v2535_v47 = vmax.f32 %v2407_v17, 0.0  ;;  %v2537_v48 = vmax.f32 %v2409_v27, 0.0 }
 0x393   : > { %v2408_v37 = vadd.f32 %v6290_v1, %v2238_v23  ;;  %v2410_v39 = vadd.f32 %v6302_v10, %v2240_v14  ;;  %v2245_v51 = vmul.f32 %v6258_v50, %v1745_v25  ;;  %v2247_v26 = vmul.f32 %v6264_v38, %v1858_v24  ;;  %v1747_v49 = vpop.f32.mrf.mxu0  ;;  %v1860_v41 = vpop.f32.mrf.mxu1 }
 0x394   : > { %v2790_v30 = vmax.f32 %v2789_v28, %v2535_v47  ;;  %v2832_v0 = vmax.f32 %v2831_v29, %v2537_v48  ;;  %v2246_v2 = vmul.f32 %v6274_v59, %v1747_v49  ;;  %v2248_v3 = vmul.f32 %v6278_v60, %v1860_v41 }
 0x395   : > { %v2536_v53 = vmax.f32 %v2408_v37, 0.0  ;;  %v2538_v40 = vmax.f32 %v2410_v39, 0.0  ;;  %v2415_v61 = vadd.f32 %v6282_v57, %v2245_v51  ;;  %v2417_v7 = vadd.f32 %v6286_v33, %v2247_v26  ;;  %v1751_v35 = vpop.f32.mrf.mxu0  ;;  %v1864_v8 = vpop.f32.mrf.mxu1 }
 0x396   : > { %v2416_v4 = vadd.f32 %v6290_v1, %v2246_v2  ;;  %v2418_v5 = vadd.f32 %v6302_v10, %v2248_v3  ;;  %v2253_v15 = vmul.f32 %v6258_v50, %v1751_v35  ;;  %v2255_v12 = vmul.f32 %v6264_v38, %v1864_v8 }
 0x397   : > { %v2811_v62 = vmax.f32 %v2810_v43, %v2536_v53  ;;  %v2853_v18 = vmax.f32 %v2852_v42, %v2538_v40  ;;  %v2543_v21 = vmax.f32 %v2415_v61, 0.0  ;;  %v2545_v22 = vmax.f32 %v2417_v7, 0.0  ;;  %v1753_v9 = vpop.f32.mrf.mxu0  ;;  %v1866_v16 = vpop.f32.mrf.mxu1 }
 0x398   : > { %v2544_v17 = vmax.f32 %v2416_v4, 0.0  ;;  %v2546_v27 = vmax.f32 %v2418_v5, 0.0  ;;  %v2423_v28 = vadd.f32 %v6282_v57, %v2253_v15  ;;  %v2425_v29 = vadd.f32 %v6286_v33, %v2255_v12 }
 0x399   : > { %v2791_v23 = vmax.f32 %v2790_v30, %v2543_v21  ;;  %v2833_v14 = vmax.f32 %v2832_v0, %v2545_v22  ;;  %v2254_v25 = vmul.f32 %v6274_v59, %v1753_v9  ;;  %v2256_v24 = vmul.f32 %v6278_v60, %v1866_v16  ;;  %v1755_v47 = vpop.f32.mrf.mxu0  ;;  %v1868_v48 = vpop.f32.mrf.mxu1  ;;  %v5236_v16 = vld [vmem:[#allocation16] sm:$0xff] }
 0x39a   : > { %v2812_v43 = vmax.f32 %v2811_v62, %v2544_v17  ;;  %v2854_v42 = vmax.f32 %v2853_v18, %v2546_v27  ;;  %v2551_v37 = vmax.f32 %v2423_v28, 0.0  ;;  %v2553_v39 = vmax.f32 %v2425_v29, 0.0 }
 0x39b   : > { %v2424_v51 = vadd.f32 %v6290_v1, %v2254_v25  ;;  %v2426_v26 = vadd.f32 %v6302_v10, %v2256_v24  ;;  %v2261_v49 = vmul.f32 %v6258_v50, %v1755_v47  ;;  %v2263_v41 = vmul.f32 %v6264_v38, %v1868_v48  ;;  %v1757_v30 = vpop.f32.mrf.mxu0  ;;  %v1870_v0 = vpop.f32.mrf.mxu1 }
 0x39c   : > { %v2792_v2 = vmax.f32 %v2791_v23, %v2551_v37  ;;  %v2834_v3 = vmax.f32 %v2833_v14, %v2553_v39  ;;  %v2262_v53 = vmul.f32 %v6274_v59, %v1757_v30  ;;  %v2264_v40 = vmul.f32 %v6278_v60, %v1870_v0 }
 0x39d   : > { %v2552_v61 = vmax.f32 %v2424_v51, 0.0  ;;  %v2554_v7 = vmax.f32 %v2426_v26, 0.0  ;;  %v2431_v35 = vadd.f32 %v6282_v57, %v2261_v49  ;;  %v2433_v8 = vadd.f32 %v6286_v33, %v2263_v41  ;;  %v1907_v4 = vpop.f32.mrf.mxu0  ;;  %v2020_v5 = vpop.f32.mrf.mxu1 }
 0x39e   : > { %v2432_v50 = vadd.f32 %v6290_v1, %v2262_v53  ;;  %v2434_v38 = vadd.f32 %v6302_v10, %v2264_v40  ;;  %v2145_v15 = vmul.f32 %v6306_v11, %v1907_v4  ;;  %v2147_v12 = vmul.f32 %v6310_v13, %v2020_v5 }
 0x39f   : > { %v2813_v62 = vmax.f32 %v2812_v43, %v2552_v61  ;;  %v2855_v59 = vmax.f32 %v2854_v42, %v2554_v7  ;;  %v2559_v18 = vmax.f32 %v2431_v35, 0.0  ;;  %v2561_v60 = vmax.f32 %v2433_v8, 0.0  ;;  %v1909_v21 = vpop.f32.mrf.mxu0  ;;  %v2022_v22 = vpop.f32.mrf.mxu1 }
 0x3a0   : > { %v2560_v9 = vmax.f32 %v2432_v50, 0.0  ;;  %v2562_v57 = vmax.f32 %v2434_v38, 0.0  ;;  %v2315_v33 = vadd.f32 %v6318_v20, %v2145_v15  ;;  %v6474_v17 = vrot.slane %v5236_v16, %v6298_v6 }
 0x3a1   : > { %v2793_v1 = vmax.f32 %v2792_v2, %v2559_v18  ;;  %v2835_v10 = vmax.f32 %v2834_v3, %v2561_v60  ;;  %v2146_v27 = vmul.f32 %v6335_v31, %v1909_v21  ;;  %v2148_v28 = vmul.f32 %v6339_v32, %v2022_v22  ;;  %v1911_v29 = vpop.f32.mrf.mxu0  ;;  %v2024_v23 = vpop.f32.mrf.mxu1 }
 0x3a2   : > { %v2814_v14 = vmax.f32 %v2813_v62, %v2560_v9  ;;  %v6481_v25 = vsub.s32 %v2961_v55, %v6240_v58  ;;  %v2856_v24 = vmax.f32 %v2855_v59, %v2562_v57  ;;  %v2443_v43 = vmax.f32 %v2315_v33, 0.0 }
 0x3a3   : > { %v2794_v47 = vrot.slane %v2793_v1, 4  ;;  %v2836_v48 = vrot.slane %v2835_v10, 4  ;;  %v6484_v42 = vadd.f32 %v6328_v63, %v2147_v12  ;;  %v1913_v37 = vpop.f32.mrf.mxu0  ;;  %v2026_v39 = vpop.f32.mrf.mxu1  ;;  %v2153_v49 = vmul.f32 %v6306_v11, %v1911_v29 }
 0x3a4   : > { %v2815_v51 = vrot.slane %v2814_v14, 4  ;;  %v2857_v26 = vrot.slane %v2856_v24, 4  ;;  %v2155_v41 = vmul.f32 %v6310_v13, %v2024_v23  ;;  %v6489_v58 = vadd.f32 %v6349_v56, %v2146_v27 }
 0x3a5   : > { %v2795_v30 = vmax.f32 %v2793_v1, %v2794_v47  ;;  %v2837_v0 = vmax.f32 %v2835_v10, %v2836_v48  ;;  %v6492_v19 = vadd.f32 %v6474_v17, %v2148_v28  ;;  %v1917_v55 = vpop.f32.mrf.mxu0  ;;  %v2030_v2 = vpop.f32.mrf.mxu1  ;;  %v2323_v40 = vadd.f32 %v6318_v20, %v2153_v49 }
 0x3a6   : > { %v2816_v3 = vmax.f32 %v2814_v14, %v2815_v51  ;;  %v2858_v53 = vmax.f32 %v2856_v24, %v2857_v26  ;;  %v2325_v61 = vadd.f32 %v6328_v63, %v2155_v41  ;;  %v2154_v8 = vmul.f32 %v6335_v31, %v1913_v37 }
 0x3a7   : > { %v2796_v7 = vrot.slane %v2795_v30, 2  ;;  %v2838_v35 = vrot.slane %v2837_v0, 2  ;;  %v2156_v4 = vmul.f32 %v6339_v32, %v2026_v39  ;;  %v1919_v5 = vpop.f32.mrf.mxu0  ;;  %v2032_v50 = vpop.f32.mrf.mxu1  ;;  %v2445_v12 = vmax.f32 %v6484_v42, 0.0 }
 0x3a8   : > { %v2817_v38 = vrot.slane %v2816_v3, 2  ;;  %v2859_v15 = vrot.slane %v2858_v53, 2  ;;  %v2451_v62 = vmax.f32 %v2323_v40, 0.0  ;;  %v2324_v60 = vadd.f32 %v6349_v56, %v2154_v8 }
 0x3a9   : > { %v2797_v59 = vmax.f32 %v2795_v30, %v2796_v7  ;;  %v2839_v18 = vmax.f32 %v2837_v0, %v2838_v35  ;;  %v2326_v21 = vadd.f32 %v6474_v17, %v2156_v4  ;;  %v1921_v22 = vpop.f32.mrf.mxu0  ;;  %v2034_v9 = vpop.f32.mrf.mxu1  ;;  %v2444_v16 = vmax.f32 %v6489_v58, 0.0 }
 0x3aa   : > { %v2818_v57 = vmax.f32 %v2816_v3, %v2817_v38  ;;  %v2860_v33 = vmax.f32 %v2858_v53, %v2859_v15  ;;  %v2446_v1 = vmax.f32 %v6492_v19, 0.0  ;;  %v2863_v28 = vmax.f32 %v2443_v43, %v2451_v62 }
 0x3ab   : > { %v2798_v10 = vrot.slane %v2797_v59, 1  ;;  %v2840_v27 = vrot.slane %v2839_v18, 1  ;;  %v2453_v29 = vmax.f32 %v2325_v61, 0.0  ;;  %v1923_v23 = vpop.f32.mrf.mxu0  ;;  %v2036_v14 = vpop.f32.mrf.mxu1  ;;  %v2161_v48 = vmul.f32 %v6306_v11, %v1917_v55 }
 0x3ac   : > { %v2819_v24 = vrot.slane %v2818_v57, 1  ;;  %v2861_v47 = vrot.slane %v2860_v33, 1  ;;  %v2163_v42 = vmul.f32 %v6310_v13, %v2030_v2  ;;  %v2452_v51 = vmax.f32 %v2324_v60, 0.0 }
 0x3ad   : > { %v2799_v37 = vmax.f32 %v2797_v59, %v2798_v10  ;;  %v2841_v39 = vmax.f32 %v2839_v18, %v2840_v27  ;;  %v2454_v26 = vmax.f32 %v2326_v21, 0.0  ;;  %v1927_v49 = vpop.f32.mrf.mxu0  ;;  %v2040_v41 = vpop.f32.mrf.mxu1  ;;  %v2331_v58 = vadd.f32 %v6318_v20, %v2161_v48 }
 0x3ae   : > { %v2820_v30 = vmax.f32 %v2818_v57, %v2819_v24  ;;  %v2862_v0 = vmax.f32 %v2860_v33, %v2861_v47  ;;  %v2333_v43 = vadd.f32 %v6328_v63, %v2163_v42  ;;  %v2162_v19 = vmul.f32 %v6335_v31, %v1919_v5 }
 0x3af   : > { %v2164_v3 = vmul.f32 %v6339_v32, %v2032_v50  ;;  %v2169_v55 = vmul.f32 %v6306_v11, %v1921_v22  ;;  %v2171_v2 = vmul.f32 %v6310_v13, %v2034_v9  ;;  %v1929_v53 = vpop.f32.mrf.mxu0  ;;  %v2042_v40 = vpop.f32.mrf.mxu1  ;;  %v2459_v35 = vmax.f32 %v2331_v58, 0.0 }
 0x3b0   : > { %v2955_v61 = vcombine.low %v2799_v37, %v2820_v30  ;;  %v2956_v7 = vcombine.low %v2841_v39, %v2862_v0  ;;  %v2461_v8 = vmax.f32 %v2333_v43, 0.0  ;;  %v2332_v4 = vadd.f32 %v6349_v56, %v2162_v19 }
 0x3b1   : > { %v2334_v38 = vadd.f32 %v6474_v17, %v2164_v3  ;;  %v2339_v15 = vadd.f32 %v6318_v20, %v2169_v55  ;;  %v2341_v5 = vadd.f32 %v6328_v63, %v2171_v2  ;;  %v1931_v62 = vpop.f32.mrf.mxu0  ;;  %v2044_v50 = vpop.f32.mrf.mxu1  ;;  %v2905_v60 = vmax.f32 %v2445_v12, %v2453_v29 }
 0x3b2   : > { %v6516_v59 = vrot.slane %v2955_v61, %v6481_v25  ;;  %v6519_v18 = vrot.slane %v2956_v7, %v6481_v25  ;;  %v2884_v21 = vmax.f32 %v2444_v16, %v2452_v51  ;;  %v2926_v22 = vmax.f32 %v2446_v1, %v2454_v26 }
 0x3b3   : > { %v2864_v9 = vmax.f32 %v2863_v28, %v2459_v35  ;;  %v2460_v57 = vmax.f32 %v2332_v4, 0.0  ;;  %v2462_v33 = vmax.f32 %v2334_v38, 0.0  ;;  %v1933_v10 = vpop.f32.mrf.mxu0  ;;  %v2046_v27 = vpop.f32.mrf.mxu1  ;;  %v2170_v47 = vmul.f32 %v6335_v31, %v1923_v23 }
 0x3b4   : > { %v2987_v24 = vcombine.low %v6516_v59, %v6519_v18  ;;  %v2172_v48 = vmul.f32 %v6339_v32, %v2036_v14  ;;  %v2177_v42 = vmul.f32 %v6306_v11, %v1927_v49  ;;  %v2906_v37 = vmax.f32 %v2905_v60, %v2461_v8  ;;  %v3327_v18 = vld [vmem:[#allocation17 + $0x9e0] sm:$0xff] }
 0x3b5   : > { %v2885_v39 = vmax.f32 %v2884_v21, %v2460_v57  ;;  %v2467_v30 = vmax.f32 %v2339_v15, 0.0  ;;  %v2469_v12 = vmax.f32 %v2341_v5, 0.0  ;;  %v1937_v16 = vpop.f32.mrf.mxu0  ;;  %v2050_v1 = vpop.f32.mrf.mxu1  ;;  %v2927_v28 = vmax.f32 %v2926_v22, %v2462_v33 }
 0x3b6   : > { %v2340_v29 = vadd.f32 %v6349_v56, %v2170_v47  ;;  %v2342_v51 = vadd.f32 %v6474_v17, %v2172_v48  ;;  %v2347_v26 = vadd.f32 %v6318_v20, %v2177_v42  ;;  %v2179_v0 = vmul.f32 %v6310_v13, %v2040_v41 }
 0x3b7   : > { %v2178_v23 = vmul.f32 %v6335_v31, %v1929_v53  ;;  %v2180_v14 = vmul.f32 %v6339_v32, %v2042_v40  ;;  %v2185_v49 = vmul.f32 %v6306_v11, %v1931_v62  ;;  %v1939_v58 = vpop.f32.mrf.mxu0  ;;  %v2052_v43 = vpop.f32.mrf.mxu1  ;;  %v2187_v2 = vmul.f32 %v6310_v13, %v2044_v50 }
 0x3b8   : > { %v2468_v19 = vmax.f32 %v2340_v29, 0.0  ;;  %v2470_v3 = vmax.f32 %v2342_v51, 0.0  ;;  %v2475_v55 = vmax.f32 %v2347_v26, 0.0  ;;  %v2349_v61 = vadd.f32 %v6328_v63, %v2179_v0 }
 0x3b9   : > { %v2348_v7 = vadd.f32 %v6349_v56, %v2178_v23  ;;  %v2350_v35 = vadd.f32 %v6474_v17, %v2180_v14  ;;  %v2355_v41 = vadd.f32 %v6318_v20, %v2185_v49  ;;  %v1941_v53 = vpop.f32.mrf.mxu0  ;;  %v2054_v8 = vpop.f32.mrf.mxu1  ;;  %v2865_v40 = vmax.f32 %v2864_v9, %v2467_v30 }
 0x3ba   : > { %v2907_v4 = vmax.f32 %v2906_v37, %v2469_v12  ;;  %v2886_v38 = vmax.f32 %v2885_v39, %v2468_v19  ;;  %v2357_v15 = vadd.f32 %v6328_v63, %v2187_v2  ;;  %v2928_v5 = vmax.f32 %v2927_v28, %v2470_v3 }
 0x3bb   : > { %v2477_v62 = vmax.f32 %v2349_v61, 0.0  ;;  %v2476_v60 = vmax.f32 %v2348_v7, 0.0  ;;  %v2478_v21 = vmax.f32 %v2350_v35, 0.0  ;;  %v1943_v50 = vpop.f32.mrf.mxu0  ;;  %v2056_v22 = vpop.f32.mrf.mxu1  ;;  %v2866_v57 = vmax.f32 %v2865_v40, %v2475_v55 }
 0x3bc   : > { %v2186_v33 = vmul.f32 %v6335_v31, %v1933_v10  ;;  %v2188_v47 = vmul.f32 %v6339_v32, %v2046_v27  ;;  %v2193_v48 = vmul.f32 %v6306_v11, %v1937_v16  ;;  %v2483_v9 = vmax.f32 %v2355_v41, 0.0 }
 0x3bd   : > { %v2908_v42 = vmax.f32 %v2907_v4, %v2477_v62  ;;  %v2887_v29 = vmax.f32 %v2886_v38, %v2476_v60  ;;  %v2485_v37 = vmax.f32 %v2357_v15, 0.0  ;;  %v1947_v39 = vpop.f32.mrf.mxu0  ;;  %v2060_v30 = vpop.f32.mrf.mxu1  ;;  %v2195_v26 = vmul.f32 %v6310_v13, %v2050_v1 }
 0x3be   : > { %v2356_v12 = vadd.f32 %v6349_v56, %v2186_v33  ;;  %v2358_v28 = vadd.f32 %v6474_v17, %v2188_v47  ;;  %v2363_v51 = vadd.f32 %v6318_v20, %v2193_v48  ;;  %v2929_v0 = vmax.f32 %v2928_v5, %v2478_v21 }
 0x3bf   : > { %v2194_v10 = vmul.f32 %v6335_v31, %v1939_v58  ;;  %v2196_v27 = vmul.f32 %v6339_v32, %v2052_v43  ;;  %v2201_v16 = vmul.f32 %v6306_v11, %v1941_v53  ;;  %v1949_v23 = vpop.f32.mrf.mxu0  ;;  %v2062_v14 = vpop.f32.mrf.mxu1  ;;  %v2365_v55 = vadd.f32 %v6328_v63, %v2195_v26 }
 0x3c0   : > { %v2484_v49 = vmax.f32 %v2356_v12, 0.0  ;;  %v2486_v19 = vmax.f32 %v2358_v28, 0.0  ;;  %v2491_v3 = vmax.f32 %v2363_v51, 0.0  ;;  %v2203_v7 = vmul.f32 %v6310_v13, %v2054_v8 }
 0x3c1   : > { %v2364_v2 = vadd.f32 %v6349_v56, %v2194_v10  ;;  %v2366_v61 = vadd.f32 %v6474_v17, %v2196_v27  ;;  %v2371_v1 = vadd.f32 %v6318_v20, %v2201_v16  ;;  %v1951_v58 = vpop.f32.mrf.mxu0  ;;  %v2064_v35 = vpop.f32.mrf.mxu1  ;;  %v2867_v43 = vmax.f32 %v2866_v57, %v2483_v9 }
 0x3c2   : > { %v2909_v41 = vmax.f32 %v2908_v42, %v2485_v37  ;;  %v2888_v53 = vmax.f32 %v2887_v29, %v2484_v49  ;;  %v2493_v40 = vmax.f32 %v2365_v55, 0.0  ;;  %v2930_v4 = vmax.f32 %v2929_v0, %v2486_v19 }
 0x3c3   : > { %v2492_v38 = vmax.f32 %v2364_v2, 0.0  ;;  %v2494_v15 = vmax.f32 %v2366_v61, 0.0  ;;  %v2373_v5 = vadd.f32 %v6328_v63, %v2203_v7  ;;  %v1953_v62 = vpop.f32.mrf.mxu0  ;;  %v2066_v60 = vpop.f32.mrf.mxu1  ;;  %v2868_v21 = vmax.f32 %v2867_v43, %v2491_v3 }
 0x3c4   : > { %v2202_v33 = vmul.f32 %v6335_v31, %v1943_v50  ;;  %v2204_v47 = vmul.f32 %v6339_v32, %v2056_v22  ;;  %v2209_v8 = vmul.f32 %v6306_v11, %v1947_v39  ;;  %v2910_v48 = vmax.f32 %v2909_v41, %v2493_v40 }
 0x3c5   : > { %v2889_v12 = vmax.f32 %v2888_v53, %v2492_v38  ;;  %v2499_v57 = vmax.f32 %v2371_v1, 0.0  ;;  %v2501_v42 = vmax.f32 %v2373_v5, 0.0  ;;  %v1957_v29 = vpop.f32.mrf.mxu0  ;;  %v2070_v9 = vpop.f32.mrf.mxu1  ;;  %v2211_v26 = vmul.f32 %v6310_v13, %v2060_v30 }
 0x3c6   : > { %v2372_v37 = vadd.f32 %v6349_v56, %v2202_v33  ;;  %v2374_v28 = vadd.f32 %v6474_v17, %v2204_v47  ;;  %v2379_v51 = vadd.f32 %v6318_v20, %v2209_v8  ;;  %v2931_v0 = vmax.f32 %v2930_v4, %v2494_v15 }
 0x3c7   : > { %v2210_v50 = vmul.f32 %v6335_v31, %v1949_v23  ;;  %v2212_v22 = vmul.f32 %v6339_v32, %v2062_v14  ;;  %v2217_v39 = vmul.f32 %v6306_v11, %v1951_v58  ;;  %v1959_v10 = vpop.f32.mrf.mxu0  ;;  %v2072_v27 = vpop.f32.mrf.mxu1  ;;  %v2381_v3 = vadd.f32 %v6328_v63, %v2211_v26 }
 0x3c8   : > { %v2500_v16 = vmax.f32 %v2372_v37, 0.0  ;;  %v2502_v49 = vmax.f32 %v2374_v28, 0.0  ;;  %v2507_v19 = vmax.f32 %v2379_v51, 0.0  ;;  %v2219_v61 = vmul.f32 %v6310_v13, %v2064_v35 }
 0x3c9   : > { %v2380_v55 = vadd.f32 %v6349_v56, %v2210_v50  ;;  %v2382_v2 = vadd.f32 %v6474_v17, %v2212_v22  ;;  %v2387_v30 = vadd.f32 %v6318_v20, %v2217_v39  ;;  %v1961_v23 = vpop.f32.mrf.mxu0  ;;  %v2074_v1 = vpop.f32.mrf.mxu1  ;;  %v2869_v14 = vmax.f32 %v2868_v21, %v2499_v57 }
 0x3ca   : > { %v2911_v7 = vmax.f32 %v2910_v48, %v2501_v42  ;;  %v2890_v58 = vmax.f32 %v2889_v12, %v2500_v16  ;;  %v2509_v43 = vmax.f32 %v2381_v3, 0.0  ;;  %v2932_v41 = vmax.f32 %v2931_v0, %v2502_v49 }
 0x3cb   : > { %v2508_v53 = vmax.f32 %v2380_v55, 0.0  ;;  %v2510_v40 = vmax.f32 %v2382_v2, 0.0  ;;  %v2389_v4 = vadd.f32 %v6328_v63, %v2219_v61  ;;  %v1963_v38 = vpop.f32.mrf.mxu0  ;;  %v2076_v15 = vpop.f32.mrf.mxu1  ;;  %v2870_v5 = vmax.f32 %v2869_v14, %v2507_v19 }
 0x3cc   : > { %v2218_v33 = vmul.f32 %v6335_v31, %v1953_v62  ;;  %v2220_v47 = vmul.f32 %v6339_v32, %v2066_v60  ;;  %v2225_v35 = vmul.f32 %v6306_v11, %v1957_v29  ;;  %v2912_v8 = vmax.f32 %v2911_v7, %v2509_v43 }
 0x3cd   : > { %v2891_v37 = vmax.f32 %v2890_v58, %v2508_v53  ;;  %v2515_v21 = vmax.f32 %v2387_v30, 0.0  ;;  %v2517_v48 = vmax.f32 %v2389_v4, 0.0  ;;  %v1967_v12 = vpop.f32.mrf.mxu0  ;;  %v2080_v57 = vpop.f32.mrf.mxu1  ;;  %v2227_v26 = vmul.f32 %v6310_v13, %v2070_v9 }
 0x3ce   : > { %v2388_v42 = vadd.f32 %v6349_v56, %v2218_v33  ;;  %v2390_v28 = vadd.f32 %v6474_v17, %v2220_v47  ;;  %v2395_v51 = vadd.f32 %v6318_v20, %v2225_v35  ;;  %v2933_v0 = vmax.f32 %v2932_v41, %v2510_v40 }
 0x3cf   : > { %v2226_v62 = vmul.f32 %v6335_v31, %v1959_v10  ;;  %v2228_v60 = vmul.f32 %v6339_v32, %v2072_v27  ;;  %v2233_v29 = vmul.f32 %v6306_v11, %v1961_v23  ;;  %v1969_v50 = vpop.f32.mrf.mxu0  ;;  %v2082_v22 = vpop.f32.mrf.mxu1  ;;  %v2397_v19 = vadd.f32 %v6328_v63, %v2227_v26 }
 0x3d0   : > { %v2516_v39 = vmax.f32 %v2388_v42, 0.0  ;;  %v2518_v16 = vmax.f32 %v2390_v28, 0.0  ;;  %v2523_v49 = vmax.f32 %v2395_v51, 0.0  ;;  %v2235_v2 = vmul.f32 %v6310_v13, %v2074_v1 }
 0x3d1   : > { %v2396_v3 = vadd.f32 %v6349_v56, %v2226_v62  ;;  %v2398_v55 = vadd.f32 %v6474_v17, %v2228_v60  ;;  %v2403_v9 = vadd.f32 %v6318_v20, %v2233_v29  ;;  %v1971_v10 = vpop.f32.mrf.mxu0  ;;  %v2084_v30 = vpop.f32.mrf.mxu1  ;;  %v2871_v27 = vmax.f32 %v2870_v5, %v2515_v21 }
 0x3d2   : > { %v2913_v61 = vmax.f32 %v2912_v8, %v2517_v48  ;;  %v2525_v23 = vmax.f32 %v2397_v19, 0.0  ;;  %v2892_v14 = vmax.f32 %v2891_v37, %v2516_v39  ;;  %v2934_v7 = vmax.f32 %v2933_v0, %v2518_v16 }
 0x3d3   : > { %v2524_v58 = vmax.f32 %v2396_v3, 0.0  ;;  %v2405_v43 = vadd.f32 %v6328_v63, %v2235_v2  ;;  %v1973_v41 = vpop.f32.mrf.mxu0  ;;  %v2086_v53 = vpop.f32.mrf.mxu1  ;;  %v2872_v40 = vmax.f32 %v2871_v27, %v2523_v49  ;;  %v2234_v4 = vmul.f32 %v6335_v31, %v1963_v38 }
 0x3d4   : > { %v2236_v33 = vmul.f32 %v6339_v32, %v2076_v15  ;;  %v2241_v47 = vmul.f32 %v6306_v11, %v1967_v12  ;;  %v2914_v1 = vmax.f32 %v2913_v61, %v2525_v23  ;;  %v2526_v42 = vmax.f32 %v2398_v55, 0.0 }
 0x3d5   : > { %v2893_v35 = vmax.f32 %v2892_v14, %v2524_v58  ;;  %v2531_v5 = vmax.f32 %v2403_v9, 0.0  ;;  %v1977_v8 = vpop.f32.mrf.mxu0  ;;  %v2090_v21 = vpop.f32.mrf.mxu1  ;;  %v2404_v37 = vadd.f32 %v6349_v56, %v2234_v4  ;;  %v2243_v51 = vmul.f32 %v6310_v13, %v2080_v57 }
 0x3d6   : > { %v2406_v48 = vadd.f32 %v6474_v17, %v2236_v33  ;;  %v2411_v28 = vadd.f32 %v6318_v20, %v2241_v47  ;;  %v2533_v26 = vmax.f32 %v2405_v43, 0.0  ;;  %v2242_v38 = vmul.f32 %v6335_v31, %v1969_v50 }
 0x3d7   : > { %v2244_v15 = vmul.f32 %v6339_v32, %v2082_v22  ;;  %v2249_v12 = vmul.f32 %v6306_v11, %v1971_v10  ;;  %v2532_v0 = vmax.f32 %v2404_v37, 0.0  ;;  %v2413_v29 = vadd.f32 %v6328_v63, %v2243_v51  ;;  %v1979_v39 = vpop.f32.mrf.mxu0  ;;  %v2092_v3 = vpop.f32.mrf.mxu1 }
 0x3d8   : > { %v2534_v62 = vmax.f32 %v2406_v48, 0.0  ;;  %v2539_v60 = vmax.f32 %v2411_v28, 0.0  ;;  %v2412_v16 = vadd.f32 %v6349_v56, %v2242_v38  ;;  %v2251_v57 = vmul.f32 %v6310_v13, %v2084_v30 }
 0x3d9   : > { %v2414_v49 = vadd.f32 %v6474_v17, %v2244_v15  ;;  %v2419_v19 = vadd.f32 %v6318_v20, %v2249_v12  ;;  %v2935_v50 = vmax.f32 %v2934_v7, %v2526_v42  ;;  %v2873_v55 = vmax.f32 %v2872_v40, %v2531_v5  ;;  %v1981_v43 = vpop.f32.mrf.mxu0  ;;  %v2094_v7 = vpop.f32.mrf.mxu1 }
 0x3da   : > { %v2541_v22 = vmax.f32 %v2413_v29, 0.0  ;;  %v2915_v9 = vmax.f32 %v2914_v1, %v2533_v26  ;;  %v2894_v2 = vmax.f32 %v2893_v35, %v2532_v0  ;;  %v2540_v10 = vmax.f32 %v2412_v16, 0.0 }
 0x3db   : > { %v2421_v27 = vadd.f32 %v6328_v63, %v2251_v57  ;;  %v2547_v61 = vmax.f32 %v2419_v19, 0.0  ;;  %v2250_v23 = vmul.f32 %v6335_v31, %v1973_v41  ;;  %v2252_v14 = vmul.f32 %v6339_v32, %v2086_v53  ;;  %v1983_v12 = vpop.f32.mrf.mxu0  ;;  %v2096_v0 = vpop.f32.mrf.mxu1 }
 0x3dc   : > { %v2257_v58 = vmul.f32 %v6306_v11, %v1977_v8  ;;  %v2936_v4 = vmax.f32 %v2935_v50, %v2534_v62  ;;  %v2874_v33 = vmax.f32 %v2873_v55, %v2539_v60  ;;  %v2916_v30 = vmax.f32 %v2915_v9, %v2541_v22 }
 0x3dd   : > { %v2542_v47 = vmax.f32 %v2414_v49, 0.0  ;;  %v2420_v40 = vadd.f32 %v6349_v56, %v2250_v23  ;;  %v2422_v1 = vadd.f32 %v6474_v17, %v2252_v14  ;;  %v2259_v42 = vmul.f32 %v6310_v13, %v2090_v21 }
 0x3de   : > { %v2427_v35 = vadd.f32 %v6318_v20, %v2257_v58  ;;  %v2549_v5 = vmax.f32 %v2421_v27, 0.0  ;;  %v2258_v41 = vmul.f32 %v6335_v31, %v1979_v39  ;;  %v2260_v53 = vmul.f32 %v6339_v32, %v2092_v3 }
 0x3df   : > { %v2265_v8 = vmul.f32 %v6306_v11, %v1981_v43  ;;  %v2895_v37 = vmax.f32 %v2894_v2, %v2540_v10  ;;  %v2875_v48 = vmax.f32 %v2874_v33, %v2547_v61  ;;  %v2429_v51 = vadd.f32 %v6328_v63, %v2259_v42 }
 0x3e0   : > { %v2555_v28 = vmax.f32 %v2427_v35, 0.0  ;;  %v2428_v26 = vadd.f32 %v6349_v56, %v2258_v41  ;;  %v2430_v38 = vadd.f32 %v6474_v17, %v2260_v53  ;;  %v2267_v21 = vmul.f32 %v6310_v13, %v2094_v7 }
 0x3e1   : > { %v2435_v15 = vadd.f32 %v6318_v20, %v2265_v8  ;;  %v2937_v62 = vmax.f32 %v2936_v4, %v2542_v47  ;;  %v2548_v60 = vmax.f32 %v2420_v40, 0.0  ;;  %v2550_v29 = vmax.f32 %v2422_v1, 0.0 }
 0x3e2   : > { %v2557_v39 = vmax.f32 %v2429_v51, 0.0  ;;  %v2917_v11 = vmax.f32 %v2916_v30, %v2549_v5  ;;  %v2876_v16 = vmax.f32 %v2875_v48, %v2555_v28  ;;  %v2437_v19 = vadd.f32 %v6328_v63, %v2267_v21 }
 0x3e3   : > { %v2563_v49 = vmax.f32 %v2435_v15, 0.0  ;;  %v2556_v57 = vmax.f32 %v2428_v26, 0.0  ;;  %v2558_v3 = vmax.f32 %v2430_v38, 0.0  ;;  %v2266_v50 = vmul.f32 %v6335_v31, %v1983_v12 }
 0x3e4   : > { %v2268_v55 = vmul.f32 %v6339_v32, %v2096_v0  ;;  %v2918_v20 = vmax.f32 %v2917_v11, %v2557_v39  ;;  %v2565_v13 = vmax.f32 %v2437_v19, 0.0  ;;  %v2896_v9 = vmax.f32 %v2895_v37, %v2548_v60 }
 0x3e5   : > { %v2877_v22 = vmax.f32 %v2876_v16, %v2563_v49  ;;  %v2938_v2 = vmax.f32 %v2937_v62, %v2550_v29  ;;  %v2436_v10 = vadd.f32 %v6349_v56, %v2266_v50  ;;  %v2995_v39 = vrot.slane %v2987_v24, %v6481_v25  ;;  %v3324_v50 = vld [vmem:[#allocation17 + $0x9c8] sm:$0xff] }
 0x3e6   : > { %v2438_v27 = vadd.f32 %v6474_v17, %v2268_v55  ;;  %v2919_v23 = vmax.f32 %v2918_v20, %v2565_v13  ;;  %v2897_v14 = vmax.f32 %v2896_v9, %v2556_v57  ;;  %v3452_v55 = vld [vmem:[#allocation17 + $0xdc8] sm:$0xff]  ;;  %v3323_v20 = vld [vmem:[#allocation17 + $0x9c0] sm:$0xff] }
 0x3e7   : > { %v2878_v61 = vrot.slane %v2877_v22, 4  ;;  %v2939_v58 = vmax.f32 %v2938_v2, %v2558_v3  ;;  %v2564_v63 = vmax.f32 %v2436_v10, 0.0  ;;  %v3319_v13 = vld [vmem:[#allocation17 + $0x9a0] sm:$0xff]  ;;  %v3316_v2 = vld [vmem:[#allocation17 + $0x988] sm:$0xff] }
 0x3e8   : > { %v2566_v43 = vmax.f32 %v2438_v27, 0.0  ;;  %v2920_v33 = vrot.slane %v2919_v23, 4  ;;  %v3447_v9 = vld [vmem:[#allocation17 + $0xda0] sm:$0xff]  ;;  %v3444_v10 = vld [vmem:[#allocation17 + $0xd88] sm:$0xff] }
 0x3e9   : > { %v2879_v4 = vmax.f32 %v2877_v22, %v2878_v61  ;;  %v2898_v31 = vmax.f32 %v2897_v14, %v2564_v63  ;;  %v3451_v22 = vld [vmem:[#allocation17 + $0xdc0] sm:$0xff]  ;;  %v3440_v14 = vld [vmem:[#allocation17 + $0xd68] sm:$0xff] }
 0x3ea   : > { %v2940_v30 = vmax.f32 %v2939_v58, %v2566_v43  ;;  %v2921_v47 = vmax.f32 %v2919_v23, %v2920_v33  ;;  %v3315_v27 = vld [vmem:[#allocation17 + $0x980] sm:$0xff]  ;;  %v3312_v23 = vld [vmem:[#allocation17 + $0x968] sm:$0xff] }
 0x3eb   : > { %v2880_v32 = vrot.slane %v2879_v4, 2  ;;  %v2899_v7 = vrot.slane %v2898_v31, 4  ;;  %v3443_v61 = vld [vmem:[#allocation17 + $0xd80] sm:$0xff]  ;;  %v3308_v43 = vld [vmem:[#allocation17 + $0x948] sm:$0xff] }
 0x3ec   : > { %v2941_v40 = vrot.slane %v2940_v30, 4  ;;  %v2922_v1 = vrot.slane %v2921_v47, 2  ;;  %v3311_v58 = vld [vmem:[#allocation17 + $0x960] sm:$0xff] }
 0x3ed   : > { %v2881_v35 = vmax.f32 %v2879_v4, %v2880_v32  ;;  %v2900_v42 = vmax.f32 %v2898_v31, %v2899_v7  ;;  %v3439_v63 = vld [vmem:[#allocation17 + $0xd60] sm:$0xff]  ;;  %v3436_v4 = vld [vmem:[#allocation17 + $0xd48] sm:$0xff] }
 0x3ee   : > { %v2942_v56 = vmax.f32 %v2940_v30, %v2941_v40  ;;  %v2923_v5 = vmax.f32 %v2921_v47, %v2922_v1  ;;  %v3307_v33 = vld [vmem:[#allocation17 + $0x940] sm:$0xff]  ;;  %v3304_v30 = vld [vmem:[#allocation17 + $0x928] sm:$0xff] }
 0x3ef   : > { %v2901_v17 = vrot.slane %v2900_v42, 2  ;;  %v2882_v53 = vrot.slane %v2881_v35, 1  ;;  %v3435_v31 = vld [vmem:[#allocation17 + $0xd40] sm:$0xff]  ;;  %v3432_v32 = vld [vmem:[#allocation17 + $0xd28] sm:$0xff] }
 0x3f0   : > { %v2943_v41 = vrot.slane %v2942_v56, 2  ;;  %v2924_v8 = vrot.slane %v2923_v5, 1  ;;  %v3303_v47 = vld [vmem:[#allocation17 + $0x920] sm:$0xff]  ;;  %v3300_v40 = vld [vmem:[#allocation17 + $0x908] sm:$0xff] }
 0x3f1   : > { %v2902_v37 = vmax.f32 %v2900_v42, %v2901_v17  ;;  %v2883_v26 = vmax.f32 %v2881_v35, %v2882_v53  ;;  %v3431_v7 = vld [vmem:[#allocation17 + $0xd20] sm:$0xff]  ;;  %v3428_v1 = vld [vmem:[#allocation17 + $0xd08] sm:$0xff] }
 0x3f2   : > { %v2944_v48 = vmax.f32 %v2942_v56, %v2943_v41  ;;  %v2925_v38 = vmax.f32 %v2923_v5, %v2924_v8  ;;  %v3299_v35 = vld [vmem:[#allocation17 + $0x900] sm:$0xff]  ;;  %v3296_v56 = vld [vmem:[#allocation17 + $0x8e8] sm:$0xff] }
 0x3f3   : > { %v2903_v28 = vrot.slane %v2902_v37, 1  ;;  %v3427_v42 = vld [vmem:[#allocation17 + $0xd00] sm:$0xff]  ;;  %v3424_v5 = vld [vmem:[#allocation17 + $0xce8] sm:$0xff] }
 0x3f4   : > { %v2945_v51 = vrot.slane %v2944_v48, 1  ;;  %v3295_v17 = vld [vmem:[#allocation17 + $0x8e0] sm:$0xff]  ;;  %v3292_v53 = vld [vmem:[#allocation17 + $0x8c8] sm:$0xff] }
 0x3f5   : > { %v2904_v15 = vmax.f32 %v2902_v37, %v2903_v28  ;;  %v3423_v41 = vld [vmem:[#allocation17 + $0xce0] sm:$0xff]  ;;  %v3420_v8 = vld [vmem:[#allocation17 + $0xcc8] sm:$0xff] }
 0x3f6   : > { %v2946_v21 = vmax.f32 %v2944_v48, %v2945_v51  ;;  %v3291_v37 = vld [vmem:[#allocation17 + $0x8c0] sm:$0xff]  ;;  %v3288_v28 = vld [vmem:[#allocation17 + $0x8a8] sm:$0xff] }
 0x3f7   : > { %v2957_v12 = vcombine.low %v2883_v26, %v2904_v15  ;;  %v3419_v48 = vld [vmem:[#allocation17 + $0xcc0] sm:$0xff]  ;;  %v3416_v51 = vld [vmem:[#allocation17 + $0xca8] sm:$0xff] }
 0x3f8   : > { %v2958_v0 = vcombine.low %v2925_v38, %v2946_v21  ;;  %v3287_v26 = vld [vmem:[#allocation17 + $0x8a0] sm:$0xff]  ;;  %v3284_v15 = vld [vmem:[#allocation17 + $0x888] sm:$0xff] }
 0x3f9   : > { %v2979_v62 = vrot.slane %v2957_v12, %v6481_v25  ;;  %v3415_v38 = vld [vmem:[#allocation17 + $0xca0] sm:$0xff]  ;;  %v3412_v21 = vld [vmem:[#allocation17 + $0xc88] sm:$0xff] }
 0x3fa   : > { %v2986_v60 = vrot.slane %v2958_v0, %v6481_v25  ;;  %v3283_v12 = vld [vmem:[#allocation17 + $0x880] sm:$0xff] }
 0x3fb   : > { %v3411_v0 = vld [vmem:[#allocation17 + $0xc80] sm:$0xff] }
 0x3fc   : > { %v2988_v29 = vcombine.low %v2979_v62, %v2986_v60  ;;  %v3280_v62 = vld [vmem:[#allocation17 + $0x868] sm:$0xff] }
 0x3fd   : > { %v3408_v60 = vld [vmem:[#allocation17 + $0xc68] sm:$0xff] }
 0x3fe   : > { %v3002_v11 = vrot.slane %v2988_v29, %v6481_v25  ;;  %v3455_v25 = vld [vmem:[#allocation17 + $0xde0] sm:$0xff] }
 0x3ff   : > { %v3279_v29 = vld [vmem:[#allocation17 + $0x860] sm:$0xff] }
 0x400   : > { %v6630_v16 = vcombine.low %v2995_v39, %v3002_v11  ;;  %v3407_v39 = vld [vmem:[#allocation17 + $0xc60] sm:$0xff]  ;;  %v3276_v11 = vld [vmem:[#allocation17 + $0x848] sm:$0xff] }
 0x402   : > { %v6634_v49 = vrot.slane %v6630_v16, %v6251_v44  ;;  %v6638_v19 = vrot.slane %v6630_v16, %v6254_v45  ;;  %v6642_v57 = vrot.slane %v6630_v16, %v6243_v34  ;;  %v6646_v59 = vrot.slane %v6630_v16, %v6246_v36 }
 0x403   : > { %v6650_v24 = vrot.slane %v6630_v16, %v6295_v46  ;;  %v6654_v3 = vrot.slane %v6630_v16, %v6298_v6  ;;  %v3320_v46 = vld [vmem:[#allocation17 + $0x9a8] sm:$0xff] }
 0x404   : > { %3628 = vmatprep.mubr.f32.mxu0 %v6634_v49  ;;  %3699 = vmatprep.mubr.f32.mxu1 %v6638_v19  ;;  %v3448_v6 = vld [vmem:[#allocation17 + $0xda8] sm:$0xff] }
 0x405   : > { %3629 = vmatmul.mubr.f32.vlgmr.msra.gmra.mxu0 %v6642_v57  ;;  %3700 = vmatmul.mubr.f32.vlgmr.msra.gmra.mxu1 %v6646_v59 }
 0x406   : > { %3707 = vmatpush1.msra.mxu0 %v3327_v18  ;;  %3778 = vmatpush1.msra.mxu1 %v3455_v25  ;;  %v3404_v18 = vld [vmem:[#allocation17 + $0xc48] sm:$0xff]  ;;  %v3275_v25 = vld [vmem:[#allocation17 + $0x840] sm:$0xff] }
 0x407   : > { %3708 = vmatprep.subr.mxu0 %v3324_v50  ;;  %3770 = vmatprep.mubr.f32.mxu0 %v6650_v24  ;;  %v3403_v50 = vld [vmem:[#allocation17 + $0xc40] sm:$0xff] }
 0x408   : > { %3779 = vmatprep.subr.mxu1 %v3452_v55  ;;  %3841 = vmatprep.mubr.f32.mxu1 %v6654_v3  ;;  %v3272_v55 = vld [vmem:[#allocation17 + $0x828] sm:$0xff] }
 0x409   : > { %3709 = vmatpush1.msra.mxu0 %v3323_v20  ;;  %3780 = vmatpush1.msra.mxu1 %v3451_v22  ;;  %v3400_v20 = vld [vmem:[#allocation17 + $0xc28] sm:$0xff]  ;;  %v3271_v22 = vld [vmem:[#allocation17 + $0x820] sm:$0xff] }
 0x40a   : > { %3710 = vmatprep.subr.mxu0 %v3320_v46  ;;  %3781 = vmatprep.subr.mxu1 %v3448_v6  ;;  %v3399_v46 = vld [vmem:[#allocation17 + $0xc20] sm:$0xff]  ;;  %v3268_v6 = vld [vmem:[#allocation17 + $0x808] sm:$0xff] }
 0x40b   : > { %3711 = vmatpush1.msra.mxu0 %v3319_v13  ;;  %3782 = vmatpush1.msra.mxu1 %v3447_v9  ;;  %v3396_v13 = vld [vmem:[#allocation17 + $0xc08] sm:$0xff]  ;;  %v3267_v9 = vld [vmem:[#allocation17 + $0x800] sm:$0xff] }
 0x40c   : > { %3712 = vmatprep.subr.mxu0 %v3316_v2  ;;  %3783 = vmatprep.subr.mxu1 %v3444_v10  ;;  %v3395_v2 = vld [vmem:[#allocation17 + $0xc00] sm:$0xff]  ;;  %v3392_v10 = vld [vmem:[#allocation17 + $0xbe8] sm:$0xff] }
 0x40d   : > { %3713 = vmatpush1.msra.mxu0 %v3315_v27  ;;  %3784 = vmatpush1.msra.mxu1 %v3443_v61  ;;  %v3520_v27 = vld [vmem:[#allocation17 + $0xfe8] sm:$0xff]  ;;  %v3391_v61 = vld [vmem:[#allocation17 + $0xbe0] sm:$0xff] }
 0x40e   : > { %3714 = vmatprep.subr.mxu0 %v3312_v23  ;;  %3785 = vmatprep.subr.mxu1 %v3440_v14  ;;  %v3519_v23 = vld [vmem:[#allocation17 + $0xfe0] sm:$0xff]  ;;  %v3388_v14 = vld [vmem:[#allocation17 + $0xbc8] sm:$0xff] }
 0x40f   : > { %3715 = vmatpush1.msra.mxu0 %v3311_v58  ;;  %3786 = vmatpush1.msra.mxu1 %v3439_v63  ;;  %v3516_v58 = vld [vmem:[#allocation17 + $0xfc8] sm:$0xff]  ;;  %v3387_v63 = vld [vmem:[#allocation17 + $0xbc0] sm:$0xff] }
 0x410   : > { %3716 = vmatprep.subr.mxu0 %v3308_v43  ;;  %3787 = vmatprep.subr.mxu1 %v3436_v4  ;;  %v3515_v43 = vld [vmem:[#allocation17 + $0xfc0] sm:$0xff]  ;;  %v3384_v4 = vld [vmem:[#allocation17 + $0xba8] sm:$0xff] }
 0x411   : > { %3717 = vmatpush1.msra.mxu0 %v3307_v33  ;;  %3788 = vmatpush1.msra.mxu1 %v3435_v31  ;;  %v3512_v33 = vld [vmem:[#allocation17 + $0xfa8] sm:$0xff]  ;;  %v3383_v31 = vld [vmem:[#allocation17 + $0xba0] sm:$0xff] }
 0x412   : > { %3718 = vmatprep.subr.mxu0 %v3304_v30  ;;  %3789 = vmatprep.subr.mxu1 %v3432_v32  ;;  %v3511_v30 = vld [vmem:[#allocation17 + $0xfa0] sm:$0xff]  ;;  %v3380_v32 = vld [vmem:[#allocation17 + $0xb88] sm:$0xff] }
 0x413   : > { %3719 = vmatpush1.msra.mxu0 %v3303_v47  ;;  %3790 = vmatpush1.msra.mxu1 %v3431_v7  ;;  %v3508_v47 = vld [vmem:[#allocation17 + $0xf88] sm:$0xff]  ;;  %v3379_v7 = vld [vmem:[#allocation17 + $0xb80] sm:$0xff] }
 0x414   : > { %3720 = vmatprep.subr.mxu0 %v3300_v40  ;;  %3791 = vmatprep.subr.mxu1 %v3428_v1  ;;  %v3507_v40 = vld [vmem:[#allocation17 + $0xf80] sm:$0xff]  ;;  %v3376_v1 = vld [vmem:[#allocation17 + $0xb68] sm:$0xff] }
 0x415   : > { %3721 = vmatpush1.msra.mxu0 %v3299_v35  ;;  %3792 = vmatpush1.msra.mxu1 %v3427_v42  ;;  %v3504_v35 = vld [vmem:[#allocation17 + $0xf68] sm:$0xff]  ;;  %v3375_v42 = vld [vmem:[#allocation17 + $0xb60] sm:$0xff] }
 0x416   : > { %3722 = vmatprep.subr.mxu0 %v3296_v56  ;;  %3793 = vmatprep.subr.mxu1 %v3424_v5  ;;  %v3503_v56 = vld [vmem:[#allocation17 + $0xf60] sm:$0xff]  ;;  %v3372_v5 = vld [vmem:[#allocation17 + $0xb48] sm:$0xff] }
 0x417   : > { %3723 = vmatpush1.msra.mxu0 %v3295_v17  ;;  %3794 = vmatpush1.msra.mxu1 %v3423_v41  ;;  %v3500_v17 = vld [vmem:[#allocation17 + $0xf48] sm:$0xff]  ;;  %v3371_v41 = vld [vmem:[#allocation17 + $0xb40] sm:$0xff] }
 0x418   : > { %3724 = vmatprep.subr.mxu0 %v3292_v53  ;;  %3795 = vmatprep.subr.mxu1 %v3420_v8  ;;  %v3499_v53 = vld [vmem:[#allocation17 + $0xf40] sm:$0xff]  ;;  %v3368_v8 = vld [vmem:[#allocation17 + $0xb28] sm:$0xff] }
 0x419   : > { %3725 = vmatpush1.msra.mxu0 %v3291_v37  ;;  %3796 = vmatpush1.msra.mxu1 %v3419_v48  ;;  %v3496_v37 = vld [vmem:[#allocation17 + $0xf28] sm:$0xff]  ;;  %v3367_v48 = vld [vmem:[#allocation17 + $0xb20] sm:$0xff] }
 0x41a   : > { %3726 = vmatprep.subr.mxu0 %v3288_v28  ;;  %3797 = vmatprep.subr.mxu1 %v3416_v51  ;;  %v3495_v28 = vld [vmem:[#allocation17 + $0xf20] sm:$0xff]  ;;  %v3364_v51 = vld [vmem:[#allocation17 + $0xb08] sm:$0xff] }
 0x41b   : > { %3727 = vmatpush1.msra.mxu0 %v3287_v26  ;;  %3798 = vmatpush1.msra.mxu1 %v3415_v38  ;;  %v3492_v26 = vld [vmem:[#allocation17 + $0xf08] sm:$0xff]  ;;  %v3363_v38 = vld [vmem:[#allocation17 + $0xb00] sm:$0xff] }
 0x41c   : > { %3728 = vmatprep.subr.mxu0 %v3284_v15  ;;  %3799 = vmatprep.subr.mxu1 %v3412_v21  ;;  %v3491_v15 = vld [vmem:[#allocation17 + $0xf00] sm:$0xff]  ;;  %v3360_v21 = vld [vmem:[#allocation17 + $0xae8] sm:$0xff] }
 0x41d   : > { %3729 = vmatpush1.msra.mxu0 %v3283_v12  ;;  %3800 = vmatpush1.msra.mxu1 %v3411_v0  ;;  %v3488_v12 = vld [vmem:[#allocation17 + $0xee8] sm:$0xff]  ;;  %v3359_v0 = vld [vmem:[#allocation17 + $0xae0] sm:$0xff] }
 0x41e   : > { %3730 = vmatprep.subr.mxu0 %v3280_v62  ;;  %3801 = vmatprep.subr.mxu1 %v3408_v60  ;;  %v3487_v62 = vld [vmem:[#allocation17 + $0xee0] sm:$0xff]  ;;  %v3356_v60 = vld [vmem:[#allocation17 + $0xac8] sm:$0xff] }
 0x41f   : > { %3731 = vmatpush1.msra.mxu0 %v3279_v29  ;;  %3802 = vmatpush1.msra.mxu1 %v3407_v39  ;;  %v3484_v29 = vld [vmem:[#allocation17 + $0xec8] sm:$0xff]  ;;  %v3355_v39 = vld [vmem:[#allocation17 + $0xac0] sm:$0xff] }
 0x420   : > { %3732 = vmatprep.subr.mxu0 %v3276_v11  ;;  %3803 = vmatprep.subr.mxu1 %v3404_v18  ;;  %v3483_v11 = vld [vmem:[#allocation17 + $0xec0] sm:$0xff]  ;;  %v3352_v18 = vld [vmem:[#allocation17 + $0xaa8] sm:$0xff] }
 0x421   : > { %3733 = vmatpush1.msra.mxu0 %v3275_v25  ;;  %3804 = vmatpush1.msra.mxu1 %v3403_v50  ;;  %v3480_v25 = vld [vmem:[#allocation17 + $0xea8] sm:$0xff]  ;;  %v3351_v50 = vld [vmem:[#allocation17 + $0xaa0] sm:$0xff] }
 0x422   : > { %3734 = vmatprep.subr.mxu0 %v3272_v55  ;;  %3805 = vmatprep.subr.mxu1 %v3400_v20  ;;  %v3479_v55 = vld [vmem:[#allocation17 + $0xea0] sm:$0xff]  ;;  %v3348_v20 = vld [vmem:[#allocation17 + $0xa88] sm:$0xff] }
 0x423   : > { %3735 = vmatpush1.msra.mxu0 %v3271_v22  ;;  %3806 = vmatpush1.msra.mxu1 %v3399_v46  ;;  %v3476_v22 = vld [vmem:[#allocation17 + $0xe88] sm:$0xff]  ;;  %v3347_v46 = vld [vmem:[#allocation17 + $0xa80] sm:$0xff] }
 0x424   : > { %3736 = vmatprep.subr.mxu0 %v3268_v6  ;;  %3807 = vmatprep.subr.mxu1 %v3396_v13  ;;  %v3475_v6 = vld [vmem:[#allocation17 + $0xe80] sm:$0xff]  ;;  %v3344_v13 = vld [vmem:[#allocation17 + $0xa68] sm:$0xff] }
 0x425   : > { %3737 = vmatpush1.msra.mxu0 %v3267_v9  ;;  %3808 = vmatpush1.msra.mxu1 %v3395_v2  ;;  %v3472_v9 = vld [vmem:[#allocation17 + $0xe68] sm:$0xff]  ;;  %v3343_v2 = vld [vmem:[#allocation17 + $0xa60] sm:$0xff] }
 0x426   : > { %3738 = vmatprep.subr.mxu0 %v3392_v10  ;;  %3809 = vmatprep.subr.mxu1 %v3520_v27  ;;  %v3471_v10 = vld [vmem:[#allocation17 + $0xe60] sm:$0xff]  ;;  %v3340_v27 = vld [vmem:[#allocation17 + $0xa48] sm:$0xff] }
 0x427   : > { %3739 = vmatpush2.msra.mxu0 %v3391_v61  ;;  %3810 = vmatpush2.msra.mxu1 %v3519_v23  ;;  %v3468_v61 = vld [vmem:[#allocation17 + $0xe48] sm:$0xff]  ;;  %v3339_v23 = vld [vmem:[#allocation17 + $0xa40] sm:$0xff] }
 0x428   : > { %3740 = vmatprep.subr.mxu0 %v3388_v14  ;;  %3811 = vmatprep.subr.mxu1 %v3516_v58  ;;  %v3467_v14 = vld [vmem:[#allocation17 + $0xe40] sm:$0xff]  ;;  %v3336_v58 = vld [vmem:[#allocation17 + $0xa28] sm:$0xff] }
 0x429   : > { %3741 = vmatpush2.msra.mxu0 %v3387_v63  ;;  %3812 = vmatpush2.msra.mxu1 %v3515_v43  ;;  %v3464_v63 = vld [vmem:[#allocation17 + $0xe28] sm:$0xff]  ;;  %v3335_v43 = vld [vmem:[#allocation17 + $0xa20] sm:$0xff] }
 0x42a   : > { %3742 = vmatprep.subr.mxu0 %v3384_v4  ;;  %3813 = vmatprep.subr.mxu1 %v3512_v33  ;;  %v3463_v4 = vld [vmem:[#allocation17 + $0xe20] sm:$0xff]  ;;  %v3332_v33 = vld [vmem:[#allocation17 + $0xa08] sm:$0xff] }
 0x42b   : > { %3743 = vmatpush2.msra.mxu0 %v3383_v31  ;;  %3814 = vmatpush2.msra.mxu1 %v3511_v30  ;;  %v3460_v31 = vld [vmem:[#allocation17 + $0xe08] sm:$0xff]  ;;  %v3331_v30 = vld [vmem:[#allocation17 + $0xa00] sm:$0xff] }
 0x42c   : > { %3744 = vmatprep.subr.mxu0 %v3380_v32  ;;  %3815 = vmatprep.subr.mxu1 %v3508_v47  ;;  %v3459_v32 = vld [vmem:[#allocation17 + $0xe00] sm:$0xff]  ;;  %v6664_v47 = vrot.slane %v6630_v16, %v6267_v52  ;;  %v3069_v52 = vld [vmem:[#allocation17 + $0x1d0] sm:$0xff] }
 0x42d   : > { %3745 = vmatpush2.msra.mxu0 %v3379_v7  ;;  %3816 = vmatpush2.msra.mxu1 %v3507_v40  ;;  %v6668_v7 = vrot.slane %v6630_v16, %v6270_v54  ;;  %v3074_v40 = vld [vmem:[#allocation17 + $0x1f8] sm:$0xff]  ;;  %v3197_v54 = vld [vmem:[#allocation17 + $0x5d0] sm:$0xff] }
 0x42e   : > { %3746 = vmatprep.subr.mxu0 %v3376_v1  ;;  %3817 = vmatprep.subr.mxu1 %v3504_v35  ;;  %v3202_v1 = vld [vmem:[#allocation17 + $0x5f8] sm:$0xff]  ;;  %v3073_v35 = vld [vmem:[#allocation17 + $0x1f0] sm:$0xff] }
 0x42f   : > { %3747 = vmatpush2.msra.mxu0 %v3375_v42  ;;  %3818 = vmatpush2.msra.mxu1 %v3503_v56  ;;  %v3201_v42 = vld [vmem:[#allocation17 + $0x5f0] sm:$0xff]  ;;  %v3070_v56 = vld [vmem:[#allocation17 + $0x1d8] sm:$0xff] }
 0x430   : > { %3748 = vmatprep.subr.mxu0 %v3372_v5  ;;  %3819 = vmatprep.subr.mxu1 %v3500_v17  ;;  %v3198_v5 = vld [vmem:[#allocation17 + $0x5d8] sm:$0xff] }
 0x431   : > { %3749 = vmatpush2.msra.mxu0 %v3371_v41  ;;  %3820 = vmatpush2.msra.mxu1 %v3499_v53  ;;  %v3066_v16 = vld [vmem:[#allocation17 + $0x1b8] sm:$0xff]  ;;  %v3065_v41 = vld [vmem:[#allocation17 + $0x1b0] sm:$0xff] }
 0x432   : > { %3750 = vmatprep.subr.mxu0 %v3368_v8  ;;  %3821 = vmatprep.subr.mxu1 %v3496_v37  ;;  %v3194_v17 = vld [vmem:[#allocation17 + $0x5b8] sm:$0xff]  ;;  %v3193_v53 = vld [vmem:[#allocation17 + $0x5b0] sm:$0xff] }
 0x433   : > { %3751 = vmatpush2.msra.mxu0 %v3367_v48  ;;  %3822 = vmatpush2.msra.mxu1 %v3495_v28  ;;  %v3062_v8 = vld [vmem:[#allocation17 + $0x198] sm:$0xff]  ;;  %v3061_v48 = vld [vmem:[#allocation17 + $0x190] sm:$0xff] }
 0x434   : > { %3752 = vmatprep.subr.mxu0 %v3364_v51  ;;  %3823 = vmatprep.subr.mxu1 %v3492_v26  ;;  %v3190_v37 = vld [vmem:[#allocation17 + $0x598] sm:$0xff]  ;;  %v3189_v28 = vld [vmem:[#allocation17 + $0x590] sm:$0xff] }
 0x435   : > { %3753 = vmatpush2.msra.mxu0 %v3363_v38  ;;  %3824 = vmatpush2.msra.mxu1 %v3491_v15  ;;  %v3186_v51 = vld [vmem:[#allocation17 + $0x578] sm:$0xff]  ;;  %v3185_v26 = vld [vmem:[#allocation17 + $0x570] sm:$0xff] }
 0x436   : > { %3754 = vmatprep.subr.mxu0 %v3360_v21  ;;  %3825 = vmatprep.subr.mxu1 %v3488_v12  ;;  %v3054_v38 = vld [vmem:[#allocation17 + $0x158] sm:$0xff]  ;;  %v3053_v21 = vld [vmem:[#allocation17 + $0x150] sm:$0xff] }
 0x437   : > { %3755 = vmatpush2.msra.mxu0 %v3359_v0  ;;  %3826 = vmatpush2.msra.mxu1 %v3487_v62  ;;  %v3182_v15 = vld [vmem:[#allocation17 + $0x558] sm:$0xff]  ;;  %v3181_v12 = vld [vmem:[#allocation17 + $0x550] sm:$0xff] }
 0x438   : > { %3756 = vmatprep.subr.mxu0 %v3356_v60  ;;  %3827 = vmatprep.subr.mxu1 %v3484_v29  ;;  %v3050_v0 = vld [vmem:[#allocation17 + $0x138] sm:$0xff]  ;;  %v3049_v60 = vld [vmem:[#allocation17 + $0x130] sm:$0xff] }
 0x439   : > { %3757 = vmatpush2.msra.mxu0 %v3355_v39  ;;  %3828 = vmatpush2.msra.mxu1 %v3483_v11  ;;  %v3178_v62 = vld [vmem:[#allocation17 + $0x538] sm:$0xff]  ;;  %v3177_v29 = vld [vmem:[#allocation17 + $0x530] sm:$0xff] }
 0x43a   : > { %3758 = vmatprep.subr.mxu0 %v3352_v18  ;;  %3829 = vmatprep.subr.mxu1 %v3480_v25  ;;  %v3046_v39 = vld [vmem:[#allocation17 + $0x118] sm:$0xff]  ;;  %v3045_v18 = vld [vmem:[#allocation17 + $0x110] sm:$0xff] }
 0x43b   : > { %3759 = vmatpush2.msra.mxu0 %v3351_v50  ;;  %3830 = vmatpush2.msra.mxu1 %v3479_v55  ;;  %v3174_v11 = vld [vmem:[#allocation17 + $0x518] sm:$0xff]  ;;  %v3173_v25 = vld [vmem:[#allocation17 + $0x510] sm:$0xff] }
 0x43c   : > { %3760 = vmatprep.subr.mxu0 %v3348_v20  ;;  %3831 = vmatprep.subr.mxu1 %v3476_v22  ;;  %v3042_v50 = vld [vmem:[#allocation17 + $0xf8] sm:$0xff]  ;;  %v3041_v20 = vld [vmem:[#allocation17 + $0xf0] sm:$0xff] }
 0x43d   : > { %3761 = vmatpush2.msra.mxu0 %v3347_v46  ;;  %3832 = vmatpush2.msra.mxu1 %v3475_v6  ;;  %v3170_v55 = vld [vmem:[#allocation17 + $0x4f8] sm:$0xff]  ;;  %v3169_v22 = vld [vmem:[#allocation17 + $0x4f0] sm:$0xff] }
 0x43e   : > { %3762 = vmatprep.subr.mxu0 %v3344_v13  ;;  %3833 = vmatprep.subr.mxu1 %v3472_v9  ;;  %v3038_v46 = vld [vmem:[#allocation17 + $0xd8] sm:$0xff]  ;;  %v3037_v13 = vld [vmem:[#allocation17 + $0xd0] sm:$0xff] }
 0x43f   : > { %3763 = vmatpush2.msra.mxu0 %v3343_v2  ;;  %3834 = vmatpush2.msra.mxu1 %v3471_v10  ;;  %v3166_v6 = vld [vmem:[#allocation17 + $0x4d8] sm:$0xff]  ;;  %v3165_v9 = vld [vmem:[#allocation17 + $0x4d0] sm:$0xff] }
 0x440   : > { %3764 = vmatprep.subr.mxu0 %v3340_v27  ;;  %3835 = vmatprep.subr.mxu1 %v3468_v61  ;;  %v3034_v2 = vld [vmem:[#allocation17 + $0xb8] sm:$0xff]  ;;  %v3033_v27 = vld [vmem:[#allocation17 + $0xb0] sm:$0xff] }
 0x441   : > { %3765 = vmatpush2.msra.mxu0 %v3339_v23  ;;  %3836 = vmatpush2.msra.mxu1 %v3467_v14  ;;  %v3162_v10 = vld [vmem:[#allocation17 + $0x4b8] sm:$0xff]  ;;  %v3161_v61 = vld [vmem:[#allocation17 + $0x4b0] sm:$0xff] }
 0x442   : > { %3766 = vmatprep.subr.mxu0 %v3336_v58  ;;  %3837 = vmatprep.subr.mxu1 %v3464_v63  ;;  %v3030_v23 = vld [vmem:[#allocation17 + $0x98] sm:$0xff]  ;;  %v3029_v58 = vld [vmem:[#allocation17 + $0x90] sm:$0xff] }
 0x443   : > { %3767 = vmatpush2.msra.mxu0 %v3335_v43  ;;  %3838 = vmatpush2.msra.mxu1 %v3463_v4  ;;  %v3158_v14 = vld [vmem:[#allocation17 + $0x498] sm:$0xff]  ;;  %v3157_v63 = vld [vmem:[#allocation17 + $0x490] sm:$0xff] }
 0x444   : > { %3768 = vmatprep.subr.mxu0 %v3332_v33  ;;  %3839 = vmatprep.subr.mxu1 %v3460_v31  ;;  %v3026_v43 = vld [vmem:[#allocation17 + $0x78] sm:$0xff]  ;;  %v3025_v33 = vld [vmem:[#allocation17 + $0x70] sm:$0xff] }
 0x445   : > { %3769 = vmatpush2.msra.mxu0 %v3331_v30  ;;  %3840 = vmatpush2.msra.mxu1 %v3459_v32  ;;  %v3154_v4 = vld [vmem:[#allocation17 + $0x478] sm:$0xff]  ;;  %v3153_v31 = vld [vmem:[#allocation17 + $0x470] sm:$0xff] }
 0x446   : > { %3771 = vmatmul.mubr.f32.vlgmr.msra.gmra.mxu0 %v6664_v47  ;;  %3842 = vmatmul.mubr.f32.vlgmr.msra.gmra.mxu1 %v6668_v7  ;;  %v3022_v30 = vld [vmem:[#allocation17 + $0x58] sm:$0xff] }
 0x447   : > { %3848 = vmatprep.subr.mxu0 %v3074_v40  ;;  %3919 = vmatprep.subr.mxu1 %v3202_v1  ;;  %v3150_v32 = vld [vmem:[#allocation17 + $0x458] sm:$0xff]  ;;  %v3021_v40 = vld [vmem:[#allocation17 + $0x50] sm:$0xff] }
 0x448   : > { %3849 = vmatpush1.msra.mxu0 %v3073_v35  ;;  %3912 = vmatprep.mubr.f32.mxu0 %v6634_v49  ;;  %v3058_v49 = vld [vmem:[#allocation17 + $0x178] sm:$0xff]  ;;  %v3149_v1 = vld [vmem:[#allocation17 + $0x450] sm:$0xff] }
 0x449   : > { %3920 = vmatpush1.msra.mxu1 %v3201_v42  ;;  %3983 = vmatprep.mubr.f32.mxu1 %v6638_v19  ;;  %v3057_v19 = vld [vmem:[#allocation17 + $0x170] sm:$0xff]  ;;  %v3018_v35 = vld [vmem:[#allocation17 + $0x38] sm:$0xff] }
 0x44a   : > { %3850 = vmatprep.subr.mxu0 %v3070_v56  ;;  %3921 = vmatprep.subr.mxu1 %v3198_v5  ;;  %v3146_v42 = vld [vmem:[#allocation17 + $0x438] sm:$0xff]  ;;  %v3017_v56 = vld [vmem:[#allocation17 + $0x30] sm:$0xff] }
 0x44b   : > { %3851 = vmatpush1.msra.mxu0 %v3069_v52  ;;  %3922 = vmatpush1.msra.mxu1 %v3197_v54  ;;  %v3145_v5 = vld [vmem:[#allocation17 + $0x430] sm:$0xff]  ;;  %v3014_v52 = vld [vmem:[#allocation17 + $0x18] sm:$0xff] }
 0x44c   : > { %3852 = vmatprep.subr.mxu0 %v3066_v16  ;;  %3923 = vmatprep.subr.mxu1 %v3194_v17  ;;  %v3142_v54 = vld [vmem:[#allocation17 + $0x418] sm:$0xff]  ;;  %v3013_v16 = vld [vmem:[#allocation17 + $0x10] sm:$0xff] }
 0x44d   : > { %3853 = vmatpush1.msra.mxu0 %v3065_v41  ;;  %3924 = vmatpush1.msra.mxu1 %v3193_v53  ;;  %v3141_v17 = vld [vmem:[#allocation17 + $0x410] sm:$0xff]  ;;  %v3138_v41 = vld [vmem:[#allocation17 + $0x3f8] sm:$0xff] }
 0x44e   : > { %3854 = vmatprep.subr.mxu0 %v3062_v8  ;;  %3925 = vmatprep.subr.mxu1 %v3190_v37  ;;  %v3266_v53 = vld [vmem:[#allocation17 + $0x7f8] sm:$0xff]  ;;  %v3137_v8 = vld [vmem:[#allocation17 + $0x3f0] sm:$0xff] }
 0x44f   : > { %3855 = vmatpush1.msra.mxu0 %v3061_v48  ;;  %3926 = vmatpush1.msra.mxu1 %v3189_v28  ;;  %v3265_v37 = vld [vmem:[#allocation17 + $0x7f0] sm:$0xff]  ;;  %v3134_v48 = vld [vmem:[#allocation17 + $0x3d8] sm:$0xff] }
 0x450   : > { %3856 = vmatprep.subr.mxu0 %v3058_v49  ;;  %3927 = vmatprep.subr.mxu1 %v3186_v51  ;;  %v3262_v28 = vld [vmem:[#allocation17 + $0x7d8] sm:$0xff]  ;;  %v3133_v49 = vld [vmem:[#allocation17 + $0x3d0] sm:$0xff] }
 0x451   : > { %3857 = vmatpush1.msra.mxu0 %v3057_v19  ;;  %3928 = vmatpush1.msra.mxu1 %v3185_v26  ;;  %v3261_v51 = vld [vmem:[#allocation17 + $0x7d0] sm:$0xff]  ;;  %v3130_v19 = vld [vmem:[#allocation17 + $0x3b8] sm:$0xff] }
 0x452   : > { %3858 = vmatprep.subr.mxu0 %v3054_v38  ;;  %3929 = vmatprep.subr.mxu1 %v3182_v15  ;;  %v3258_v26 = vld [vmem:[#allocation17 + $0x7b8] sm:$0xff]  ;;  %v3129_v38 = vld [vmem:[#allocation17 + $0x3b0] sm:$0xff] }
 0x453   : > { %3859 = vmatpush1.msra.mxu0 %v3053_v21  ;;  %3930 = vmatpush1.msra.mxu1 %v3181_v12  ;;  %v3257_v15 = vld [vmem:[#allocation17 + $0x7b0] sm:$0xff]  ;;  %v3126_v21 = vld [vmem:[#allocation17 + $0x398] sm:$0xff] }
 0x454   : > { %3860 = vmatprep.subr.mxu0 %v3050_v0  ;;  %3931 = vmatprep.subr.mxu1 %v3178_v62  ;;  %v3254_v12 = vld [vmem:[#allocation17 + $0x798] sm:$0xff]  ;;  %v3125_v0 = vld [vmem:[#allocation17 + $0x390] sm:$0xff] }
 0x455   : > { %3861 = vmatpush1.msra.mxu0 %v3049_v60  ;;  %3932 = vmatpush1.msra.mxu1 %v3177_v29  ;;  %v3253_v62 = vld [vmem:[#allocation17 + $0x790] sm:$0xff]  ;;  %v3122_v60 = vld [vmem:[#allocation17 + $0x378] sm:$0xff] }
 0x456   : > { %3862 = vmatprep.subr.mxu0 %v3046_v39  ;;  %3933 = vmatprep.subr.mxu1 %v3174_v11  ;;  %v3250_v29 = vld [vmem:[#allocation17 + $0x778] sm:$0xff]  ;;  %v3121_v39 = vld [vmem:[#allocation17 + $0x370] sm:$0xff] }
 0x457   : > { %3863 = vmatpush1.msra.mxu0 %v3045_v18  ;;  %3934 = vmatpush1.msra.mxu1 %v3173_v25  ;;  %v3249_v11 = vld [vmem:[#allocation17 + $0x770] sm:$0xff]  ;;  %v3118_v18 = vld [vmem:[#allocation17 + $0x358] sm:$0xff] }
 0x458   : > { %3864 = vmatprep.subr.mxu0 %v3042_v50  ;;  %3935 = vmatprep.subr.mxu1 %v3170_v55  ;;  %v3246_v25 = vld [vmem:[#allocation17 + $0x758] sm:$0xff]  ;;  %v3117_v50 = vld [vmem:[#allocation17 + $0x350] sm:$0xff] }
 0x459   : > { %3865 = vmatpush1.msra.mxu0 %v3041_v20  ;;  %3936 = vmatpush1.msra.mxu1 %v3169_v22  ;;  %v3245_v55 = vld [vmem:[#allocation17 + $0x750] sm:$0xff]  ;;  %v3114_v20 = vld [vmem:[#allocation17 + $0x338] sm:$0xff] }
 0x45a   : > { %3866 = vmatprep.subr.mxu0 %v3038_v46  ;;  %3937 = vmatprep.subr.mxu1 %v3166_v6  ;;  %v3242_v22 = vld [vmem:[#allocation17 + $0x738] sm:$0xff]  ;;  %v3113_v46 = vld [vmem:[#allocation17 + $0x330] sm:$0xff] }
 0x45b   : > { %3867 = vmatpush1.msra.mxu0 %v3037_v13  ;;  %3938 = vmatpush1.msra.mxu1 %v3165_v9  ;;  %v3241_v6 = vld [vmem:[#allocation17 + $0x730] sm:$0xff]  ;;  %v3110_v13 = vld [vmem:[#allocation17 + $0x318] sm:$0xff] }
 0x45c   : > { %3868 = vmatprep.subr.mxu0 %v3034_v2  ;;  %3939 = vmatprep.subr.mxu1 %v3162_v10  ;;  %v3238_v9 = vld [vmem:[#allocation17 + $0x718] sm:$0xff]  ;;  %v3109_v2 = vld [vmem:[#allocation17 + $0x310] sm:$0xff] }
 0x45d   : > { %3869 = vmatpush1.msra.mxu0 %v3033_v27  ;;  %3940 = vmatpush1.msra.mxu1 %v3161_v61  ;;  %v3237_v10 = vld [vmem:[#allocation17 + $0x710] sm:$0xff]  ;;  %v3106_v27 = vld [vmem:[#allocation17 + $0x2f8] sm:$0xff] }
 0x45e   : > { %3870 = vmatprep.subr.mxu0 %v3030_v23  ;;  %3941 = vmatprep.subr.mxu1 %v3158_v14  ;;  %v3234_v61 = vld [vmem:[#allocation17 + $0x6f8] sm:$0xff]  ;;  %v3105_v23 = vld [vmem:[#allocation17 + $0x2f0] sm:$0xff] }
 0x45f   : > { %3871 = vmatpush1.msra.mxu0 %v3029_v58  ;;  %3942 = vmatpush1.msra.mxu1 %v3157_v63  ;;  %v3233_v14 = vld [vmem:[#allocation17 + $0x6f0] sm:$0xff]  ;;  %v3102_v58 = vld [vmem:[#allocation17 + $0x2d8] sm:$0xff] }
 0x460   : > { %3872 = vmatprep.subr.mxu0 %v3026_v43  ;;  %3943 = vmatprep.subr.mxu1 %v3154_v4  ;;  %v3230_v63 = vld [vmem:[#allocation17 + $0x6d8] sm:$0xff]  ;;  %v3101_v43 = vld [vmem:[#allocation17 + $0x2d0] sm:$0xff] }
 0x461   : > { %3873 = vmatpush1.msra.mxu0 %v3025_v33  ;;  %3944 = vmatpush1.msra.mxu1 %v3153_v31  ;;  %v3229_v4 = vld [vmem:[#allocation17 + $0x6d0] sm:$0xff]  ;;  %v3098_v33 = vld [vmem:[#allocation17 + $0x2b8] sm:$0xff] }
 0x462   : > { %3874 = vmatprep.subr.mxu0 %v3022_v30  ;;  %3945 = vmatprep.subr.mxu1 %v3150_v32  ;;  %v3226_v31 = vld [vmem:[#allocation17 + $0x6b8] sm:$0xff]  ;;  %v3097_v30 = vld [vmem:[#allocation17 + $0x2b0] sm:$0xff] }
 0x463   : > { %3875 = vmatpush1.msra.mxu0 %v3021_v40  ;;  %3946 = vmatpush1.msra.mxu1 %v3149_v1  ;;  %v3225_v32 = vld [vmem:[#allocation17 + $0x6b0] sm:$0xff]  ;;  %v3094_v40 = vld [vmem:[#allocation17 + $0x298] sm:$0xff] }
 0x464   : > { %3876 = vmatprep.subr.mxu0 %v3018_v35  ;;  %3947 = vmatprep.subr.mxu1 %v3146_v42  ;;  %v3222_v1 = vld [vmem:[#allocation17 + $0x698] sm:$0xff]  ;;  %v3093_v35 = vld [vmem:[#allocation17 + $0x290] sm:$0xff] }
 0x465   : > { %3877 = vmatpush1.msra.mxu0 %v3017_v56  ;;  %3948 = vmatpush1.msra.mxu1 %v3145_v5  ;;  %v3221_v42 = vld [vmem:[#allocation17 + $0x690] sm:$0xff]  ;;  %v3090_v56 = vld [vmem:[#allocation17 + $0x278] sm:$0xff] }
 0x466   : > { %3878 = vmatprep.subr.mxu0 %v3014_v52  ;;  %3949 = vmatprep.subr.mxu1 %v3142_v54  ;;  %v3218_v5 = vld [vmem:[#allocation17 + $0x678] sm:$0xff]  ;;  %v3089_v52 = vld [vmem:[#allocation17 + $0x270] sm:$0xff] }
 0x467   : > { %3879 = vmatpush1.msra.mxu0 %v3013_v16  ;;  %3950 = vmatpush1.msra.mxu1 %v3141_v17  ;;  %v3217_v54 = vld [vmem:[#allocation17 + $0x670] sm:$0xff]  ;;  %v3086_v16 = vld [vmem:[#allocation17 + $0x258] sm:$0xff] }
 0x468   : > { %3880 = vmatprep.subr.mxu0 %v3138_v41  ;;  %3951 = vmatprep.subr.mxu1 %v3266_v53  ;;  %v3214_v17 = vld [vmem:[#allocation17 + $0x658] sm:$0xff]  ;;  %v3085_v41 = vld [vmem:[#allocation17 + $0x250] sm:$0xff] }
 0x469   : > { %3881 = vmatpush2.msra.mxu0 %v3137_v8  ;;  %3952 = vmatpush2.msra.mxu1 %v3265_v37  ;;  %v3213_v53 = vld [vmem:[#allocation17 + $0x650] sm:$0xff]  ;;  %v3082_v8 = vld [vmem:[#allocation17 + $0x238] sm:$0xff] }
 0x46a   : > { %3882 = vmatprep.subr.mxu0 %v3134_v48  ;;  %3953 = vmatprep.subr.mxu1 %v3262_v28  ;;  %v3210_v37 = vld [vmem:[#allocation17 + $0x638] sm:$0xff]  ;;  %v3081_v48 = vld [vmem:[#allocation17 + $0x230] sm:$0xff] }
 0x46b   : > { %3883 = vmatpush2.msra.mxu0 %v3133_v49  ;;  %3954 = vmatpush2.msra.mxu1 %v3261_v51  ;;  %v3209_v28 = vld [vmem:[#allocation17 + $0x630] sm:$0xff]  ;;  %v3078_v49 = vld [vmem:[#allocation17 + $0x218] sm:$0xff] }
 0x46c   : > { %3884 = vmatprep.subr.mxu0 %v3130_v19  ;;  %3955 = vmatprep.subr.mxu1 %v3258_v26  ;;  %v3206_v51 = vld [vmem:[#allocation17 + $0x618] sm:$0xff]  ;;  %v3077_v19 = vld [vmem:[#allocation17 + $0x210] sm:$0xff] }
 0x46d   : > { %3885 = vmatpush2.msra.mxu0 %v3129_v38  ;;  %3956 = vmatpush2.msra.mxu1 %v3257_v15  ;;  %v3205_v26 = vld [vmem:[#allocation17 + $0x610] sm:$0xff]  ;;  %v3330_v38 = vld [vmem:[#allocation17 + $0x9f8] sm:$0xff] }
 0x46e   : > { %3886 = vmatprep.subr.mxu0 %v3126_v21  ;;  %3957 = vmatprep.subr.mxu1 %v3254_v12  ;;  %v3458_v15 = vld [vmem:[#allocation17 + $0xdf8] sm:$0xff]  ;;  %v3329_v21 = vld [vmem:[#allocation17 + $0x9f0] sm:$0xff] }
 0x46f   : > { %3887 = vmatpush2.msra.mxu0 %v3125_v0  ;;  %3958 = vmatpush2.msra.mxu1 %v3253_v62  ;;  %v3457_v12 = vld [vmem:[#allocation17 + $0xdf0] sm:$0xff]  ;;  %v3326_v0 = vld [vmem:[#allocation17 + $0x9d8] sm:$0xff] }
 0x470   : > { %3888 = vmatprep.subr.mxu0 %v3122_v60  ;;  %3959 = vmatprep.subr.mxu1 %v3250_v29  ;;  %v3454_v62 = vld [vmem:[#allocation17 + $0xdd8] sm:$0xff]  ;;  %v3325_v60 = vld [vmem:[#allocation17 + $0x9d0] sm:$0xff] }
 0x471   : > { %3889 = vmatpush2.msra.mxu0 %v3121_v39  ;;  %3960 = vmatpush2.msra.mxu1 %v3249_v11  ;;  %v3453_v29 = vld [vmem:[#allocation17 + $0xdd0] sm:$0xff]  ;;  %v3322_v39 = vld [vmem:[#allocation17 + $0x9b8] sm:$0xff] }
 0x472   : > { %3890 = vmatprep.subr.mxu0 %v3118_v18  ;;  %3961 = vmatprep.subr.mxu1 %v3246_v25  ;;  %v3450_v11 = vld [vmem:[#allocation17 + $0xdb8] sm:$0xff]  ;;  %v3449_v18 = vld [vmem:[#allocation17 + $0xdb0] sm:$0xff] }
 0x473   : > { %3891 = vmatpush2.msra.mxu0 %v3117_v50  ;;  %3962 = vmatpush2.msra.mxu1 %v3245_v55  ;;  %v3446_v25 = vld [vmem:[#allocation17 + $0xd98] sm:$0xff]  ;;  %v3317_v50 = vld [vmem:[#allocation17 + $0x990] sm:$0xff] }
 0x474   : > { %3892 = vmatprep.subr.mxu0 %v3114_v20  ;;  %3963 = vmatprep.subr.mxu1 %v3242_v22  ;;  %v3445_v55 = vld [vmem:[#allocation17 + $0xd90] sm:$0xff]  ;;  %v3442_v20 = vld [vmem:[#allocation17 + $0xd78] sm:$0xff] }
 0x475   : > { %3893 = vmatpush2.msra.mxu0 %v3113_v46  ;;  %3964 = vmatpush2.msra.mxu1 %v3241_v6  ;;  %v3441_v22 = vld [vmem:[#allocation17 + $0xd70] sm:$0xff]  ;;  %v3310_v46 = vld [vmem:[#allocation17 + $0x958] sm:$0xff] }
 0x476   : > { %3894 = vmatprep.subr.mxu0 %v3110_v13  ;;  %3965 = vmatprep.subr.mxu1 %v3238_v9  ;;  %v3438_v6 = vld [vmem:[#allocation17 + $0xd58] sm:$0xff]  ;;  %v3309_v13 = vld [vmem:[#allocation17 + $0x950] sm:$0xff] }
 0x477   : > { %3895 = vmatpush2.msra.mxu0 %v3109_v2  ;;  %3966 = vmatpush2.msra.mxu1 %v3237_v10  ;;  %v3437_v9 = vld [vmem:[#allocation17 + $0xd50] sm:$0xff]  ;;  %v3306_v2 = vld [vmem:[#allocation17 + $0x938] sm:$0xff] }
 0x478   : > { %3896 = vmatprep.subr.mxu0 %v3106_v27  ;;  %3967 = vmatprep.subr.mxu1 %v3234_v61  ;;  %v3434_v10 = vld [vmem:[#allocation17 + $0xd38] sm:$0xff]  ;;  %v3305_v27 = vld [vmem:[#allocation17 + $0x930] sm:$0xff] }
 0x479   : > { %3897 = vmatpush2.msra.mxu0 %v3105_v23  ;;  %3968 = vmatpush2.msra.mxu1 %v3233_v14  ;;  %v3433_v61 = vld [vmem:[#allocation17 + $0xd30] sm:$0xff]  ;;  %v3302_v23 = vld [vmem:[#allocation17 + $0x918] sm:$0xff] }
 0x47a   : > { %3898 = vmatprep.subr.mxu0 %v3102_v58  ;;  %3969 = vmatprep.subr.mxu1 %v3230_v63  ;;  %v3430_v14 = vld [vmem:[#allocation17 + $0xd18] sm:$0xff]  ;;  %v3301_v58 = vld [vmem:[#allocation17 + $0x910] sm:$0xff] }
 0x47b   : > { %3899 = vmatpush2.msra.mxu0 %v3101_v43  ;;  %3970 = vmatpush2.msra.mxu1 %v3229_v4  ;;  %v3429_v63 = vld [vmem:[#allocation17 + $0xd10] sm:$0xff]  ;;  %v3298_v43 = vld [vmem:[#allocation17 + $0x8f8] sm:$0xff] }
 0x47c   : > { %3900 = vmatprep.subr.mxu0 %v3098_v33  ;;  %3971 = vmatprep.subr.mxu1 %v3226_v31  ;;  %v3426_v4 = vld [vmem:[#allocation17 + $0xcf8] sm:$0xff]  ;;  %v3297_v33 = vld [vmem:[#allocation17 + $0x8f0] sm:$0xff] }
 0x47d   : > { %3901 = vmatpush2.msra.mxu0 %v3097_v30  ;;  %3972 = vmatpush2.msra.mxu1 %v3225_v32  ;;  %v3425_v31 = vld [vmem:[#allocation17 + $0xcf0] sm:$0xff]  ;;  %v3294_v30 = vld [vmem:[#allocation17 + $0x8d8] sm:$0xff] }
 0x47e   : > { %3902 = vmatprep.subr.mxu0 %v3094_v40  ;;  %3973 = vmatprep.subr.mxu1 %v3222_v1  ;;  %v3422_v32 = vld [vmem:[#allocation17 + $0xcd8] sm:$0xff]  ;;  %v3293_v40 = vld [vmem:[#allocation17 + $0x8d0] sm:$0xff] }
 0x47f   : > { %3903 = vmatpush2.msra.mxu0 %v3093_v35  ;;  %3974 = vmatpush2.msra.mxu1 %v3221_v42  ;;  %v3421_v1 = vld [vmem:[#allocation17 + $0xcd0] sm:$0xff]  ;;  %v3290_v35 = vld [vmem:[#allocation17 + $0x8b8] sm:$0xff] }
 0x480   : > { %3904 = vmatprep.subr.mxu0 %v3090_v56  ;;  %3975 = vmatprep.subr.mxu1 %v3218_v5  ;;  %v3418_v42 = vld [vmem:[#allocation17 + $0xcb8] sm:$0xff]  ;;  %v3289_v56 = vld [vmem:[#allocation17 + $0x8b0] sm:$0xff] }
 0x481   : > { %3905 = vmatpush2.msra.mxu0 %v3089_v52  ;;  %3976 = vmatpush2.msra.mxu1 %v3217_v54  ;;  %v3417_v5 = vld [vmem:[#allocation17 + $0xcb0] sm:$0xff]  ;;  %v3286_v52 = vld [vmem:[#allocation17 + $0x898] sm:$0xff] }
 0x482   : > { %3906 = vmatprep.subr.mxu0 %v3086_v16  ;;  %3977 = vmatprep.subr.mxu1 %v3214_v17  ;;  %v3414_v54 = vld [vmem:[#allocation17 + $0xc98] sm:$0xff]  ;;  %v3285_v16 = vld [vmem:[#allocation17 + $0x890] sm:$0xff] }
 0x483   : > { %3907 = vmatpush2.msra.mxu0 %v3085_v41  ;;  %3978 = vmatpush2.msra.mxu1 %v3213_v53  ;;  %v3413_v17 = vld [vmem:[#allocation17 + $0xc90] sm:$0xff]  ;;  %v3282_v41 = vld [vmem:[#allocation17 + $0x878] sm:$0xff] }
 0x484   : > { %3908 = vmatprep.subr.mxu0 %v3082_v8  ;;  %3979 = vmatprep.subr.mxu1 %v3210_v37  ;;  %v3410_v53 = vld [vmem:[#allocation17 + $0xc78] sm:$0xff]  ;;  %v3281_v8 = vld [vmem:[#allocation17 + $0x870] sm:$0xff] }
 0x485   : > { %3909 = vmatpush2.msra.mxu0 %v3081_v48  ;;  %3980 = vmatpush2.msra.mxu1 %v3209_v28  ;;  %v3409_v37 = vld [vmem:[#allocation17 + $0xc70] sm:$0xff]  ;;  %v3278_v48 = vld [vmem:[#allocation17 + $0x858] sm:$0xff] }
 0x486   : > { %3910 = vmatprep.subr.mxu0 %v3078_v49  ;;  %3981 = vmatprep.subr.mxu1 %v3206_v51  ;;  %v3406_v28 = vld [vmem:[#allocation17 + $0xc58] sm:$0xff]  ;;  %v3277_v49 = vld [vmem:[#allocation17 + $0x850] sm:$0xff] }
 0x487   : > { %3911 = vmatpush2.msra.mxu0 %v3077_v19  ;;  %3982 = vmatpush2.msra.mxu1 %v3205_v26  ;;  %v3405_v51 = vld [vmem:[#allocation17 + $0xc50] sm:$0xff]  ;;  %v3274_v19 = vld [vmem:[#allocation17 + $0x838] sm:$0xff] }
 0x488   : > { %3913 = vmatmul.mubr.f32.vlgmr.msra.gmra.mxu0 %v6642_v57  ;;  %3984 = vmatmul.mubr.f32.vlgmr.msra.gmra.mxu1 %v6646_v59  ;;  %v3321_v57 = vld [vmem:[#allocation17 + $0x9b0] sm:$0xff]  ;;  %v3318_v59 = vld [vmem:[#allocation17 + $0x998] sm:$0xff] }
 0x489   : > { %3990 = vmatprep.subr.mxu0 %v3330_v38  ;;  %4061 = vmatprep.subr.mxu1 %v3458_v15  ;;  %v3402_v26 = vld [vmem:[#allocation17 + $0xc38] sm:$0xff]  ;;  %v3273_v38 = vld [vmem:[#allocation17 + $0x830] sm:$0xff] }
 0x48a   : > { %3991 = vmatpush1.msra.mxu0 %v3329_v21  ;;  %4054 = vmatprep.mubr.f32.mxu0 %v6650_v24  ;;  %v3314_v24 = vld [vmem:[#allocation17 + $0x978] sm:$0xff]  ;;  %v3401_v15 = vld [vmem:[#allocation17 + $0xc30] sm:$0xff] }
 0x48b   : > { %4062 = vmatpush1.msra.mxu1 %v3457_v12  ;;  %4125 = vmatprep.mubr.f32.mxu1 %v6654_v3  ;;  %v3313_v3 = vld [vmem:[#allocation17 + $0x970] sm:$0xff]  ;;  %v3270_v21 = vld [vmem:[#allocation17 + $0x818] sm:$0xff] }
 0x48c   : > { %3992 = vmatprep.subr.mxu0 %v3326_v0  ;;  %4063 = vmatprep.subr.mxu1 %v3454_v62  ;;  %v3398_v12 = vld [vmem:[#allocation17 + $0xc18] sm:$0xff]  ;;  %v3269_v0 = vld [vmem:[#allocation17 + $0x810] sm:$0xff] }
 0x48d   : > { %3993 = vmatpush1.msra.mxu0 %v3325_v60  ;;  %4064 = vmatpush1.msra.mxu1 %v3453_v29  ;;  %v3397_v62 = vld [vmem:[#allocation17 + $0xc10] sm:$0xff]  ;;  %v3394_v60 = vld [vmem:[#allocation17 + $0xbf8] sm:$0xff] }
 0x48e   : > { %3994 = vmatprep.subr.mxu0 %v3322_v39  ;;  %4065 = vmatprep.subr.mxu1 %v3450_v11  ;;  %v3522_v29 = vld [vmem:[#allocation17 + $0xff8] sm:$0xff]  ;;  %v3393_v39 = vld [vmem:[#allocation17 + $0xbf0] sm:$0xff] }
 0x48f   : > { %3995 = vmatpush1.msra.mxu0 %v3321_v57  ;;  %4066 = vmatpush1.msra.mxu1 %v3449_v18  ;;  %v3521_v11 = vld [vmem:[#allocation17 + $0xff0] sm:$0xff]  ;;  %v3390_v57 = vld [vmem:[#allocation17 + $0xbd8] sm:$0xff] }
 0x490   : > { %3996 = vmatprep.subr.mxu0 %v3318_v59  ;;  %4067 = vmatprep.subr.mxu1 %v3446_v25  ;;  %v3518_v18 = vld [vmem:[#allocation17 + $0xfd8] sm:$0xff]  ;;  %v3389_v59 = vld [vmem:[#allocation17 + $0xbd0] sm:$0xff] }
 0x491   : > { %3997 = vmatpush1.msra.mxu0 %v3317_v50  ;;  %4068 = vmatpush1.msra.mxu1 %v3445_v55  ;;  %v3517_v25 = vld [vmem:[#allocation17 + $0xfd0] sm:$0xff]  ;;  %v3386_v50 = vld [vmem:[#allocation17 + $0xbb8] sm:$0xff] }
 0x492   : > { %3998 = vmatprep.subr.mxu0 %v3314_v24  ;;  %4069 = vmatprep.subr.mxu1 %v3442_v20  ;;  %v3514_v55 = vld [vmem:[#allocation17 + $0xfb8] sm:$0xff]  ;;  %v3385_v24 = vld [vmem:[#allocation17 + $0xbb0] sm:$0xff] }
 0x493   : > { %3999 = vmatpush1.msra.mxu0 %v3313_v3  ;;  %4070 = vmatpush1.msra.mxu1 %v3441_v22  ;;  %v3513_v20 = vld [vmem:[#allocation17 + $0xfb0] sm:$0xff]  ;;  %v3382_v3 = vld [vmem:[#allocation17 + $0xb98] sm:$0xff] }
 0x494   : > { %4000 = vmatprep.subr.mxu0 %v3310_v46  ;;  %4071 = vmatprep.subr.mxu1 %v3438_v6  ;;  %v3510_v22 = vld [vmem:[#allocation17 + $0xf98] sm:$0xff]  ;;  %v3381_v46 = vld [vmem:[#allocation17 + $0xb90] sm:$0xff] }
 0x495   : > { %4001 = vmatpush1.msra.mxu0 %v3309_v13  ;;  %4072 = vmatpush1.msra.mxu1 %v3437_v9  ;;  %v3509_v6 = vld [vmem:[#allocation17 + $0xf90] sm:$0xff]  ;;  %v3378_v13 = vld [vmem:[#allocation17 + $0xb78] sm:$0xff] }
 0x496   : > { %4002 = vmatprep.subr.mxu0 %v3306_v2  ;;  %4073 = vmatprep.subr.mxu1 %v3434_v10  ;;  %v3506_v9 = vld [vmem:[#allocation17 + $0xf78] sm:$0xff]  ;;  %v3377_v2 = vld [vmem:[#allocation17 + $0xb70] sm:$0xff] }
 0x497   : > { %4003 = vmatpush1.msra.mxu0 %v3305_v27  ;;  %4074 = vmatpush1.msra.mxu1 %v3433_v61  ;;  %v3505_v10 = vld [vmem:[#allocation17 + $0xf70] sm:$0xff]  ;;  %v3374_v27 = vld [vmem:[#allocation17 + $0xb58] sm:$0xff] }
 0x498   : > { %4004 = vmatprep.subr.mxu0 %v3302_v23  ;;  %4075 = vmatprep.subr.mxu1 %v3430_v14  ;;  %v3502_v61 = vld [vmem:[#allocation17 + $0xf58] sm:$0xff]  ;;  %v3373_v23 = vld [vmem:[#allocation17 + $0xb50] sm:$0xff] }
 0x499   : > { %4005 = vmatpush1.msra.mxu0 %v3301_v58  ;;  %4076 = vmatpush1.msra.mxu1 %v3429_v63  ;;  %v3501_v14 = vld [vmem:[#allocation17 + $0xf50] sm:$0xff]  ;;  %v3370_v58 = vld [vmem:[#allocation17 + $0xb38] sm:$0xff] }
 0x49a   : > { %4006 = vmatprep.subr.mxu0 %v3298_v43  ;;  %4077 = vmatprep.subr.mxu1 %v3426_v4  ;;  %v3498_v63 = vld [vmem:[#allocation17 + $0xf38] sm:$0xff]  ;;  %v3369_v43 = vld [vmem:[#allocation17 + $0xb30] sm:$0xff] }
 0x49b   : > { %4007 = vmatpush1.msra.mxu0 %v3297_v33  ;;  %4078 = vmatpush1.msra.mxu1 %v3425_v31  ;;  %v3497_v4 = vld [vmem:[#allocation17 + $0xf30] sm:$0xff]  ;;  %v3366_v33 = vld [vmem:[#allocation17 + $0xb18] sm:$0xff] }
 0x49c   : > { %4008 = vmatprep.subr.mxu0 %v3294_v30  ;;  %4079 = vmatprep.subr.mxu1 %v3422_v32  ;;  %v3494_v31 = vld [vmem:[#allocation17 + $0xf18] sm:$0xff]  ;;  %v3365_v30 = vld [vmem:[#allocation17 + $0xb10] sm:$0xff] }
 0x49d   : > { %4009 = vmatpush1.msra.mxu0 %v3293_v40  ;;  %4080 = vmatpush1.msra.mxu1 %v3421_v1  ;;  %v3493_v32 = vld [vmem:[#allocation17 + $0xf10] sm:$0xff]  ;;  %v3362_v40 = vld [vmem:[#allocation17 + $0xaf8] sm:$0xff] }
 0x49e   : > { %4010 = vmatprep.subr.mxu0 %v3290_v35  ;;  %4081 = vmatprep.subr.mxu1 %v3418_v42  ;;  %v3490_v1 = vld [vmem:[#allocation17 + $0xef8] sm:$0xff]  ;;  %v3361_v35 = vld [vmem:[#allocation17 + $0xaf0] sm:$0xff] }
 0x49f   : > { %4011 = vmatpush1.msra.mxu0 %v3289_v56  ;;  %4082 = vmatpush1.msra.mxu1 %v3417_v5  ;;  %v3489_v42 = vld [vmem:[#allocation17 + $0xef0] sm:$0xff]  ;;  %v3358_v56 = vld [vmem:[#allocation17 + $0xad8] sm:$0xff] }
 0x4a0   : > { %4012 = vmatprep.subr.mxu0 %v3286_v52  ;;  %4083 = vmatprep.subr.mxu1 %v3414_v54  ;;  %v3486_v5 = vld [vmem:[#allocation17 + $0xed8] sm:$0xff]  ;;  %v3357_v52 = vld [vmem:[#allocation17 + $0xad0] sm:$0xff] }
 0x4a1   : > { %4013 = vmatpush1.msra.mxu0 %v3285_v16  ;;  %4084 = vmatpush1.msra.mxu1 %v3413_v17  ;;  %v3485_v54 = vld [vmem:[#allocation17 + $0xed0] sm:$0xff]  ;;  %v3354_v16 = vld [vmem:[#allocation17 + $0xab8] sm:$0xff] }
 0x4a2   : > { %4014 = vmatprep.subr.mxu0 %v3282_v41  ;;  %4085 = vmatprep.subr.mxu1 %v3410_v53  ;;  %v3482_v17 = vld [vmem:[#allocation17 + $0xeb8] sm:$0xff]  ;;  %v3353_v41 = vld [vmem:[#allocation17 + $0xab0] sm:$0xff] }
 0x4a3   : > { %4015 = vmatpush1.msra.mxu0 %v3281_v8  ;;  %4086 = vmatpush1.msra.mxu1 %v3409_v37  ;;  %v3481_v53 = vld [vmem:[#allocation17 + $0xeb0] sm:$0xff]  ;;  %v3350_v8 = vld [vmem:[#allocation17 + $0xa98] sm:$0xff] }
 0x4a4   : > { %4016 = vmatprep.subr.mxu0 %v3278_v48  ;;  %4087 = vmatprep.subr.mxu1 %v3406_v28  ;;  %v3478_v37 = vld [vmem:[#allocation17 + $0xe98] sm:$0xff]  ;;  %v3349_v48 = vld [vmem:[#allocation17 + $0xa90] sm:$0xff] }
 0x4a5   : > { %4017 = vmatpush1.msra.mxu0 %v3277_v49  ;;  %4088 = vmatpush1.msra.mxu1 %v3405_v51  ;;  %v3477_v28 = vld [vmem:[#allocation17 + $0xe90] sm:$0xff]  ;;  %v3346_v49 = vld [vmem:[#allocation17 + $0xa78] sm:$0xff] }
 0x4a6   : > { %4018 = vmatprep.subr.mxu0 %v3274_v19  ;;  %4089 = vmatprep.subr.mxu1 %v3402_v26  ;;  %v3474_v51 = vld [vmem:[#allocation17 + $0xe78] sm:$0xff]  ;;  %v3345_v19 = vld [vmem:[#allocation17 + $0xa70] sm:$0xff] }
 0x4a7   : > { %4019 = vmatpush1.msra.mxu0 %v3273_v38  ;;  %4090 = vmatpush1.msra.mxu1 %v3401_v15  ;;  %v3473_v26 = vld [vmem:[#allocation17 + $0xe70] sm:$0xff]  ;;  %v3342_v38 = vld [vmem:[#allocation17 + $0xa58] sm:$0xff] }
 0x4a8   : > { %4020 = vmatprep.subr.mxu0 %v3270_v21  ;;  %4091 = vmatprep.subr.mxu1 %v3398_v12  ;;  %v3470_v15 = vld [vmem:[#allocation17 + $0xe58] sm:$0xff]  ;;  %v3341_v21 = vld [vmem:[#allocation17 + $0xa50] sm:$0xff] }
 0x4a9   : > { %4021 = vmatpush1.msra.mxu0 %v3269_v0  ;;  %4092 = vmatpush1.msra.mxu1 %v3397_v62  ;;  %v3469_v12 = vld [vmem:[#allocation17 + $0xe50] sm:$0xff]  ;;  %v3338_v0 = vld [vmem:[#allocation17 + $0xa38] sm:$0xff] }
 0x4aa   : > { %4022 = vmatprep.subr.mxu0 %v3394_v60  ;;  %4093 = vmatprep.subr.mxu1 %v3522_v29  ;;  %v3466_v62 = vld [vmem:[#allocation17 + $0xe38] sm:$0xff]  ;;  %v3337_v60 = vld [vmem:[#allocation17 + $0xa30] sm:$0xff] }
 0x4ab   : > { %4023 = vmatpush2.msra.mxu0 %v3393_v39  ;;  %4094 = vmatpush2.msra.mxu1 %v3521_v11  ;;  %v3465_v29 = vld [vmem:[#allocation17 + $0xe30] sm:$0xff]  ;;  %v3334_v39 = vld [vmem:[#allocation17 + $0xa18] sm:$0xff] }
 0x4ac   : > { %4024 = vmatprep.subr.mxu0 %v3390_v57  ;;  %4095 = vmatprep.subr.mxu1 %v3518_v18  ;;  %v3462_v11 = vld [vmem:[#allocation17 + $0xe18] sm:$0xff]  ;;  %v3333_v57 = vld [vmem:[#allocation17 + $0xa10] sm:$0xff] }
 0x4ad   : > { %4025 = vmatpush2.msra.mxu0 %v3389_v59  ;;  %4096 = vmatpush2.msra.mxu1 %v3517_v25  ;;  %v3461_v18 = vld [vmem:[#allocation17 + $0xe10] sm:$0xff]  ;;  %v4219_v59 = vld [vmem:[#allocation22 + $0xf8] sm:$0xff]  ;;  %v4218_v25 = vld [vmem:[#allocation22 + $0xf0] sm:$0xff] }
 0x4ae   : > { %4026 = vmatprep.subr.mxu0 %v3386_v50  ;;  %4097 = vmatprep.subr.mxu1 %v3514_v55  ;;  %v4217_v50 = vld [vmem:[#allocation22 + $0xe8] sm:$0xff]  ;;  %v4216_v55 = vld [vmem:[#allocation22 + $0xe0] sm:$0xff] }
 0x4af   : > { %4027 = vmatpush2.msra.mxu0 %v3385_v24  ;;  %4098 = vmatpush2.msra.mxu1 %v3513_v20  ;;  %v4283_v24 = vld [vmem:[#allocation22 + $0x2f8] sm:$0xff]  ;;  %v4282_v20 = vld [vmem:[#allocation22 + $0x2f0] sm:$0xff] }
 0x4b0   : > { %4028 = vmatprep.subr.mxu0 %v3382_v3  ;;  %4099 = vmatprep.subr.mxu1 %v3510_v22  ;;  %v4281_v3 = vld [vmem:[#allocation22 + $0x2e8] sm:$0xff]  ;;  %v4215_v22 = vld [vmem:[#allocation22 + $0xd8] sm:$0xff] }
 0x4b1   : > { %4029 = vmatpush2.msra.mxu0 %v3381_v46  ;;  %4100 = vmatpush2.msra.mxu1 %v3509_v6  ;;  %v4280_v46 = vld [vmem:[#allocation22 + $0x2e0] sm:$0xff]  ;;  %v4214_v6 = vld [vmem:[#allocation22 + $0xd0] sm:$0xff] }
 0x4b2   : > { %4030 = vmatprep.subr.mxu0 %v3378_v13  ;;  %4101 = vmatprep.subr.mxu1 %v3506_v9  ;;  %v4279_v13 = vld [vmem:[#allocation22 + $0x2d8] sm:$0xff]  ;;  %v4213_v9 = vld [vmem:[#allocation22 + $0xc8] sm:$0xff] }
 0x4b3   : > { %4031 = vmatpush2.msra.mxu0 %v3377_v2  ;;  %4102 = vmatpush2.msra.mxu1 %v3505_v10  ;;  %v4277_v2 = vld [vmem:[#allocation22 + $0x2c8] sm:$0xff]  ;;  %v4211_v10 = vld [vmem:[#allocation22 + $0xb8] sm:$0xff] }
 0x4b4   : > { %4032 = vmatprep.subr.mxu0 %v3374_v27  ;;  %4103 = vmatprep.subr.mxu1 %v3502_v61  ;;  %v4276_v27 = vld [vmem:[#allocation22 + $0x2c0] sm:$0xff]  ;;  %v4210_v61 = vld [vmem:[#allocation22 + $0xb0] sm:$0xff] }
 0x4b5   : > { %4033 = vmatpush2.msra.mxu0 %v3373_v23  ;;  %4104 = vmatpush2.msra.mxu1 %v3501_v14  ;;  %v4275_v23 = vld [vmem:[#allocation22 + $0x2b8] sm:$0xff]  ;;  %v4209_v14 = vld [vmem:[#allocation22 + $0xa8] sm:$0xff] }
 0x4b6   : > { %4034 = vmatprep.subr.mxu0 %v3370_v58  ;;  %4105 = vmatprep.subr.mxu1 %v3498_v63  ;;  %v4274_v58 = vld [vmem:[#allocation22 + $0x2b0] sm:$0xff]  ;;  %v4208_v63 = vld [vmem:[#allocation22 + $0xa0] sm:$0xff] }
 0x4b7   : > { %4035 = vmatpush2.msra.mxu0 %v3369_v43  ;;  %4106 = vmatpush2.msra.mxu1 %v3497_v4  ;;  %v4273_v43 = vld [vmem:[#allocation22 + $0x2a8] sm:$0xff]  ;;  %v4207_v4 = vld [vmem:[#allocation22 + $0x98] sm:$0xff] }
 0x4b8   : > { %4036 = vmatprep.subr.mxu0 %v3366_v33  ;;  %4107 = vmatprep.subr.mxu1 %v3494_v31  ;;  %v4272_v33 = vld [vmem:[#allocation22 + $0x2a0] sm:$0xff]  ;;  %v4206_v31 = vld [vmem:[#allocation22 + $0x90] sm:$0xff] }
 0x4b9   : > { %4037 = vmatpush2.msra.mxu0 %v3365_v30  ;;  %4108 = vmatpush2.msra.mxu1 %v3493_v32  ;;  %v4271_v30 = vld [vmem:[#allocation22 + $0x298] sm:$0xff]  ;;  %v4205_v32 = vld [vmem:[#allocation22 + $0x88] sm:$0xff] }
 0x4ba   : > { %4038 = vmatprep.subr.mxu0 %v3362_v40  ;;  %4109 = vmatprep.subr.mxu1 %v3490_v1  ;;  %v4270_v40 = vld [vmem:[#allocation22 + $0x290] sm:$0xff]  ;;  %v4204_v1 = vld [vmem:[#allocation22 + $0x80] sm:$0xff] }
 0x4bb   : > { %4039 = vmatpush2.msra.mxu0 %v3361_v35  ;;  %4110 = vmatpush2.msra.mxu1 %v3489_v42  ;;  %v4269_v35 = vld [vmem:[#allocation22 + $0x288] sm:$0xff]  ;;  %v4203_v42 = vld [vmem:[#allocation22 + $0x78] sm:$0xff] }
 0x4bc   : > { %4040 = vmatprep.subr.mxu0 %v3358_v56  ;;  %4111 = vmatprep.subr.mxu1 %v3486_v5  ;;  %v4268_v56 = vld [vmem:[#allocation22 + $0x280] sm:$0xff]  ;;  %v4202_v5 = vld [vmem:[#allocation22 + $0x70] sm:$0xff] }
 0x4bd   : > { %4041 = vmatpush2.msra.mxu0 %v3357_v52  ;;  %4112 = vmatpush2.msra.mxu1 %v3485_v54  ;;  %v4267_v52 = vld [vmem:[#allocation22 + $0x278] sm:$0xff]  ;;  %v4201_v54 = vld [vmem:[#allocation22 + $0x68] sm:$0xff] }
 0x4be   : > { %4042 = vmatprep.subr.mxu0 %v3354_v16  ;;  %4113 = vmatprep.subr.mxu1 %v3482_v17  ;;  %v4266_v16 = vld [vmem:[#allocation22 + $0x270] sm:$0xff]  ;;  %v4200_v17 = vld [vmem:[#allocation22 + $0x60] sm:$0xff] }
 0x4bf   : > { %4043 = vmatpush2.msra.mxu0 %v3353_v41  ;;  %4114 = vmatpush2.msra.mxu1 %v3481_v53  ;;  %v4265_v41 = vld [vmem:[#allocation22 + $0x268] sm:$0xff]  ;;  %v4199_v53 = vld [vmem:[#allocation22 + $0x58] sm:$0xff] }
 0x4c0   : > { %4044 = vmatprep.subr.mxu0 %v3350_v8  ;;  %4115 = vmatprep.subr.mxu1 %v3478_v37  ;;  %v4264_v8 = vld [vmem:[#allocation22 + $0x260] sm:$0xff]  ;;  %v4198_v37 = vld [vmem:[#allocation22 + $0x50] sm:$0xff] }
 0x4c1   : > { %4045 = vmatpush2.msra.mxu0 %v3349_v48  ;;  %4116 = vmatpush2.msra.mxu1 %v3477_v28  ;;  %v4263_v48 = vld [vmem:[#allocation22 + $0x258] sm:$0xff]  ;;  %v4197_v28 = vld [vmem:[#allocation22 + $0x48] sm:$0xff] }
 0x4c2   : > { %4046 = vmatprep.subr.mxu0 %v3346_v49  ;;  %4117 = vmatprep.subr.mxu1 %v3474_v51  ;;  %v4262_v49 = vld [vmem:[#allocation22 + $0x250] sm:$0xff]  ;;  %v4196_v51 = vld [vmem:[#allocation22 + $0x40] sm:$0xff] }
 0x4c3   : > { %4047 = vmatpush2.msra.mxu0 %v3345_v19  ;;  %4118 = vmatpush2.msra.mxu1 %v3473_v26  ;;  %v4261_v19 = vld [vmem:[#allocation22 + $0x248] sm:$0xff]  ;;  %v4195_v26 = vld [vmem:[#allocation22 + $0x38] sm:$0xff] }
 0x4c4   : > { %4048 = vmatprep.subr.mxu0 %v3342_v38  ;;  %4119 = vmatprep.subr.mxu1 %v3470_v15  ;;  %v4260_v38 = vld [vmem:[#allocation22 + $0x240] sm:$0xff]  ;;  %v4194_v15 = vld [vmem:[#allocation22 + $0x30] sm:$0xff] }
 0x4c5   : > { %4049 = vmatpush2.msra.mxu0 %v3341_v21  ;;  %4120 = vmatpush2.msra.mxu1 %v3469_v12  ;;  %v4259_v21 = vld [vmem:[#allocation22 + $0x238] sm:$0xff]  ;;  %v4193_v12 = vld [vmem:[#allocation22 + $0x28] sm:$0xff] }
 0x4c6   : > { %4050 = vmatprep.subr.mxu0 %v3338_v0  ;;  %4121 = vmatprep.subr.mxu1 %v3466_v62  ;;  %v4258_v0 = vld [vmem:[#allocation22 + $0x230] sm:$0xff]  ;;  %v4192_v62 = vld [vmem:[#allocation22 + $0x20] sm:$0xff] }
 0x4c7   : > { %4051 = vmatpush2.msra.mxu0 %v3337_v60  ;;  %4122 = vmatpush2.msra.mxu1 %v3465_v29  ;;  %v4257_v60 = vld [vmem:[#allocation22 + $0x228] sm:$0xff]  ;;  %v4191_v29 = vld [vmem:[#allocation22 + $0x18] sm:$0xff] }
 0x4c8   : > { %4052 = vmatprep.subr.mxu0 %v3334_v39  ;;  %4123 = vmatprep.subr.mxu1 %v3462_v11  ;;  %v4256_v39 = vld [vmem:[#allocation22 + $0x220] sm:$0xff]  ;;  %v4190_v11 = vld [vmem:[#allocation22 + $0x10] sm:$0xff] }
 0x4c9   : > { %4053 = vmatpush2.msra.mxu0 %v3333_v57  ;;  %4124 = vmatpush2.msra.mxu1 %v3461_v18  ;;  %v4255_v57 = vld [vmem:[#allocation22 + $0x218] sm:$0xff]  ;;  %v4189_v18 = vld [vmem:[#allocation22 + $0x8] sm:$0xff] }
 0x4ca   : > { %4055 = vmatmul.mubr.f32.vlgmr.msra.gmra.mxu0 %v6664_v47  ;;  %4126 = vmatmul.mubr.f32.vlgmr.msra.gmra.mxu1 %v6668_v7  ;;  %v4278_v47 = vld [vmem:[#allocation22 + $0x2d0] sm:$0xff]  ;;  %v4212_v7 = vld [vmem:[#allocation22 + $0xc0] sm:$0xff] }
 0x4cb   : > { %4316 = vmatprep.subr.mxu0 %v4219_v59  ;;  %4387 = vmatprep.subr.mxu1 %v4283_v24  ;;  %v4254_v59 = vld [vmem:[#allocation22 + $0x210] sm:$0xff]  ;;  %v4252_v24 = vld [vmem:[#allocation22 + $0x200] sm:$0xff] }
 0x4cc   : > { %4317 = vmatpush1.msra.mxu0 %v4218_v25  ;;  %4388 = vmatpush1.msra.mxu1 %v4282_v20  ;;  %v4188_v25 = vld [vmem:[#allocation22] sm:$0xff]  ;;  %v4250_v20 = vld [vmem:[#allocation22 + $0x1f0] sm:$0xff] }
 0x4cd   : > { %4318 = vmatprep.subr.mxu0 %v4217_v50  ;;  %4389 = vmatprep.subr.mxu1 %v4281_v3  ;;  %v4253_v50 = vld [vmem:[#allocation22 + $0x208] sm:$0xff]  ;;  %v4315_v3 = vld [vmem:[#allocation22 + $0x3f8] sm:$0xff] }
 0x4ce   : > { %4319 = vmatpush1.msra.mxu0 %v4216_v55  ;;  %4390 = vmatpush1.msra.mxu1 %v4280_v46  ;;  %v4251_v55 = vld [vmem:[#allocation22 + $0x1f8] sm:$0xff]  ;;  %v4314_v46 = vld [vmem:[#allocation22 + $0x3f0] sm:$0xff] }
 0x4cf   : > { %4320 = vmatprep.subr.mxu0 %v4215_v22  ;;  %4391 = vmatprep.subr.mxu1 %v4279_v13  ;;  %v4249_v22 = vld [vmem:[#allocation22 + $0x1e8] sm:$0xff] }
 0x4d0   : > { %4321 = vmatpush1.msra.mxu0 %v4214_v6  ;;  %4392 = vmatpush1.msra.mxu1 %v4278_v47  ;;  %v4248_v6 = vld [vmem:[#allocation22 + $0x1e0] sm:$0xff]  ;;  %v4313_v13 = vld [vmem:[#allocation22 + $0x3e8] sm:$0xff] }
 0x4d1   : > { %4322 = vmatprep.subr.mxu0 %v4213_v9  ;;  %4393 = vmatprep.subr.mxu1 %v4277_v2  ;;  %v4247_v9 = vld [vmem:[#allocation22 + $0x1d8] sm:$0xff]  ;;  %v4312_v47 = vld [vmem:[#allocation22 + $0x3e0] sm:$0xff] }
 0x4d2   : > { %4323 = vmatpush1.msra.mxu0 %v4212_v7  ;;  %4394 = vmatpush1.msra.mxu1 %v4276_v27  ;;  %v4246_v7 = vld [vmem:[#allocation22 + $0x1d0] sm:$0xff]  ;;  %v4311_v2 = vld [vmem:[#allocation22 + $0x3d8] sm:$0xff] }
 0x4d3   : > { %4324 = vmatprep.subr.mxu0 %v4211_v10  ;;  %4395 = vmatprep.subr.mxu1 %v4275_v23  ;;  %v4245_v10 = vld [vmem:[#allocation22 + $0x1c8] sm:$0xff]  ;;  %v4310_v27 = vld [vmem:[#allocation22 + $0x3d0] sm:$0xff] }
 0x4d4   : > { %4325 = vmatpush1.msra.mxu0 %v4210_v61  ;;  %4396 = vmatpush1.msra.mxu1 %v4274_v58  ;;  %v4244_v61 = vld [vmem:[#allocation22 + $0x1c0] sm:$0xff]  ;;  %v4309_v23 = vld [vmem:[#allocation22 + $0x3c8] sm:$0xff] }
 0x4d5   : > { %4326 = vmatprep.subr.mxu0 %v4209_v14  ;;  %4397 = vmatprep.subr.mxu1 %v4273_v43  ;;  %v4243_v14 = vld [vmem:[#allocation22 + $0x1b8] sm:$0xff]  ;;  %v4308_v58 = vld [vmem:[#allocation22 + $0x3c0] sm:$0xff] }
 0x4d6   : > { %4327 = vmatpush1.msra.mxu0 %v4208_v63  ;;  %4398 = vmatpush1.msra.mxu1 %v4272_v33  ;;  %v4242_v63 = vld [vmem:[#allocation22 + $0x1b0] sm:$0xff]  ;;  %v4307_v43 = vld [vmem:[#allocation22 + $0x3b8] sm:$0xff] }
 0x4d7   : > { %4328 = vmatprep.subr.mxu0 %v4207_v4  ;;  %4399 = vmatprep.subr.mxu1 %v4271_v30  ;;  %v4241_v4 = vld [vmem:[#allocation22 + $0x1a8] sm:$0xff]  ;;  %v4306_v33 = vld [vmem:[#allocation22 + $0x3b0] sm:$0xff] }
 0x4d8   : > { %4329 = vmatpush1.msra.mxu0 %v4206_v31  ;;  %4400 = vmatpush1.msra.mxu1 %v4270_v40  ;;  %v4240_v31 = vld [vmem:[#allocation22 + $0x1a0] sm:$0xff]  ;;  %v4305_v30 = vld [vmem:[#allocation22 + $0x3a8] sm:$0xff] }
 0x4d9   : > { %4330 = vmatprep.subr.mxu0 %v4205_v32  ;;  %4401 = vmatprep.subr.mxu1 %v4269_v35  ;;  %v4239_v32 = vld [vmem:[#allocation22 + $0x198] sm:$0xff]  ;;  %v4304_v40 = vld [vmem:[#allocation22 + $0x3a0] sm:$0xff] }
 0x4da   : > { %4331 = vmatpush1.msra.mxu0 %v4204_v1  ;;  %4402 = vmatpush1.msra.mxu1 %v4268_v56  ;;  %v4238_v1 = vld [vmem:[#allocation22 + $0x190] sm:$0xff]  ;;  %v4303_v35 = vld [vmem:[#allocation22 + $0x398] sm:$0xff] }
 0x4db   : > { %4332 = vmatprep.subr.mxu0 %v4203_v42  ;;  %4403 = vmatprep.subr.mxu1 %v4267_v52  ;;  %v4237_v42 = vld [vmem:[#allocation22 + $0x188] sm:$0xff]  ;;  %v4302_v56 = vld [vmem:[#allocation22 + $0x390] sm:$0xff] }
 0x4dc   : > { %4333 = vmatpush1.msra.mxu0 %v4202_v5  ;;  %4404 = vmatpush1.msra.mxu1 %v4266_v16  ;;  %v4236_v5 = vld [vmem:[#allocation22 + $0x180] sm:$0xff]  ;;  %v4301_v52 = vld [vmem:[#allocation22 + $0x388] sm:$0xff] }
 0x4dd   : > { %4334 = vmatprep.subr.mxu0 %v4201_v54  ;;  %4405 = vmatprep.subr.mxu1 %v4265_v41  ;;  %v4235_v54 = vld [vmem:[#allocation22 + $0x178] sm:$0xff]  ;;  %v4300_v16 = vld [vmem:[#allocation22 + $0x380] sm:$0xff] }
 0x4de   : > { %4335 = vmatpush1.msra.mxu0 %v4200_v17  ;;  %4406 = vmatpush1.msra.mxu1 %v4264_v8  ;;  %v4234_v17 = vld [vmem:[#allocation22 + $0x170] sm:$0xff]  ;;  %v4299_v41 = vld [vmem:[#allocation22 + $0x378] sm:$0xff] }
 0x4df   : > { %4336 = vmatprep.subr.mxu0 %v4199_v53  ;;  %4407 = vmatprep.subr.mxu1 %v4263_v48  ;;  %v4233_v53 = vld [vmem:[#allocation22 + $0x168] sm:$0xff]  ;;  %v4298_v8 = vld [vmem:[#allocation22 + $0x370] sm:$0xff]  ;;  %v4231_v48 = vld [vmem:[#allocation22 + $0x158] sm:$0xff] }
 0x4e0   : > { %4337 = vmatpush1.msra.mxu0 %v4198_v37  ;;  %4408 = vmatpush1.msra.mxu1 %v4262_v49  ;;  %v4232_v37 = vld [vmem:[#allocation22 + $0x160] sm:$0xff]  ;;  %v4229_v49 = vld [vmem:[#allocation22 + $0x148] sm:$0xff] }
 0x4e1   : > { %4338 = vmatprep.subr.mxu0 %v4197_v28  ;;  %4409 = vmatprep.subr.mxu1 %v4261_v19  ;;  %v4230_v28 = vld [vmem:[#allocation22 + $0x150] sm:$0xff]  ;;  %v3630_v19 = vpop.f32.mrf.mxu0 }
 0x4e2   : > { %4339 = vmatpush1.msra.mxu0 %v4196_v51  ;;  %4410 = vmatpush1.msra.mxu1 %v4260_v38  ;;  %v4228_v51 = vld [vmem:[#allocation22 + $0x140] sm:$0xff]  ;;  %v4227_v38 = vld [vmem:[#allocation22 + $0x138] sm:$0xff] }
 0x4e3   : > { %4340 = vmatprep.subr.mxu0 %v4195_v26  ;;  %4411 = vmatprep.subr.mxu1 %v4259_v21  ;;  %v3701_v26 = vpop.f32.mrf.mxu1  ;;  %v4225_v21 = vld [vmem:[#allocation22 + $0x128] sm:$0xff] }
 0x4e4   : > { %4341 = vmatpush1.msra.mxu0 %v4194_v15  ;;  %4412 = vmatpush1.msra.mxu1 %v4258_v0  ;;  %v4226_v15 = vld [vmem:[#allocation22 + $0x130] sm:$0xff]  ;;  %v3632_v0 = vpop.f32.mrf.mxu0 }
 0x4e5   : > { %4342 = vmatprep.subr.mxu0 %v4193_v12  ;;  %4413 = vmatprep.subr.mxu1 %v4257_v60  ;;  %v4224_v12 = vld [vmem:[#allocation22 + $0x120] sm:$0xff]  ;;  %v6680_v60 = vld [vmem:[#allocation19] sm:$0xf] }
 0x4e6   : > { %4343 = vmatpush1.msra.mxu0 %v4192_v62  ;;  %4414 = vmatpush1.msra.mxu1 %v4256_v39  ;;  %v3703_v62 = vpop.f32.mrf.mxu1  ;;  %v3702_v39 = vadd.f32 %v3701_v26, %v3630_v19  ;;  %v4513_v19 = vld [vmem:[%s6858_s25 + $0xc8] sm:$0xff] }
 0x4e7   : > { %4344 = vmatprep.subr.mxu0 %v4191_v29  ;;  %4415 = vmatprep.subr.mxu1 %v4255_v57  ;;  %v4223_v29 = vld [vmem:[#allocation22 + $0x118] sm:$0xff]  ;;  %v4497_v26 = vld [vmem:[%s6858_s25 + $0x48] sm:$0xff] }
 0x4e8   : > { %4345 = vmatpush1.msra.mxu0 %v4190_v11  ;;  %4416 = vmatpush1.msra.mxu1 %v4254_v59  ;;  %v4222_v11 = vld [vmem:[#allocation22 + $0x110] sm:$0xff]  ;;  %v4221_v59 = vld [vmem:[#allocation22 + $0x108] sm:$0xff] }
 0x4e9   : > { %4346 = vmatprep.subr.mxu0 %v4189_v18  ;;  %4417 = vmatprep.subr.mxu1 %v4253_v50 }
 0x4ea   : > { %4347 = vmatpush1.msra.mxu0 %v4188_v25  ;;  %4418 = vmatpush1.msra.mxu1 %v4252_v24  ;;  %v3704_v25 = vadd.f32 %v3703_v62, %v3632_v0  ;;  %v6684_v24 = vld [vmem:[#allocation20] sm:$0xf]  ;;  %v4510_v0 = vld [vmem:[%s6858_s25 + $0xb0] sm:$0xff] }
 0x4eb   : > { %4348 = vmatprep.subr.mxu0 %v4251_v55  ;;  %4419 = vmatprep.subr.mxu1 %v4315_v3  ;;  %v4137_v55 = vrot.slane %v6680_v60, %v6243_v34  ;;  %v4494_v62 = vld [vmem:[%s6858_s25 + $0x30] sm:$0xff] }
 0x4ec   : > { %4349 = vmatpush2.msra.mxu0 %v4250_v20  ;;  %4420 = vmatpush2.msra.mxu1 %v4314_v46  ;;  %v4220_v20 = vld [vmem:[#allocation22 + $0x100] sm:$0xff] }
 0x4ed   : > { %4350 = vmatprep.subr.mxu0 %v4249_v22  ;;  %4421 = vmatprep.subr.mxu1 %v4313_v13  ;;  %v4297_v13 = vld [vmem:[#allocation22 + $0x368] sm:$0xff] }
 0x4ee   : > { %4351 = vmatpush2.msra.mxu0 %v4248_v6  ;;  %4422 = vmatpush2.msra.mxu1 %v4312_v47  ;;  %v4141_v6 = vrot.slane %v6680_v60, %v6251_v44 }
 0x4ef   : > { %4352 = vmatprep.subr.mxu0 %v4247_v9  ;;  %4423 = vmatprep.subr.mxu1 %v4311_v2  ;;  %v4163_v9 = vrot.slane %v6684_v24, %v6243_v34 }
 0x4f0   : > { %4353 = vmatpush2.msra.mxu0 %v4246_v7  ;;  %4424 = vmatpush2.msra.mxu1 %v4310_v27  ;;  %v4296_v7 = vld [vmem:[#allocation22 + $0x360] sm:$0xff]  ;;  %v4167_v27 = vrot.slane %v6684_v24, %v6251_v44 }
 0x4f1   : > { %4354 = vmatprep.subr.mxu0 %v4245_v10  ;;  %4425 = vmatprep.subr.mxu1 %v4309_v23  ;;  %v4294_v23 = vld [vmem:[#allocation22 + $0x350] sm:$0xff] }
 0x4f2   : > { %4355 = vmatpush2.msra.mxu0 %v4244_v61  ;;  %4426 = vmatpush2.msra.mxu1 %v4308_v58  ;;  %v4295_v61 = vld [vmem:[#allocation22 + $0x358] sm:$0xff]  ;;  %v4293_v58 = vld [vmem:[#allocation22 + $0x348] sm:$0xff] }
 0x4f3   : > { %4356 = vmatprep.subr.mxu0 %v4243_v14  ;;  %4427 = vmatprep.subr.mxu1 %v4307_v43  ;;  %v4292_v43 = vld [vmem:[#allocation22 + $0x340] sm:$0xff] }
 0x4f4   : > { %4357 = vmatpush2.msra.mxu0 %v4242_v63  ;;  %4428 = vmatpush2.msra.mxu1 %v4306_v33  ;;  %v4291_v33 = vld [vmem:[#allocation22 + $0x338] sm:$0xff] }
 0x4f5   : > { %4358 = vmatprep.subr.mxu0 %v4241_v4  ;;  %4429 = vmatprep.subr.mxu1 %v4305_v30 }
 0x4f6   : > { %4359 = vmatpush2.msra.mxu0 %v4240_v31  ;;  %4430 = vmatpush2.msra.mxu1 %v4304_v40  ;;  %v4290_v31 = vld [vmem:[#allocation22 + $0x330] sm:$0xff] }
 0x4f7   : > { %4360 = vmatprep.subr.mxu0 %v4239_v32  ;;  %4431 = vmatprep.subr.mxu1 %v4303_v35  ;;  %v4289_v32 = vld [vmem:[#allocation22 + $0x328] sm:$0xff]  ;;  %v4287_v35 = vld [vmem:[#allocation22 + $0x318] sm:$0xff] }
 0x4f8   : > { %4361 = vmatpush2.msra.mxu0 %v4238_v1  ;;  %4432 = vmatpush2.msra.mxu1 %v4302_v56  ;;  %v4288_v1 = vld [vmem:[#allocation22 + $0x320] sm:$0xff]  ;;  %v4285_v56 = vld [vmem:[#allocation22 + $0x308] sm:$0xff] }
 0x4f9   : > { %4362 = vmatprep.subr.mxu0 %v4237_v42  ;;  %4433 = vmatprep.subr.mxu1 %v4301_v52  ;;  %v4286_v42 = vld [vmem:[#allocation22 + $0x310] sm:$0xff] }
 0x4fa   : > { %4363 = vmatpush2.msra.mxu0 %v4236_v5  ;;  %4434 = vmatpush2.msra.mxu1 %v4300_v16  ;;  %v4284_v5 = vld [vmem:[#allocation22 + $0x300] sm:$0xff]  ;;  %v4519_v52 = vld [vmem:[%s6858_s25 + $0xf8] sm:$0xff]  ;;  %v4518_v16 = vld [vmem:[%s6858_s25 + $0xf0] sm:$0xff] }
 0x4fb   : > { %4364 = vmatprep.subr.mxu0 %v4235_v54  ;;  %4435 = vmatprep.subr.mxu1 %v4299_v41  ;;  %v4503_v54 = vld [vmem:[%s6858_s25 + $0x78] sm:$0xff]  ;;  %v4517_v41 = vld [vmem:[%s6858_s25 + $0xe8] sm:$0xff] }
 0x4fc   : > { %4365 = vmatpush2.msra.mxu0 %v4234_v17  ;;  %4436 = vmatpush2.msra.mxu1 %v4298_v8  ;;  %v4502_v17 = vld [vmem:[%s6858_s25 + $0x70] sm:$0xff]  ;;  %v4516_v8 = vld [vmem:[%s6858_s25 + $0xe0] sm:$0xff] }
 0x4fd   : > { %4366 = vmatprep.subr.mxu0 %v4233_v53  ;;  %4437 = vmatprep.subr.mxu1 %v4297_v13  ;;  %v4501_v53 = vld [vmem:[%s6858_s25 + $0x68] sm:$0xff]  ;;  %v4171_v13 = vrot.slane %v6684_v24, %v6246_v36 }
 0x4fe   : > { %4367 = vmatpush2.msra.mxu0 %v4232_v37  ;;  %4438 = vmatpush2.msra.mxu1 %v4296_v7  ;;  %v4500_v37 = vld [vmem:[%s6858_s25 + $0x60] sm:$0xff] }
 0x4ff   : > { %4368 = vmatprep.subr.mxu0 %v4231_v48  ;;  %4439 = vmatprep.subr.mxu1 %v4295_v61  ;;  %v4515_v48 = vld [vmem:[%s6858_s25 + $0xd8] sm:$0xff] }
 0x500   : > { %4369 = vmatpush2.msra.mxu0 %v4230_v28  ;;  %4440 = vmatpush2.msra.mxu1 %v4294_v23  ;;  %v4499_v28 = vld [vmem:[%s6858_s25 + $0x58] sm:$0xff] }
 0x501   : > { %4370 = vmatprep.subr.mxu0 %v4229_v49  ;;  %4441 = vmatprep.subr.mxu1 %v4293_v58  ;;  %v4514_v49 = vld [vmem:[%s6858_s25 + $0xd0] sm:$0xff]  ;;  %v4507_v58 = vld [vmem:[%s6858_s25 + $0x98] sm:$0xff] }
 0x502   : > { %4371 = vmatpush2.msra.mxu0 %v4228_v51  ;;  %4442 = vmatpush2.msra.mxu1 %v4292_v43  ;;  %v4498_v51 = vld [vmem:[%s6858_s25 + $0x50] sm:$0xff] }
 0x503   : > { %4372 = vmatprep.subr.mxu0 %v4227_v38  ;;  %4443 = vmatprep.subr.mxu1 %v4291_v33  ;;  %v4512_v38 = vld [vmem:[%s6858_s25 + $0xc0] sm:$0xff]  ;;  %v4506_v43 = vld [vmem:[%s6858_s25 + $0x90] sm:$0xff]  ;;  %v4505_v33 = vld [vmem:[%s6858_s25 + $0x88] sm:$0xff] }
 0x504   : > { %4373 = vmatpush2.msra.mxu0 %v4226_v15  ;;  %4444 = vmatpush2.msra.mxu1 %v4290_v31  ;;  %v4496_v15 = vld [vmem:[%s6858_s25 + $0x40] sm:$0xff]  ;;  %v4489_v31 = vld [vmem:[%s6858_s25 + $0x8] sm:$0xff] }
 0x505   : > { %4374 = vmatprep.subr.mxu0 %v4225_v21  ;;  %4445 = vmatprep.subr.mxu1 %v4289_v32  ;;  %v4511_v21 = vld [vmem:[%s6858_s25 + $0xb8] sm:$0xff]  ;;  %v4488_v32 = vld [vmem:[%s6858_s25] sm:$0xff] }
 0x506   : > { %v3772_v57 = vpop.f32.mrf.mxu0  ;;  %v3843_v18 = vpop.f32.mrf.mxu1  ;;  %4375 = vmatpush2.msra.mxu0 %v4224_v12  ;;  %4446 = vmatpush2.msra.mxu1 %v4288_v1  ;;  %v4495_v12 = vld [vmem:[%s6858_s25 + $0x38] sm:$0xff] }
 0x507   : > { %v3773_v50 = vadd.f32 %v3772_v57, %v3702_v39  ;;  %4376 = vmatprep.subr.mxu0 %v4223_v29  ;;  %4447 = vmatprep.subr.mxu1 %v4287_v35 }
 0x508   : > { %v3774_v3 = vpop.f32.mrf.mxu0  ;;  %4377 = vmatpush2.msra.mxu0 %v4222_v11  ;;  %v3845_v47 = vpop.f32.mrf.mxu1  ;;  %4448 = vmatpush2.msra.mxu1 %v4286_v42  ;;  %v4472_v42 = vld [vmem:[#allocation25] sm:$0x3] }
 0x509   : > { %v3844_v22 = vadd.f32 %v3843_v18, %v3773_v50  ;;  %v3775_v46 = vadd.f32 %v3774_v3, %v3704_v25  ;;  %4378 = vmatprep.subr.mxu0 %v4221_v59  ;;  %4449 = vmatprep.subr.mxu1 %v4285_v56 }
 0x50a   : > { %4379 = vmatpush2.msra.mxu0 %v4220_v20  ;;  %4450 = vmatpush2.msra.mxu1 %v4284_v5  ;;  %v4145_v20 = vrot.slane %v6680_v60, %v6246_v36  ;;  %v4493_v36 = vld [vmem:[%s6858_s25 + $0x28] sm:$0xff] }
 0x50b   : > { %v4154_v2 = vmul.f32 %v4137_v55, %v3844_v22  ;;  %v3846_v10 = vadd.f32 %v3845_v47, %v3775_v46  ;;  %4961 = vmatprep.subr.mxu0 %v4519_v52 }
 0x50d   : > { %v4155_v14 = vmul.f32 %v4141_v6, %v3846_v10  ;;  %v4180_v63 = vadd.f32 %v4163_v9, %v4154_v2  ;;  %v4149_v6 = vrot.slane %v6680_v60, %v6254_v45  ;;  %v4175_v2 = vrot.slane %v6684_v24, %v6254_v45  ;;  %v4509_v60 = vld [vmem:[%s6858_s25 + $0xa8] sm:$0xff]  ;;  %v4508_v45 = vld [vmem:[%s6858_s25 + $0xa0] sm:$0xff] }
 0x50e   : > { %v4492_v24 = vld [vmem:[%s6858_s25 + $0x20] sm:$0xff] }
 0x50f   : > { %v4181_v4 = vadd.f32 %v4167_v27, %v4155_v14  ;;  %v4184_v40 = vmax.f32 %v4180_v63, 0.0  ;;  %v4491_v63 = vld [vmem:[%s6858_s25 + $0x18] sm:$0xff] }
 0x511   : > { %v4185_v30 = vmax.f32 %v4181_v4, 0.0  ;;  %v4490_v4 = vld [vmem:[%s6858_s25 + $0x10] sm:$0xff] }
 0x513   : > { %4380 = vmatprep.mubr.f32.mxu0 %v4185_v30  ;;  %v4504_v30 = vld [vmem:[%s6858_s25 + $0x80] sm:$0xff] }
 0x514   : > { %4381 = vmatmul.mubr.f32.vlgmr.msra.gmra.mxu0 %v4184_v40  ;;  %v4458_v40 = vld [vmem:[#allocation23] sm:$0x3] }
 0x515   : > { %4962 = vmatpush3.msra.mxu0 %v4503_v54  ;;  %v4463_v35 = vrot.slane %v4458_v40, %v6243_v34  ;;  %v4467_v52 = vrot.slane %v4458_v40, %v6251_v44 }
 0x516   : > { %4963 = vmatprep.subr.mxu0 %v4518_v16  ;;  %v4477_v16 = vrot.slane %v4472_v42, %v6243_v34 }
 0x517   : > { %4964 = vmatpush3.msra.mxu0 %v4502_v17 }
 0x518   : > { %4965 = vmatprep.subr.mxu0 %v4517_v41 }
 0x519   : > { %4966 = vmatpush3.msra.mxu0 %v4501_v53 }
 0x51a   : > { %4967 = vmatprep.subr.mxu0 %v4516_v8  ;;  %v4481_v8 = vrot.slane %v4472_v42, %v6251_v44 }
 0x51b   : > { %4968 = vmatpush3.msra.mxu0 %v4500_v37 }
 0x51c   : > { %4969 = vmatprep.subr.mxu0 %v4515_v48 }
 0x51d   : > { %4970 = vmatpush3.msra.mxu0 %v4499_v28 }
 0x51e   : > { %4971 = vmatprep.subr.mxu0 %v4514_v49 }
 0x51f   : > { %4972 = vmatpush3.msra.mxu0 %v4498_v51 }
 0x520   : > { %4973 = vmatprep.subr.mxu0 %v4513_v19 }
 0x521   : > { %4974 = vmatpush3.msra.mxu0 %v4497_v26  ;;  %v4520_v26 = vld [vmem:[#allocation26] sm:$0x1] }
 0x522   : > { %4975 = vmatprep.subr.mxu0 %v4512_v38 }
 0x523   : > { %4976 = vmatpush3.msra.mxu0 %v4496_v15 }
 0x524   : > { %4977 = vmatprep.subr.mxu0 %v4511_v21 }
 0x525   : > { %4978 = vmatpush3.msra.mxu0 %v4495_v12 }
 0x526   : > { %4979 = vmatprep.subr.mxu0 %v4510_v0 }
 0x527   : > { %4980 = vmatpush3.msra.mxu0 %v4494_v62 }
 0x528   : > { %4981 = vmatprep.subr.mxu0 %v4509_v60 }
 0x529   : > { %4982 = vmatpush3.msra.mxu0 %v4493_v36 }
 0x52a   : > { %4983 = vmatprep.subr.mxu0 %v4508_v45 }
 0x52b   : > { %4984 = vmatpush3.msra.mxu0 %v4492_v24 }
 0x52c   : > { %4985 = vmatprep.subr.mxu0 %v4507_v58 }
 0x52d   : > { %4986 = vmatpush3.msra.mxu0 %v4491_v63 }
 0x52e   : > { %4987 = vmatprep.subr.mxu0 %v4506_v43 }
 0x52f   : > { %4988 = vmatpush3.msra.mxu0 %v4490_v4 }
 0x530   : > { %4989 = vmatprep.subr.mxu0 %v4505_v33 }
 0x531   : > { %4990 = vmatpush3.msra.mxu0 %v4489_v31 }
 0x532   : > { %4991 = vmatprep.subr.mxu0 %v4504_v30 }
 0x533   : > { %4992 = vmatpush3.msra.mxu0 %v4488_v32 }
 0x548   : > { %v3914_v29 = vpop.f32.mrf.mxu0  ;;  %v3985_v39 = vpop.f32.mrf.mxu1 }
 0x549   : > { %v3986_v18 = vadd.f32 %v3985_v39, %v3914_v29 }
 0x54a   : > { %v3916_v11 = vpop.f32.mrf.mxu0  ;;  %v3987_v57 = vpop.f32.mrf.mxu1 }
 0x54b   : > { %v3988_v50 = vadd.f32 %v3987_v57, %v3916_v11 }
 0x58a   : > { %v4056_v59 = vpop.f32.mrf.mxu0  ;;  %v4127_v25 = vpop.f32.mrf.mxu1 }
 0x58b   : > { %v4057_v55 = vadd.f32 %v4056_v59, %v3986_v18 }
 0x58c   : > { %v4058_v3 = vpop.f32.mrf.mxu0  ;;  %v4129_v9 = vpop.f32.mrf.mxu1 }
 0x58d   : > { %v4128_v22 = vadd.f32 %v4127_v25, %v4057_v55  ;;  %v4059_v46 = vadd.f32 %v4058_v3, %v3988_v50 }
 0x58f   : > { %v4156_v47 = vmul.f32 %v4145_v20, %v4128_v22  ;;  %v4130_v7 = vadd.f32 %v4129_v9, %v4059_v46 }
 0x591   : > { %v4157_v10 = vmul.f32 %v4149_v6, %v4130_v7  ;;  %v4182_v27 = vadd.f32 %v4171_v13, %v4156_v47 }
 0x593   : > { %v4183_v61 = vadd.f32 %v4175_v2, %v4157_v10  ;;  %v4186_v14 = vmax.f32 %v4182_v27, 0.0 }
 0x595   : > { %v4187_v23 = vmax.f32 %v4183_v61, 0.0 }
 0x597   : > { %4451 = vmatprep.mubr.f32.mxu1 %v4187_v23 }
 0x598   : > { %4452 = vmatmul.mubr.f32.vlgmr.msra.gmra.mxu1 %v4186_v14 }
 0x5d4   : > { %v4382_v1 = vpop.f32.mrf.mxu0 }
 0x5d6   : > { %v4384_v54 = vpop.f32.mrf.mxu0 }
 0x658   : > { %v4453_v56 = vpop.f32.mrf.mxu1 }
 0x659   : > { %v4454_v5 = vadd.f32 %v4453_v56, %v4382_v1 }
 0x65a   : > { %v4455_v17 = vpop.f32.mrf.mxu1 }
 0x65b   : > { %v4470_v41 = vmul.f32 %v4463_v35, %v4454_v5  ;;  %v4456_v53 = vadd.f32 %v4455_v17, %v4384_v54 }
 0x65d   : > { %v4471_v37 = vmul.f32 %v4467_v52, %v4456_v53  ;;  %v4484_v48 = vadd.f32 %v4477_v16, %v4470_v41 }
 0x65f   : > { %v4485_v28 = vadd.f32 %v4481_v8, %v4471_v37  ;;  %v4486_v51 = vmax.f32 %v4484_v48, 0.0 }
 0x661   : > { %v4487_v49 = vmax.f32 %v4485_v28, 0.0 }
 0x663   : > { %4585 = vmatprep.mubr.f32.mxu0 %v4487_v49 }
 0x664   : > { %4586 = vmatmul.mubr.f32.vlgmr.msra.gmra.mxu0 %v4486_v51 }
 0x724   : > { %v4993_v19 = vpop.f32.mrf.mxu0 }
 0x726   : > { %v4994_v38 = vpop.f32.mrf.mxu0 }
 0x727   : > { %v4995_v15 = vadd.f32 %v4994_v38, %v4993_v19 }
 0x729   : > { %v4588_v34 = vadd.f32 %v4995_v15, %v4520_v26 }
 0x72b   : > { %4592 = vst.msk [vmem:[%s808_s30] sm:$0x1] %vm4591_vm4, %v4588_v34 }
 0x72c PF: > { %s6860_s24 = sld [smem:[#allocation37_spill]]  ;;  %s6861_s27 = smov %s5707_s28 }
 0x72d   : > { %s6862_s28 = smov %s6864_s21 }
 0x732   : > { %s37_s29 = sadd.s32 1, %s6860_s24  }
 0x733   : > { %p34_p6 = scmp.ge.s32.totalorder %s37_s29, 4  }
 0x735   :  { %36 = sbr.rel (!%p34_p6) target bundleno = 17 (0x11), region = 195 }
 0x73a   :  { %4610 = vsyncpa [#allocation4], 1 }
 0x73b   :  { %4612 = vsyncpa [#allocation4 + $0x1], 1 }
 0x73c   :  { %4613 = vsyncpa [#allocation6], 1 }
 0x73d   :  { %4614 = vsyncpa [#allocation9], 1 }
 0x73e   :  { %4615 = vsyncpa [#allocation12], 1 }
 0x73f   :  { %4616 = vsyncpa [#allocation15], 1 }
 0x740   :  { %4617 = vsyncpa [#allocation18], 1 }
 0x741   :  { %4618 = vsyncpa [#allocation21], 1 }
 0x742   :  { %4619 = vsyncpa [#allocation24], 1 }
 0x743   :  { %4620 = vsyncpa [#allocation27], 1 }

</bundles_post_ra>
